<compile_context>
chip_gen: v7x
topology: tpu7x:2x2x1
jax: 0.10.0
libtpu: 0.0.40
codegen_flags: <defaults>
</compile_context>

<pallas_src>
import functools

import jax
import jax.numpy as jnp
from jax import lax
from jax.experimental import pallas as pl
from jax.experimental.pallas import tpu as pltpu


def _mikolov_bisg_kernel(x_ref, wi_ref, wo_ref, o_ref, h_ref, m_ref, l_ref,
                         *, v_real, tv):
    # x_ref : (TB, Vp)  bf16   resident per batch tile
    # wi_ref: (Vp, D)   bf16   resident, single-buffered (W_I pre-transposed)
    # wo_ref: (D,  TV)  bf16   streamed vocab tile of pre-transposed W_O
    # o_ref : (TB, TV)  out_dtype
    # h_ref : (TB, D)   bf16 scratch; m_ref/l_ref: (TB, 1) f32 scratch
    p = pl.program_id(1)   # phase: 0 = accumulate softmax stats, 1 = write output
    j = pl.program_id(2)   # vocab tile

    # ---- once per batch tile: hidden projection + softmax-state init --------
    @pl.when((p == 0) & (j == 0))
    def _():
        h = jnp.dot(x_ref[...], wi_ref[...],               # canonical (M,K)x(K,N)
                    preferred_element_type=jnp.float32)    # (TB, D) f32 acc
        h_ref[...] = h.astype(h_ref.dtype)                 # store bf16 once
        m_ref[...] = jnp.full(m_ref.shape, -jnp.inf, m_ref.dtype)
        l_ref[...] = jnp.zeros(l_ref.shape, l_ref.dtype)

    # ---- logits for this vocab tile (wo tile is streamed per grid step, so
    #      recomputing in both phases adds no HBM traffic) ---------------------
    logits = jnp.dot(h_ref[...], wo_ref[...],
                     preferred_element_type=jnp.float32)   # (TB, TV) f32

    @pl.when(p == 0)
    def _():
        lg = logits
        if v_real % tv != 0:
            # Only the running SUM needs padded columns excluded; phase-1 values
            # in padded columns are sliced off by the wrapper.
            col = j * tv + lax.broadcasted_iota(jnp.int32, lg.shape, 1)
            lg = jnp.where(col < v_real, lg, -1e30)
        m_prev = m_ref[...]
        m_new = jnp.maximum(m_prev, jnp.max(lg, axis=-1, keepdims=True))
        l_ref[...] = (l_ref[...] * jnp.exp(m_prev - m_new)
                      + jnp.sum(jnp.exp(lg - m_new), axis=-1, keepdims=True))
        m_ref[...] = m_new

    @pl.when(p == 1)
    def _():
        # Exact normalization (approx reciprocal broke the row-sum guarantee).
        inv_l = 1.0 / l_ref[...]                           # (TB, 1) f32 divide
        o_ref[...] = (jnp.exp(logits - m_ref[...]) * inv_l).astype(o_ref.dtype)


def prepare_params(w_i, w_o, *, tv=1024, compute_dtype=jnp.bfloat16):
    """One-time weight prep (outside the per-call hot path).

    w_i: (D, V) torch layout of W_I.weight -> transposed ONCE to (V, D) so the
         hidden projection is a canonical MXU feed.
    w_o: (V, D) torch layout of W_O.weight -> transposed ONCE to (D, V) so each
         streamed vocab tile (D, TV) is lane-dense.
    Both cast to bf16 and the vocab axis zero-padded to a multiple of tv.
    """
    d, v = w_i.shape
    assert w_o.shape == (v, d)
    v_pad = int(pl.cdiv(v, tv)) * tv
    wi_t = jnp.transpose(w_i).astype(compute_dtype)   # (V, D)
    wo_t = jnp.transpose(w_o).astype(compute_dtype)   # (D, V)
    if v_pad != v:
        wi_t = jnp.pad(wi_t, ((0, v_pad - v), (0, 0)))
        wo_t = jnp.pad(wo_t, ((0, 0), (0, v_pad - v)))
    return wi_t, wo_t


def _vmem_capacity_bytes():
    try:
        return int(pltpu.get_tpu_info().vmem_capacity_bytes)
    except Exception:
        return 64 << 20   # conservative: valid on v5e/v6e/v7x alike


def mikolov_bisg_forward(x, wi_t, wo_t, *, tb=None, tv=1024,
                         compute_dtype=jnp.bfloat16, out_dtype=jnp.float32):
    """x: (B, V) float; wi_t: (Vp, D) prepared; wo_t: (D, Vp) prepared."""
    b, v = x.shape
    v_pad, d = wi_t.shape
    assert wo_t.shape == (d, v_pad) and v_pad % tv == 0 and v_pad >= v

    # TB=256 fills the 256-wide MXU and halves W_O re-reads, but only when it
    # still leaves >= 2 batch tiles for the "parallel" axis (v7x: 2 TensorCores).
    if tb is None:
        tb = 256 if pl.cdiv(b, 256) >= 2 else 128
    b_pad = int(pl.cdiv(b, tb)) * tb

    xp = x.astype(compute_dtype)
    if b_pad != b or v_pad != v:
        xp = jnp.pad(xp, ((0, b_pad - b), (0, v_pad - v)))

    nb, nv = b_pad // tb, v_pad // tv

    in_bpe = jnp.dtype(compute_dtype).itemsize
    out_bpe = jnp.dtype(out_dtype).itemsize
    est = (2 * tb * v_pad * in_bpe        # x tile (double-buffered)
           + 1 * v_pad * d * in_bpe       # W_I resident (Buffered(1))
           + 2 * d * tv * in_bpe          # W_O vocab tile (double-buffered)
           + 2 * tb * tv * out_bpe        # output tile (double-buffered)
           + tb * d * in_bpe + 2 * tb * 4)  # scratch: h + m/l
    budget = _vmem_capacity_bytes() - (8 << 20)   # headroom for Mosaic scratch
    if est > budget:
        raise ValueError(
            f"Resident tile set (~{est >> 20} MiB) exceeds VMEM budget "
            f"({budget >> 20} MiB); reduce tb/tv or add K-tiling of x/W_I.")
    vmem_limit = int(min(max(est + (4 << 20), 32 << 20), budget))

    # W_I's block index never changes -> single-buffer it (double-buffering would
    # only double its VMEM footprint for zero benefit).
    wi_index = lambda bi, p, j: (0, 0)
    try:
        wi_spec = pl.BlockSpec((v_pad, d), wi_index, pipeline_mode=pl.Buffered(1))
    except TypeError:   # older jax: BlockSpec without pipeline_mode
        wi_spec = pl.BlockSpec((v_pad, d), wi_index)

    kernel = functools.partial(_mikolov_bisg_kernel, v_real=v, tv=tv)

    out = pl.pallas_call(
        kernel,
        out_shape=jax.ShapeDtypeStruct((b_pad, v_pad), out_dtype),
        grid_spec=pltpu.PrefetchScalarGridSpec(
            num_scalar_prefetch=0,
            grid=(nb, 2, nv),
            in_specs=[
                pl.BlockSpec((tb, v_pad), lambda bi, p, j: (bi, 0)),   # x tile
                wi_spec,                                               # W_I^T resident
                pl.BlockSpec((d, tv), lambda bi, p, j: (0, j)),        # W_O^T vocab tile
            ],
            # Phase 0 parks the output block at (bi, 0) and never writes it; phase 1
            # writes the real (bi, j) tiles -> every output block has exactly one
            # contiguous visit span and is fully written before it is flushed.
            out_specs=pl.BlockSpec((tb, tv), lambda bi, p, j: (bi, j * p)),
            scratch_shapes=[
                pltpu.VMEM((tb, d), compute_dtype),   # hidden h (bf16, MXU feed)
                pltpu.VMEM((tb, 1), jnp.float32),     # running max m
                pltpu.VMEM((tb, 1), jnp.float32),     # running sum-of-exp l
            ],
        ),
        compiler_params=pltpu.CompilerParams(
            dimension_semantics=("parallel", "arbitrary", "arbitrary"),
            vmem_limit_bytes=vmem_limit,
        ),
    )(xp, wi_t, wo_t)

    return out[:b, :v]


if __name__ == "__main__":
    # v = vocab size, d = embedding dim.  Deliberately NOT multiples of the tile
    # sizes so the batch/vocab padding + phase-0 mask paths are exercised.
    B, V, D = 200, 2000, 128
    TV = 1024

    key = jax.random.PRNGKey(0)
    kx, kwi, kwo = jax.random.split(key, 3)

    x = jax.random.uniform(kx, (B, V), dtype=jnp.float32)
    w_i = jax.random.normal(kwi, (D, V), dtype=jnp.float32) * 0.02   # W_I.weight (d, v)
    w_o = jax.random.normal(kwo, (V, D), dtype=jnp.float32) * 0.02   # W_O.weight (v, d)

    wi_t, wo_t = prepare_params(w_i, w_o, tv=TV)
    out = mikolov_bisg_forward(x, wi_t, wo_t, tv=TV)
    out = jax.block_until_ready(out)

    # Reference in plain JAX, mirroring the kernel's bf16-input / f32-acc numerics
    # (bf16 MXU feeds + bf16 hidden are part of the kernel's numerics contract).
    xb = x.astype(jnp.bfloat16).astype(jnp.float32)
    wib = w_i.astype(jnp.bfloat16).astype(jnp.float32)
    wob = w_o.astype(jnp.bfloat16).astype(jnp.float32)
    h_ref = (xb @ wib.T).astype(jnp.bfloat16).astype(jnp.float32)
    ref = jax.nn.softmax(h_ref @ wob.T, axis=1)

    assert out.shape == (B, V)
    assert bool(jnp.all(jnp.isfinite(out)))
    max_abs_err = float(jnp.max(jnp.abs(out - ref)))
    assert jnp.allclose(out, ref, atol=2e-5, rtol=5e-3), max_abs_err
    row_sum_err = float(jnp.max(jnp.abs(jnp.sum(out, axis=1) - 1.0)))
    assert row_sum_err < 1e-3, row_sum_err
    print("KERNEL_OK")
</pallas_src>

<mosaic_0001>
module attributes {stable_mosaic.version = 11 : i64} {
  func.func @_mikolov_bisg_kernel(%arg0: i32, %arg1: i32, %arg2: i32, %arg3: memref<128x2048xbf16, #tpu.memory_space<vmem>>, %arg4: memref<2048x128xbf16, #tpu.memory_space<vmem>>, %arg5: memref<128x1024xbf16, #tpu.memory_space<vmem>>, %arg6: memref<128x1024xf32, #tpu.memory_space<vmem>>, %arg7: memref<128x128xbf16, #tpu.memory_space<vmem>>, %arg8: memref<128x1xf32, #tpu.memory_space<vmem>>, %arg9: memref<128x1xf32, #tpu.memory_space<vmem>>) attributes {dimension_semantics = [#tpu.dimension_semantics<parallel>, #tpu.dimension_semantics<arbitrary>, #tpu.dimension_semantics<arbitrary>], iteration_bounds = array<i64: 2, 2, 2>, scalar_prefetch = 0 : i64, scratch_operands = 3 : i64, tpu.core_type = #tpu.core_type<tc>, window_params = [{transform_indices = @transform_0, window_bounds = array<i64: 128, 2048>}, {pipeline_mode = #tpu.pipeline_mode<synchronous>, transform_indices = @transform_1, window_bounds = array<i64: 2048, 128>}, {transform_indices = @transform_2, window_bounds = array<i64: 128, 1024>}, {transform_indices = @transform_3, window_bounds = array<i64: 128, 1024>}]} {
    %c0_i32 = arith.constant 0 : i32
    %0 = arith.cmpi eq, %arg1, %c0_i32 : i32
    %c0_i32_0 = arith.constant 0 : i32
    %1 = arith.cmpi eq, %arg2, %c0_i32_0 : i32
    %2 = arith.andi %0, %1 : i1
    %3 = arith.extui %2 : i1 to i32
    %c0_i32_1 = arith.constant 0 : i32
    %4 = arith.cmpi ne, %3, %c0_i32_1 : i32
    scf.if %4 {
      %c0_8 = arith.constant 0 : index
      %c0_9 = arith.constant 0 : index
      %14 = vector.load %arg3[%c0_8, %c0_9] : memref<128x2048xbf16, #tpu.memory_space<vmem>>, vector<128x2048xbf16>
      %c0_10 = arith.constant 0 : index
      %c0_11 = arith.constant 0 : index
      %15 = vector.load %arg4[%c0_10, %c0_11] : memref<2048x128xbf16, #tpu.memory_space<vmem>>, vector<2048x128xbf16>
      %cst_12 = arith.constant dense<0.000000e+00> : vector<128x128xf32>
      %16 = tpu.matmul %14, %15, %cst_12 {dimension_numbers = #tpu.dot_dimension_numbers<[1], [0], [0], [1], [0, 0, 1, 1], [], []>} : vector<128x2048xbf16>, vector<2048x128xbf16>, vector<128x128xf32> -> vector<128x128xf32>
      %17 = arith.truncf %16 : vector<128x128xf32> to vector<128x128xbf16>
      %c0_13 = arith.constant 0 : index
      %c0_14 = arith.constant 0 : index
      %18 = vector.load %arg7[%c0_13, %c0_14] : memref<128x128xbf16, #tpu.memory_space<vmem>>, vector<128x128xbf16>
      tpu.vector_store %arg7[%c0_13, %c0_14], %17 {strides = array<i32>} : memref<128x128xbf16, #tpu.memory_space<vmem>>, vector<128x128xbf16>,
      %cst_15 = arith.constant 0xFF800000 : f32
      %19 = vector.broadcast %cst_15 : f32 to vector<128x1xf32>
      %c0_16 = arith.constant 0 : index
      %c0_17 = arith.constant 0 : index
      %20 = vector.load %arg8[%c0_16, %c0_17] : memref<128x1xf32, #tpu.memory_space<vmem>>, vector<128x1xf32>
      tpu.vector_store %arg8[%c0_16, %c0_17], %19 {strides = array<i32>} : memref<128x1xf32, #tpu.memory_space<vmem>>, vector<128x1xf32>,
      %cst_18 = arith.constant 0.000000e+00 : f32
      %21 = vector.broadcast %cst_18 : f32 to vector<128x1xf32>
      %c0_19 = arith.constant 0 : index
      %c0_20 = arith.constant 0 : index
      %22 = vector.load %arg9[%c0_19, %c0_20] : memref<128x1xf32, #tpu.memory_space<vmem>>, vector<128x1xf32>
      tpu.vector_store %arg9[%c0_19, %c0_20], %21 {strides = array<i32>} : memref<128x1xf32, #tpu.memory_space<vmem>>, vector<128x1xf32>,
    } else {
    }
    %c0 = arith.constant 0 : index
    %c0_2 = arith.constant 0 : index
    %5 = vector.load %arg7[%c0, %c0_2] : memref<128x128xbf16, #tpu.memory_space<vmem>>, vector<128x128xbf16>
    %c0_3 = arith.constant 0 : index
    %c0_4 = arith.constant 0 : index
    %6 = vector.load %arg5[%c0_3, %c0_4] : memref<128x1024xbf16, #tpu.memory_space<vmem>>, vector<128x1024xbf16>
    %cst = arith.constant dense<0.000000e+00> : vector<128x1024xf32>
    %7 = tpu.matmul %5, %6, %cst {dimension_numbers = #tpu.dot_dimension_numbers<[1], [0], [0], [1], [0, 0, 1, 1], [], []>} : vector<128x128xbf16>, vector<128x1024xbf16>, vector<128x1024xf32> -> vector<128x1024xf32>
    %c0_i32_5 = arith.constant 0 : i32
    %8 = arith.cmpi eq, %arg1, %c0_i32_5 : i32
    %9 = arith.extui %8 : i1 to i32
    %c0_i32_6 = arith.constant 0 : i32
    %10 = arith.cmpi ne, %9, %c0_i32_6 : i32
    scf.if %10 {
      %c1024_i32 = arith.constant 1024 : i32
      %14 = arith.muli %arg2, %c1024_i32 : i32
      %15 = tpu.iota {dimensions = array<i32: 1>} : vector<128x1024xi32>
      %16 = vector.broadcast %14 : i32 to vector<128x1024xi32>
      %17 = arith.addi %16, %15 : vector<128x1024xi32>
      %c2000_i32 = arith.constant 2000 : i32
      %18 = vector.broadcast %c2000_i32 : i32 to vector<128x1024xi32>
      %19 = arith.cmpi slt, %17, %18 : vector<128x1024xi32>
      %cst_8 = arith.constant -1.000000e+30 : f32
      %20 = vector.broadcast %cst_8 : f32 to vector<128x1024xf32>
      %21 = arith.select %19, %7, %20 : vector<128x1024xi1>, vector<128x1024xf32>
      %c0_9 = arith.constant 0 : index
      %c0_10 = arith.constant 0 : index
      %22 = vector.load %arg8[%c0_9, %c0_10] : memref<128x1xf32, #tpu.memory_space<vmem>>, vector<128x1xf32>
      %cst_11 = arith.constant dense<0xFF800000> : vector<128xf32>
      %23 = vector.multi_reduction <maximumf>, %21, %cst_11 [1] : vector<128x1024xf32> to vector<128xf32>
      %24 = vector.shape_cast %23 : vector<128xf32> to vector<128x1xf32>
      %25 = arith.maximumf %22, %24 : vector<128x1xf32>
      %c0_12 = arith.constant 0 : index
      %c0_13 = arith.constant 0 : index
      %26 = vector.load %arg9[%c0_12, %c0_13] : memref<128x1xf32, #tpu.memory_space<vmem>>, vector<128x1xf32>
      %27 = arith.subf %22, %25 : vector<128x1xf32>
      %28 = math.exp %27 : vector<128x1xf32>
      %29 = arith.mulf %26, %28 : vector<128x1xf32>
      %30 = vector.broadcast %25 : vector<128x1xf32> to vector<128x1024xf32>
      %31 = arith.subf %21, %30 : vector<128x1024xf32>
      %32 = math.exp %31 : vector<128x1024xf32>
      %cst_14 = arith.constant dense<0.000000e+00> : vector<128xf32>
      %33 = vector.multi_reduction <add>, %32, %cst_14 [1] : vector<128x1024xf32> to vector<128xf32>
      %34 = vector.shape_cast %33 : vector<128xf32> to vector<128x1xf32>
      %35 = arith.addf %29, %34 : vector<128x1xf32>
      %c0_15 = arith.constant 0 : index
      %c0_16 = arith.constant 0 : index
      %36 = vector.load %arg9[%c0_15, %c0_16] : memref<128x1xf32, #tpu.memory_space<vmem>>, vector<128x1xf32>
      tpu.vector_store %arg9[%c0_15, %c0_16], %35 {strides = array<i32>} : memref<128x1xf32, #tpu.memory_space<vmem>>, vector<128x1xf32>,
      %c0_17 = arith.constant 0 : index
      %c0_18 = arith.constant 0 : index
      %37 = vector.load %arg8[%c0_17, %c0_18] : memref<128x1xf32, #tpu.memory_space<vmem>>, vector<128x1xf32>
      tpu.vector_store %arg8[%c0_17, %c0_18], %25 {strides = array<i32>} : memref<128x1xf32, #tpu.memory_space<vmem>>, vector<128x1xf32>,
    } else {
    }
    %c1_i32 = arith.constant 1 : i32
    %11 = arith.cmpi eq, %arg1, %c1_i32 : i32
    %12 = arith.extui %11 : i1 to i32
    %c0_i32_7 = arith.constant 0 : i32
    %13 = arith.cmpi ne, %12, %c0_i32_7 : i32
    scf.if %13 {
      %c0_8 = arith.constant 0 : index
      %c0_9 = arith.constant 0 : index
      %14 = vector.load %arg9[%c0_8, %c0_9] : memref<128x1xf32, #tpu.memory_space<vmem>>, vector<128x1xf32>
      %cst_10 = arith.constant 1.000000e+00 : f32
      %15 = vector.broadcast %cst_10 : f32 to vector<128x1xf32>
      %16 = arith.divf %15, %14 : vector<128x1xf32>
      %c0_11 = arith.constant 0 : index
      %c0_12 = arith.constant 0 : index
      %17 = vector.load %arg8[%c0_11, %c0_12] : memref<128x1xf32, #tpu.memory_space<vmem>>, vector<128x1xf32>
      %18 = vector.broadcast %17 : vector<128x1xf32> to vector<128x1024xf32>
      %19 = arith.subf %7, %18 : vector<128x1024xf32>
      %20 = math.exp %19 : vector<128x1024xf32>
      %21 = vector.broadcast %16 : vector<128x1xf32> to vector<128x1024xf32>
      %22 = arith.mulf %20, %21 : vector<128x1024xf32>
      %c0_13 = arith.constant 0 : index
      %c0_14 = arith.constant 0 : index
      %23 = vector.load %arg6[%c0_13, %c0_14] : memref<128x1024xf32, #tpu.memory_space<vmem>>, vector<128x1024xf32>
      tpu.vector_store %arg6[%c0_13, %c0_14], %22 {strides = array<i32>} : memref<128x1024xf32, #tpu.memory_space<vmem>>, vector<128x1024xf32>,
    } else {
    }
    return
  }
  func.func @transform_0(%arg0: i32, %arg1: i32, %arg2: i32) -> (i32, i32) {
    %c0_i32 = arith.constant 0 : i32
    %c0_i32_0 = arith.constant 0 : i32
    return %arg0, %c0_i32 : i32, i32
  }
  func.func @transform_1(%arg0: i32, %arg1: i32, %arg2: i32) -> (i32, i32) {
    %c0_i32 = arith.constant 0 : i32
    %c0_i32_0 = arith.constant 0 : i32
    %c0_i32_1 = arith.constant 0 : i32
    return %c0_i32, %c0_i32_0 : i32, i32
  }
  func.func @transform_2(%arg0: i32, %arg1: i32, %arg2: i32) -> (i32, i32) {
    %c0_i32 = arith.constant 0 : i32
    %c0_i32_0 = arith.constant 0 : i32
    return %c0_i32, %arg2 : i32, i32
  }
  func.func @transform_3(%arg0: i32, %arg1: i32, %arg2: i32) -> (i32, i32) {
    %0 = arith.muli %arg2, %arg1 : i32
    %c0_i32 = arith.constant 0 : i32
    return %arg0, %0 : i32, i32
  }
}

</mosaic_0001>

<bundles_post_ra>
// kernel: tpu_custom_call.1
= control target key start
LH: loop header
LB: loop body
LE: loop exit
PB: predicated region body
PF: predicated region fallthrough
CT: control target
= control target key end

     0   :  { %s11227_s0 = inlined_call_operand.hbm [shape: bf16[256,2048], index: 0, kind: input, shape index: {}]   ;;  %s11228_s1 = inlined_call_operand.hbm [shape: bf16[2048,128], index: 1, kind: input, shape index: {}]   ;;  %s11229_s2 = inlined_call_operand.hbm [shape: bf16[128,2048], index: 2, kind: input, shape index: {}]   ;;  %s11230_s3 = inlined_call_operand.hbm [shape: f32[256,2048], index: 3, kind: output, shape index: {}]  }
   0x1   :  { %11427 = sst [smem:[#allocation339_spill]] %s11227_s0 }
   0x2   :  { %11428 = sst [smem:[#allocation340_spill]] %s11228_s1 }
   0x3   :  { %11429 = sst [smem:[#allocation341_spill]] %s11229_s2 }
   0x4   :  { %11430 = sst [smem:[#allocation342_spill]] %s11230_s3 }
   0x5   :  { %8 = vsyncpa [#allocation6], 0 }
   0x6   :  { %10 = vsyncpa [#allocation6 + $0x1], 0 }
   0x7   :  { %11 = vsyncpa [#allocation9], 0 }
   0x8   :  { %12 = vsyncpa [#allocation7], 0 }
   0x9   :  { %14 = vsyncpa [#allocation7 + $0x1], 0  ;;  %s7857_s12 = smov 0   ;;  %s7859_s13 = smov 0  }
   0xa   :  { %s7861_s14 = smov 0   ;;  %s7863_s15 = smov 0  }
   0xb   :  { %s7865_s16 = smov 0   ;;  %s7867_s17 = smov 0  }
   0xc   :  { %s7869_s18 = smov 0   ;;  %s7871_s19 = smov 0  }
   0xd   :  { %s7873_s20 = smov 0   ;;  %s7875_s21 = smov 0  }
   0xe   :  { %s7877_s22 = smov 0   ;;  %s7879_s23 = smov 0  }
   0xf   :  { %s7881_s24 = smov 0   ;;  %s7883_s25 = smov 0  }
  0x10   :  { %s7885_s26 = smov 0   ;;  %s7887_s27 = smov 0  }
  0x11 LB: > { %11431 = sst [smem:[#allocation16_spill]] %s7778_s17  ;;  %s32_s28 = sadd.s32 1, %s7806_s24  ;;  %s7818_s27 = sphi %s7887_s27, %s20_s27   ;;  %s7814_s26 = sphi %s7885_s26, %s12233_s26   ;;  %s7810_s25 = sphi %s7883_s25, %s12244_s25   ;;  %s7806_s24 = sphi %s7881_s24, %s12231_s24   ;;  %s7802_s23 = sphi %s7879_s23, %s12243_s23   ;;  %s7798_s22 = sphi %s7877_s22, %s12242_s22   ;;  %s7794_s21 = sphi %s7875_s21, %s12228_s21   ;;  %s7790_s20 = sphi %s7873_s20, %s12227_s20   ;;  %s7786_s19 = sphi %s7871_s19, %s12241_s19   ;;  %s7782_s18 = sphi %s7869_s18, %s12240_s18   ;;  %s7778_s17 = sphi %s7867_s17, %s12225_s17   ;;  %s7774_s16 = sphi %s7865_s16, %s12239_s16   ;;  %s7770_s15 = sphi %s7863_s15, %s12238_s15   ;;  %s7766_s14 = sphi %s7861_s14, %s12237_s14   ;;  %s7762_s13 = sphi %s7859_s13, %s12236_s13   ;;  %s7758_s12 = sphi %s7857_s12, %s12234_s12  }
  0x12   : > { %11432 = sst [smem:[#allocation17_spill]] %s7790_s20  ;;  %s35_s29 = sadd.s32 1, %s7810_s25 }
  0x13   : > { %11433 = sst [smem:[#allocation18_spill]] %s7794_s21  ;;  %p33_p0 = scmp.ge.s32.totalorder %s32_s28, 2 }
  0x14   : > { %11434 = sst [smem:[#allocation19_spill]] %s7798_s22  ;;  %s39_s30 = sadd.s32 1, %s7814_s26 }
  0x15   : > { %11435 = sst [smem:[#allocation20_spill]] %s7802_s23  ;;  %s46_s4 = sadd.s32 1, %s7790_s20 }
  0x16   : > { %11436 = sst [smem:[#allocation21_spill]] %s7806_s24  ;;  %p53_p1 = scmp.ne.s32.totalorder %s7790_s20, %s7786_s19 }
  0x17   : > { %11437 = sst [smem:[#allocation22_spill]] %s7810_s25  ;;  %s12246_s28 = smov (%p33_p0, %s32_s28), 0 }
  0x18   : > { %11438 = sst [smem:[#allocation23_spill]] %s7814_s26  ;;  %s12248_s29 = smov (!%p33_p0, %s35_s29), %s7810_s25 }
  0x19   : > { %11439 = sst [smem:[#allocation24_spill]] %s12246_s28  ;;  %p11239_p2 = scmp.eq.s32.totalorder %s7818_s27, 0 }
  0x1a   : > { %s90_s5 = ssub.s32 %s7806_s24, %s12246_s28  ;;  %p37_p3 = scmp.ge.s32.totalorder %s12248_s29, 2 }
  0x1b   : > { %p7949_p4 = scmp.eq.s32.totalorder %s90_s5, 0  ;;  %p7955_p5 = por %p11239_p2, %p53_p1 }
  0x1c   : > { %s116_s8 = smul.u32 %s7806_s24, %s7810_s25  ;;  %s12250_s29 = smov (%p37_p3, %s12248_s29), 0 }
  0x1d   : > { %11442 = sst [smem:[#allocation25_spill]] %s12250_s29  ;;  %s12252_s30 = smov (!%p37_p3, %s39_s30), %s7814_s26 }
  0x1e   : > { %s117_s9 = smul.u32 %s12250_s29, %s12246_s28  ;;  %s123_s10 = sadd.s32 1, %s7766_s14 }
  0x1f   : > { %p41_p6 = scmp.ge.s32.totalorder %s12252_s30, 2  ;;  %p11238_p7 = scmp.lt.s32.totalorder %s7818_s27, 8 }
  0x20   : > { %s119_s11 = ssub.s32 %s116_s8, %s117_s9  ;;  %s173_s5 = sand.u32 1, %s7818_s27  }
  0x21   : > { %s12254_s30 = smov (%p41_p6, %s12252_s30), 0  ;;  %s175_s23 = sand.u32 1, %s7790_s20  }
  0x22   : > { %11443 = sst [smem:[#allocation26_spill]] %s12254_s30  ;;  %s43_s3 = ssub.s32 %s7814_s26, %s12254_s30 }
  0x23   : > { %p44_p8 = scmp.eq.s32.totalorder %s43_s3, 0  ;;  %s120_s25 = sor.u32 %s119_s11, %s43_s3 }
  0x24   : > { %p121_p9 = scmp.eq.s32.totalorder %s120_s25, 0  ;;  %s5823_s29 = sshll.u32 %s175_s23, 10 }
  0x25   : > { %s7975_s21 = scalar_select %p44_p8, %s7790_s20, %s46_s4  }
  0x26   : > { %s7978_s22 = scalar_select %p121_p9, %s7766_s14, %s123_s10  }
  0x27   : > { %11444 = sst [smem:[#allocation27_spill]] %s7975_s21  ;;  %s6166_s28 = sshll.u32 %s7814_s26, 14 }
  0x28   : > { %s11445_s0 = sld [smem:[#allocation339_spill]]  ;;  %s177_s30 = scalar_lea.vmem [#allocation5], %s5823_s29 }
  0x29   : > { %s185_s1 = sshll.u32 %s177_s30, 4  ;;  %p7990_p10 = pnand %p11238_p7, %p7955_p5  ;;  %s7994_s1 = int_to_ptr.vmem [resolvable:$true] %s185_s1 }
  0x2a   : > { %s7996_s23 = scalar_lea.sflag [#allocation6], %s173_s5 }
  0x2b   : > { %p7562_p12 = pneg %p7990_p10 }
  0x2e   : > { %s7984_s9 = scalar_lea.hbm %s11445_s0, %s6166_s28  ;;  %s7565_s29 = scalar_lea.hbm %s11445_s0, 32768 }
  0x2f   : > { %s7560_s2 = scalar_lea.hbm %s7984_s9, 16384  ;;  %p7566_p1 = scmp.lt.u32.totalorder %s7984_s9, %s11445_s0 }
  0x30   : > { %p7561_p11 = scmp.ne.s32.totalorder %s7984_s9, %s7560_s2  ;;  %p7567_p3 = scmp.lt.u32.totalorder %s7565_s29, %s7560_s2 }
  0x31   : > { %p7569_p6 = scmp.lt.u32.totalorder %s7560_s2, %s7984_s9 }
  0x32   : > { %p7563_p13 = pnand %p7562_p12, %p7561_p11  ;;  %p7568_p5 = por %p7567_p3, %p7566_p1 }
  0x34   : > { %p7564_p0 = pneg %p7563_p13  ;;  %p7570_p8 = por %p7569_p6, %p7568_p5 }
  0x36   : > { %p7571_p9 = pnand %p7570_p8, %p7564_p0 }
  0x38   : > { %7574 = shalt.err (!%p7571_p9)
}
  0x39   : > { %s7575_s7 = scalar_lea.vmem %s7994_s1, 16384  ;;  %s7820_s10 = smov [#allocation5]  }
  0x3a   : > { %p7576_p11 = scmp.ne.s32.totalorder %s7994_s1, %s7575_s7  ;;  %s7580_s11 = sshll.u32 %s7820_s10, 4  ;;  %s7581_s11 = int_to_ptr.vmem [resolvable:$false] %s7580_s11 }
  0x3b   : > { %s7582_s5 = scalar_lea.vmem %s7581_s11, 32768  ;;  %p7583_p2 = scmp.lt.s32.totalorder %s7994_s1, %s7581_s11 }
  0x3c   : > { %p7578_p13 = pnand %p7576_p11, %p7562_p12  ;;  %p7584_p1 = scmp.lt.s32.totalorder %s7582_s5, %s7575_s7 }
  0x3e   : > { %p7579_p7 = pneg %p7578_p13  ;;  %p7585_p3 = por %p7584_p1, %p7583_p2 }
  0x40   : > { %p7586_p5 = pnand %p7585_p3, %p7579_p7 }
  0x42   : > { %7589 = shalt.err (!%p7586_p5)
}
  0x43   : > { %s11240_s8 = smov 1024   ;;  %s11241_s2 = smov 64  }
  0x44   : > { %6698 = dma.hbm_to_vmem [thread:$0]  (!%p7990_p10), %s7984_s9, 16384, %s7994_s1, %s7996_s23, %s11240_s8, %s11240_s8, %s11241_s2  }
  0x45   : > { %s8028_s25 = sadd.s32 4294967295, %s7818_s27   ;;  %s5819_s28 = sadd.s32 4294967294, %s7818_s27  }
  0x46   : > { %p59_p2 = scmp.ne.s32.totalorder %s7786_s19, %s7782_s18  ;;  %p11244_p7 = scmp.eq.s32.totalorder %s8028_s25, 0 }
  0x47   : > { %s93_s29 = sadd.s32 1, %s7778_s17  ;;  %p100_p10 = scmp.ne.s32.totalorder %s7778_s17, %s7774_s16 }
  0x48   : > { %s8038_s30 = scalar_select %p7949_p4, %s7778_s17, %s93_s29  }
  0x49   : > { %p8042_p12 = por %p11244_p7, %p59_p2  ;;  %p106_p0 = scmp.ne.s32.totalorder %s7774_s16, %s7770_s15 }
  0x4a   : > { %11447 = sst [smem:[#allocation28_spill]] %s8038_s30  ;;  %p133_p6 = scmp.ne.s32.totalorder %s7766_s14, %s7762_s13 }
  0x4b   : > { %s11448_s3 = scalar_select %p8042_p12, 1, 0 }
  0x4c   : > { %p11449_p8 = scmp.eq.s32.totalorder %s7818_s27, 0  ;;  %p134_p11 = scmp.eq.s32.totalorder %s8028_s25, 7 }
  0x4d   : > { %p8061_p4 = por %p106_p0, %p11244_p7  ;;  %p139_p13 = scmp.ne.s32.totalorder %s7762_s13, %s7758_s12 }
  0x4e   : > { %p8054_p9 = por %p100_p10, %p11449_p8  ;;  %p8067_p1 = por %p134_p11, %p133_p6 }
  0x4f   : > { %s11451_s18 = scalar_select %p8061_p4, 1, 0 }
  0x50   : > { %s11452_s15 = scalar_select %p8067_p1, 1, 0 }
  0x51   : > { %p140_p3 = scmp.eq.s32.totalorder %s5819_s28, 7  ;;  %p5820_p5 = scmp.ge.s32.totalorder %s7818_s27, 1 }
  0x52   : > { %p147_p2 = scmp.lt.s32.totalorder %s7818_s27, 9  ;;  %s7823_s4 = smov [#allocation8]  }
  0x53   : > { %p8073_p10 = por %p140_p3, %p139_p13  ;;  %s159_s7 = sshll.u32 %s7823_s4, 4  ;;  %s160_s7 = int_to_ptr.vmem [resolvable:$true] %s159_s7 }
  0x54   : > { %p8077_p8 = pnand %p5820_p5, %p147_p2  ;;  %p11455_p6 = scmp.lt.s32.totalorder %s7818_s27, 8 }
  0x55   : > { %s11453_s6 = scalar_select %p8073_p10, 1, 0 }
  0x56   : > { %s11454_s9 = scalar_select %p8077_p8, 1, 0 }
  0x57   : > { %p6691_p0 = pneg %p8077_p8  ;;  %p8087_p11 = pnand %p11455_p6, %p8054_p9 }
  0x58   : > { %s197_s11 = sand.u32 1, %s7778_s17   ;;  %s6167_s29 = sshll.u32 %s7806_s24, 9 }
  0x59   : > { %s11456_s10 = scalar_select %p8087_p11, 1, 0 }
  0x5a   : > { %p8094_p13 = pnand %p6691_p0, %p11244_p7  ;;  %s5827_s28 = sshll.u32 %s197_s11, 9 }
  0x5b   : > { %s11458_s2 = sld [smem:[#allocation340_spill]] }
  0x5c   : > { %p7592_p3 = pneg %p8094_p13 }
  0x61   : > { %s7590_s0 = scalar_lea.hbm %s11458_s2, 16384 }
  0x62   : > { %p7591_p9 = scmp.ne.s32.totalorder %s11458_s2, %s7590_s0  ;;  %p7597_p0 = scmp.lt.u32.totalorder %s7590_s0, %s11458_s2 }
  0x64   : > { %p7593_p5 = pnand %p7592_p3, %p7591_p9 }
  0x66   : > { %p7594_p2 = pneg %p7593_p5 }
  0x68   : > { %p7599_p6 = pnand %p7597_p0, %p7594_p2 }
  0x6a   : > { %7602 = shalt.err (!%p7599_p6)
}
  0x6b   : > { %s7603_s11 = scalar_lea.vmem %s160_s7, 16384  ;;  %p7611_p4 = scmp.lt.s32.totalorder %s160_s7, %s160_s7 }
  0x6c   : > { %p7604_p7 = scmp.ne.s32.totalorder %s160_s7, %s7603_s11  ;;  %p7612_p12 = scmp.lt.s32.totalorder %s7603_s11, %s7603_s11 }
  0x6e   : > { %p7606_p10 = pnand %p7604_p7, %p7592_p3  ;;  %p7613_p8 = por %p7612_p12, %p7611_p4 }
  0x70   : > { %p7607_p1 = pneg %p7606_p10 }
  0x72   : > { %p7614_p11 = pnand %p7613_p8, %p7607_p1 }
  0x74   : > { %7617 = shalt.err (!%p7614_p11)
}
  0x75   : > { %s7824_s26 = smov 4   ;;  %s11459_s8 = smov 64  }
  0x76   : > { %6694 = dma.hbm_to_vmem [thread:$0]  (!%p8094_p13), %s11458_s2, 16384, %s160_s7, [#allocation9], %s11459_s8, %s11459_s8, %s7824_s26  }
  0x77   : > { %s11460_s21 = sld [smem:[#allocation341_spill]]  ;;  %s199_s11 = scalar_lea.vmem [#allocation10], %s5827_s28 }
  0x78   : > { %s206_s17 = sshll.u32 %s199_s11, 4  ;;  %p11462_p12 = scmp.ne.s32.totalorder %s11456_s10, 0  ;;  %s8122_s17 = int_to_ptr.vmem [resolvable:$true] %s206_s17 }
  0x7a   : > { %p7620_p4 = pneg %p11462_p12 }
  0x7d   : > { %s11461_s30 = smov %s11460_s21  ;;  %s8120_s24 = scalar_lea.hbm %s11460_s21, %s6167_s29 }
  0x7e   : > { %s7618_s5 = scalar_lea.hbm %s8120_s24, 8192  ;;  %s7623_s29 = scalar_lea.hbm %s11461_s30, 16384 }
  0x7f   : > { %p7619_p7 = scmp.ne.s32.totalorder %s8120_s24, %s7618_s5  ;;  %p7624_p8 = scmp.lt.u32.totalorder %s8120_s24, %s11461_s30 }
  0x80   : > { %p7625_p11 = scmp.lt.u32.totalorder %s7623_s29, %s7618_s5  ;;  %p7627_p9 = scmp.lt.u32.totalorder %s7618_s5, %s8120_s24 }
  0x81   : > { %p7621_p1 = pnand %p7620_p4, %p7619_p7 }
  0x82   : > { %p7626_p13 = por %p7625_p11, %p7624_p8 }
  0x83   : > { %p7622_p10 = pneg %p7621_p1 }
  0x84   : > { %p7628_p3 = por %p7627_p9, %p7626_p13 }
  0x86   : > { %p7629_p5 = pnand %p7628_p3, %p7622_p10 }
  0x88   : > { %7632 = shalt.err (!%p7629_p5)
}
  0x89   : > { %s7633_s28 = scalar_lea.vmem %s8122_s17, 8192  ;;  %s7825_s1 = smov [#allocation10]  }
  0x8a   : > { %p7634_p2 = scmp.ne.s32.totalorder %s8122_s17, %s7633_s28  ;;  %s7638_s0 = sshll.u32 %s7825_s1, 4  ;;  %s7639_s0 = int_to_ptr.vmem [resolvable:$false] %s7638_s0 }
  0x8b   : > { %s7640_s20 = scalar_lea.vmem %s7639_s0, 16384  ;;  %p7641_p7 = scmp.lt.s32.totalorder %s8122_s17, %s7639_s0 }
  0x8c   : > { %p7636_p0 = pnand %p7634_p2, %p7620_p4  ;;  %p7642_p1 = scmp.lt.s32.totalorder %s7640_s20, %s7633_s28 }
  0x8e   : > { %p7637_p6 = pneg %p7636_p0  ;;  %p7643_p8 = por %p7642_p1, %p7641_p7 }
  0x90   : > { %p7644_p11 = pnand %p7643_p8, %p7637_p6 }
  0x92   : > { %7647 = shalt.err (!%p7644_p11)
}
  0x93   : > { %s7826_s21 = smov 512   ;;  %s7827_s11 = smov 32  }
  0x94   : > { %s11463_s5 = smov 1024   ;;  %p11464_p4 = scmp.ne.s32.totalorder %s11454_s9, 0 }
  0x95   : > { %6701 = dma.hbm_to_vmem [thread:$0]  (!%p11462_p12), %s8120_s24, 8192, %s8122_s17, %s7996_s23, %s11463_s5, %s7826_s21, %s7827_s11  }
  0x96   : > { %218 = sbr.rel (%p11464_p4) target bundleno = 1988 (0x7c4), region = 32 }
  0x9d   : > { %s220_s7 = sand.u32 1, %s8028_s25   ;;  %s222_s26 = sand.u32 1, %s7786_s19  }
  0x9e   : > { %s5831_s29 = sshll.u32 %s222_s26, 10  ;;  %s221_s8 = scalar_lea.sflag [#allocation6], %s220_s7 }
  0x9f   : > { %s8155_s4 = scalar_lea.vmem [#allocation5], %s5831_s29  ;;  %p11465_p10 = scmp.ne.s32.totalorder %s11448_s3, 0 }
  0xa1   : > { %7741 = dma.done.wait (%p11465_p10), %s221_s8, 16384  }
  0xa2   : > { %7743 = vsyncadd (%p11465_p10), %s221_s8, 4294950912  ;;  %p11466_p13 = scmp.eq.s32.totalorder %s8028_s25, 0 }
  0xa4   : > { %7745 = dma.done.wait (%p11466_p13), [#allocation9], 16384   ;;  %p11467_p12 = pmov %p11466_p13 }
  0xa5   : > { %s235_s17 = sand.u32 1, %s7774_s16   ;;  %p11468_p9 = scmp.ne.s32.totalorder %s11451_s18, 0 }
  0xa6   : > { %7747 = vsyncadd (%p11467_p12), [#allocation9], 4294950912  ;;  %s5833_s24 = sshll.u32 %s235_s17, 9 }
  0xa7   : > { %s8166_s23 = scalar_lea.vmem [#allocation10], %s5833_s24 }
  0xa8   : > { %7749 = dma.done.wait (%p11468_p9), %s221_s8, 8192  }
  0xa9   : > { %7751 = vsyncadd (%p11468_p9), %s221_s8, 4294959104  ;;  %s11469_s3 = sld [smem:[#allocation19_spill]]  ;;  %s11470_s9 = sld [smem:[#allocation18_spill]] }
  0xaa   : > { %s262_s10 = sand.u32 1, %s7762_s13  }
  0xab   : > { %s5834_s25 = sshll.u32 %s262_s10, 10 }
  0xac   : > { %s8177_s28 = scalar_lea.vmem [#allocation11], %s5834_s25 }
  0xaf   : > { %p271_p3 = scmp.eq.s32.totalorder %s11469_s3, 0  ;;  %p272_p5 = scmp.eq.s32.totalorder %s11470_s9, 0 }
  0xb1   : > { %p273_p2 = pnand %p272_p5, %p271_p3 }
  0xb2   : > { %v6852_v0 = vld [vmem:[#allocation8 + $0x40] sm:$0xff] (!%p273_p2)   ;;  %v6856_v4 = vld [vmem:[#allocation8 + $0x48] sm:$0xff] (!%p273_p2)   ;;  %v6860_v8 = vld [vmem:[#allocation8 + $0x50] sm:$0xff] (!%p273_p2)   ;;  %vm2861_vm0 = vcmask (!%p273_p2), 7168  }
  0xb3   : > { %276 = sbr.rel (%p273_p2) target bundleno = 684 (0x2ac), region = 48  ;;  %v6853_v1 = vld [vmem:[#allocation8 + $0xc0] sm:$0xff] (!%p273_p2)   ;;  %6169 = vmatprep.subr.bf16.mxu0 (!%p273_p2), %v6852_v0  ;;  %v6857_v5 = vld [vmem:[#allocation8 + $0xc8] sm:$0xff] (!%p273_p2)   ;;  %v6861_v9 = vld [vmem:[#allocation8 + $0xd0] sm:$0xff] (!%p273_p2)  }
  0xb4   : > { %v6854_v2 = vld [vmem:[#allocation8] sm:$0xff] (!%p273_p2)   ;;  %6233 = vmatprep.subr.bf16.mxu1 (!%p273_p2), %v6853_v1  ;;  %v6858_v6 = vld [vmem:[#allocation8 + $0x8] sm:$0xff] (!%p273_p2)   ;;  %v6862_v10 = vld [vmem:[#allocation8 + $0x10] sm:$0xff] (!%p273_p2)  }
  0xb5   : > { %v6855_v3 = vld [vmem:[#allocation8 + $0x80] sm:$0xff] (!%p273_p2)   ;;  %6170 = vmatpush3.bf16.msra.mxu0 (!%p273_p2), %v6854_v2  ;;  %v6859_v7 = vld [vmem:[#allocation8 + $0x88] sm:$0xff] (!%p273_p2)   ;;  %v6863_v11 = vld [vmem:[#allocation8 + $0x90] sm:$0xff] (!%p273_p2)  }
  0xb6   : > { %6234 = vmatpush3.bf16.msra.mxu1 (!%p273_p2), %v6855_v3  ;;  %6171 = vmatprep.subr.bf16.mxu0 (!%p273_p2), %v6856_v4  ;;  %v6864_v12 = vld [vmem:[#allocation8 + $0x58] sm:$0xff] (!%p273_p2)   ;;  %v6868_v16 = vld [vmem:[#allocation8 + $0x60] sm:$0xff] (!%p273_p2)   ;;  %v6872_v20 = vld [vmem:[#allocation8 + $0x68] sm:$0xff] (!%p273_p2)  }
  0xb7   : > { %6235 = vmatprep.subr.bf16.mxu1 (!%p273_p2), %v6857_v5  ;;  %v6865_v13 = vld [vmem:[#allocation8 + $0xd8] sm:$0xff] (!%p273_p2)   ;;  %v6869_v17 = vld [vmem:[#allocation8 + $0xe0] sm:$0xff] (!%p273_p2)   ;;  %v6873_v21 = vld [vmem:[#allocation8 + $0xe8] sm:$0xff] (!%p273_p2)  }
  0xb8   : > { %v6866_v14 = vld [vmem:[#allocation8 + $0x18] sm:$0xff] (!%p273_p2)   ;;  %v6870_v18 = vld [vmem:[#allocation8 + $0x20] sm:$0xff] (!%p273_p2)   ;;  %v6874_v22 = vld [vmem:[#allocation8 + $0x28] sm:$0xff] (!%p273_p2)  }
  0xb9   : > { %6172 = vmatpush3.bf16.msra.mxu0 (!%p273_p2), %v6858_v6  ;;  %v6867_v15 = vld [vmem:[#allocation8 + $0x98] sm:$0xff] (!%p273_p2)   ;;  %v6871_v19 = vld [vmem:[#allocation8 + $0xa0] sm:$0xff] (!%p273_p2)   ;;  %v6875_v23 = vld [vmem:[#allocation8 + $0xa8] sm:$0xff] (!%p273_p2)  }
  0xba   : > { %6236 = vmatpush3.bf16.msra.mxu1 %v6859_v7  ;;  %6173 = vmatprep.subr.bf16.mxu0 %v6860_v8  ;;  %v6876_v24 = vld [vmem:[#allocation8 + $0x70] sm:$0xff]   ;;  %v6880_v28 = vld [vmem:[#allocation8 + $0x78] sm:$0xff]   ;;  %v277_v32 = vld [vmem:[%s8155_s4] sm:$0xff] }
  0xbb   : > { %6237 = vmatprep.subr.bf16.mxu1 %v6861_v9  ;;  %v6877_v25 = vld [vmem:[#allocation8 + $0xf0] sm:$0xff]   ;;  %v6881_v29 = vld [vmem:[#allocation8 + $0xf8] sm:$0xff]   ;;  %v285_v33 = vld [vmem:[%s8155_s4 + $0x40] sm:$0xff] }
  0xbc   : > { %v6878_v26 = vld [vmem:[#allocation8 + $0x30] sm:$0xff]   ;;  %v6882_v30 = vld [vmem:[#allocation8 + $0x38] sm:$0xff]   ;;  %v278_v34 = vld [vmem:[%s8155_s4 + $0x8] sm:$0xff]  ;;  %v5835_v35 = vcombine.low %v277_v32, %v285_v33  ;;  %v5836_v36 = vcombine.high %v277_v32, %v285_v33 }
  0xbd   : > { %6174 = vmatpush3.bf16.msra.mxu0 %v6862_v10  ;;  %v6879_v27 = vld [vmem:[#allocation8 + $0xb0] sm:$0xff]   ;;  %v6883_v31 = vld [vmem:[#allocation8 + $0xb8] sm:$0xff]   ;;  %v286_v37 = vld [vmem:[%s8155_s4 + $0x48] sm:$0xff] }
  0xbe   : > { %6238 = vmatpush3.bf16.msra.mxu1 %v6863_v11  ;;  %6175 = vmatprep.subr.bf16.mxu0 %v6864_v12  ;;  %v5837_v38 = vcombine.low %v278_v34, %v286_v37  ;;  %v5838_v39 = vcombine.high %v278_v34, %v286_v37  ;;  %v6884_v40 = vld [vmem:[#allocation8 + $0x140] sm:$0xff]   ;;  %v294_v47 = vld [vmem:[%s8155_s4 + $0x88] sm:$0xff]  ;;  %v6892_v62 = vld [vmem:[#allocation8 + $0x150] sm:$0xff]  }
  0xbf   : > { %6239 = vmatprep.subr.bf16.mxu1 %v6865_v13  ;;  %2101 = vmatprep.mubr.bf16.mxu0 %v5836_v36  ;;  %v6885_v41 = vld [vmem:[#allocation8 + $0x100] sm:$0xff]   ;;  %v302_v48 = vld [vmem:[%s8155_s4 + $0xc8] sm:$0xff]  ;;  %v6893_v63 = vld [vmem:[#allocation8 + $0x110] sm:$0xff]  }
  0xc0   : > { %2198 = vmatprep.mubr.bf16.mxu1 %v5838_v39  ;;  %v6886_v42 = vld [vmem:[#allocation8 + $0x1c0] sm:$0xff]   ;;  %v5854_v49 = vcombine.high %v294_v47, %v302_v48  ;;  %v6888_v50 = vld [vmem:[#allocation8 + $0x148] sm:$0xff]   ;;  %v5853_v53 = vcombine.low %v294_v47, %v302_v48  ;;  %v6894_v0 = vld [vmem:[#allocation8 + $0x1d0] sm:$0xff]  }
  0xc1   : > { %6176 = vmatpush3.bf16.msra.mxu0 %v6866_v14  ;;  %v6887_v43 = vld [vmem:[#allocation8 + $0x180] sm:$0xff]   ;;  %v6889_v52 = vld [vmem:[#allocation8 + $0x108] sm:$0xff]   ;;  %v6895_v1 = vld [vmem:[#allocation8 + $0x190] sm:$0xff]  }
  0xc2   : > { %6240 = vmatpush3.bf16.msra.mxu1 %v6867_v15  ;;  %6177 = vmatprep.subr.bf16.mxu0 %v6868_v16  ;;  %v293_v44 = vld [vmem:[%s8155_s4 + $0x80] sm:$0xff]  ;;  %v6890_v54 = vld [vmem:[#allocation8 + $0x1c8] sm:$0xff]   ;;  %v6896_v10 = vld [vmem:[#allocation8 + $0x158] sm:$0xff]  }
  0xc3   : > { %6241 = vmatprep.subr.bf16.mxu1 %v6869_v17  ;;  %v301_v45 = vld [vmem:[%s8155_s4 + $0xc0] sm:$0xff]  ;;  %v6891_v55 = vld [vmem:[#allocation8 + $0x188] sm:$0xff]   ;;  %v6897_v11 = vld [vmem:[#allocation8 + $0x118] sm:$0xff]  }
  0xc4   : > { %v5852_v46 = vcombine.high %v293_v44, %v301_v45  ;;  %v5851_v51 = vcombine.low %v293_v44, %v301_v45  ;;  %v309_v56 = vld [vmem:[%s8155_s4 + $0x100] sm:$0xff]  ;;  %v310_v58 = vld [vmem:[%s8155_s4 + $0x108] sm:$0xff]  ;;  %v6898_v12 = vld [vmem:[#allocation8 + $0x1d8] sm:$0xff]  }
  0xc5   : > { %6178 = vmatpush3.bf16.msra.mxu0 %v6870_v18  ;;  %v317_v57 = vld [vmem:[%s8155_s4 + $0x140] sm:$0xff]  ;;  %v318_v59 = vld [vmem:[%s8155_s4 + $0x148] sm:$0xff]  ;;  %v6899_v13 = vld [vmem:[#allocation8 + $0x198] sm:$0xff]  }
  0xc6   : > { %6242 = vmatpush3.bf16.msra.mxu1 %v6871_v19  ;;  %6179 = vmatprep.subr.bf16.mxu0 %v6872_v20  ;;  %v5868_v60 = vcombine.high %v309_v56, %v317_v57  ;;  %v5870_v61 = vcombine.high %v310_v58, %v318_v59  ;;  %v5867_v2 = vcombine.low %v309_v56, %v317_v57  ;;  %v325_v3 = vld [vmem:[%s8155_s4 + $0x180] sm:$0xff]  ;;  %v326_v5 = vld [vmem:[%s8155_s4 + $0x188] sm:$0xff]  ;;  %v6909_v39 = vld [vmem:[#allocation8 + $0x130] sm:$0xff]  }
  0xc7   : > { %6243 = vmatprep.subr.bf16.mxu1 %v6873_v21  ;;  %v333_v4 = vld [vmem:[%s8155_s4 + $0x1c0] sm:$0xff]  ;;  %v5869_v6 = vcombine.low %v310_v58, %v318_v59  ;;  %v334_v8 = vld [vmem:[%s8155_s4 + $0x1c8] sm:$0xff]  ;;  %v6913_v48 = vld [vmem:[#allocation8 + $0x138] sm:$0xff]  }
  0xc8   : > { %v5884_v7 = vcombine.high %v325_v3, %v333_v4  ;;  %v5886_v9 = vcombine.high %v326_v5, %v334_v8  ;;  %v341_v14 = vld [vmem:[%s8155_s4 + $0x200] sm:$0xff]  ;;  %v342_v16 = vld [vmem:[%s8155_s4 + $0x208] sm:$0xff]  ;;  %v5883_v19 = vcombine.low %v325_v3, %v333_v4  ;;  %v5885_v21 = vcombine.low %v326_v5, %v334_v8  ;;  %v288_v3 = vld [vmem:[%s8155_s4 + $0x58] sm:$0xff] }
  0xc9   : > { %6180 = vmatpush3.bf16.msra.mxu0 %v6874_v22  ;;  %v349_v15 = vld [vmem:[%s8155_s4 + $0x240] sm:$0xff]  ;;  %v350_v17 = vld [vmem:[%s8155_s4 + $0x248] sm:$0xff]  ;;  %v295_v8 = vld [vmem:[%s8155_s4 + $0x90] sm:$0xff] }
  0xca   : > { %6244 = vmatpush3.bf16.msra.mxu1 %v6875_v23  ;;  %6181 = vmatprep.subr.bf16.mxu0 %v6876_v24  ;;  %v6900_v18 = vld [vmem:[#allocation8 + $0x160] sm:$0xff]   ;;  %v5900_v22 = vcombine.high %v341_v14, %v349_v15  ;;  %v5902_v24 = vcombine.high %v342_v16, %v350_v17  ;;  %v6906_v32 = vld [vmem:[#allocation8 + $0x1e8] sm:$0xff]   ;;  %v5899_v34 = vcombine.low %v341_v14, %v349_v15 }
  0xcb   : > { %6245 = vmatprep.subr.bf16.mxu1 %v6877_v25  ;;  %v6901_v20 = vld [vmem:[#allocation8 + $0x120] sm:$0xff]   ;;  %v6907_v33 = vld [vmem:[#allocation8 + $0x1a8] sm:$0xff]  }
  0xcc   : > { %v6902_v23 = vld [vmem:[#allocation8 + $0x1e0] sm:$0xff]   ;;  %v374_v44 = vld [vmem:[%s8155_s4 + $0x308] sm:$0xff] }
  0xcd   : > { %6182 = vmatpush3.bf16.msra.mxu0 %v6878_v26  ;;  %v6903_v25 = vld [vmem:[#allocation8 + $0x1a0] sm:$0xff]   ;;  %v382_v45 = vld [vmem:[%s8155_s4 + $0x348] sm:$0xff] }
  0xce   : > { %6246 = vmatpush3.bf16.msra.mxu1 %v6879_v27  ;;  %6183 = vmatprep.subr.bf16.mxu0 %v6880_v28  ;;  %v357_v26 = vld [vmem:[%s8155_s4 + $0x280] sm:$0xff]  ;;  %v6904_v28 = vld [vmem:[#allocation8 + $0x168] sm:$0xff]  }
  0xcf   : > { %6247 = vmatprep.subr.bf16.mxu1 %v6881_v29  ;;  %v365_v27 = vld [vmem:[%s8155_s4 + $0x2c0] sm:$0xff]  ;;  %v358_v29 = vld [vmem:[%s8155_s4 + $0x288] sm:$0xff] }
  0xd0   : > { %v5916_v36 = vcombine.high %v357_v26, %v365_v27  ;;  %v5915_v47 = vcombine.low %v357_v26, %v365_v27  ;;  %v6916_v56 = vld [vmem:[#allocation8 + $0x240] sm:$0xff]   ;;  %v390_v57 = vld [vmem:[%s8155_s4 + $0x388] sm:$0xff]  ;;  %v6924_v26 = vld [vmem:[#allocation8 + $0x250] sm:$0xff]  }
  0xd1   : > { %6184 = vmatpush3.bf16.msra.mxu0 %v6882_v30  ;;  %v366_v30 = vld [vmem:[%s8155_s4 + $0x2c8] sm:$0xff]  ;;  %v6918_v58 = vld [vmem:[#allocation8 + $0x2c0] sm:$0xff]   ;;  %v6926_v27 = vld [vmem:[#allocation8 + $0x2d0] sm:$0xff]  }
  0xd2   : > { %6248 = vmatpush3.bf16.msra.mxu1 %v6883_v31  ;;  %6297 = vmatprep.subr.bf16.mxu0 %v6884_v40  ;;  %v6905_v31 = vld [vmem:[#allocation8 + $0x128] sm:$0xff]   ;;  %v5918_v37 = vcombine.high %v358_v29, %v366_v30  ;;  %v6910_v40 = vld [vmem:[#allocation8 + $0x1f0] sm:$0xff]   ;;  %v6919_v15 = vld [vmem:[#allocation8 + $0x280] sm:$0xff]  }
  0xd3   : > { %6361 = vmatprep.subr.bf16.mxu1 %v6886_v42  ;;  %v381_v42 = vld [vmem:[%s8155_s4 + $0x340] sm:$0xff]  ;;  %v398_v59 = vld [vmem:[%s8155_s4 + $0x3c8] sm:$0xff] }
  0xd4   : > { %2102 = vmatmul.mubr.bf16.vlgmr.msra.gmra.mrb[0].mxu0 %v5835_v35  ;;  %v5901_v35 = vcombine.low %v342_v16, %v350_v17  ;;  %v5949_v5 = vcombine.low %v390_v57, %v398_v59  ;;  %v6920_v17 = vld [vmem:[#allocation8 + $0x248] sm:$0xff]  }
  0xd5   : > { %2199 = vmatmul.mubr.bf16.vlgmr.msra.gmra.mrb[0].mxu1 %v5837_v38  ;;  %6298 = vmatpush3.bf16.msra.mxu0 %v6885_v41  ;;  %v6908_v38 = vld [vmem:[#allocation8 + $0x170] sm:$0xff]   ;;  %v373_v41 = vld [vmem:[%s8155_s4 + $0x300] sm:$0xff] }
  0xd6   : > { %6362 = vmatpush3.bf16.msra.mxu1 %v6887_v43  ;;  %2109 = vmatprep.mubr.bf16.mxu0 %v5852_v46  ;;  %v6911_v43 = vld [vmem:[#allocation8 + $0x1b0] sm:$0xff]   ;;  %v6912_v46 = vld [vmem:[#allocation8 + $0x178] sm:$0xff]  }
  0xd7   : > { %2206 = vmatprep.mubr.bf16.mxu1 %v5854_v49  ;;  %6299 = vmatprep.subr.bf16.mxu0 %v6888_v50  ;;  %v5917_v49 = vcombine.low %v358_v29, %v366_v30  ;;  %v5932_v50 = vcombine.high %v373_v41, %v381_v42 }
  0xd8   : > { %6363 = vmatprep.subr.bf16.mxu1 %v6890_v54  ;;  %v389_v54 = vld [vmem:[%s8155_s4 + $0x380] sm:$0xff] }
  0xd9   : > { %6300 = vmatpush3.bf16.msra.mxu0 %v6889_v52  ;;  %v5934_v52 = vcombine.high %v374_v44, %v382_v45 }
  0xda   : > { %6364 = vmatpush3.bf16.msra.mxu1 %v6891_v55  ;;  %6301 = vmatprep.subr.bf16.mxu0 %v6892_v62  ;;  %v397_v55 = vld [vmem:[%s8155_s4 + $0x3c0] sm:$0xff] }
  0xdb   : > { %6365 = vmatprep.subr.bf16.mxu1 %v6894_v0  ;;  %v5948_v62 = vcombine.high %v389_v54, %v397_v55  ;;  %v279_v0 = vld [vmem:[%s8155_s4 + $0x10] sm:$0xff]  ;;  %v5947_v4 = vcombine.low %v389_v54, %v397_v55  ;;  %v344_v54 = vld [vmem:[%s8155_s4 + $0x218] sm:$0xff] }
  0xdc   : > { %2110 = vmatmul.mubr.bf16.gmra.mrb[4].mxu0 %v5851_v51  ;;  %v6914_v51 = vld [vmem:[#allocation8 + $0x1f8] sm:$0xff]  }
  0xdd   : > { %2207 = vmatmul.mubr.bf16.gmra.mrb[4].mxu1 %v5853_v53  ;;  %2117 = vmatprep.mubr.bf16.mxu0 %v5868_v60  ;;  %v6915_v53 = vld [vmem:[#allocation8 + $0x1b8] sm:$0xff]   ;;  %v5931_v60 = vcombine.low %v373_v41, %v381_v42  ;;  %v6932_v42 = vld [vmem:[#allocation8 + $0x260] sm:$0xff]  }
  0xde   : > { %2214 = vmatprep.mubr.bf16.mxu1 %v5870_v61  ;;  %6302 = vmatpush3.bf16.msra.mxu0 %v6893_v63  ;;  %v5933_v61 = vcombine.low %v374_v44, %v382_v45  ;;  %v5950_v63 = vcombine.high %v390_v57, %v398_v59  ;;  %v6931_v41 = vld [vmem:[#allocation8 + $0x298] sm:$0xff]   ;;  %v6934_v44 = vld [vmem:[#allocation8 + $0x2e0] sm:$0xff]   ;;  %v6939_v57 = vld [vmem:[#allocation8 + $0x2a8] sm:$0xff]  }
  0xdf   : > { %6366 = vmatpush3.bf16.msra.mxu1 %v6895_v1  ;;  %6303 = vmatprep.subr.bf16.mxu0 %v6896_v10  ;;  %v287_v1 = vld [vmem:[%s8155_s4 + $0x50] sm:$0xff]  ;;  %v352_v55 = vld [vmem:[%s8155_s4 + $0x258] sm:$0xff] }
  0xe0   : > { %6367 = vmatprep.subr.bf16.mxu1 %v6898_v12  ;;  %v5839_v10 = vcombine.low %v279_v0, %v287_v1  ;;  %v296_v12 = vld [vmem:[%s8155_s4 + $0x98] sm:$0xff] }
  0xe2   : > { %6304 = vmatpush3.bf16.msra.mxu0 %v6897_v11  ;;  %v6917_v11 = vld [vmem:[#allocation8 + $0x200] sm:$0xff]  }
  0xe3   : > { %6368 = vmatpush3.bf16.msra.mxu1 %v6899_v13  ;;  %6305 = vmatprep.subr.bf16.mxu0 %v6900_v18  ;;  %v304_v13 = vld [vmem:[%s8155_s4 + $0xd8] sm:$0xff] }
  0xe4   : > { %2118 = vmatmul.mubr.bf16.gmra.mrb[8].mxu0 %v5867_v2  ;;  %6369 = vmatprep.subr.bf16.mxu1 %v6902_v23  ;;  %v280_v2 = vld [vmem:[%s8155_s4 + $0x18] sm:$0xff]  ;;  %v5858_v18 = vcombine.high %v296_v12, %v304_v13  ;;  %v319_v23 = vld [vmem:[%s8155_s4 + $0x150] sm:$0xff]  ;;  %v5857_v29 = vcombine.low %v296_v12, %v304_v13  ;;  %v6950_v12 = vld [vmem:[#allocation8 + $0x3c0] sm:$0xff]   ;;  %v5905_v13 = vcombine.low %v344_v54, %v352_v55 }
  0xe5   : > { %2215 = vmatmul.mubr.bf16.gmra.mrb[8].mxu1 %v5869_v6  ;;  %2125 = vmatprep.mubr.bf16.mxu0 %v5884_v7  ;;  %v5840_v6 = vcombine.high %v279_v0, %v287_v1  ;;  %v5842_v7 = vcombine.high %v280_v2, %v288_v3  ;;  %v5841_v14 = vcombine.low %v280_v2, %v288_v3  ;;  %v6941_v0 = vld [vmem:[#allocation8 + $0x230] sm:$0xff]   ;;  %v6944_v2 = vld [vmem:[#allocation8 + $0x278] sm:$0xff]  }
  0xe6   : > { %2222 = vmatprep.mubr.bf16.mxu1 %v5886_v9  ;;  %6306 = vmatpush3.bf16.msra.mxu0 %v6901_v20  ;;  %v303_v9 = vld [vmem:[%s8155_s4 + $0xd0] sm:$0xff]  ;;  %v6922_v20 = vld [vmem:[#allocation8 + $0x2c8] sm:$0xff]  }
  0xe7   : > { %6370 = vmatpush3.bf16.msra.mxu1 %v6903_v25  ;;  %6307 = vmatprep.subr.bf16.mxu0 %v6904_v28  ;;  %v5856_v16 = vcombine.high %v295_v8, %v303_v9  ;;  %v320_v25 = vld [vmem:[%s8155_s4 + $0x158] sm:$0xff]  ;;  %v5855_v28 = vcombine.low %v295_v8, %v303_v9  ;;  %v6943_v1 = vld [vmem:[#allocation8 + $0x2b0] sm:$0xff]  }
  0xe8   : > { %6371 = vmatprep.subr.bf16.mxu1 %v6906_v32  ;;  %v6925_v32 = vld [vmem:[#allocation8 + $0x210] sm:$0xff]   ;;  %v6945_v8 = vld [vmem:[#allocation8 + $0x238] sm:$0xff]  }
  0xe9   : > { %v359_v3 = vld [vmem:[%s8155_s4 + $0x290] sm:$0xff]  ;;  %v6947_v9 = vld [vmem:[#allocation8 + $0x2b8] sm:$0xff]  }
  0xea   : > { %6308 = vmatpush3.bf16.msra.mxu0 %v6905_v31 }
  0xeb   : > { %6372 = vmatpush3.bf16.msra.mxu1 %v6907_v33  ;;  %6309 = vmatprep.subr.bf16.mxu0 %v6908_v38  ;;  %v6927_v33 = vld [vmem:[#allocation8 + $0x290] sm:$0xff]   ;;  %v328_v38 = vld [vmem:[%s8155_s4 + $0x198] sm:$0xff] }
  0xec   : > { %2126 = vmatmul.mubr.bf16.gmra.mrb[12].mxu0 %v5883_v19  ;;  %6373 = vmatprep.subr.bf16.mxu1 %v6910_v40  ;;  %v6921_v19 = vld [vmem:[#allocation8 + $0x208] sm:$0xff]   ;;  %v6929_v40 = vld [vmem:[#allocation8 + $0x218] sm:$0xff]  }
  0xed   : > { %2223 = vmatmul.mubr.bf16.gmra.mrb[12].mxu1 %v5885_v21  ;;  %2133 = vmatprep.mubr.bf16.mxu0 %v5900_v22  ;;  %v6923_v21 = vld [vmem:[#allocation8 + $0x288] sm:$0xff]   ;;  %v311_v22 = vld [vmem:[%s8155_s4 + $0x110] sm:$0xff] }
  0xee   : > { %2230 = vmatprep.mubr.bf16.mxu1 %v5902_v24  ;;  %6310 = vmatpush3.bf16.msra.mxu0 %v6909_v39  ;;  %v312_v24 = vld [vmem:[%s8155_s4 + $0x118] sm:$0xff]  ;;  %v5872_v30 = vcombine.high %v311_v22, %v319_v23 }
  0xef   : > { %6374 = vmatpush3.bf16.msra.mxu1 %v6911_v43  ;;  %6311 = vmatprep.subr.bf16.mxu0 %v6912_v46  ;;  %v5874_v31 = vcombine.high %v312_v24, %v320_v25  ;;  %v336_v39 = vld [vmem:[%s8155_s4 + $0x1d8] sm:$0xff]  ;;  %v5871_v43 = vcombine.low %v311_v22, %v319_v23  ;;  %v5873_v45 = vcombine.low %v312_v24, %v320_v25  ;;  %v391_v24 = vld [vmem:[%s8155_s4 + $0x390] sm:$0xff] }
  0xf0   : > { %6375 = vmatprep.subr.bf16.mxu1 %v6914_v51  ;;  %v343_v51 = vld [vmem:[%s8155_s4 + $0x210] sm:$0xff] }
  0xf1   : > { %v399_v25 = vld [vmem:[%s8155_s4 + $0x3d0] sm:$0xff] }
  0xf2   : > { %6312 = vmatpush3.bf16.msra.mxu0 %v6913_v48  ;;  %v5890_v48 = vcombine.high %v328_v38, %v336_v39 }
  0xf3   : > { %6376 = vmatpush3.bf16.msra.mxu1 %v6915_v53  ;;  %6425 = vmatprep.subr.bf16.mxu0 %v6916_v56  ;;  %v351_v53 = vld [vmem:[%s8155_s4 + $0x250] sm:$0xff]  ;;  %v6937_v56 = vld [vmem:[#allocation8 + $0x228] sm:$0xff]  }
  0xf4   : > { %2134 = vmatmul.mubr.bf16.gmra.mrb[16].mxu0 %v5899_v34  ;;  %6489 = vmatprep.subr.bf16.mxu1 %v6918_v58  ;;  %v6928_v34 = vld [vmem:[#allocation8 + $0x258] sm:$0xff]   ;;  %v6940_v58 = vld [vmem:[#allocation8 + $0x270] sm:$0xff]  }
  0xf5   : > { %2231 = vmatmul.mubr.bf16.gmra.mrb[16].mxu1 %v5901_v35  ;;  %2141 = vmatprep.mubr.bf16.mxu0 %v5916_v36  ;;  %v327_v35 = vld [vmem:[%s8155_s4 + $0x190] sm:$0xff] }
  0xf6   : > { %2238 = vmatprep.mubr.bf16.mxu1 %v5918_v37  ;;  %v335_v36 = vld [vmem:[%s8155_s4 + $0x1d0] sm:$0xff]  ;;  %v6930_v37 = vld [vmem:[#allocation8 + $0x2d8] sm:$0xff]  }
  0xf7   : > { %v5888_v46 = vcombine.high %v327_v35, %v335_v36  ;;  %v5887_v59 = vcombine.low %v327_v35, %v335_v36  ;;  %v290_v35 = vld [vmem:[%s8155_s4 + $0x68] sm:$0xff]  ;;  %v5951_v36 = vcombine.low %v391_v24, %v399_v25 }
  0xfc   : > { %2142 = vmatmul.mubr.bf16.gmra.mrb[20].mxu0 %v5915_v47  ;;  %v6933_v47 = vld [vmem:[#allocation8 + $0x220] sm:$0xff]  }
  0xfd   : > { %2239 = vmatmul.mubr.bf16.gmra.mrb[20].mxu1 %v5917_v49  ;;  %2149 = vmatprep.mubr.bf16.mxu0 %v5932_v50  ;;  %v6935_v49 = vld [vmem:[#allocation8 + $0x2a0] sm:$0xff]   ;;  %v6936_v50 = vld [vmem:[#allocation8 + $0x268] sm:$0xff]  }
  0xfe   : > { %2246 = vmatprep.mubr.bf16.mxu1 %v5934_v52  ;;  %v6938_v52 = vld [vmem:[#allocation8 + $0x2e8] sm:$0xff]  }
 0x104   : > { %2150 = vmatmul.mubr.bf16.gmra.mrb[24].mxu0 %v5931_v60  ;;  %v6942_v60 = vld [vmem:[#allocation8 + $0x2f0] sm:$0xff]  }
 0x105   : > { %2247 = vmatmul.mubr.bf16.gmra.mrb[24].mxu1 %v5933_v61  ;;  %2157 = vmatprep.mubr.bf16.mxu0 %v5948_v62  ;;  %v5889_v61 = vcombine.low %v328_v38, %v336_v39  ;;  %v5904_v62 = vcombine.high %v343_v51, %v351_v53 }
 0x106   : > { %2254 = vmatprep.mubr.bf16.mxu1 %v5950_v63  ;;  %v5906_v63 = vcombine.high %v344_v54, %v352_v55  ;;  %v313_v54 = vld [vmem:[%s8155_s4 + $0x120] sm:$0xff] }
 0x107   : > { %v321_v55 = vld [vmem:[%s8155_s4 + $0x160] sm:$0xff] }
 0x10c   : > { %2158 = vmatmul.mubr.bf16.gmra.mrb[28].mxu0 %v5947_v4  ;;  %v367_v4 = vld [vmem:[%s8155_s4 + $0x2d0] sm:$0xff] }
 0x10d   : > { %2255 = vmatmul.mubr.bf16.gmra.mrb[28].mxu1 %v5949_v5  ;;  %2295 = vmatprep.mubr.bf16.mxu0 %v5840_v6  ;;  %v6946_v5 = vld [vmem:[#allocation8 + $0x2f8] sm:$0xff]  }
 0x10e   : > { %2392 = vmatprep.mubr.bf16.mxu1 %v5842_v7  ;;  %v360_v6 = vld [vmem:[%s8155_s4 + $0x298] sm:$0xff] }
 0x10f   : > { %v368_v7 = vld [vmem:[%s8155_s4 + $0x2d8] sm:$0xff] }
 0x114   : > { %2296 = vmatmul.mubr.bf16.vlgmr.msra.gmra.mrb[32].mxu0 %v5839_v10  ;;  %v6948_v10 = vld [vmem:[#allocation8 + $0x340] sm:$0xff]  }
 0x115   : > { %2393 = vmatmul.mubr.bf16.vlgmr.msra.gmra.mrb[32].mxu1 %v5841_v14  ;;  %6426 = vmatpush3.bf16.msra.mxu0 %v6917_v11  ;;  %v5903_v11 = vcombine.low %v343_v51, %v351_v53  ;;  %v5920_v14 = vcombine.high %v359_v3, %v367_v4  ;;  %v6954_v51 = vld [vmem:[#allocation8 + $0x3c8] sm:$0xff]  }
 0x116   : > { %6490 = vmatpush3.bf16.msra.mxu1 %v6919_v15  ;;  %2303 = vmatprep.mubr.bf16.mxu0 %v5856_v16  ;;  %v5922_v15 = vcombine.high %v360_v6, %v368_v7  ;;  %v375_v16 = vld [vmem:[%s8155_s4 + $0x310] sm:$0xff]  ;;  %v6955_v53 = vld [vmem:[#allocation8 + $0x388] sm:$0xff]  }
 0x117   : > { %2400 = vmatprep.mubr.bf16.mxu1 %v5858_v18  ;;  %6427 = vmatprep.subr.bf16.mxu0 %v6920_v17  ;;  %v383_v17 = vld [vmem:[%s8155_s4 + $0x350] sm:$0xff]  ;;  %v376_v18 = vld [vmem:[%s8155_s4 + $0x318] sm:$0xff] }
 0x118   : > { %6491 = vmatprep.subr.bf16.mxu1 %v6922_v20  ;;  %v5919_v20 = vcombine.low %v359_v3, %v367_v4  ;;  %v5936_v22 = vcombine.high %v375_v16, %v383_v17  ;;  %v6962_v3 = vld [vmem:[#allocation8 + $0x3d8] sm:$0xff]   ;;  %v329_v4 = vld [vmem:[%s8155_s4 + $0x1a0] sm:$0xff] }
 0x119   : > { %6428 = vmatpush3.bf16.msra.mxu0 %v6921_v19  ;;  %v384_v19 = vld [vmem:[%s8155_s4 + $0x358] sm:$0xff] }
 0x11a   : > { %6492 = vmatpush3.bf16.msra.mxu1 %v6923_v21  ;;  %6429 = vmatprep.subr.bf16.mxu0 %v6924_v26  ;;  %v5921_v21 = vcombine.low %v360_v6, %v368_v7  ;;  %v5938_v23 = vcombine.high %v376_v18, %v384_v19  ;;  %v392_v26 = vld [vmem:[%s8155_s4 + $0x398] sm:$0xff]  ;;  %v330_v6 = vld [vmem:[%s8155_s4 + $0x1a8] sm:$0xff] }
 0x11b   : > { %6493 = vmatprep.subr.bf16.mxu1 %v6926_v27  ;;  %v400_v27 = vld [vmem:[%s8155_s4 + $0x3d8] sm:$0xff] }
 0x11c   : > { %2304 = vmatmul.mubr.bf16.gmra.mrb[36].mxu0 %v5855_v28  ;;  %v5935_v28 = vcombine.low %v375_v16, %v383_v17  ;;  %v6961_v7 = vld [vmem:[#allocation8 + $0x318] sm:$0xff]   ;;  %v6965_v16 = vld [vmem:[#allocation8 + $0x320] sm:$0xff]  }
 0x11d   : > { %2401 = vmatmul.mubr.bf16.gmra.mrb[36].mxu1 %v5857_v29  ;;  %2311 = vmatprep.mubr.bf16.mxu0 %v5872_v30  ;;  %v5937_v29 = vcombine.low %v376_v18, %v384_v19  ;;  %v5952_v30 = vcombine.high %v391_v24, %v399_v25  ;;  %v6967_v17 = vld [vmem:[#allocation8 + $0x3a0] sm:$0xff]   ;;  %v6968_v18 = vld [vmem:[#allocation8 + $0x368] sm:$0xff]  }
 0x11e   : > { %2408 = vmatprep.mubr.bf16.mxu1 %v5874_v31  ;;  %6430 = vmatpush3.bf16.msra.mxu0 %v6925_v32  ;;  %v5954_v31 = vcombine.high %v392_v26, %v400_v27  ;;  %v281_v32 = vld [vmem:[%s8155_s4 + $0x20] sm:$0xff]  ;;  %v6970_v19 = vld [vmem:[#allocation8 + $0x3e8] sm:$0xff]  }
 0x11f   : > { %6494 = vmatpush3.bf16.msra.mxu1 %v6927_v33  ;;  %6431 = vmatprep.subr.bf16.mxu0 %v6928_v34  ;;  %v289_v33 = vld [vmem:[%s8155_s4 + $0x60] sm:$0xff]  ;;  %v282_v34 = vld [vmem:[%s8155_s4 + $0x28] sm:$0xff] }
 0x120   : > { %6495 = vmatprep.subr.bf16.mxu1 %v6930_v37  ;;  %v5953_v37 = vcombine.low %v392_v26, %v400_v27  ;;  %v5844_v38 = vcombine.high %v281_v32, %v289_v33  ;;  %v5846_v39 = vcombine.high %v282_v34, %v290_v35  ;;  %v354_v24 = vld [vmem:[%s8155_s4 + $0x268] sm:$0xff]  ;;  %v6972_v26 = vld [vmem:[#allocation8 + $0x370] sm:$0xff]  }
 0x121   : > { %v6971_v25 = vld [vmem:[#allocation8 + $0x3a8] sm:$0xff]  }
 0x122   : > { %6432 = vmatpush3.bf16.msra.mxu0 %v6929_v40  ;;  %v297_v40 = vld [vmem:[%s8155_s4 + $0xa0] sm:$0xff] }
 0x123   : > { %6496 = vmatpush3.bf16.msra.mxu1 %v6931_v41  ;;  %6433 = vmatprep.subr.bf16.mxu0 %v6932_v42  ;;  %v305_v41 = vld [vmem:[%s8155_s4 + $0xe0] sm:$0xff]  ;;  %v5843_v42 = vcombine.low %v281_v32, %v289_v33  ;;  %v6973_v32 = vld [vmem:[#allocation8 + $0x330] sm:$0xff]  }
 0x124   : > { %2312 = vmatmul.mubr.bf16.gmra.mrb[40].mxu0 %v5871_v43  ;;  %6497 = vmatprep.subr.bf16.mxu1 %v6934_v44  ;;  %v298_v43 = vld [vmem:[%s8155_s4 + $0xa8] sm:$0xff]  ;;  %v6975_v33 = vld [vmem:[#allocation8 + $0x3b0] sm:$0xff]  }
 0x125   : > { %2409 = vmatmul.mubr.bf16.gmra.mrb[40].mxu1 %v5873_v45  ;;  %2319 = vmatprep.mubr.bf16.mxu0 %v5888_v46  ;;  %v306_v44 = vld [vmem:[%s8155_s4 + $0xe8] sm:$0xff]  ;;  %v5845_v45 = vcombine.low %v282_v34, %v290_v35  ;;  %v6949_v46 = vld [vmem:[#allocation8 + $0x300] sm:$0xff]   ;;  %v6976_v34 = vld [vmem:[#allocation8 + $0x378] sm:$0xff]  }
 0x126   : > { %2416 = vmatprep.mubr.bf16.mxu1 %v5890_v48  ;;  %6434 = vmatpush3.bf16.msra.mxu0 %v6933_v47  ;;  %v6951_v47 = vld [vmem:[#allocation8 + $0x380] sm:$0xff]   ;;  %v5860_v48 = vcombine.high %v297_v40, %v305_v41  ;;  %v6978_v35 = vld [vmem:[#allocation8 + $0x3f8] sm:$0xff]  }
 0x127   : > { %6498 = vmatpush3.bf16.msra.mxu1 %v6935_v49  ;;  %6435 = vmatprep.subr.bf16.mxu0 %v6936_v50  ;;  %v5862_v49 = vcombine.high %v298_v43, %v306_v44  ;;  %v6952_v50 = vld [vmem:[#allocation8 + $0x348] sm:$0xff]  }
 0x128   : > { %6499 = vmatprep.subr.bf16.mxu1 %v6938_v52  ;;  %v6953_v52 = vld [vmem:[#allocation8 + $0x308] sm:$0xff]  }
 0x12a   : > { %6436 = vmatpush3.bf16.msra.mxu0 %v6937_v56  ;;  %v6956_v56 = vld [vmem:[#allocation8 + $0x350] sm:$0xff]  }
 0x12b   : > { %6500 = vmatpush3.bf16.msra.mxu1 %v6939_v57  ;;  %6437 = vmatprep.subr.bf16.mxu0 %v6940_v58  ;;  %v314_v57 = vld [vmem:[%s8155_s4 + $0x128] sm:$0xff] }
 0x12c   : > { %2320 = vmatmul.mubr.bf16.gmra.mrb[44].mxu0 %v5887_v59  ;;  %6501 = vmatprep.subr.bf16.mxu1 %v6942_v60  ;;  %v322_v58 = vld [vmem:[%s8155_s4 + $0x168] sm:$0xff]  ;;  %v6958_v59 = vld [vmem:[#allocation8 + $0x3d0] sm:$0xff]   ;;  %v5859_v60 = vcombine.low %v297_v40, %v305_v41  ;;  %v6979_v41 = vld [vmem:[#allocation8 + $0x3b8] sm:$0xff]  }
 0x12d   : > { %2417 = vmatmul.mubr.bf16.gmra.mrb[44].mxu1 %v5889_v61  ;;  %2327 = vmatprep.mubr.bf16.mxu0 %v5904_v62  ;;  %v5861_v61 = vcombine.low %v298_v43, %v306_v44  ;;  %v5876_v62 = vcombine.high %v313_v54, %v321_v55  ;;  %v370_v40 = vld [vmem:[%s8155_s4 + $0x2e8] sm:$0xff] }
 0x12e   : > { %2424 = vmatprep.mubr.bf16.mxu1 %v5906_v63  ;;  %6438 = vmatpush3.bf16.msra.mxu0 %v6941_v0  ;;  %v5878_v63 = vcombine.high %v314_v57, %v322_v58  ;;  %v6957_v0 = vld [vmem:[#allocation8 + $0x310] sm:$0xff]  }
 0x12f   : > { %6502 = vmatpush3.bf16.msra.mxu1 %v6943_v1  ;;  %6439 = vmatprep.subr.bf16.mxu0 %v6944_v2  ;;  %v6959_v1 = vld [vmem:[#allocation8 + $0x390] sm:$0xff]   ;;  %v6960_v2 = vld [vmem:[#allocation8 + $0x358] sm:$0xff]  }
 0x130   : > { %6503 = vmatprep.subr.bf16.mxu1 %v6946_v5  ;;  %v337_v5 = vld [vmem:[%s8155_s4 + $0x1e0] sm:$0xff] }
 0x131   : > { %v5891_v27 = vcombine.low %v329_v4, %v337_v5 }
 0x132   : > { %6440 = vmatpush3.bf16.msra.mxu0 %v6945_v8  ;;  %v338_v8 = vld [vmem:[%s8155_s4 + $0x1e8] sm:$0xff] }
 0x133   : > { %6504 = vmatpush3.bf16.msra.mxu1 %v6947_v9  ;;  %6553 = vmatprep.subr.bf16.mxu0 %v6948_v10  ;;  %v6963_v9 = vld [vmem:[#allocation8 + $0x398] sm:$0xff]   ;;  %v6964_v10 = vld [vmem:[#allocation8 + $0x360] sm:$0xff]  }
 0x134   : > { %2328 = vmatmul.mubr.bf16.gmra.mrb[48].mxu0 %v5903_v11  ;;  %6617 = vmatprep.subr.bf16.mxu1 %v6950_v12  ;;  %v5875_v11 = vcombine.low %v313_v54, %v321_v55  ;;  %v6966_v12 = vld [vmem:[#allocation8 + $0x3e0] sm:$0xff]  }
 0x135   : > { %2425 = vmatmul.mubr.bf16.gmra.mrb[48].mxu1 %v5905_v13  ;;  %2335 = vmatprep.mubr.bf16.mxu0 %v5920_v14  ;;  %v5877_v13 = vcombine.low %v314_v57, %v322_v58  ;;  %v5892_v14 = vcombine.high %v329_v4, %v337_v5  ;;  %v393_v54 = vld [vmem:[%s8155_s4 + $0x3a0] sm:$0xff]  ;;  %v402_v57 = vld [vmem:[%s8155_s4 + $0x3e8] sm:$0xff] }
 0x136   : > { %2432 = vmatprep.mubr.bf16.mxu1 %v5922_v15  ;;  %v5894_v15 = vcombine.high %v330_v6, %v338_v8  ;;  %v401_v55 = vld [vmem:[%s8155_s4 + $0x3e0] sm:$0xff] }
 0x13c   : > { %2336 = vmatmul.mubr.bf16.gmra.mrb[52].mxu0 %v5919_v20  ;;  %v345_v20 = vld [vmem:[%s8155_s4 + $0x220] sm:$0xff] }
 0x13d   : > { %2433 = vmatmul.mubr.bf16.gmra.mrb[52].mxu1 %v5921_v21  ;;  %2343 = vmatprep.mubr.bf16.mxu0 %v5936_v22  ;;  %v353_v21 = vld [vmem:[%s8155_s4 + $0x260] sm:$0xff]  ;;  %v346_v22 = vld [vmem:[%s8155_s4 + $0x228] sm:$0xff] }
 0x13e   : > { %2440 = vmatprep.mubr.bf16.mxu1 %v5938_v23  ;;  %v6969_v23 = vld [vmem:[#allocation8 + $0x328] sm:$0xff]   ;;  %v5909_v43 = vcombine.low %v346_v22, %v354_v24 }
 0x144   : > { %2344 = vmatmul.mubr.bf16.gmra.mrb[56].mxu0 %v5935_v28  ;;  %v6974_v28 = vld [vmem:[#allocation8 + $0x3f0] sm:$0xff]  }
 0x145   : > { %2441 = vmatmul.mubr.bf16.gmra.mrb[56].mxu1 %v5937_v29  ;;  %2351 = vmatprep.mubr.bf16.mxu0 %v5952_v30  ;;  %v5893_v29 = vcombine.low %v330_v6, %v338_v8  ;;  %v5908_v30 = vcombine.high %v345_v20, %v353_v21  ;;  %v299_v6 = vld [vmem:[%s8155_s4 + $0xb0] sm:$0xff]  ;;  %v300_v8 = vld [vmem:[%s8155_s4 + $0xb8] sm:$0xff] }
 0x146   : > { %2448 = vmatprep.mubr.bf16.mxu1 %v5954_v31  ;;  %v5910_v31 = vcombine.high %v346_v22, %v354_v24  ;;  %v331_v22 = vld [vmem:[%s8155_s4 + $0x1b0] sm:$0xff]  ;;  %v332_v24 = vld [vmem:[%s8155_s4 + $0x1b8] sm:$0xff] }
 0x14c   : > { %2352 = vmatmul.mubr.bf16.gmra.mrb[60].mxu0 %v5951_v36  ;;  %v361_v36 = vld [vmem:[%s8155_s4 + $0x2a0] sm:$0xff] }
 0x14d   : > { %2449 = vmatmul.mubr.bf16.gmra.mrb[60].mxu1 %v5953_v37  ;;  %2489 = vmatprep.mubr.bf16.mxu0 %v5844_v38  ;;  %v369_v37 = vld [vmem:[%s8155_s4 + $0x2e0] sm:$0xff]  ;;  %v6977_v38 = vld [vmem:[#allocation8 + $0x338] sm:$0xff]  }
 0x14e   : > { %2586 = vmatprep.mubr.bf16.mxu1 %v5846_v39  ;;  %v362_v39 = vld [vmem:[%s8155_s4 + $0x2a8] sm:$0xff]  ;;  %v5924_v44 = vcombine.high %v361_v36, %v369_v37 }
 0x154   : > { %2490 = vmatmul.mubr.bf16.vlgmr.msra.gmra.mrb[64].mxu0 %v5843_v42  ;;  %v5907_v42 = vcombine.low %v345_v20, %v353_v21 }
 0x155   : > { %2587 = vmatmul.mubr.bf16.vlgmr.msra.gmra.mrb[64].mxu1 %v5845_v45  ;;  %6554 = vmatpush3.bf16.msra.mxu0 %v6949_v46  ;;  %v5926_v45 = vcombine.high %v362_v39, %v370_v40  ;;  %v377_v46 = vld [vmem:[%s8155_s4 + $0x320] sm:$0xff] }
 0x156   : > { %6618 = vmatpush3.bf16.msra.mxu1 %v6951_v47  ;;  %2497 = vmatprep.mubr.bf16.mxu0 %v5860_v48  ;;  %v385_v47 = vld [vmem:[%s8155_s4 + $0x360] sm:$0xff]  ;;  %v378_v48 = vld [vmem:[%s8155_s4 + $0x328] sm:$0xff] }
 0x157   : > { %2594 = vmatprep.mubr.bf16.mxu1 %v5862_v49  ;;  %6555 = vmatprep.subr.bf16.mxu0 %v6952_v50  ;;  %v386_v49 = vld [vmem:[%s8155_s4 + $0x368] sm:$0xff]  ;;  %v5923_v50 = vcombine.low %v361_v36, %v369_v37  ;;  %v5939_v58 = vcombine.low %v377_v46, %v385_v47 }
 0x158   : > { %6619 = vmatprep.subr.bf16.mxu1 %v6954_v51  ;;  %v5925_v51 = vcombine.low %v362_v39, %v370_v40 }
 0x159   : > { %6556 = vmatpush3.bf16.msra.mxu0 %v6953_v52  ;;  %v5940_v52 = vcombine.high %v377_v46, %v385_v47 }
 0x15a   : > { %6620 = vmatpush3.bf16.msra.mxu1 %v6955_v53  ;;  %6557 = vmatprep.subr.bf16.mxu0 %v6956_v56  ;;  %v5942_v53 = vcombine.high %v378_v48, %v386_v49  ;;  %v394_v56 = vld [vmem:[%s8155_s4 + $0x3a8] sm:$0xff] }
 0x15b   : > { %6621 = vmatprep.subr.bf16.mxu1 %v6958_v59  ;;  %v5941_v59 = vcombine.low %v378_v48, %v386_v49 }
 0x15c   : > { %2498 = vmatmul.mubr.bf16.gmra.mrb[68].mxu0 %v5859_v60  ;;  %v5956_v60 = vcombine.high %v393_v54, %v401_v55 }
 0x15d   : > { %2595 = vmatmul.mubr.bf16.gmra.mrb[68].mxu1 %v5861_v61  ;;  %2505 = vmatprep.mubr.bf16.mxu0 %v5876_v62  ;;  %v5958_v61 = vcombine.high %v394_v56, %v402_v57  ;;  %v283_v62 = vld [vmem:[%s8155_s4 + $0x30] sm:$0xff] }
 0x15e   : > { %2602 = vmatprep.mubr.bf16.mxu1 %v5878_v63  ;;  %6558 = vmatpush3.bf16.msra.mxu0 %v6957_v0  ;;  %v291_v63 = vld [vmem:[%s8155_s4 + $0x70] sm:$0xff]  ;;  %v284_v0 = vld [vmem:[%s8155_s4 + $0x38] sm:$0xff] }
 0x15f   : > { %6622 = vmatpush3.bf16.msra.mxu1 %v6959_v1  ;;  %6559 = vmatprep.subr.bf16.mxu0 %v6960_v2  ;;  %v292_v1 = vld [vmem:[%s8155_s4 + $0x78] sm:$0xff]  ;;  %v5955_v2 = vcombine.low %v393_v54, %v401_v55  ;;  %v5848_v4 = vcombine.high %v283_v62, %v291_v63 }
 0x160   : > { %6623 = vmatprep.subr.bf16.mxu1 %v6962_v3  ;;  %v5957_v3 = vcombine.low %v394_v56, %v402_v57  ;;  %v5850_v5 = vcombine.high %v284_v0, %v292_v1  ;;  %v364_v55 = vld [vmem:[%s8155_s4 + $0x2b8] sm:$0xff] }
 0x161   : > { %v372_v56 = vld [vmem:[%s8155_s4 + $0x2f8] sm:$0xff] }
 0x162   : > { %6560 = vmatpush3.bf16.msra.mxu0 %v6961_v7  ;;  %v307_v7 = vld [vmem:[%s8155_s4 + $0xf0] sm:$0xff] }
 0x163   : > { %6624 = vmatpush3.bf16.msra.mxu1 %v6963_v9  ;;  %6561 = vmatprep.subr.bf16.mxu0 %v6964_v10  ;;  %v308_v9 = vld [vmem:[%s8155_s4 + $0xf8] sm:$0xff]  ;;  %v5847_v10 = vcombine.low %v283_v62, %v291_v63 }
 0x164   : > { %2506 = vmatmul.mubr.bf16.gmra.mrb[72].mxu0 %v5875_v11  ;;  %6625 = vmatprep.subr.bf16.mxu1 %v6966_v12  ;;  %v5849_v11 = vcombine.low %v284_v0, %v292_v1  ;;  %v5864_v12 = vcombine.high %v299_v6, %v307_v7 }
 0x165   : > { %2603 = vmatmul.mubr.bf16.gmra.mrb[72].mxu1 %v5877_v13  ;;  %2513 = vmatprep.mubr.bf16.mxu0 %v5892_v14  ;;  %v5866_v13 = vcombine.high %v300_v8, %v308_v9  ;;  %v315_v14 = vld [vmem:[%s8155_s4 + $0x130] sm:$0xff] }
 0x166   : > { %2610 = vmatprep.mubr.bf16.mxu1 %v5894_v15  ;;  %6562 = vmatpush3.bf16.msra.mxu0 %v6965_v16  ;;  %v323_v15 = vld [vmem:[%s8155_s4 + $0x170] sm:$0xff]  ;;  %v316_v16 = vld [vmem:[%s8155_s4 + $0x138] sm:$0xff] }
 0x167   : > { %6626 = vmatpush3.bf16.msra.mxu1 %v6967_v17  ;;  %6563 = vmatprep.subr.bf16.mxu0 %v6968_v18  ;;  %v324_v17 = vld [vmem:[%s8155_s4 + $0x178] sm:$0xff]  ;;  %v5863_v18 = vcombine.low %v299_v6, %v307_v7  ;;  %v5880_v20 = vcombine.high %v315_v14, %v323_v15 }
 0x168   : > { %6627 = vmatprep.subr.bf16.mxu1 %v6970_v19  ;;  %v5865_v19 = vcombine.low %v300_v8, %v308_v9  ;;  %v5882_v21 = vcombine.high %v316_v16, %v324_v17 }
 0x16a   : > { %6564 = vmatpush3.bf16.msra.mxu0 %v6969_v23  ;;  %v339_v23 = vld [vmem:[%s8155_s4 + $0x1f0] sm:$0xff] }
 0x16b   : > { %6628 = vmatpush3.bf16.msra.mxu1 %v6971_v25  ;;  %6565 = vmatprep.subr.bf16.mxu0 %v6972_v26  ;;  %v340_v25 = vld [vmem:[%s8155_s4 + $0x1f8] sm:$0xff]  ;;  %v5879_v26 = vcombine.low %v315_v14, %v323_v15  ;;  %v5895_v37 = vcombine.low %v331_v22, %v339_v23 }
 0x16c   : > { %2514 = vmatmul.mubr.bf16.gmra.mrb[76].mxu0 %v5891_v27  ;;  %6629 = vmatprep.subr.bf16.mxu1 %v6974_v28  ;;  %v5881_v27 = vcombine.low %v316_v16, %v324_v17  ;;  %v5896_v28 = vcombine.high %v331_v22, %v339_v23  ;;  %v388_v14 = vld [vmem:[%s8155_s4 + $0x378] sm:$0xff] }
 0x16d   : > { %2611 = vmatmul.mubr.bf16.gmra.mrb[76].mxu1 %v5893_v29  ;;  %2521 = vmatprep.mubr.bf16.mxu0 %v5908_v30  ;;  %v5898_v29 = vcombine.high %v332_v24, %v340_v25  ;;  %v347_v30 = vld [vmem:[%s8155_s4 + $0x230] sm:$0xff] }
 0x16e   : > { %2618 = vmatprep.mubr.bf16.mxu1 %v5910_v31  ;;  %6566 = vmatpush3.bf16.msra.mxu0 %v6973_v32  ;;  %v355_v31 = vld [vmem:[%s8155_s4 + $0x270] sm:$0xff] }
 0x16f   : > { %6630 = vmatpush3.bf16.msra.mxu1 %v6975_v33  ;;  %6567 = vmatprep.subr.bf16.mxu0 %v6976_v34  ;;  %v348_v33 = vld [vmem:[%s8155_s4 + $0x238] sm:$0xff] }
 0x170   : > { %6631 = vmatprep.subr.bf16.mxu1 %v6978_v35  ;;  %v356_v34 = vld [vmem:[%s8155_s4 + $0x278] sm:$0xff] }
 0x171   : > { %v5914_v46 = vcombine.high %v348_v33, %v356_v34  ;;  %v5913_v63 = vcombine.low %v348_v33, %v356_v34  ;;  %v403_v33 = vld [vmem:[%s8155_s4 + $0x3f0] sm:$0xff] }
 0x172   : > { %6568 = vmatpush3.bf16.msra.mxu0 %v6977_v38 }
 0x173   : > { %6632 = vmatpush3.bf16.msra.mxu1 %v6979_v41  ;;  %v5897_v41 = vcombine.low %v332_v24, %v340_v25 }
 0x174   : > { %2522 = vmatmul.mubr.bf16.gmra.mrb[80].mxu0 %v5907_v42  ;;  %v5912_v42 = vcombine.high %v347_v30, %v355_v31 }
 0x175   : > { %2619 = vmatmul.mubr.bf16.gmra.mrb[80].mxu1 %v5909_v43  ;;  %2529 = vmatprep.mubr.bf16.mxu0 %v5924_v44 }
 0x176   : > { %2626 = vmatprep.mubr.bf16.mxu1 %v5926_v45 }
 0x17c   : > { %2530 = vmatmul.mubr.bf16.gmra.mrb[84].mxu0 %v5923_v50 }
 0x17d   : > { %2627 = vmatmul.mubr.bf16.gmra.mrb[84].mxu1 %v5925_v51  ;;  %2537 = vmatprep.mubr.bf16.mxu0 %v5940_v52  ;;  %v363_v52 = vld [vmem:[%s8155_s4 + $0x2b0] sm:$0xff] }
 0x17e   : > { %2634 = vmatprep.mubr.bf16.mxu1 %v5942_v53  ;;  %v371_v53 = vld [vmem:[%s8155_s4 + $0x2f0] sm:$0xff] }
 0x17f   : > { %v5928_v0 = vcombine.high %v363_v52, %v371_v53  ;;  %v5927_v17 = vcombine.low %v363_v52, %v371_v53 }
 0x184   : > { %2538 = vmatmul.mubr.bf16.gmra.mrb[88].mxu0 %v5939_v58 }
 0x185   : > { %2635 = vmatmul.mubr.bf16.gmra.mrb[88].mxu1 %v5941_v59  ;;  %2545 = vmatprep.mubr.bf16.mxu0 %v5956_v60  ;;  %v5911_v59 = vcombine.low %v347_v30, %v355_v31 }
 0x186   : > { %2642 = vmatprep.mubr.bf16.mxu1 %v5958_v61 }
 0x18c   : > { %2546 = vmatmul.mubr.bf16.gmra.mrb[92].mxu0 %v5955_v2 }
 0x18d   : > { %2643 = vmatmul.mubr.bf16.gmra.mrb[92].mxu1 %v5957_v3  ;;  %2683 = vmatprep.mubr.bf16.mxu0 %v5848_v4  ;;  %v5930_v4 = vcombine.high %v364_v55, %v372_v56 }
 0x18e   : > { %2780 = vmatprep.mubr.bf16.mxu1 %v5850_v5 }
 0x194   : > { %2684 = vmatmul.mubr.bf16.vlgmr.msra.gmra.mrb[96].mxu0 %v5847_v10  ;;  %v379_v10 = vld [vmem:[%s8155_s4 + $0x330] sm:$0xff] }
 0x195   : > { %2781 = vmatmul.mubr.bf16.vlgmr.msra.gmra.mrb[96].mxu1 %v5849_v11  ;;  %2691 = vmatprep.mubr.bf16.mxu0 %v5864_v12  ;;  %v387_v11 = vld [vmem:[%s8155_s4 + $0x370] sm:$0xff] }
 0x196   : > { %2788 = vmatprep.mubr.bf16.mxu1 %v5866_v13  ;;  %v380_v13 = vld [vmem:[%s8155_s4 + $0x338] sm:$0xff]  ;;  %v5944_v22 = vcombine.high %v379_v10, %v387_v11 }
 0x19c   : > { %2692 = vmatmul.mubr.bf16.gmra.mrb[100].mxu0 %v5863_v18 }
 0x19d   : > { %2789 = vmatmul.mubr.bf16.gmra.mrb[100].mxu1 %v5865_v19  ;;  %2699 = vmatprep.mubr.bf16.mxu0 %v5880_v20 }
 0x19e   : > { %2796 = vmatprep.mubr.bf16.mxu1 %v5882_v21  ;;  %v5929_v21 = vcombine.low %v364_v55, %v372_v56 }
 0x1a4   : > { %2700 = vmatmul.mubr.bf16.gmra.mrb[104].mxu0 %v5879_v26  ;;  %v5946_v26 = vcombine.high %v380_v13, %v388_v14 }
 0x1a5   : > { %2797 = vmatmul.mubr.bf16.gmra.mrb[104].mxu1 %v5881_v27  ;;  %2707 = vmatprep.mubr.bf16.mxu0 %v5896_v28 }
 0x1a6   : > { %2804 = vmatprep.mubr.bf16.mxu1 %v5898_v29 }
 0x1a7   : > { %v6185_v32 = vpop.f32.mrb[0].mxu0 }
 0x1a8   : > { %v6249_v35 = vpop.f32.mrb[0].mxu1  ;;  %v6186_v36 = vpop.f32.mrb[1].mxu0 }
 0x1a9   : > { %v6187_v38 = vadd.f32 %v6186_v36, %v6185_v32  ;;  %v6250_v39 = vpop.f32.mrb[1].mxu1  ;;  %v6188_v40 = vpop.f32.mrb[2].mxu0  ;;  %v395_v32 = vld [vmem:[%s8155_s4 + $0x3b0] sm:$0xff]  ;;  %v404_v36 = vld [vmem:[%s8155_s4 + $0x3f8] sm:$0xff] }
 0x1aa   : > { %v6251_v43 = vadd.f32 %v6250_v39, %v6249_v35  ;;  %v6252_v44 = vpop.f32.mrb[2].mxu1  ;;  %v6189_v45 = vpop.f32.mrb[3].mxu0  ;;  %v396_v35 = vld [vmem:[%s8155_s4 + $0x3b8] sm:$0xff]  ;;  %v5943_v39 = vcombine.low %v379_v10, %v387_v11 }
 0x1ab   : > { %v6190_v47 = vadd.f32 %v6189_v45, %v6188_v40  ;;  %v6253_v48 = vpop.f32.mrb[3].mxu1 }
 0x1ac   : > { %v8295_v49 = vadd.f32 %v6251_v43, %v6187_v38  ;;  %v6254_v50 = vadd.f32 %v6253_v48, %v6252_v44  ;;  %2708 = vmatmul.mubr.bf16.gmra.mrb[108].mxu0 %v5895_v37  ;;  %v5945_v43 = vcombine.low %v380_v13, %v388_v14  ;;  %v5960_v44 = vcombine.high %v395_v32, %v403_v33 }
 0x1ad   : > { %2805 = vmatmul.mubr.bf16.gmra.mrb[108].mxu1 %v5897_v41  ;;  %2715 = vmatprep.mubr.bf16.mxu0 %v5912_v42  ;;  %v5962_v48 = vcombine.high %v396_v35, %v404_v36 }
 0x1ae   : > { %v8297_v51 = vadd.f32 %v6254_v50, %v6190_v47  ;;  %2812 = vmatprep.mubr.bf16.mxu1 %v5914_v46 }
 0x1af   : > { %v6191_v54 = vpop.f32.mrb[4].mxu0 }
 0x1b0   : > { %v6255_v57 = vpop.f32.mrb[4].mxu1  ;;  %v6192_v58 = vpop.f32.mrb[5].mxu0 }
 0x1b1   : > { %v6193_v60 = vadd.f32 %v6192_v58, %v6191_v54  ;;  %v6256_v61 = vpop.f32.mrb[5].mxu1  ;;  %v6194_v62 = vpop.f32.mrb[6].mxu0 }
 0x1b2   : > { %v6257_v1 = vadd.f32 %v6256_v61, %v6255_v57  ;;  %v6258_v2 = vpop.f32.mrb[6].mxu1  ;;  %v6195_v3 = vpop.f32.mrb[7].mxu0 }
 0x1b3   : > { %v6196_v5 = vadd.f32 %v6195_v3, %v6194_v62  ;;  %v6259_v6 = vpop.f32.mrb[7].mxu1 }
 0x1b4   : > { %v8303_v7 = vadd.f32 %v6257_v1, %v6193_v60  ;;  %v6260_v8 = vadd.f32 %v6259_v6, %v6258_v2  ;;  %2716 = vmatmul.mubr.bf16.gmra.mrb[112].mxu0 %v5911_v59  ;;  %v5959_v59 = vcombine.low %v395_v32, %v403_v33 }
 0x1b5   : > { %2813 = vmatmul.mubr.bf16.gmra.mrb[112].mxu1 %v5913_v63  ;;  %2723 = vmatprep.mubr.bf16.mxu0 %v5928_v0  ;;  %v5961_v63 = vcombine.low %v396_v35, %v404_v36 }
 0x1b6   : > { %v8305_v9 = vadd.f32 %v6260_v8, %v6196_v5  ;;  %2820 = vmatprep.mubr.bf16.mxu1 %v5930_v4 }
 0x1b7   : > { %v6197_v12 = vpop.f32.mrb[8].mxu0 }
 0x1b8   : > { %v6261_v15 = vpop.f32.mrb[8].mxu1  ;;  %v6198_v16 = vpop.f32.mrb[9].mxu0 }
 0x1b9   : > { %v6199_v18 = vadd.f32 %v6198_v16, %v6197_v12  ;;  %v6262_v19 = vpop.f32.mrb[9].mxu1  ;;  %v6200_v20 = vpop.f32.mrb[10].mxu0 }
 0x1ba   : > { %v6263_v23 = vadd.f32 %v6262_v19, %v6261_v15  ;;  %v6264_v24 = vpop.f32.mrb[10].mxu1  ;;  %v6201_v25 = vpop.f32.mrb[11].mxu0 }
 0x1bb   : > { %v6202_v27 = vadd.f32 %v6201_v25, %v6200_v20  ;;  %v6265_v28 = vpop.f32.mrb[11].mxu1 }
 0x1bc   : > { %v8311_v29 = vadd.f32 %v6263_v23, %v6199_v18  ;;  %v6266_v30 = vadd.f32 %v6265_v28, %v6264_v24  ;;  %2724 = vmatmul.mubr.bf16.gmra.mrb[116].mxu0 %v5927_v17 }
 0x1bd   : > { %2821 = vmatmul.mubr.bf16.gmra.mrb[116].mxu1 %v5929_v21  ;;  %2731 = vmatprep.mubr.bf16.mxu0 %v5944_v22 }
 0x1be   : > { %v8313_v31 = vadd.f32 %v6266_v30, %v6202_v27  ;;  %2828 = vmatprep.mubr.bf16.mxu1 %v5946_v26 }
 0x1bf   : > { %v6203_v34 = vpop.f32.mrb[12].mxu0 }
 0x1c0   : > { %v6267_v37 = vpop.f32.mrb[12].mxu1  ;;  %v6204_v38 = vpop.f32.mrb[13].mxu0 }
 0x1c1   : > { %v6205_v40 = vadd.f32 %v6204_v38, %v6203_v34  ;;  %v6268_v41 = vpop.f32.mrb[13].mxu1  ;;  %v6206_v42 = vpop.f32.mrb[14].mxu0 }
 0x1c2   : > { %v6269_v45 = vadd.f32 %v6268_v41, %v6267_v37  ;;  %v6270_v46 = vpop.f32.mrb[14].mxu1  ;;  %v6207_v47 = vpop.f32.mrb[15].mxu0 }
 0x1c3   : > { %v6208_v50 = vadd.f32 %v6207_v47, %v6206_v42  ;;  %v6271_v52 = vpop.f32.mrb[15].mxu1 }
 0x1c4   : > { %v8319_v53 = vadd.f32 %v6269_v45, %v6205_v40  ;;  %v6272_v54 = vadd.f32 %v6271_v52, %v6270_v46  ;;  %2732 = vmatmul.mubr.bf16.gmra.mrb[120].mxu0 %v5943_v39 }
 0x1c5   : > { %2829 = vmatmul.mubr.bf16.gmra.mrb[120].mxu1 %v5945_v43  ;;  %2739 = vmatprep.mubr.bf16.mxu0 %v5960_v44 }
 0x1c6   : > { %v8321_v55 = vadd.f32 %v6272_v54, %v6208_v50  ;;  %2836 = vmatprep.mubr.bf16.mxu1 %v5962_v48 }
 0x1c7   : > { %v6209_v56 = vpop.f32.mrb[16].mxu0 }
 0x1c8   : > { %v6273_v57 = vpop.f32.mrb[16].mxu1  ;;  %v6210_v58 = vpop.f32.mrb[17].mxu0 }
 0x1c9   : > { %v6211_v60 = vadd.f32 %v6210_v58, %v6209_v56  ;;  %v6274_v61 = vpop.f32.mrb[17].mxu1  ;;  %v6212_v62 = vpop.f32.mrb[18].mxu0 }
 0x1ca   : > { %v6275_v0 = vadd.f32 %v6274_v61, %v6273_v57  ;;  %v6276_v1 = vpop.f32.mrb[18].mxu1  ;;  %v6213_v2 = vpop.f32.mrb[19].mxu0 }
 0x1cb   : > { %v6214_v3 = vadd.f32 %v6213_v2, %v6212_v62  ;;  %v6277_v4 = vpop.f32.mrb[19].mxu1 }
 0x1cc   : > { %v8323_v5 = vadd.f32 %v6275_v0, %v6211_v60  ;;  %v6278_v6 = vadd.f32 %v6277_v4, %v6276_v1  ;;  %2740 = vmatmul.mubr.bf16.gmra.mrb[124].mxu0 %v5959_v59 }
 0x1cd   : > { %2837 = vmatmul.mubr.bf16.gmra.mrb[124].mxu1 %v5961_v63 }
 0x1ce   : > { %v8325_v8 = vadd.f32 %v6278_v6, %v6214_v3 }
 0x1cf   : > { %v6215_v10 = vpop.f32.mrb[20].mxu0 }
 0x1d0   : > { %v6279_v11 = vpop.f32.mrb[20].mxu1  ;;  %v6216_v12 = vpop.f32.mrb[21].mxu0 }
 0x1d1   : > { %v6217_v13 = vadd.f32 %v6216_v12, %v6215_v10  ;;  %v6280_v14 = vpop.f32.mrb[21].mxu1  ;;  %v6218_v15 = vpop.f32.mrb[22].mxu0 }
 0x1d2   : > { %v6281_v16 = vadd.f32 %v6280_v14, %v6279_v11  ;;  %v6282_v17 = vpop.f32.mrb[22].mxu1  ;;  %v6219_v18 = vpop.f32.mrb[23].mxu0 }
 0x1d3   : > { %v6220_v19 = vadd.f32 %v6219_v18, %v6218_v15  ;;  %v6283_v20 = vpop.f32.mrb[23].mxu1 }
 0x1d4   : > { %v8327_v21 = vadd.f32 %v6281_v16, %v6217_v13  ;;  %v6284_v22 = vadd.f32 %v6283_v20, %v6282_v17 }
 0x1d6   : > { %v8329_v23 = vadd.f32 %v6284_v22, %v6220_v19 }
 0x1d7   : > { %v6221_v24 = vpop.f32.mrb[24].mxu0 }
 0x1d8   : > { %v6285_v25 = vpop.f32.mrb[24].mxu1  ;;  %v6222_v26 = vpop.f32.mrb[25].mxu0 }
 0x1d9   : > { %v6223_v27 = vadd.f32 %v6222_v26, %v6221_v24  ;;  %v6286_v28 = vpop.f32.mrb[25].mxu1  ;;  %v6224_v30 = vpop.f32.mrb[26].mxu0 }
 0x1da   : > { %v6287_v32 = vadd.f32 %v6286_v28, %v6285_v25  ;;  %v6288_v33 = vpop.f32.mrb[26].mxu1  ;;  %v6225_v34 = vpop.f32.mrb[27].mxu0 }
 0x1db   : > { %v6226_v35 = vadd.f32 %v6225_v34, %v6224_v30  ;;  %v6289_v36 = vpop.f32.mrb[27].mxu1 }
 0x1dc   : > { %v8331_v37 = vadd.f32 %v6287_v32, %v6223_v27  ;;  %v6290_v38 = vadd.f32 %v6289_v36, %v6288_v33 }
 0x1de   : > { %v8333_v39 = vadd.f32 %v6290_v38, %v6226_v35 }
 0x1df   : > { %v6227_v40 = vpop.f32.mrb[28].mxu0 }
 0x1e0   : > { %v6291_v41 = vpop.f32.mrb[28].mxu1  ;;  %v6228_v42 = vpop.f32.mrb[29].mxu0 }
 0x1e1   : > { %v6229_v43 = vadd.f32 %v6228_v42, %v6227_v40  ;;  %v6292_v44 = vpop.f32.mrb[29].mxu1  ;;  %v6230_v45 = vpop.f32.mrb[30].mxu0 }
 0x1e2   : > { %v6293_v46 = vadd.f32 %v6292_v44, %v6291_v41  ;;  %v6294_v47 = vpop.f32.mrb[30].mxu1  ;;  %v6231_v48 = vpop.f32.mrb[31].mxu0 }
 0x1e3   : > { %v6232_v50 = vadd.f32 %v6231_v48, %v6230_v45  ;;  %v6295_v52 = vpop.f32.mrb[31].mxu1 }
 0x1e4   : > { %v8335_v54 = vadd.f32 %v6293_v46, %v6229_v43  ;;  %v6296_v56 = vadd.f32 %v6295_v52, %v6294_v47 }
 0x1e6   : > { %v8337_v57 = vadd.f32 %v6296_v56, %v6232_v50 }
 0x1e7   : > { %v6313_v58 = vpop.f32.mrb[32].mxu0 }
 0x1e8   : > { %v6377_v59 = vpop.f32.mrb[32].mxu1  ;;  %v6314_v60 = vpop.f32.mrb[33].mxu0 }
 0x1e9   : > { %v6315_v61 = vadd.f32 %v6314_v60, %v6313_v58  ;;  %v6378_v62 = vpop.f32.mrb[33].mxu1  ;;  %v6316_v63 = vpop.f32.mrb[34].mxu0 }
 0x1ea   : > { %v6379_v0 = vadd.f32 %v6378_v62, %v6377_v59  ;;  %v6380_v1 = vpop.f32.mrb[34].mxu1  ;;  %v6317_v2 = vpop.f32.mrb[35].mxu0 }
 0x1eb   : > { %v2298_v3 = vadd.f32 %v6315_v61, %v8295_v49  ;;  %v6318_v4 = vadd.f32 %v6317_v2, %v6316_v63  ;;  %v6381_v6 = vpop.f32.mrb[35].mxu1 }
 0x1ec   : > { %v6382_v10 = vadd.f32 %v6381_v6, %v6380_v1 }
 0x1ed   : > { %v8340_v11 = vadd.f32 %v6379_v0, %v2298_v3  ;;  %v2301_v12 = vadd.f32 %v6318_v4, %v8297_v51 }
 0x1ef   : > { %v8343_v13 = vadd.f32 %v6382_v10, %v2301_v12  ;;  %v6319_v14 = vpop.f32.mrb[36].mxu0 }
 0x1f0   : > { %v6383_v15 = vpop.f32.mrb[36].mxu1  ;;  %v6320_v16 = vpop.f32.mrb[37].mxu0 }
 0x1f1   : > { %v6321_v17 = vadd.f32 %v6320_v16, %v6319_v14  ;;  %v6384_v18 = vpop.f32.mrb[37].mxu1  ;;  %v6322_v19 = vpop.f32.mrb[38].mxu0 }
 0x1f2   : > { %v6385_v20 = vadd.f32 %v6384_v18, %v6383_v15  ;;  %v6386_v22 = vpop.f32.mrb[38].mxu1  ;;  %v6323_v24 = vpop.f32.mrb[39].mxu0 }
 0x1f3   : > { %v2306_v49 = vadd.f32 %v6321_v17, %v8303_v7  ;;  %v6324_v25 = vadd.f32 %v6323_v24, %v6322_v19  ;;  %v6387_v26 = vpop.f32.mrb[39].mxu1 }
 0x1f4   : > { %v6388_v27 = vadd.f32 %v6387_v26, %v6386_v22 }
 0x1f5   : > { %v8346_v28 = vadd.f32 %v6385_v20, %v2306_v49  ;;  %v2309_v51 = vadd.f32 %v6324_v25, %v8305_v9 }
 0x1f7   : > { %v8349_v30 = vadd.f32 %v6388_v27, %v2309_v51  ;;  %v6325_v32 = vpop.f32.mrb[40].mxu0 }
 0x1f8   : > { %v6389_v33 = vpop.f32.mrb[40].mxu1  ;;  %v6326_v34 = vpop.f32.mrb[41].mxu0 }
 0x1f9   : > { %v6327_v35 = vadd.f32 %v6326_v34, %v6325_v32  ;;  %v6390_v36 = vpop.f32.mrb[41].mxu1  ;;  %v6328_v38 = vpop.f32.mrb[42].mxu0 }
 0x1fa   : > { %v6391_v40 = vadd.f32 %v6390_v36, %v6389_v33  ;;  %v6392_v41 = vpop.f32.mrb[42].mxu1  ;;  %v6329_v42 = vpop.f32.mrb[43].mxu0 }
 0x1fb   : > { %v2314_v7 = vadd.f32 %v6327_v35, %v8311_v29  ;;  %v6330_v43 = vadd.f32 %v6329_v42, %v6328_v38  ;;  %v6393_v44 = vpop.f32.mrb[43].mxu1 }
 0x1fc   : > { %v6394_v45 = vadd.f32 %v6393_v44, %v6392_v41 }
 0x1fd   : > { %v8352_v46 = vadd.f32 %v6391_v40, %v2314_v7  ;;  %v2317_v9 = vadd.f32 %v6330_v43, %v8313_v31 }
 0x1ff   : > { %v8355_v47 = vadd.f32 %v6394_v45, %v2317_v9  ;;  %v6331_v48 = vpop.f32.mrb[44].mxu0 }
 0x200   : > { %v6395_v50 = vpop.f32.mrb[44].mxu1  ;;  %v6332_v52 = vpop.f32.mrb[45].mxu0 }
 0x201   : > { %v6333_v56 = vadd.f32 %v6332_v52, %v6331_v48  ;;  %v6396_v58 = vpop.f32.mrb[45].mxu1  ;;  %v6334_v59 = vpop.f32.mrb[46].mxu0 }
 0x202   : > { %v6397_v60 = vadd.f32 %v6396_v58, %v6395_v50  ;;  %v6398_v61 = vpop.f32.mrb[46].mxu1  ;;  %v6335_v62 = vpop.f32.mrb[47].mxu0 }
 0x203   : > { %v2322_v29 = vadd.f32 %v6333_v56, %v8319_v53  ;;  %v6336_v63 = vadd.f32 %v6335_v62, %v6334_v59  ;;  %v6399_v0 = vpop.f32.mrb[47].mxu1 }
 0x204   : > { %v6400_v1 = vadd.f32 %v6399_v0, %v6398_v61 }
 0x205   : > { %v8358_v2 = vadd.f32 %v6397_v60, %v2322_v29  ;;  %v2325_v31 = vadd.f32 %v6336_v63, %v8321_v55 }
 0x207   : > { %v8361_v3 = vadd.f32 %v6400_v1, %v2325_v31  ;;  %v6337_v4 = vpop.f32.mrb[48].mxu0 }
 0x208   : > { %v6401_v6 = vpop.f32.mrb[48].mxu1  ;;  %v6338_v10 = vpop.f32.mrb[49].mxu0 }
 0x209   : > { %v6339_v12 = vadd.f32 %v6338_v10, %v6337_v4  ;;  %v6402_v14 = vpop.f32.mrb[49].mxu1  ;;  %v6340_v15 = vpop.f32.mrb[50].mxu0 }
 0x20a   : > { %v6403_v16 = vadd.f32 %v6402_v14, %v6401_v6  ;;  %v6404_v17 = vpop.f32.mrb[50].mxu1  ;;  %v6341_v18 = vpop.f32.mrb[51].mxu0 }
 0x20b   : > { %v2330_v53 = vadd.f32 %v6339_v12, %v8323_v5  ;;  %v6342_v19 = vadd.f32 %v6341_v18, %v6340_v15  ;;  %v6405_v20 = vpop.f32.mrb[51].mxu1 }
 0x20c   : > { %v6406_v22 = vadd.f32 %v6405_v20, %v6404_v17 }
 0x20d   : > { %v8364_v24 = vadd.f32 %v6403_v16, %v2330_v53  ;;  %v2333_v55 = vadd.f32 %v6342_v19, %v8325_v8 }
 0x20f   : > { %v8367_v49 = vadd.f32 %v6406_v22, %v2333_v55  ;;  %v6343_v25 = vpop.f32.mrb[52].mxu0 }
 0x210   : > { %v6407_v26 = vpop.f32.mrb[52].mxu1  ;;  %v6344_v27 = vpop.f32.mrb[53].mxu0 }
 0x211   : > { %v6345_v51 = vadd.f32 %v6344_v27, %v6343_v25  ;;  %v6408_v32 = vpop.f32.mrb[53].mxu1  ;;  %v6346_v33 = vpop.f32.mrb[54].mxu0 }
 0x212   : > { %v6409_v34 = vadd.f32 %v6408_v32, %v6407_v26  ;;  %v6410_v35 = vpop.f32.mrb[54].mxu1  ;;  %v6347_v36 = vpop.f32.mrb[55].mxu0 }
 0x213   : > { %v2338_v5 = vadd.f32 %v6345_v51, %v8327_v21  ;;  %v6348_v38 = vadd.f32 %v6347_v36, %v6346_v33  ;;  %v6411_v40 = vpop.f32.mrb[55].mxu1  ;;  %v7828_v36 = vmov -inf  }
 0x214   : > { %v6412_v41 = vadd.f32 %v6411_v40, %v6410_v35  ;;  %2862 = vst.msk [vmem:[#allocation3] sm:$0xff] %vm2861_vm0, %v7828_v36  ;;  %2863 = vst.msk [vmem:[#allocation3 + $0x8] sm:$0xff] %vm2861_vm0, %v7828_v36 }
 0x215   : > { %v8370_v42 = vadd.f32 %v6409_v34, %v2338_v5  ;;  %v2341_v8 = vadd.f32 %v6348_v38, %v8329_v23  ;;  %2864 = vst.msk [vmem:[#allocation3 + $0x10] sm:$0xff] %vm2861_vm0, %v7828_v36  ;;  %2865 = vst.msk [vmem:[#allocation3 + $0x18] sm:$0xff] %vm2861_vm0, %v7828_v36  ;;  %v7829_v5 = vmov 0.0  }
 0x216   : > { %2866 = vst.msk [vmem:[#allocation3 + $0x20] sm:$0xff] %vm2861_vm0, %v7828_v36  ;;  %2867 = vst.msk [vmem:[#allocation3 + $0x28] sm:$0xff] %vm2861_vm0, %v7828_v36 }
 0x217   : > { %v8373_v7 = vadd.f32 %v6412_v41, %v2341_v8  ;;  %v6349_v43 = vpop.f32.mrb[56].mxu0  ;;  %2868 = vst.msk [vmem:[#allocation3 + $0x30] sm:$0xff] %vm2861_vm0, %v7828_v36  ;;  %2869 = vst.msk [vmem:[#allocation3 + $0x38] sm:$0xff] %vm2861_vm0, %v7828_v36 }
 0x218   : > { %v6413_v44 = vpop.f32.mrb[56].mxu1  ;;  %v6350_v45 = vpop.f32.mrb[57].mxu0  ;;  %2870 = vst.msk [vmem:[#allocation3 + $0x40] sm:$0xff] %vm2861_vm0, %v7828_v36  ;;  %2871 = vst.msk [vmem:[#allocation3 + $0x48] sm:$0xff] %vm2861_vm0, %v7828_v36 }
 0x219   : > { %v6351_v9 = vadd.f32 %v6350_v45, %v6349_v43  ;;  %v6414_v48 = vpop.f32.mrb[57].mxu1  ;;  %v6352_v50 = vpop.f32.mrb[58].mxu0  ;;  %2872 = vst.msk [vmem:[#allocation3 + $0x50] sm:$0xff] %vm2861_vm0, %v7828_v36  ;;  %2873 = vst.msk [vmem:[#allocation3 + $0x58] sm:$0xff] %vm2861_vm0, %v7828_v36 }
 0x21a   : > { %v6415_v52 = vadd.f32 %v6414_v48, %v6413_v44  ;;  %v6416_v56 = vpop.f32.mrb[58].mxu1  ;;  %v6353_v58 = vpop.f32.mrb[59].mxu0  ;;  %2874 = vst.msk [vmem:[#allocation3 + $0x60] sm:$0xff] %vm2861_vm0, %v7828_v36  ;;  %2875 = vst.msk [vmem:[#allocation3 + $0x68] sm:$0xff] %vm2861_vm0, %v7828_v36 }
 0x21b   : > { %v2346_v21 = vadd.f32 %v6351_v9, %v8331_v37  ;;  %v6354_v59 = vadd.f32 %v6353_v58, %v6352_v50  ;;  %v6417_v60 = vpop.f32.mrb[59].mxu1  ;;  %2876 = vst.msk [vmem:[#allocation3 + $0x70] sm:$0xff] %vm2861_vm0, %v7828_v36  ;;  %2877 = vst.msk [vmem:[#allocation3 + $0x78] sm:$0xff] %vm2861_vm0, %v7828_v36 }
 0x21c   : > { %v6418_v61 = vadd.f32 %v6417_v60, %v6416_v56  ;;  %2878 = vst.msk [vmem:[#allocation4] sm:$0xff] %vm2861_vm0, %v7829_v5  ;;  %2879 = vst.msk [vmem:[#allocation4 + $0x8] sm:$0xff] %vm2861_vm0, %v7829_v5 }
 0x21d   : > { %v8376_v62 = vadd.f32 %v6415_v52, %v2346_v21  ;;  %v2349_v23 = vadd.f32 %v6354_v59, %v8333_v39  ;;  %2880 = vst.msk [vmem:[#allocation4 + $0x10] sm:$0xff] %vm2861_vm0, %v7829_v5  ;;  %2881 = vst.msk [vmem:[#allocation4 + $0x18] sm:$0xff] %vm2861_vm0, %v7829_v5 }
 0x21e   : > { %2882 = vst.msk [vmem:[#allocation4 + $0x20] sm:$0xff] %vm2861_vm0, %v7829_v5  ;;  %2883 = vst.msk [vmem:[#allocation4 + $0x28] sm:$0xff] %vm2861_vm0, %v7829_v5 }
 0x21f   : > { %v8379_v29 = vadd.f32 %v6418_v61, %v2349_v23  ;;  %v6355_v63 = vpop.f32.mrb[60].mxu0  ;;  %2884 = vst.msk [vmem:[#allocation4 + $0x30] sm:$0xff] %vm2861_vm0, %v7829_v5  ;;  %2885 = vst.msk [vmem:[#allocation4 + $0x38] sm:$0xff] %vm2861_vm0, %v7829_v5 }
 0x220   : > { %v6419_v0 = vpop.f32.mrb[60].mxu1  ;;  %v6356_v1 = vpop.f32.mrb[61].mxu0  ;;  %2886 = vst.msk [vmem:[#allocation4 + $0x40] sm:$0xff] %vm2861_vm0, %v7829_v5  ;;  %2887 = vst.msk [vmem:[#allocation4 + $0x48] sm:$0xff] %vm2861_vm0, %v7829_v5 }
 0x221   : > { %v6357_v31 = vadd.f32 %v6356_v1, %v6355_v63  ;;  %v6420_v4 = vpop.f32.mrb[61].mxu1  ;;  %v6358_v6 = vpop.f32.mrb[62].mxu0  ;;  %2888 = vst.msk [vmem:[#allocation4 + $0x50] sm:$0xff] %vm2861_vm0, %v7829_v5  ;;  %2889 = vst.msk [vmem:[#allocation4 + $0x58] sm:$0xff] %vm2861_vm0, %v7829_v5 }
 0x222   : > { %v6421_v10 = vadd.f32 %v6420_v4, %v6419_v0  ;;  %v6422_v12 = vpop.f32.mrb[62].mxu1  ;;  %v6359_v14 = vpop.f32.mrb[63].mxu0  ;;  %2890 = vst.msk [vmem:[#allocation4 + $0x60] sm:$0xff] %vm2861_vm0, %v7829_v5  ;;  %2891 = vst.msk [vmem:[#allocation4 + $0x68] sm:$0xff] %vm2861_vm0, %v7829_v5 }
 0x223   : > { %v2354_v37 = vadd.f32 %v6357_v31, %v8335_v54  ;;  %v6360_v15 = vadd.f32 %v6359_v14, %v6358_v6  ;;  %v6423_v16 = vpop.f32.mrb[63].mxu1  ;;  %2892 = vst.msk [vmem:[#allocation4 + $0x70] sm:$0xff] %vm2861_vm0, %v7829_v5  ;;  %2893 = vst.msk [vmem:[#allocation4 + $0x78] sm:$0xff] %vm2861_vm0, %v7829_v5 }
 0x224   : > { %v6424_v17 = vadd.f32 %v6423_v16, %v6422_v12 }
 0x225   : > { %v8382_v18 = vadd.f32 %v6421_v10, %v2354_v37  ;;  %v2357_v39 = vadd.f32 %v6360_v15, %v8337_v57 }
 0x227   : > { %v8385_v53 = vadd.f32 %v6424_v17, %v2357_v39  ;;  %v6441_v19 = vpop.f32.mrb[64].mxu0 }
 0x228   : > { %v6505_v20 = vpop.f32.mrb[64].mxu1  ;;  %v6442_v22 = vpop.f32.mrb[65].mxu0 }
 0x229   : > { %v6443_v55 = vadd.f32 %v6442_v22, %v6441_v19  ;;  %v6506_v25 = vpop.f32.mrb[65].mxu1  ;;  %v6444_v26 = vpop.f32.mrb[66].mxu0 }
 0x22a   : > { %v6507_v27 = vadd.f32 %v6506_v25, %v6505_v20  ;;  %v6508_v51 = vpop.f32.mrb[66].mxu1  ;;  %v6445_v32 = vpop.f32.mrb[67].mxu0 }
 0x22b   : > { %v2492_v54 = vadd.f32 %v6443_v55, %v8340_v11  ;;  %v6446_v33 = vadd.f32 %v6445_v32, %v6444_v26  ;;  %v6509_v34 = vpop.f32.mrb[67].mxu1 }
 0x22c   : > { %v6510_v35 = vadd.f32 %v6509_v34, %v6508_v51 }
 0x22d   : > { %v8404_v57 = vadd.f32 %v6507_v27, %v2492_v54  ;;  %v2495_v11 = vadd.f32 %v6446_v33, %v8343_v13 }
 0x22f   : > { %v8423_v13 = vadd.f32 %v6510_v35, %v2495_v11  ;;  %v6447_v38 = vpop.f32.mrb[68].mxu0 }
 0x230   : > { %v6511_v40 = vpop.f32.mrb[68].mxu1  ;;  %v6448_v41 = vpop.f32.mrb[69].mxu0 }
 0x231   : > { %v6449_v8 = vadd.f32 %v6448_v41, %v6447_v38  ;;  %v6512_v43 = vpop.f32.mrb[69].mxu1  ;;  %v6450_v44 = vpop.f32.mrb[70].mxu0 }
 0x232   : > { %v6513_v45 = vadd.f32 %v6512_v43, %v6511_v40  ;;  %v6514_v9 = vpop.f32.mrb[70].mxu1  ;;  %v6451_v48 = vpop.f32.mrb[71].mxu0 }
 0x233   : > { %v2500_v50 = vadd.f32 %v6449_v8, %v8346_v28  ;;  %v6452_v52 = vadd.f32 %v6451_v48, %v6450_v44  ;;  %v6515_v56 = vpop.f32.mrb[71].mxu1 }
 0x234   : > { %v6516_v58 = vadd.f32 %v6515_v56, %v6514_v9 }
 0x235   : > { %v8426_v21 = vadd.f32 %v6513_v45, %v2500_v50  ;;  %v2503_v59 = vadd.f32 %v6452_v52, %v8349_v30 }
 0x237   : > { %v8429_v60 = vadd.f32 %v6516_v58, %v2503_v59  ;;  %v6453_v61 = vpop.f32.mrb[72].mxu0 }
 0x238   : > { %v6517_v23 = vpop.f32.mrb[72].mxu1  ;;  %v6454_v63 = vpop.f32.mrb[73].mxu0 }
 0x239   : > { %v6455_v0 = vadd.f32 %v6454_v63, %v6453_v61  ;;  %v6518_v1 = vpop.f32.mrb[73].mxu1  ;;  %v6456_v31 = vpop.f32.mrb[74].mxu0 }
 0x23a   : > { %v6519_v4 = vadd.f32 %v6518_v1, %v6517_v23  ;;  %v6520_v6 = vpop.f32.mrb[74].mxu1  ;;  %v6457_v10 = vpop.f32.mrb[75].mxu0 }
 0x23b   : > { %v2508_v28 = vadd.f32 %v6455_v0, %v8352_v46  ;;  %v6458_v12 = vadd.f32 %v6457_v10, %v6456_v31  ;;  %v6521_v14 = vpop.f32.mrb[75].mxu1 }
 0x23c   : > { %v6522_v37 = vadd.f32 %v6521_v14, %v6520_v6 }
 0x23d   : > { %v8432_v15 = vadd.f32 %v6519_v4, %v2508_v28  ;;  %v2511_v30 = vadd.f32 %v6458_v12, %v8355_v47 }
 0x23f   : > { %v8435_v16 = vadd.f32 %v6522_v37, %v2511_v30  ;;  %v6459_v17 = vpop.f32.mrb[76].mxu0 }
 0x240   : > { %v6523_v39 = vpop.f32.mrb[76].mxu1  ;;  %v6460_v19 = vpop.f32.mrb[77].mxu0 }
 0x241   : > { %v6461_v20 = vadd.f32 %v6460_v19, %v6459_v17  ;;  %v6524_v22 = vpop.f32.mrb[77].mxu1  ;;  %v6462_v55 = vpop.f32.mrb[78].mxu0 }
 0x242   : > { %v6525_v25 = vadd.f32 %v6524_v22, %v6523_v39  ;;  %v6526_v26 = vpop.f32.mrb[78].mxu1  ;;  %v6463_v27 = vpop.f32.mrb[79].mxu0 }
 0x243   : > { %v2516_v46 = vadd.f32 %v6461_v20, %v8358_v2  ;;  %v6464_v51 = vadd.f32 %v6463_v27, %v6462_v55  ;;  %v6527_v32 = vpop.f32.mrb[79].mxu1 }
 0x244   : > { %v6528_v54 = vadd.f32 %v6527_v32, %v6526_v26 }
 0x245   : > { %v8438_v33 = vadd.f32 %v6525_v25, %v2516_v46  ;;  %v2519_v47 = vadd.f32 %v6464_v51, %v8361_v3 }
 0x247   : > { %v8441_v34 = vadd.f32 %v6528_v54, %v2519_v47  ;;  %v6465_v35 = vpop.f32.mrb[80].mxu0 }
 0x248   : > { %v6529_v36 = vpop.f32.mrb[80].mxu1  ;;  %v6466_v11 = vpop.f32.mrb[81].mxu0 }
 0x249   : > { %v6467_v5 = vadd.f32 %v6466_v11, %v6465_v35  ;;  %v6530_v38 = vpop.f32.mrb[81].mxu1  ;;  %v6468_v40 = vpop.f32.mrb[82].mxu0 }
 0x24a   : > { %v6531_v41 = vadd.f32 %v6530_v38, %v6529_v36  ;;  %v6532_v8 = vpop.f32.mrb[82].mxu1  ;;  %v6469_v43 = vpop.f32.mrb[83].mxu0 }
 0x24b   : > { %v2524_v2 = vadd.f32 %v6467_v5, %v8364_v24  ;;  %v6470_v44 = vadd.f32 %v6469_v43, %v6468_v40  ;;  %v6533_v45 = vpop.f32.mrb[83].mxu1 }
 0x24c   : > { %v6534_v9 = vadd.f32 %v6533_v45, %v6532_v8 }
 0x24d   : > { %v8444_v48 = vadd.f32 %v6531_v41, %v2524_v2  ;;  %v2527_v3 = vadd.f32 %v6470_v44, %v8367_v49 }
 0x24f   : > { %v8447_v50 = vadd.f32 %v6534_v9, %v2527_v3  ;;  %v6471_v52 = vpop.f32.mrb[84].mxu0 }
 0x250   : > { %v6535_v56 = vpop.f32.mrb[84].mxu1  ;;  %v6472_v58 = vpop.f32.mrb[85].mxu0 }
 0x251   : > { %v6473_v59 = vadd.f32 %v6472_v58, %v6471_v52  ;;  %v6536_v61 = vpop.f32.mrb[85].mxu1  ;;  %v6474_v23 = vpop.f32.mrb[86].mxu0 }
 0x252   : > { %v6537_v63 = vadd.f32 %v6536_v61, %v6535_v56  ;;  %v6538_v0 = vpop.f32.mrb[86].mxu1  ;;  %v6475_v1 = vpop.f32.mrb[87].mxu0 }
 0x253   : > { %v2532_v24 = vadd.f32 %v6473_v59, %v8370_v42  ;;  %v6476_v31 = vadd.f32 %v6475_v1, %v6474_v23  ;;  %v6539_v4 = vpop.f32.mrb[87].mxu1 }
 0x254   : > { %v6540_v6 = vadd.f32 %v6539_v4, %v6538_v0 }
 0x255   : > { %v8450_v10 = vadd.f32 %v6537_v63, %v2532_v24  ;;  %v2535_v49 = vadd.f32 %v6476_v31, %v8373_v7 }
 0x257   : > { %v8453_v28 = vadd.f32 %v6540_v6, %v2535_v49  ;;  %v6477_v12 = vpop.f32.mrb[88].mxu0 }
 0x258   : > { %v6541_v14 = vpop.f32.mrb[88].mxu1  ;;  %v6478_v37 = vpop.f32.mrb[89].mxu0 }
 0x259   : > { %v6479_v30 = vadd.f32 %v6478_v37, %v6477_v12  ;;  %v6542_v17 = vpop.f32.mrb[89].mxu1  ;;  %v6480_v39 = vpop.f32.mrb[90].mxu0 }
 0x25a   : > { %v6543_v19 = vadd.f32 %v6542_v17, %v6541_v14  ;;  %v6544_v20 = vpop.f32.mrb[90].mxu1  ;;  %v6481_v22 = vpop.f32.mrb[91].mxu0 }
 0x25b   : > { %v2540_v42 = vadd.f32 %v6479_v30, %v8376_v62  ;;  %v6482_v55 = vadd.f32 %v6481_v22, %v6480_v39  ;;  %v6545_v25 = vpop.f32.mrb[91].mxu1 }
 0x25c   : > { %v6546_v26 = vadd.f32 %v6545_v25, %v6544_v20 }
 0x25d   : > { %v8456_v27 = vadd.f32 %v6543_v19, %v2540_v42  ;;  %v2543_v7 = vadd.f32 %v6482_v55, %v8379_v29 }
 0x25f   : > { %v8459_v46 = vadd.f32 %v6546_v26, %v2543_v7  ;;  %v6483_v51 = vpop.f32.mrb[92].mxu0 }
 0x260   : > { %v6547_v32 = vpop.f32.mrb[92].mxu1  ;;  %v6484_v54 = vpop.f32.mrb[93].mxu0 }
 0x261   : > { %v6485_v47 = vadd.f32 %v6484_v54, %v6483_v51  ;;  %v6548_v35 = vpop.f32.mrb[93].mxu1  ;;  %v6486_v36 = vpop.f32.mrb[94].mxu0 }
 0x262   : > { %v6549_v11 = vadd.f32 %v6548_v35, %v6547_v32  ;;  %v6550_v5 = vpop.f32.mrb[94].mxu1  ;;  %v6487_v38 = vpop.f32.mrb[95].mxu0 }
 0x263   : > { %v2548_v62 = vadd.f32 %v6485_v47, %v8382_v18  ;;  %v6488_v40 = vadd.f32 %v6487_v38, %v6486_v36  ;;  %v6551_v41 = vpop.f32.mrb[95].mxu1 }
 0x264   : > { %v6552_v8 = vadd.f32 %v6551_v41, %v6550_v5 }
 0x265   : > { %v8462_v43 = vadd.f32 %v6549_v11, %v2548_v62  ;;  %v2551_v29 = vadd.f32 %v6488_v40, %v8385_v53 }
 0x267   : > { %v8465_v2 = vadd.f32 %v6552_v8, %v2551_v29  ;;  %v6569_v44 = vpop.f32.mrb[96].mxu0 }
 0x268   : > { %v6633_v45 = vpop.f32.mrb[96].mxu1  ;;  %v6570_v9 = vpop.f32.mrb[97].mxu0 }
 0x269   : > { %v6571_v3 = vadd.f32 %v6570_v9, %v6569_v44  ;;  %v6634_v52 = vpop.f32.mrb[97].mxu1  ;;  %v6572_v56 = vpop.f32.mrb[98].mxu0 }
 0x26a   : > { %v6635_v58 = vadd.f32 %v6634_v52, %v6633_v45  ;;  %v6636_v59 = vpop.f32.mrb[98].mxu1  ;;  %v6573_v61 = vpop.f32.mrb[99].mxu0 }
 0x26b   : > { %v2686_v18 = vadd.f32 %v6571_v3, %v8404_v57  ;;  %v6574_v23 = vadd.f32 %v6573_v61, %v6572_v56  ;;  %v6637_v63 = vpop.f32.mrb[99].mxu1 }
 0x26c   : > { %v6638_v0 = vadd.f32 %v6637_v63, %v6636_v59 }
 0x26d   : > { %v2783_v1 = vadd.f32 %v6635_v58, %v2686_v18  ;;  %v2689_v24 = vadd.f32 %v6574_v23, %v8423_v13 }
 0x26f   : > { %v2786_v53 = vadd.f32 %v6638_v0, %v2689_v24  ;;  %v6575_v31 = vpop.f32.mrb[100].mxu0 }
 0x270   : > { %v6639_v4 = vpop.f32.mrb[100].mxu1  ;;  %v6576_v6 = vpop.f32.mrb[101].mxu0 }
 0x271   : > { %v2845_v49 = vpack.c.bf16 %v2786_v53, %v2783_v1  ;;  %v6577_v12 = vadd.f32 %v6576_v6, %v6575_v31  ;;  %v6640_v14 = vpop.f32.mrb[101].mxu1  ;;  %v6578_v37 = vpop.f32.mrb[102].mxu0 }
 0x272   : > { %v6641_v30 = vadd.f32 %v6640_v14, %v6639_v4  ;;  %v6642_v17 = vpop.f32.mrb[102].mxu1  ;;  %v6579_v39 = vpop.f32.mrb[103].mxu0 }
 0x273   : > { %2853 = vst [vmem:[#allocation2] sm:$0xff] %v2845_v49  ;;  %v2694_v57 = vadd.f32 %v6577_v12, %v8426_v21  ;;  %v6580_v19 = vadd.f32 %v6579_v39, %v6578_v37  ;;  %v6643_v20 = vpop.f32.mrb[103].mxu1 }
 0x274   : > { %v6644_v22 = vadd.f32 %v6643_v20, %v6642_v17 }
 0x275   : > { %v2791_v42 = vadd.f32 %v6641_v30, %v2694_v57  ;;  %v2697_v13 = vadd.f32 %v6580_v19, %v8429_v60 }
 0x277   : > { %v2794_v55 = vadd.f32 %v6644_v22, %v2697_v13  ;;  %v6581_v25 = vpop.f32.mrb[104].mxu0 }
 0x278   : > { %v6645_v26 = vpop.f32.mrb[104].mxu1  ;;  %v6582_v7 = vpop.f32.mrb[105].mxu0 }
 0x279   : > { %v2846_v51 = vpack.c.bf16 %v2794_v55, %v2791_v42  ;;  %v6583_v32 = vadd.f32 %v6582_v7, %v6581_v25  ;;  %v6646_v54 = vpop.f32.mrb[105].mxu1  ;;  %v6584_v47 = vpop.f32.mrb[106].mxu0 }
 0x27a   : > { %v6647_v35 = vadd.f32 %v6646_v54, %v6645_v26  ;;  %v6648_v36 = vpop.f32.mrb[106].mxu1  ;;  %v6585_v11 = vpop.f32.mrb[107].mxu0 }
 0x27b   : > { %2854 = vst [vmem:[#allocation2 + $0x8] sm:$0xff] %v2846_v51  ;;  %v2702_v21 = vadd.f32 %v6583_v32, %v8432_v15  ;;  %v6586_v5 = vadd.f32 %v6585_v11, %v6584_v47  ;;  %v6649_v38 = vpop.f32.mrb[107].mxu1 }
 0x27c   : > { %v6650_v62 = vadd.f32 %v6649_v38, %v6648_v36 }
 0x27d   : > { %v2799_v40 = vadd.f32 %v6647_v35, %v2702_v21  ;;  %v2705_v60 = vadd.f32 %v6586_v5, %v8435_v16 }
 0x27f   : > { %v2802_v41 = vadd.f32 %v6650_v62, %v2705_v60  ;;  %v6587_v8 = vpop.f32.mrb[108].mxu0 }
 0x280   : > { %v6651_v29 = vpop.f32.mrb[108].mxu1  ;;  %v6588_v44 = vpop.f32.mrb[109].mxu0 }
 0x281   : > { %v2847_v45 = vpack.c.bf16 %v2802_v41, %v2799_v40  ;;  %v6589_v9 = vadd.f32 %v6588_v44, %v6587_v8  ;;  %v6652_v3 = vpop.f32.mrb[109].mxu1  ;;  %v6590_v52 = vpop.f32.mrb[110].mxu0 }
 0x282   : > { %v6653_v56 = vadd.f32 %v6652_v3, %v6651_v29  ;;  %v6654_v58 = vpop.f32.mrb[110].mxu1  ;;  %v6591_v59 = vpop.f32.mrb[111].mxu0 }
 0x283   : > { %2855 = vst [vmem:[#allocation2 + $0x10] sm:$0xff] %v2847_v45  ;;  %v2710_v15 = vadd.f32 %v6589_v9, %v8438_v33  ;;  %v6592_v61 = vadd.f32 %v6591_v59, %v6590_v52  ;;  %v6655_v18 = vpop.f32.mrb[111].mxu1 }
 0x284   : > { %v6656_v23 = vadd.f32 %v6655_v18, %v6654_v58 }
 0x285   : > { %v2807_v63 = vadd.f32 %v6653_v56, %v2710_v15  ;;  %v2713_v16 = vadd.f32 %v6592_v61, %v8441_v34 }
 0x287   : > { %v2810_v0 = vadd.f32 %v6656_v23, %v2713_v16  ;;  %v6593_v1 = vpop.f32.mrb[112].mxu0 }
 0x288   : > { %v6657_v24 = vpop.f32.mrb[112].mxu1  ;;  %v6594_v53 = vpop.f32.mrb[113].mxu0 }
 0x289   : > { %v2848_v31 = vpack.c.bf16 %v2810_v0, %v2807_v63  ;;  %v6595_v4 = vadd.f32 %v6594_v53, %v6593_v1  ;;  %v6658_v6 = vpop.f32.mrb[113].mxu1  ;;  %v6596_v49 = vpop.f32.mrb[114].mxu0 }
 0x28a   : > { %v6659_v12 = vadd.f32 %v6658_v6, %v6657_v24  ;;  %v6660_v14 = vpop.f32.mrb[114].mxu1  ;;  %v6597_v37 = vpop.f32.mrb[115].mxu0 }
 0x28b   : > { %2856 = vst [vmem:[#allocation2 + $0x18] sm:$0xff] %v2848_v31  ;;  %v2718_v33 = vadd.f32 %v6595_v4, %v8444_v48  ;;  %v6598_v30 = vadd.f32 %v6597_v37, %v6596_v49  ;;  %v6661_v17 = vpop.f32.mrb[115].mxu1 }
 0x28c   : > { %v6662_v39 = vadd.f32 %v6661_v17, %v6660_v14 }
 0x28d   : > { %v2815_v57 = vadd.f32 %v6659_v12, %v2718_v33  ;;  %v2721_v34 = vadd.f32 %v6598_v30, %v8447_v50 }
 0x28f   : > { %v2818_v19 = vadd.f32 %v6662_v39, %v2721_v34  ;;  %v6599_v20 = vpop.f32.mrb[116].mxu0 }
 0x290   : > { %v6663_v22 = vpop.f32.mrb[116].mxu1  ;;  %v6600_v42 = vpop.f32.mrb[117].mxu0 }
 0x291   : > { %v2849_v13 = vpack.c.bf16 %v2818_v19, %v2815_v57  ;;  %v6601_v55 = vadd.f32 %v6600_v42, %v6599_v20  ;;  %v6664_v25 = vpop.f32.mrb[117].mxu1  ;;  %v6602_v26 = vpop.f32.mrb[118].mxu0 }
 0x292   : > { %v6665_v7 = vadd.f32 %v6664_v25, %v6663_v22  ;;  %v6666_v51 = vpop.f32.mrb[118].mxu1  ;;  %v6603_v32 = vpop.f32.mrb[119].mxu0 }
 0x293   : > { %2857 = vst [vmem:[#allocation2 + $0x20] sm:$0xff] %v2849_v13  ;;  %v2726_v48 = vadd.f32 %v6601_v55, %v8450_v10  ;;  %v6604_v54 = vadd.f32 %v6603_v32, %v6602_v26  ;;  %v6667_v47 = vpop.f32.mrb[119].mxu1 }
 0x294   : > { %v6668_v35 = vadd.f32 %v6667_v47, %v6666_v51 }
 0x295   : > { %v2823_v36 = vadd.f32 %v6665_v7, %v2726_v48  ;;  %v2729_v50 = vadd.f32 %v6604_v54, %v8453_v28 }
 0x297   : > { %v2826_v11 = vadd.f32 %v6668_v35, %v2729_v50  ;;  %v6605_v21 = vpop.f32.mrb[120].mxu0 }
 0x298   : > { %v6669_v5 = vpop.f32.mrb[120].mxu1  ;;  %v6606_v38 = vpop.f32.mrb[121].mxu0 }
 0x299   : > { %v2850_v62 = vpack.c.bf16 %v2826_v11, %v2823_v36  ;;  %v6607_v40 = vadd.f32 %v6606_v38, %v6605_v21  ;;  %v6670_v60 = vpop.f32.mrb[121].mxu1  ;;  %v6608_v41 = vpop.f32.mrb[122].mxu0 }
 0x29a   : > { %v6671_v8 = vadd.f32 %v6670_v60, %v6669_v5  ;;  %v6672_v29 = vpop.f32.mrb[122].mxu1  ;;  %v6609_v44 = vpop.f32.mrb[123].mxu0 }
 0x29b   : > { %2858 = vst [vmem:[#allocation2 + $0x28] sm:$0xff] %v2850_v62  ;;  %v2734_v10 = vadd.f32 %v6607_v40, %v8456_v27  ;;  %v6610_v45 = vadd.f32 %v6609_v44, %v6608_v41  ;;  %v6673_v9 = vpop.f32.mrb[123].mxu1 }
 0x29c   : > { %v6674_v3 = vadd.f32 %v6673_v9, %v6672_v29 }
 0x29d   : > { %v2831_v52 = vadd.f32 %v6671_v8, %v2734_v10  ;;  %v2737_v28 = vadd.f32 %v6610_v45, %v8459_v46 }
 0x29f   : > { %v2834_v56 = vadd.f32 %v6674_v3, %v2737_v28  ;;  %v6611_v58 = vpop.f32.mrb[124].mxu0 }
 0x2a0   : > { %v6675_v59 = vpop.f32.mrb[124].mxu1  ;;  %v6612_v15 = vpop.f32.mrb[125].mxu0 }
 0x2a1   : > { %v2851_v61 = vpack.c.bf16 %v2834_v56, %v2831_v52  ;;  %v6613_v18 = vadd.f32 %v6612_v15, %v6611_v58  ;;  %v6676_v23 = vpop.f32.mrb[125].mxu1  ;;  %v6614_v63 = vpop.f32.mrb[126].mxu0 }
 0x2a2   : > { %v6677_v16 = vadd.f32 %v6676_v23, %v6675_v59  ;;  %v6678_v0 = vpop.f32.mrb[126].mxu1  ;;  %v6615_v1 = vpop.f32.mrb[127].mxu0 }
 0x2a3   : > { %2859 = vst [vmem:[#allocation2 + $0x30] sm:$0xff] %v2851_v61  ;;  %v2742_v27 = vadd.f32 %v6613_v18, %v8462_v43  ;;  %v6616_v24 = vadd.f32 %v6615_v1, %v6614_v63  ;;  %v6679_v53 = vpop.f32.mrb[127].mxu1 }
 0x2a4   : > { %v6680_v31 = vadd.f32 %v6679_v53, %v6678_v0 }
 0x2a5   : > { %v2839_v4 = vadd.f32 %v6677_v16, %v2742_v27  ;;  %v2745_v46 = vadd.f32 %v6616_v24, %v8465_v2 }
 0x2a7   : > { %v2842_v6 = vadd.f32 %v6680_v31, %v2745_v46 }
 0x2a9   : > { %v2852_v49 = vpack.c.bf16 %v2842_v6, %v2839_v4 }
 0x2ab   : > { %2860 = vst [vmem:[#allocation2 + $0x38] sm:$0xff] %v2852_v49 }
 0x2ac PF: > { %v2902_v12 = vld [vmem:[%s8166_s23] sm:$0xff]  ;;  %v2903_v14 = vld [vmem:[%s8166_s23 + $0x8] sm:$0xff]  ;;  %v7830_v39 = vmov 0   ;;  %v2904_v49 = vld [vmem:[%s8166_s23 + $0x10] sm:$0xff]  ;;  %s11599_s18 = sld [smem:[#allocation19_spill]] }
 0x2ad   : > { %v2906_v43 = vld [vmem:[%s8166_s23 + $0x20] sm:$0xff]  ;;  %v2907_v33 = vld [vmem:[%s8166_s23 + $0x28] sm:$0xff]  ;;  %3318 = vmatprep.mubr.bf16.mxu0 %v7830_v39  ;;  %3431 = vmatprep.mubr.bf16.mxu1 %v7830_v39 }
 0x2ae   : > { %v6092_v37 = vcombine.high %v2902_v12, %v2906_v43  ;;  %v6091_v2 = vcombine.low %v2902_v12, %v2906_v43  ;;  %v2910_v30 = vld [vmem:[%s8166_s23 + $0x40] sm:$0xff]  ;;  %v6094_v57 = vcombine.high %v2903_v14, %v2907_v33  ;;  %v6093_v34 = vcombine.low %v2903_v14, %v2907_v33  ;;  %v2911_v20 = vld [vmem:[%s8166_s23 + $0x48] sm:$0xff]  ;;  %v2908_v12 = vld [vmem:[%s8166_s23 + $0x30] sm:$0xff] }
 0x2af   : > { %v2914_v17 = vld [vmem:[%s8166_s23 + $0x60] sm:$0xff]  ;;  %v2915_v22 = vld [vmem:[%s8166_s23 + $0x68] sm:$0xff]  ;;  %v2905_v43 = vld [vmem:[%s8166_s23 + $0x18] sm:$0xff] }
 0x2b0   : > { %v6100_v19 = vcombine.high %v2910_v30, %v2914_v17  ;;  %v2918_v42 = vld [vmem:[%s8166_s23 + $0x80] sm:$0xff]  ;;  %3286 = vmatprep.subr.bf16.mxu0 %v6092_v37  ;;  %v6102_v13 = vcombine.high %v2911_v20, %v2915_v22  ;;  %v2919_v25 = vld [vmem:[%s8166_s23 + $0x88] sm:$0xff]  ;;  %3399 = vmatprep.subr.bf16.mxu1 %v6094_v57  ;;  %v6099_v7 = vcombine.low %v2910_v30, %v2914_v17  ;;  %v2909_v14 = vld [vmem:[%s8166_s23 + $0x38] sm:$0xff] }
 0x2b1   : > { %v2922_v55 = vld [vmem:[%s8166_s23 + $0xa0] sm:$0xff]  ;;  %v2923_v26 = vld [vmem:[%s8166_s23 + $0xa8] sm:$0xff]  ;;  %3287 = vmatpush1.bf16.msra.mxu0 %v6091_v2  ;;  %3400 = vmatpush1.bf16.msra.mxu1 %v6093_v34  ;;  %v6101_v51 = vcombine.low %v2911_v20, %v2915_v22  ;;  %v6096_v2 = vcombine.high %v2904_v49, %v2908_v12  ;;  %v6098_v30 = vcombine.high %v2905_v43, %v2909_v14  ;;  %v2912_v17 = vld [vmem:[%s8166_s23 + $0x50] sm:$0xff] }
 0x2b2   : > { %3288 = vmatprep.subr.bf16.mxu0 %v6100_v19  ;;  %v6108_v32 = vcombine.high %v2918_v42, %v2922_v55  ;;  %3401 = vmatprep.subr.bf16.mxu1 %v6102_v13  ;;  %v6110_v48 = vcombine.high %v2919_v25, %v2923_v26  ;;  %v2926_v54 = vld [vmem:[%s8166_s23 + $0xc0] sm:$0xff]  ;;  %v2927_v35 = vld [vmem:[%s8166_s23 + $0xc8] sm:$0xff]  ;;  %v6107_v50 = vcombine.low %v2918_v42, %v2922_v55  ;;  %v2916_v57 = vld [vmem:[%s8166_s23 + $0x70] sm:$0xff]  ;;  %p6155_p0 = scmp.ne.s32.totalorder %s11599_s18, 0 }
 0x2b3   : > { %v2930_v47 = vld [vmem:[%s8166_s23 + $0xe0] sm:$0xff]  ;;  %v2931_v36 = vld [vmem:[%s8166_s23 + $0xe8] sm:$0xff]  ;;  %v6109_v11 = vcombine.low %v2919_v25, %v2923_v26  ;;  %v6095_v19 = vcombine.low %v2904_v49, %v2908_v12  ;;  %v2913_v20 = vld [vmem:[%s8166_s23 + $0x58] sm:$0xff]  ;;  %v6097_v42 = vcombine.low %v2905_v43, %v2909_v14  ;;  %v6104_v13 = vcombine.high %v2912_v17, %v2916_v57 }
 0x2b4   : > { %v6116_v21 = vcombine.high %v2926_v54, %v2930_v47  ;;  %v6118_v5 = vcombine.high %v2927_v35, %v2931_v36  ;;  %v2934_v38 = vld [vmem:[%s8166_s23 + $0x100] sm:$0xff]  ;;  %v2935_v40 = vld [vmem:[%s8166_s23 + $0x108] sm:$0xff]  ;;  %v6115_v41 = vcombine.low %v2926_v54, %v2930_v47  ;;  %v6117_v8 = vcombine.low %v2927_v35, %v2931_v36  ;;  %v2917_v22 = vld [vmem:[%s8166_s23 + $0x78] sm:$0xff] }
 0x2b5   : > { %3289 = vmatpush1.bf16.msra.mxu0 %v6099_v7  ;;  %3402 = vmatpush1.bf16.msra.mxu1 %v6101_v51  ;;  %v2938_v62 = vld [vmem:[%s8166_s23 + $0x120] sm:$0xff]  ;;  %v2939_v60 = vld [vmem:[%s8166_s23 + $0x128] sm:$0xff]  ;;  %v2920_v55 = vld [vmem:[%s8166_s23 + $0x90] sm:$0xff]  ;;  %v6106_v26 = vcombine.high %v2913_v20, %v2917_v22 }
 0x2b6   : > { %3290 = vmatprep.subr.bf16.mxu0 %v6108_v32  ;;  %3403 = vmatprep.subr.bf16.mxu1 %v6110_v48  ;;  %v6124_v29 = vcombine.high %v2934_v38, %v2938_v62  ;;  %v6126_v44 = vcombine.high %v2935_v40, %v2939_v60  ;;  %v2942_v10 = vld [vmem:[%s8166_s23 + $0x140] sm:$0xff]  ;;  %v2943_v9 = vld [vmem:[%s8166_s23 + $0x148] sm:$0xff]  ;;  %v6123_v52 = vcombine.low %v2934_v38, %v2938_v62  ;;  %v2924_v25 = vld [vmem:[%s8166_s23 + $0xb0] sm:$0xff] }
 0x2b7   : > { %v2946_v45 = vld [vmem:[%s8166_s23 + $0x160] sm:$0xff]  ;;  %v2947_v3 = vld [vmem:[%s8166_s23 + $0x168] sm:$0xff]  ;;  %v6125_v28 = vcombine.low %v2935_v40, %v2939_v60  ;;  %v2921_v7 = vld [vmem:[%s8166_s23 + $0x98] sm:$0xff]  ;;  %v6103_v32 = vcombine.low %v2912_v17, %v2916_v57  ;;  %v6105_v48 = vcombine.low %v2913_v20, %v2917_v22  ;;  %v6112_v54 = vcombine.high %v2920_v55, %v2924_v25 }
 0x2b8   : > { %v6132_v56 = vcombine.high %v2942_v10, %v2946_v45  ;;  %v6134_v58 = vcombine.high %v2943_v9, %v2947_v3  ;;  %v2950_v59 = vld [vmem:[%s8166_s23 + $0x180] sm:$0xff]  ;;  %v2951_v61 = vld [vmem:[%s8166_s23 + $0x188] sm:$0xff]  ;;  %v6131_v23 = vcombine.low %v2942_v10, %v2946_v45  ;;  %v6133_v63 = vcombine.low %v2943_v9, %v2947_v3  ;;  %v2925_v51 = vld [vmem:[%s8166_s23 + $0xb8] sm:$0xff] }
 0x2b9   : > { %3291 = vmatpush1.bf16.msra.mxu0 %v6107_v50  ;;  %3404 = vmatpush1.bf16.msra.mxu1 %v6109_v11  ;;  %v2954_v15 = vld [vmem:[%s8166_s23 + $0x1a0] sm:$0xff]  ;;  %v2955_v18 = vld [vmem:[%s8166_s23 + $0x1a8] sm:$0xff]  ;;  %v6114_v47 = vcombine.high %v2921_v7, %v2925_v51  ;;  %v2928_v35 = vld [vmem:[%s8166_s23 + $0xd0] sm:$0xff]  ;;  %v6113_v38 = vcombine.low %v2921_v7, %v2925_v51 }
 0x2ba   : > { %3292 = vmatprep.subr.bf16.mxu0 %v6116_v21  ;;  %3405 = vmatprep.subr.bf16.mxu1 %v6118_v5  ;;  %v6140_v16 = vcombine.high %v2950_v59, %v2954_v15  ;;  %v6142_v0 = vcombine.high %v2951_v61, %v2955_v18  ;;  %v2958_v1 = vld [vmem:[%s8166_s23 + $0x1c0] sm:$0xff]  ;;  %v2959_v24 = vld [vmem:[%s8166_s23 + $0x1c8] sm:$0xff]  ;;  %v6139_v31 = vcombine.low %v2950_v59, %v2954_v15  ;;  %v2932_v36 = vld [vmem:[%s8166_s23 + $0xf0] sm:$0xff] }
 0x2bb   : > { %v2962_v27 = vld [vmem:[%s8166_s23 + $0x1e0] sm:$0xff]  ;;  %v2963_v53 = vld [vmem:[%s8166_s23 + $0x1e8] sm:$0xff]  ;;  %v6141_v4 = vcombine.low %v2951_v61, %v2955_v18  ;;  %v2929_v11 = vld [vmem:[%s8166_s23 + $0xd8] sm:$0xff]  ;;  %v6111_v5 = vcombine.low %v2920_v55, %v2924_v25  ;;  %v6120_v62 = vcombine.high %v2928_v35, %v2932_v36 }
 0x2bc   : > { %v6148_v46 = vcombine.high %v2958_v1, %v2962_v27  ;;  %v6150_v6 = vcombine.high %v2959_v24, %v2963_v53  ;;  %v6147_v37 = vcombine.low %v2958_v1, %v2962_v27  ;;  %v6149_v33 = vcombine.low %v2959_v24, %v2963_v53  ;;  %v8523_v34 = vld [vmem:[#allocation2] sm:$0xff]  ;;  %v8537_v50 = vld [vmem:[#allocation2 + $0x8] sm:$0xff]  ;;  %v2933_v21 = vld [vmem:[%s8166_s23 + $0xf8] sm:$0xff] }
 0x2bd   : > { %3293 = vmatpush1.bf16.msra.mxu0 %v6115_v41  ;;  %3406 = vmatpush1.bf16.msra.mxu1 %v6117_v8  ;;  %v6122_v40 = vcombine.high %v2929_v11, %v2933_v21  ;;  %v2936_v60 = vld [vmem:[%s8166_s23 + $0x110] sm:$0xff]  ;;  %v2937_v8 = vld [vmem:[%s8166_s23 + $0x118] sm:$0xff]  ;;  %v6121_v10 = vcombine.low %v2929_v11, %v2933_v21  ;;  %v2899_v17 = vld [vmem:[#allocation2 + $0x28] sm:$0xff] }
 0x2be   : > { %3294 = vmatprep.subr.bf16.mxu0 %v6124_v29  ;;  %3407 = vmatprep.subr.bf16.mxu1 %v6126_v44  ;;  %v2940_v41 = vld [vmem:[%s8166_s23 + $0x130] sm:$0xff]  ;;  %v2941_v29 = vld [vmem:[%s8166_s23 + $0x138] sm:$0xff]  ;;  %v6119_v44 = vcombine.low %v2928_v35, %v2932_v36 }
 0x2bf   : > { %v6128_v45 = vcombine.high %v2936_v60, %v2940_v41  ;;  %v6130_v9 = vcombine.high %v2937_v8, %v2941_v29  ;;  %v2944_v3 = vld [vmem:[%s8166_s23 + $0x150] sm:$0xff]  ;;  %v6127_v59 = vcombine.low %v2936_v60, %v2940_v41  ;;  %v6129_v15 = vcombine.low %v2937_v8, %v2941_v29  ;;  %v2965_v49 = vld [vmem:[%s8166_s23 + $0x1f8] sm:$0xff] }
 0x2c0   : > { %v2900_v57 = vld [vmem:[#allocation2 + $0x30] sm:$0xff] }
 0x2c1   : > { %3295 = vmatpush1.bf16.msra.mxu0 %v6123_v52  ;;  %3408 = vmatpush1.bf16.msra.mxu1 %v6125_v28  ;;  %v2948_v52 = vld [vmem:[%s8166_s23 + $0x170] sm:$0xff] }
 0x2c2   : > { %3296 = vmatprep.subr.bf16.mxu0 %v6132_v56  ;;  %3409 = vmatprep.subr.bf16.mxu1 %v6134_v58  ;;  %v8551_v28 = vld [vmem:[#allocation2 + $0x10] sm:$0xff]  ;;  %v2945_v56 = vld [vmem:[%s8166_s23 + $0x158] sm:$0xff]  ;;  %v6136_v61 = vcombine.high %v2944_v3, %v2948_v52  ;;  %v6135_v1 = vcombine.low %v2944_v3, %v2948_v52 }
 0x2c3   : > { %v2949_v58 = vld [vmem:[%s8166_s23 + $0x178] sm:$0xff] }
 0x2c4   : > { %v6138_v18 = vcombine.high %v2945_v56, %v2949_v58  ;;  %v6137_v27 = vcombine.low %v2945_v56, %v2949_v58 }
 0x2c5   : > { %3297 = vmatpush1.bf16.msra.mxu0 %v6131_v23  ;;  %3410 = vmatpush1.bf16.msra.mxu1 %v6133_v63  ;;  %v2952_v23 = vld [vmem:[%s8166_s23 + $0x190] sm:$0xff] }
 0x2c6   : > { %3298 = vmatprep.subr.bf16.mxu0 %v6140_v16  ;;  %3411 = vmatprep.subr.bf16.mxu1 %v6142_v0  ;;  %v2956_v63 = vld [vmem:[%s8166_s23 + $0x1b0] sm:$0xff]  ;;  %v2953_v16 = vld [vmem:[%s8166_s23 + $0x198] sm:$0xff] }
 0x2c7   : > { %v2957_v0 = vld [vmem:[%s8166_s23 + $0x1b8] sm:$0xff]  ;;  %v6144_v24 = vcombine.high %v2952_v23, %v2956_v63  ;;  %v6143_v12 = vcombine.low %v2952_v23, %v2956_v63 }
 0x2c8   : > { %v6146_v53 = vcombine.high %v2953_v16, %v2957_v0  ;;  %v6145_v43 = vcombine.low %v2953_v16, %v2957_v0 }
 0x2c9   : > { %3299 = vmatpush1.bf16.msra.mxu0 %v6139_v31  ;;  %3412 = vmatpush1.bf16.msra.mxu1 %v6141_v4  ;;  %v2960_v31 = vld [vmem:[%s8166_s23 + $0x1d0] sm:$0xff] }
 0x2ca   : > { %3300 = vmatprep.subr.bf16.mxu0 %v6148_v46  ;;  %3413 = vmatprep.subr.bf16.mxu1 %v6150_v6  ;;  %v2964_v4 = vld [vmem:[%s8166_s23 + $0x1f0] sm:$0xff]  ;;  %v2897_v46 = vld [vmem:[#allocation2 + $0x18] sm:$0xff] }
 0x2cb   : > { %v2961_v6 = vld [vmem:[%s8166_s23 + $0x1d8] sm:$0xff]  ;;  %v6152_v14 = vcombine.high %v2960_v31, %v2964_v4 }
 0x2cd   : > { %3301 = vmatpush1.bf16.msra.mxu0 %v6147_v37  ;;  %3414 = vmatpush1.bf16.msra.mxu1 %v6149_v33  ;;  %v6154_v37 = vcombine.high %v2961_v6, %v2965_v49  ;;  %v6151_v33 = vcombine.low %v2960_v31, %v2964_v4 }
 0x2ce   : > { %3512 = vmatprep.subr.bf16.mxu0 %v6096_v2  ;;  %3625 = vmatprep.subr.bf16.mxu1 %v6098_v30  ;;  %v6153_v2 = vcombine.low %v2961_v6, %v2965_v49  ;;  %v2898_v30 = vld [vmem:[#allocation2 + $0x20] sm:$0xff] }
 0x2d0   : > { %3319 = vmatmul.mubr.bf16.vlgmr.msra.gmra.mrb[0].mxu0 %v8523_v34  ;;  %3432 = vmatmul.mubr.bf16.vlgmr.msra.gmra.mrb[0].mxu1 %v8523_v34 }
 0x2d1   : > { %3513 = vmatpush1.bf16.msra.mxu0 %v6095_v19  ;;  %3626 = vmatpush1.bf16.msra.mxu1 %v6097_v42  ;;  %v2901_v19 = vld [vmem:[#allocation2 + $0x38] sm:$0xff] }
 0x2d2   : > { %3328 = vmatprep.mubr.bf16.mxu0 %v7830_v39  ;;  %3441 = vmatprep.mubr.bf16.mxu1 %v7830_v39 }
 0x2d3   : > { %3514 = vmatprep.subr.bf16.mxu0 %v6104_v13  ;;  %3627 = vmatprep.subr.bf16.mxu1 %v6106_v26 }
 0x2d5   : > { %3515 = vmatpush1.bf16.msra.mxu0 %v6103_v32  ;;  %3628 = vmatpush1.bf16.msra.mxu1 %v6105_v48 }
 0x2d6   : > { %3516 = vmatprep.subr.bf16.mxu0 %v6112_v54  ;;  %3629 = vmatprep.subr.bf16.mxu1 %v6114_v47 }
 0x2d8   : > { %3329 = vmatmul.mubr.bf16.gmra.mrb[4].mxu0 %v8537_v50  ;;  %3442 = vmatmul.mubr.bf16.gmra.mrb[4].mxu1 %v8537_v50 }
 0x2d9   : > { %3338 = vmatprep.mubr.bf16.mxu0 %v7830_v39  ;;  %3451 = vmatprep.mubr.bf16.mxu1 %v7830_v39 }
 0x2da   : > { %3517 = vmatpush1.bf16.msra.mxu0 %v6111_v5  ;;  %3630 = vmatpush1.bf16.msra.mxu1 %v6113_v38 }
 0x2db   : > { %3518 = vmatprep.subr.bf16.mxu0 %v6120_v62  ;;  %3631 = vmatprep.subr.bf16.mxu1 %v6122_v40 }
 0x2de   : > { %3519 = vmatpush1.bf16.msra.mxu0 %v6119_v44  ;;  %3632 = vmatpush1.bf16.msra.mxu1 %v6121_v10 }
 0x2df   : > { %3520 = vmatprep.subr.bf16.mxu0 %v6128_v45  ;;  %3633 = vmatprep.subr.bf16.mxu1 %v6130_v9 }
 0x2e0   : > { %3339 = vmatmul.mubr.bf16.gmra.mrb[8].mxu0 %v8551_v28  ;;  %3452 = vmatmul.mubr.bf16.gmra.mrb[8].mxu1 %v8551_v28 }
 0x2e1   : > { %3348 = vmatprep.mubr.bf16.mxu0 %v7830_v39  ;;  %3461 = vmatprep.mubr.bf16.mxu1 %v7830_v39 }
 0x2e2   : > { %3521 = vmatpush1.bf16.msra.mxu0 %v6127_v59  ;;  %3634 = vmatpush1.bf16.msra.mxu1 %v6129_v15 }
 0x2e3   : > { %3522 = vmatprep.subr.bf16.mxu0 %v6136_v61  ;;  %3635 = vmatprep.subr.bf16.mxu1 %v6138_v18 }
 0x2e6   : > { %3523 = vmatpush1.bf16.msra.mxu0 %v6135_v1  ;;  %3636 = vmatpush1.bf16.msra.mxu1 %v6137_v27 }
 0x2e7   : > { %3524 = vmatprep.subr.bf16.mxu0 %v6144_v24  ;;  %3637 = vmatprep.subr.bf16.mxu1 %v6146_v53 }
 0x2e8   : > { %3349 = vmatmul.mubr.bf16.gmra.mrb[12].mxu0 %v2897_v46  ;;  %3462 = vmatmul.mubr.bf16.gmra.mrb[12].mxu1 %v2897_v46 }
 0x2e9   : > { %3358 = vmatprep.mubr.bf16.mxu0 %v7830_v39  ;;  %3471 = vmatprep.mubr.bf16.mxu1 %v7830_v39 }
 0x2ea   : > { %3525 = vmatpush1.bf16.msra.mxu0 %v6143_v12  ;;  %3638 = vmatpush1.bf16.msra.mxu1 %v6145_v43 }
 0x2eb   : > { %3526 = vmatprep.subr.bf16.mxu0 %v6152_v14  ;;  %3639 = vmatprep.subr.bf16.mxu1 %v6154_v37 }
 0x2ee   : > { %3527 = vmatpush1.bf16.msra.mxu0 %v6151_v33  ;;  %3640 = vmatpush1.bf16.msra.mxu1 %v6153_v2 }
 0x2f0   : > { %3359 = vmatmul.mubr.bf16.gmra.mrb[16].mxu0 %v2898_v30  ;;  %3472 = vmatmul.mubr.bf16.gmra.mrb[16].mxu1 %v2898_v30 }
 0x2f1   : > { %3368 = vmatprep.mubr.bf16.mxu0 %v7830_v39  ;;  %3481 = vmatprep.mubr.bf16.mxu1 %v7830_v39 }
 0x2f8   : > { %3369 = vmatmul.mubr.bf16.gmra.mrb[20].mxu0 %v2899_v17  ;;  %3482 = vmatmul.mubr.bf16.gmra.mrb[20].mxu1 %v2899_v17 }
 0x2f9   : > { %3378 = vmatprep.mubr.bf16.mxu0 %v7830_v39  ;;  %3491 = vmatprep.mubr.bf16.mxu1 %v7830_v39 }
 0x300   : > { %3379 = vmatmul.mubr.bf16.gmra.mrb[24].mxu0 %v2900_v57  ;;  %3492 = vmatmul.mubr.bf16.gmra.mrb[24].mxu1 %v2900_v57 }
 0x301   : > { %3388 = vmatprep.mubr.bf16.mxu0 %v7830_v39  ;;  %3501 = vmatprep.mubr.bf16.mxu1 %v7830_v39 }
 0x308   : > { %3389 = vmatmul.mubr.bf16.gmra.mrb[28].mxu0 %v2901_v19  ;;  %3502 = vmatmul.mubr.bf16.gmra.mrb[28].mxu1 %v2901_v19 }
 0x309   : > { %3544 = vmatprep.mubr.bf16.mxu0 %v7830_v39  ;;  %3657 = vmatprep.mubr.bf16.mxu1 %v7830_v39 }
 0x310   : > { %3545 = vmatmul.mubr.bf16.vlgmr.msra.gmra.mrb[32].mxu0 %v8523_v34  ;;  %3658 = vmatmul.mubr.bf16.vlgmr.msra.gmra.mrb[32].mxu1 %v8523_v34 }
 0x311   : > { %3554 = vmatprep.mubr.bf16.mxu0 %v7830_v39  ;;  %3667 = vmatprep.mubr.bf16.mxu1 %v7830_v39 }
 0x318   : > { %3555 = vmatmul.mubr.bf16.gmra.mrb[36].mxu0 %v8537_v50  ;;  %3668 = vmatmul.mubr.bf16.gmra.mrb[36].mxu1 %v8537_v50 }
 0x319   : > { %3564 = vmatprep.mubr.bf16.mxu0 %v7830_v39  ;;  %3677 = vmatprep.mubr.bf16.mxu1 %v7830_v39 }
 0x320   : > { %3565 = vmatmul.mubr.bf16.gmra.mrb[40].mxu0 %v8551_v28  ;;  %3678 = vmatmul.mubr.bf16.gmra.mrb[40].mxu1 %v8551_v28 }
 0x321   : > { %3574 = vmatprep.mubr.bf16.mxu0 %v7830_v39  ;;  %3687 = vmatprep.mubr.bf16.mxu1 %v7830_v39 }
 0x328   : > { %3575 = vmatmul.mubr.bf16.gmra.mrb[44].mxu0 %v2897_v46  ;;  %3688 = vmatmul.mubr.bf16.gmra.mrb[44].mxu1 %v2897_v46 }
 0x329   : > { %3584 = vmatprep.mubr.bf16.mxu0 %v7830_v39  ;;  %3697 = vmatprep.mubr.bf16.mxu1 %v7830_v39 }
 0x330   : > { %3585 = vmatmul.mubr.bf16.gmra.mrb[48].mxu0 %v2898_v30  ;;  %3698 = vmatmul.mubr.bf16.gmra.mrb[48].mxu1 %v2898_v30 }
 0x331   : > { %3594 = vmatprep.mubr.bf16.mxu0 %v7830_v39  ;;  %3707 = vmatprep.mubr.bf16.mxu1 %v7830_v39 }
 0x338   : > { %3595 = vmatmul.mubr.bf16.gmra.mrb[52].mxu0 %v2899_v17  ;;  %3708 = vmatmul.mubr.bf16.gmra.mrb[52].mxu1 %v2899_v17 }
 0x339   : > { %3604 = vmatprep.mubr.bf16.mxu0 %v7830_v39  ;;  %3717 = vmatprep.mubr.bf16.mxu1 %v7830_v39 }
 0x340   : > { %3605 = vmatmul.mubr.bf16.gmra.mrb[56].mxu0 %v2900_v57  ;;  %3718 = vmatmul.mubr.bf16.gmra.mrb[56].mxu1 %v2900_v57 }
 0x341   : > { %3614 = vmatprep.mubr.bf16.mxu0 %v7830_v39  ;;  %3727 = vmatprep.mubr.bf16.mxu1 %v7830_v39 }
 0x348   : > { %3615 = vmatmul.mubr.bf16.gmra.mrb[60].mxu0 %v2901_v19  ;;  %3728 = vmatmul.mubr.bf16.gmra.mrb[60].mxu1 %v2901_v19 }
 0x3a3   : > { %v8597_v34 = vpop.f32.mrb[0].mxu0  ;;  %v8599_v20 = vpop.f32.mrb[0].mxu1 }
 0x3a4   : > { %11471 = vst [vmem:[#allocation29_spill] sm:$0xff] %v8597_v34  ;;  %11472 = vst [vmem:[#allocation30_spill] sm:$0xff] %v8599_v20  ;;  %v8601_v22 = vpop.f32.mrb[1].mxu0  ;;  %v8603_v42 = vpop.f32.mrb[1].mxu1 }
 0x3a5   : > { %11473 = vst [vmem:[#allocation31_spill] sm:$0xff] %v8601_v22  ;;  %11474 = vst [vmem:[#allocation32_spill] sm:$0xff] %v8603_v42  ;;  %v8605_v13 = vpop.f32.mrb[2].mxu0  ;;  %v8607_v55 = vpop.f32.mrb[2].mxu1 }
 0x3a6   : > { %11475 = vst [vmem:[#allocation33_spill] sm:$0xff] %v8605_v13  ;;  %11476 = vst [vmem:[#allocation34_spill] sm:$0xff] %v8607_v55  ;;  %v8609_v25 = vpop.f32.mrb[3].mxu0  ;;  %v8611_v26 = vpop.f32.mrb[3].mxu1 }
 0x3a7   : > { %11477 = vst [vmem:[#allocation35_spill] sm:$0xff] %v8609_v25  ;;  %11478 = vst [vmem:[#allocation36_spill] sm:$0xff] %v8611_v26 }
 0x3ab   : > { %v8613_v7 = vpop.f32.mrb[4].mxu0  ;;  %v8615_v39 = vpop.f32.mrb[4].mxu1 }
 0x3ac   : > { %11479 = vst [vmem:[#allocation37_spill] sm:$0xff] %v8613_v7  ;;  %11480 = vst [vmem:[#allocation38_spill] sm:$0xff] %v8615_v39  ;;  %v8617_v51 = vpop.f32.mrb[5].mxu0  ;;  %v8619_v32 = vpop.f32.mrb[5].mxu1 }
 0x3ad   : > { %11481 = vst [vmem:[#allocation39_spill] sm:$0xff] %v8617_v51  ;;  %11482 = vst [vmem:[#allocation40_spill] sm:$0xff] %v8619_v32  ;;  %v8621_v48 = vpop.f32.mrb[6].mxu0  ;;  %v8623_v54 = vpop.f32.mrb[6].mxu1 }
 0x3ae   : > { %11483 = vst [vmem:[#allocation41_spill] sm:$0xff] %v8621_v48  ;;  %11484 = vst [vmem:[#allocation42_spill] sm:$0xff] %v8623_v54  ;;  %v8625_v47 = vpop.f32.mrb[7].mxu0  ;;  %v8627_v35 = vpop.f32.mrb[7].mxu1 }
 0x3af   : > { %11485 = vst [vmem:[#allocation43_spill] sm:$0xff] %v8625_v47  ;;  %11486 = vst [vmem:[#allocation44_spill] sm:$0xff] %v8627_v35 }
 0x3b3   : > { %v8629_v36 = vpop.f32.mrb[8].mxu0  ;;  %v8631_v50 = vpop.f32.mrb[8].mxu1 }
 0x3b4   : > { %11487 = vst [vmem:[#allocation45_spill] sm:$0xff] %v8629_v36  ;;  %11488 = vst [vmem:[#allocation46_spill] sm:$0xff] %v8631_v50  ;;  %v8633_v11 = vpop.f32.mrb[9].mxu0  ;;  %v8635_v21 = vpop.f32.mrb[9].mxu1 }
 0x3b5   : > { %11489 = vst [vmem:[#allocation47_spill] sm:$0xff] %v8633_v11  ;;  %11490 = vst [vmem:[#allocation48_spill] sm:$0xff] %v8635_v21  ;;  %v8637_v5 = vpop.f32.mrb[10].mxu0  ;;  %v8639_v38 = vpop.f32.mrb[10].mxu1 }
 0x3b6   : > { %11491 = vst [vmem:[#allocation49_spill] sm:$0xff] %v8637_v5  ;;  %11492 = vst [vmem:[#allocation50_spill] sm:$0xff] %v8639_v38  ;;  %v8641_v62 = vpop.f32.mrb[11].mxu0  ;;  %v8643_v40 = vpop.f32.mrb[11].mxu1 }
 0x3b7   : > { %11493 = vst [vmem:[#allocation51_spill] sm:$0xff] %v8641_v62  ;;  %11494 = vst [vmem:[#allocation52_spill] sm:$0xff] %v8643_v40 }
 0x3bb   : > { %v8645_v60 = vpop.f32.mrb[12].mxu0  ;;  %v8647_v41 = vpop.f32.mrb[12].mxu1 }
 0x3bc   : > { %11495 = vst [vmem:[#allocation53_spill] sm:$0xff] %v8645_v60  ;;  %11496 = vst [vmem:[#allocation54_spill] sm:$0xff] %v8647_v41  ;;  %v8649_v8 = vpop.f32.mrb[13].mxu0  ;;  %v8651_v29 = vpop.f32.mrb[13].mxu1 }
 0x3bd   : > { %11497 = vst [vmem:[#allocation55_spill] sm:$0xff] %v8649_v8  ;;  %11498 = vst [vmem:[#allocation56_spill] sm:$0xff] %v8651_v29  ;;  %v8653_v44 = vpop.f32.mrb[14].mxu0  ;;  %v8655_v10 = vpop.f32.mrb[14].mxu1 }
 0x3be   : > { %11499 = vst [vmem:[#allocation57_spill] sm:$0xff] %v8653_v44  ;;  %11500 = vst [vmem:[#allocation58_spill] sm:$0xff] %v8655_v10  ;;  %v8657_v45 = vpop.f32.mrb[15].mxu0  ;;  %v8659_v9 = vpop.f32.mrb[15].mxu1 }
 0x3bf   : > { %11501 = vst [vmem:[#allocation59_spill] sm:$0xff] %v8657_v45  ;;  %11502 = vst [vmem:[#allocation60_spill] sm:$0xff] %v8659_v9 }
 0x3c3   : > { %v8661_v3 = vpop.f32.mrb[16].mxu0  ;;  %v8663_v52 = vpop.f32.mrb[16].mxu1 }
 0x3c4   : > { %11503 = vst [vmem:[#allocation61_spill] sm:$0xff] %v8661_v3  ;;  %11504 = vst [vmem:[#allocation62_spill] sm:$0xff] %v8663_v52  ;;  %v8665_v28 = vpop.f32.mrb[17].mxu0  ;;  %v8667_v56 = vpop.f32.mrb[17].mxu1 }
 0x3c5   : > { %11505 = vst [vmem:[#allocation63_spill] sm:$0xff] %v8665_v28  ;;  %11506 = vst [vmem:[#allocation64_spill] sm:$0xff] %v8667_v56  ;;  %v8669_v58 = vpop.f32.mrb[18].mxu0  ;;  %v8671_v59 = vpop.f32.mrb[18].mxu1 }
 0x3c6   : > { %11507 = vst [vmem:[#allocation65_spill] sm:$0xff] %v8669_v58  ;;  %11508 = vst [vmem:[#allocation66_spill] sm:$0xff] %v8671_v59  ;;  %v8673_v15 = vpop.f32.mrb[19].mxu0  ;;  %v8675_v61 = vpop.f32.mrb[19].mxu1 }
 0x3c7   : > { %11509 = vst [vmem:[#allocation67_spill] sm:$0xff] %v8673_v15  ;;  %11510 = vst [vmem:[#allocation68_spill] sm:$0xff] %v8675_v61 }
 0x3cb   : > { %v8677_v18 = vpop.f32.mrb[20].mxu0  ;;  %v8679_v23 = vpop.f32.mrb[20].mxu1 }
 0x3cc   : > { %11511 = vst [vmem:[#allocation69_spill] sm:$0xff] %v8677_v18  ;;  %11512 = vst [vmem:[#allocation70_spill] sm:$0xff] %v8679_v23  ;;  %v8681_v63 = vpop.f32.mrb[21].mxu0  ;;  %v8683_v16 = vpop.f32.mrb[21].mxu1 }
 0x3cd   : > { %11513 = vst [vmem:[#allocation71_spill] sm:$0xff] %v8681_v63  ;;  %11514 = vst [vmem:[#allocation72_spill] sm:$0xff] %v8683_v16  ;;  %v8685_v0 = vpop.f32.mrb[22].mxu0  ;;  %v8687_v1 = vpop.f32.mrb[22].mxu1 }
 0x3ce   : > { %11515 = vst [vmem:[#allocation73_spill] sm:$0xff] %v8685_v0  ;;  %11516 = vst [vmem:[#allocation74_spill] sm:$0xff] %v8687_v1  ;;  %v8689_v27 = vpop.f32.mrb[23].mxu0  ;;  %v8691_v24 = vpop.f32.mrb[23].mxu1 }
 0x3cf   : > { %11517 = vst [vmem:[#allocation75_spill] sm:$0xff] %v8689_v27  ;;  %11518 = vst [vmem:[#allocation76_spill] sm:$0xff] %v8691_v24 }
 0x3d3   : > { %v8693_v53 = vpop.f32.mrb[24].mxu0  ;;  %v8695_v31 = vpop.f32.mrb[24].mxu1 }
 0x3d4   : > { %11519 = vst [vmem:[#allocation77_spill] sm:$0xff] %v8693_v53  ;;  %11520 = vst [vmem:[#allocation78_spill] sm:$0xff] %v8695_v31  ;;  %v8697_v4 = vpop.f32.mrb[25].mxu0  ;;  %v8699_v46 = vpop.f32.mrb[25].mxu1 }
 0x3d5   : > { %11521 = vst [vmem:[#allocation79_spill] sm:$0xff] %v8697_v4  ;;  %11522 = vst [vmem:[#allocation80_spill] sm:$0xff] %v8699_v46  ;;  %v8701_v6 = vpop.f32.mrb[26].mxu0  ;;  %v8703_v49 = vpop.f32.mrb[26].mxu1 }
 0x3d6   : > { %11523 = vst [vmem:[#allocation81_spill] sm:$0xff] %v8701_v6  ;;  %11524 = vst [vmem:[#allocation82_spill] sm:$0xff] %v8703_v49  ;;  %v8705_v12 = vpop.f32.mrb[27].mxu0  ;;  %v8707_v43 = vpop.f32.mrb[27].mxu1 }
 0x3d7   : > { %11525 = vst [vmem:[#allocation83_spill] sm:$0xff] %v8705_v12  ;;  %11526 = vst [vmem:[#allocation84_spill] sm:$0xff] %v8707_v43 }
 0x3db   : > { %v8709_v14 = vpop.f32.mrb[28].mxu0  ;;  %v8711_v37 = vpop.f32.mrb[28].mxu1 }
 0x3dc   : > { %11527 = vst [vmem:[#allocation85_spill] sm:$0xff] %v8709_v14  ;;  %11528 = vst [vmem:[#allocation86_spill] sm:$0xff] %v8711_v37  ;;  %v8713_v33 = vpop.f32.mrb[29].mxu0  ;;  %v8715_v2 = vpop.f32.mrb[29].mxu1 }
 0x3dd   : > { %11529 = vst [vmem:[#allocation87_spill] sm:$0xff] %v8713_v33  ;;  %11530 = vst [vmem:[#allocation88_spill] sm:$0xff] %v8715_v2  ;;  %v8717_v30 = vpop.f32.mrb[30].mxu0  ;;  %v8719_v17 = vpop.f32.mrb[30].mxu1 }
 0x3de   : > { %11531 = vst [vmem:[#allocation89_spill] sm:$0xff] %v8717_v30  ;;  %11532 = vst [vmem:[#allocation90_spill] sm:$0xff] %v8719_v17  ;;  %v8721_v57 = vpop.f32.mrb[31].mxu0  ;;  %v8723_v19 = vpop.f32.mrb[31].mxu1 }
 0x3df   : > { %11533 = vst [vmem:[#allocation91_spill] sm:$0xff] %v8721_v57  ;;  %11534 = vst [vmem:[#allocation92_spill] sm:$0xff] %v8723_v19 }
 0x3e3   : > { %v8725_v46 = vpop.f32.mrb[32].mxu0  ;;  %v8727_v31 = vpop.f32.mrb[32].mxu1 }
 0x3e4   : > { %11535 = vst [vmem:[#allocation93_spill] sm:$0xff] %v8725_v46  ;;  %11536 = vst [vmem:[#allocation94_spill] sm:$0xff] %v8727_v31  ;;  %v8729_v4 = vpop.f32.mrb[33].mxu0  ;;  %v8731_v14 = vpop.f32.mrb[33].mxu1 }
 0x3e5   : > { %11537 = vst [vmem:[#allocation95_spill] sm:$0xff] %v8729_v4  ;;  %11538 = vst [vmem:[#allocation96_spill] sm:$0xff] %v8731_v14  ;;  %v8733_v37 = vpop.f32.mrb[34].mxu0  ;;  %v8735_v33 = vpop.f32.mrb[34].mxu1 }
 0x3e6   : > { %11539 = vst [vmem:[#allocation97_spill] sm:$0xff] %v8733_v37  ;;  %11540 = vst [vmem:[#allocation98_spill] sm:$0xff] %v8735_v33  ;;  %v8737_v2 = vpop.f32.mrb[35].mxu0  ;;  %v8739_v53 = vpop.f32.mrb[35].mxu1 }
 0x3e7   : > { %11541 = vst [vmem:[#allocation99_spill] sm:$0xff] %v8737_v2  ;;  %11542 = vst [vmem:[#allocation100_spill] sm:$0xff] %v8739_v53 }
 0x3eb   : > { %v8741_v16 = vpop.f32.mrb[36].mxu0  ;;  %v8743_v23 = vpop.f32.mrb[36].mxu1 }
 0x3ec   : > { %11543 = vst [vmem:[#allocation101_spill] sm:$0xff] %v8741_v16  ;;  %11544 = vst [vmem:[#allocation102_spill] sm:$0xff] %v8743_v23  ;;  %v8745_v63 = vpop.f32.mrb[37].mxu0  ;;  %v8747_v56 = vpop.f32.mrb[37].mxu1 }
 0x3ed   : > { %11545 = vst [vmem:[#allocation103_spill] sm:$0xff] %v8745_v63  ;;  %11546 = vst [vmem:[#allocation104_spill] sm:$0xff] %v8747_v56  ;;  %v8749_v18 = vpop.f32.mrb[38].mxu0  ;;  %v8751_v52 = vpop.f32.mrb[38].mxu1 }
 0x3ee   : > { %11547 = vst [vmem:[#allocation105_spill] sm:$0xff] %v8749_v18  ;;  %11548 = vst [vmem:[#allocation106_spill] sm:$0xff] %v8751_v52  ;;  %v8753_v28 = vpop.f32.mrb[39].mxu0  ;;  %v8755_v3 = vpop.f32.mrb[39].mxu1 }
 0x3ef   : > { %11549 = vst [vmem:[#allocation107_spill] sm:$0xff] %v8753_v28  ;;  %11550 = vst [vmem:[#allocation108_spill] sm:$0xff] %v8755_v3 }
 0x3f3   : > { %v8757_v19 = vpop.f32.mrb[40].mxu0  ;;  %v8759_v17 = vpop.f32.mrb[40].mxu1 }
 0x3f4   : > { %11551 = vst [vmem:[#allocation109_spill] sm:$0xff] %v8757_v19  ;;  %11552 = vst [vmem:[#allocation110_spill] sm:$0xff] %v8759_v17  ;;  %v8761_v57 = vpop.f32.mrb[41].mxu0  ;;  %v8763_v30 = vpop.f32.mrb[41].mxu1 }
 0x3f5   : > { %11553 = vst [vmem:[#allocation111_spill] sm:$0xff] %v8761_v57  ;;  %11554 = vst [vmem:[#allocation112_spill] sm:$0xff] %v8763_v30  ;;  %v8765_v29 = vpop.f32.mrb[42].mxu0  ;;  %v8767_v41 = vpop.f32.mrb[42].mxu1 }
 0x3f6   : > { %11555 = vst [vmem:[#allocation113_spill] sm:$0xff] %v8765_v29  ;;  %11556 = vst [vmem:[#allocation114_spill] sm:$0xff] %v8767_v41  ;;  %v8769_v8 = vpop.f32.mrb[43].mxu0  ;;  %v8771_v43 = vpop.f32.mrb[43].mxu1 }
 0x3f7   : > { %11557 = vst [vmem:[#allocation115_spill] sm:$0xff] %v8769_v8  ;;  %11558 = vst [vmem:[#allocation116_spill] sm:$0xff] %v8771_v43 }
 0x3fb   : > { %v8773_v60 = vpop.f32.mrb[44].mxu0  ;;  %v8775_v49 = vpop.f32.mrb[44].mxu1 }
 0x3fc   : > { %11559 = vst [vmem:[#allocation117_spill] sm:$0xff] %v8773_v60  ;;  %11560 = vst [vmem:[#allocation118_spill] sm:$0xff] %v8775_v49  ;;  %v8777_v12 = vpop.f32.mrb[45].mxu0  ;;  %v8779_v6 = vpop.f32.mrb[45].mxu1 }
 0x3fd   : > { %11561 = vst [vmem:[#allocation119_spill] sm:$0xff] %v8777_v12  ;;  %11562 = vst [vmem:[#allocation120_spill] sm:$0xff] %v8779_v6  ;;  %v8781_v17 = vpop.f32.mrb[46].mxu0  ;;  %v8783_v57 = vpop.f32.mrb[46].mxu1 }
 0x3fe   : > { %11563 = vst [vmem:[#allocation121_spill] sm:$0xff] %v8781_v17  ;;  %11564 = vst [vmem:[#allocation122_spill] sm:$0xff] %v8783_v57  ;;  %v8785_v30 = vpop.f32.mrb[47].mxu0  ;;  %v8787_v24 = vpop.f32.mrb[47].mxu1 }
 0x3ff   : > { %11565 = vst [vmem:[#allocation123_spill] sm:$0xff] %v8785_v30  ;;  %11566 = vst [vmem:[#allocation124_spill] sm:$0xff] %v8787_v24 }
 0x403   : > { %v8789_v19 = vpop.f32.mrb[48].mxu0  ;;  %v8791_v1 = vpop.f32.mrb[48].mxu1 }
 0x404   : > { %11567 = vst [vmem:[#allocation125_spill] sm:$0xff] %v8789_v19  ;;  %11568 = vst [vmem:[#allocation126_spill] sm:$0xff] %v8791_v1  ;;  %v8793_v27 = vpop.f32.mrb[49].mxu0  ;;  %v8795_v60 = vpop.f32.mrb[49].mxu1 }
 0x405   : > { %11569 = vst [vmem:[#allocation127_spill] sm:$0xff] %v8793_v27  ;;  %11570 = vst [vmem:[#allocation128_spill] sm:$0xff] %v8795_v60  ;;  %v8797_v49 = vpop.f32.mrb[50].mxu0  ;;  %v8799_v12 = vpop.f32.mrb[50].mxu1 }
 0x406   : > { %11571 = vst [vmem:[#allocation129_spill] sm:$0xff] %v8797_v49  ;;  %11572 = vst [vmem:[#allocation130_spill] sm:$0xff] %v8799_v12  ;;  %v8801_v6 = vpop.f32.mrb[51].mxu0  ;;  %v8803_v0 = vpop.f32.mrb[51].mxu1 }
 0x407   : > { %11573 = vst [vmem:[#allocation131_spill] sm:$0xff] %v8801_v6  ;;  %11574 = vst [vmem:[#allocation132_spill] sm:$0xff] %v8803_v0 }
 0x40b   : > { %v8805_v21 = vpop.f32.mrb[52].mxu0  ;;  %v8807_v50 = vpop.f32.mrb[52].mxu1 }
 0x40c   : > { %11575 = vst [vmem:[#allocation133_spill] sm:$0xff] %v8805_v21  ;;  %11576 = vst [vmem:[#allocation134_spill] sm:$0xff] %v8807_v50  ;;  %v8809_v24 = vpop.f32.mrb[53].mxu0  ;;  %v8811_v19 = vpop.f32.mrb[53].mxu1 }
 0x40d   : > { %11577 = vst [vmem:[#allocation135_spill] sm:$0xff] %v8809_v24  ;;  %11578 = vst [vmem:[#allocation136_spill] sm:$0xff] %v8811_v19  ;;  %v8813_v1 = vpop.f32.mrb[54].mxu0  ;;  %v8815_v27 = vpop.f32.mrb[54].mxu1 }
 0x40e   : > { %11579 = vst [vmem:[#allocation137_spill] sm:$0xff] %v8813_v1  ;;  %11580 = vst [vmem:[#allocation138_spill] sm:$0xff] %v8815_v27  ;;  %v8817_v60 = vpop.f32.mrb[55].mxu0  ;;  %v8819_v49 = vpop.f32.mrb[55].mxu1 }
 0x40f   : > { %11581 = vst [vmem:[#allocation139_spill] sm:$0xff] %v8817_v60  ;;  %11582 = vst [vmem:[#allocation140_spill] sm:$0xff] %v8819_v49 }
 0x413   : > { %v8821_v12 = vpop.f32.mrb[56].mxu0  ;;  %v8823_v6 = vpop.f32.mrb[56].mxu1 }
 0x414   : > { %11583 = vst [vmem:[#allocation141_spill] sm:$0xff] %v8821_v12  ;;  %11584 = vst [vmem:[#allocation142_spill] sm:$0xff] %v8823_v6  ;;  %v8825_v0 = vpop.f32.mrb[57].mxu0  ;;  %v8827_v21 = vpop.f32.mrb[57].mxu1 }
 0x415   : > { %11585 = vst [vmem:[#allocation143_spill] sm:$0xff] %v8825_v0  ;;  %11586 = vst [vmem:[#allocation144_spill] sm:$0xff] %v8827_v21  ;;  %v8829_v50 = vpop.f32.mrb[58].mxu0  ;;  %v8831_v24 = vpop.f32.mrb[58].mxu1 }
 0x416   : > { %11587 = vst [vmem:[#allocation145_spill] sm:$0xff] %v8829_v50  ;;  %11588 = vst [vmem:[#allocation146_spill] sm:$0xff] %v8831_v24  ;;  %v8833_v19 = vpop.f32.mrb[59].mxu0  ;;  %v8835_v1 = vpop.f32.mrb[59].mxu1 }
 0x417   : > { %11589 = vst [vmem:[#allocation147_spill] sm:$0xff] %v8833_v19  ;;  %11590 = vst [vmem:[#allocation148_spill] sm:$0xff] %v8835_v1 }
 0x419   : > { %3740 = sbr.rel (%p6155_p0) target bundleno = 1660 (0x67c), region = 52 }
 0x41b   : > { %v8837_v27 = vpop.f32.mrb[60].mxu0  ;;  %v8839_v60 = vpop.f32.mrb[60].mxu1 }
 0x41c   : > { %11591 = vst [vmem:[#allocation149_spill] sm:$0xff] %v8837_v27  ;;  %11592 = vst [vmem:[#allocation150_spill] sm:$0xff] %v8839_v60  ;;  %v8841_v49 = vpop.f32.mrb[61].mxu0  ;;  %v8843_v12 = vpop.f32.mrb[61].mxu1 }
 0x41d   : > { %11593 = vst [vmem:[#allocation151_spill] sm:$0xff] %v8841_v49  ;;  %11594 = vst [vmem:[#allocation152_spill] sm:$0xff] %v8843_v12  ;;  %v8845_v6 = vpop.f32.mrb[62].mxu0  ;;  %v8847_v0 = vpop.f32.mrb[62].mxu1 }
 0x41e   : > { %11595 = vst [vmem:[#allocation153_spill] sm:$0xff] %v8845_v6  ;;  %11596 = vst [vmem:[#allocation154_spill] sm:$0xff] %v8847_v0  ;;  %v8849_v21 = vpop.f32.mrb[63].mxu0  ;;  %v8851_v50 = vpop.f32.mrb[63].mxu1 }
 0x41f   : > { %11597 = vst [vmem:[#allocation155_spill] sm:$0xff] %v8849_v21  ;;  %11598 = vst [vmem:[#allocation156_spill] sm:$0xff] %v8851_v50 }
 0x420   : > { %s11600_s1 = sld [smem:[#allocation18_spill]]  ;;  %v3742_v27 = vlaneseq  ;;  %vm4776_vm9 = vcmask 7168  }
 0x422   : > { %v3743_v1 = vand.u32 127, %v3742_v27 }
 0x424   : > { %v3744_v24 = vadd.s32 128, %v3743_v1  ;;  %v3745_v49 = vadd.s32 256, %v3743_v1  ;;  %v3746_v19 = vadd.s32 384, %v3743_v1  ;;  %v3747_v12 = vadd.s32 512, %v3743_v1 }
 0x425   : > { %v3748_v57 = vadd.s32 640, %v3743_v1  ;;  %v3749_v6 = vadd.s32 768, %v3743_v1  ;;  %v3750_v43 = vadd.s32 896, %v3743_v1 }
 0x426   : > { %s6156_s0 = sshll.u32 %s11600_s1, 10 }
 0x427   : > { %v3751_v60 = vstv %s6156_s0 }
 0x428   : > { %v8855_v0 = vadd.s32 %v3751_v60, %v3743_v1  ;;  %v8857_v21 = vadd.s32 %v3751_v60, %v3744_v24  ;;  %v8859_v50 = vadd.s32 %v3751_v60, %v3745_v49  ;;  %v8861_v11 = vadd.s32 %v3751_v60, %v3746_v19 }
 0x429   : > { %v8863_v36 = vadd.s32 %v3751_v60, %v3747_v12  ;;  %v8865_v61 = vadd.s32 %v3751_v60, %v3748_v57  ;;  %v8870_v27 = vadd.s32 %v3751_v60, %v3749_v6  ;;  %v8872_v1 = vadd.s32 %v3751_v60, %v3750_v43 }
 0x42a   : > { %vm3760_vm1 = vcmp.lt.s32.totalorder %v8855_v0, 2000  ;;  %vm3761_vm2 = vcmp.lt.s32.totalorder %v8857_v21, 2000  ;;  %vm3762_vm3 = vcmp.lt.s32.totalorder %v8859_v50, 2000  ;;  %vm3763_vm4 = vcmp.lt.s32.totalorder %v8861_v11, 2000  ;;  %v11744_v0 = vld [vmem:[#allocation134_spill] sm:$0xff]  ;;  %v11746_v21 = vld [vmem:[#allocation141_spill] sm:$0xff] }
 0x42b   : > { %v8878_v24 = vsel %vm3760_vm1, %v8613_v7, -1e+30  ;;  %v8883_v49 = vsel %vm3761_vm2, %v8617_v51, -1e+30  ;;  %v8888_v12 = vsel %vm3762_vm3, %v8615_v39, -1e+30 }
 0x42c   : > { %vm3764_vm5 = vcmp.lt.s32.totalorder %v8863_v36, 2000  ;;  %vm3765_vm6 = vcmp.lt.s32.totalorder %v8865_v61, 2000  ;;  %v3930_v60 = vmax.f32 %v8878_v24, %v8883_v49  ;;  %v8897_v6 = vsel %vm3763_vm4, %v8619_v32, -1e+30 }
 0x42d   : > { %11601 = vst [vmem:[#allocation157_spill] sm:$0xff] %v8897_v6  ;;  %v8902_v43 = vsel %vm3760_vm1, %v8597_v34, -1e+30  ;;  %v8907_v57 = vsel %vm3761_vm2, %v8601_v22, -1e+30  ;;  %vm3766_vm7 = vcmp.lt.s32.totalorder %v8870_v27, 2000 }
 0x42e   : > { %vm3767_vm8 = vcmp.lt.s32.totalorder %v8872_v1, 2000  ;;  %v3931_v19 = vmax.f32 %v3930_v60, %v8888_v12  ;;  %v8915_v32 = vsel %vm3762_vm3, %v8599_v20, -1e+30  ;;  %v8920_v34 = vsel %vm3764_vm5, %v8741_v16, -1e+30 }
 0x42f   : > { %11602 = vst [vmem:[#allocation158_spill] sm:$0xff] %v8920_v34  ;;  %v8925_v22 = vsel %vm3765_vm6, %v8745_v63, -1e+30  ;;  %v3912_v39 = vmax.f32 %v8902_v43, %v8907_v57  ;;  %v8933_v20 = vsel %vm3763_vm4, %v8603_v42, -1e+30 }
 0x430   : > { %11603 = vst [vmem:[#allocation159_spill] sm:$0xff] %v8925_v22  ;;  %v3932_v60 = vmax.f32 %v3931_v19, %v8897_v6  ;;  %v8938_v16 = vsel %vm3760_vm1, %v8621_v48, -1e+30  ;;  %v8943_v63 = vsel %vm3761_vm2, %v8625_v47, -1e+30  ;;  %v11664_v6 = vld [vmem:[#allocation139_spill] sm:$0xff] }
 0x431   : > { %v8948_v51 = vsel %vm3766_vm7, %v8743_v23, -1e+30  ;;  %v8953_v19 = vsel %vm3767_vm8, %v8747_v56, -1e+30  ;;  %v3913_v42 = vmax.f32 %v3912_v39, %v8915_v32  ;;  %v8959_v48 = vsel %vm3762_vm3, %v8623_v54, -1e+30 }
 0x432   : > { %11604 = vst [vmem:[#allocation160_spill] sm:$0xff] %v8948_v51  ;;  %11605 = vst [vmem:[#allocation161_spill] sm:$0xff] %v8953_v19  ;;  %v3933_v47 = vmax.f32 %v3932_v60, %v8920_v34  ;;  %v8965_v7 = vsel %vm3764_vm5, %v8725_v46, -1e+30  ;;  %v8970_v23 = vsel %vm3765_vm6, %v8729_v4, -1e+30  ;;  %v3939_v39 = vmax.f32 %v8938_v16, %v8943_v63 }
 0x433   : > { %v3914_v56 = vmax.f32 %v3913_v42, %v8933_v20  ;;  %v8978_v54 = vsel %vm3763_vm4, %v8627_v35, -1e+30  ;;  %v8983_v60 = vsel %vm3760_vm1, %v8605_v13, -1e+30  ;;  %v8988_v4 = vsel %vm3761_vm2, %v8609_v25, -1e+30 }
 0x434   : > { %11606 = vst [vmem:[#allocation162_spill] sm:$0xff] %v8978_v54  ;;  %v3934_v46 = vmax.f32 %v3933_v47, %v8925_v22  ;;  %v8994_v42 = vsel %vm3766_vm7, %v8727_v31, -1e+30  ;;  %v8999_v35 = vsel %vm3767_vm8, %v8731_v14, -1e+30  ;;  %v3940_v13 = vmax.f32 %v3939_v39, %v8959_v48 }
 0x435   : > { %v3915_v34 = vmax.f32 %v3914_v56, %v8965_v7  ;;  %v9006_v25 = vsel %vm3764_vm5, %v8749_v18, -1e+30  ;;  %v9011_v47 = vsel %vm3765_vm6, %v8753_v28, -1e+30  ;;  %v9016_v31 = vsel %vm3762_vm3, %v8607_v55, -1e+30 }
 0x436   : > { %11607 = vst [vmem:[#allocation163_spill] sm:$0xff] %v9006_v25  ;;  %11608 = vst [vmem:[#allocation164_spill] sm:$0xff] %v9011_v47  ;;  %v3935_v14 = vmax.f32 %v3934_v46, %v8948_v51  ;;  %v9022_v56 = vsel %vm3766_vm7, %v8751_v52, -1e+30  ;;  %v3941_v39 = vmax.f32 %v3940_v13, %v8978_v54  ;;  %v3921_v18 = vmax.f32 %v8983_v60, %v8988_v4 }
 0x437   : > { %11609 = vst [vmem:[#allocation165_spill] sm:$0xff] %v9022_v56  ;;  %v3916_v28 = vmax.f32 %v3915_v34, %v8970_v23  ;;  %v9031_v22 = vsel %vm3763_vm4, %v8611_v26, -1e+30  ;;  %v9036_v46 = vsel %vm3760_vm1, %v8637_v5, -1e+30 }
 0x438   : > { %11610 = vst [vmem:[#allocation166_spill] sm:$0xff] %v9031_v22  ;;  %v9041_v55 = vsel %vm3761_vm2, %v8641_v62, -1e+30  ;;  %v3936_v13 = vmax.f32 %v3935_v14, %v8953_v19  ;;  %v9047_v34 = vsel %vm3767_vm8, %v8755_v3, -1e+30  ;;  %v3942_v26 = vmax.f32 %v3941_v39, %v9006_v25  ;;  %v11628_v3 = vld [vmem:[#allocation45_spill] sm:$0xff] }
 0x439   : > { %11611 = vst [vmem:[#allocation167_spill] sm:$0xff] %v9047_v34  ;;  %v3922_v52 = vmax.f32 %v3921_v18, %v9016_v31  ;;  %v3917_v51 = vmax.f32 %v3916_v28, %v8994_v42  ;;  %v9055_v5 = vsel %vm3764_vm5, %v8733_v37, -1e+30  ;;  %v9060_v14 = vsel %vm3765_vm6, %v8737_v2, -1e+30  ;;  %v11638_v25 = vld [vmem:[#allocation46_spill] sm:$0xff] }
 0x43a   : > { %11612 = vst [vmem:[#allocation168_spill] sm:$0xff] %v9055_v5  ;;  %11613 = vst [vmem:[#allocation169_spill] sm:$0xff] %v9060_v14  ;;  %v9065_v62 = vsel %vm3762_vm3, %v8639_v38, -1e+30  ;;  %3937 = vmax.xlane.f32.xlu1 %v3936_v13  ;;  %v3943_v18 = vmax.f32 %v3942_v26, %v9011_v47  ;;  %v3957_v39 = vmax.f32 %v9036_v46, %v9041_v55  ;;  %v9074_v37 = vsel %vm3760_vm1, %v8653_v44, -1e+30 }
 0x43b   : > { %v3923_v28 = vmax.f32 %v3922_v52, %v9031_v22  ;;  %11614 = vst [vmem:[#allocation170_spill] sm:$0xff] %v9074_v37  ;;  %v3918_v2 = vmax.f32 %v3917_v51, %v8999_v35  ;;  %v9080_v38 = vsel %vm3766_vm7, %v8735_v33, -1e+30  ;;  %v9085_v26 = vsel %vm3763_vm4, %v8643_v40, -1e+30  ;;  %v11634_v47 = vld [vmem:[#allocation124_spill] sm:$0xff] }
 0x43c   : > { %11615 = vst [vmem:[#allocation171_spill] sm:$0xff] %v9080_v38  ;;  %11616 = vst [vmem:[#allocation172_spill] sm:$0xff] %v9085_v26  ;;  %v9090_v52 = vsel %vm3761_vm2, %v8657_v45, -1e+30  ;;  %v3944_v13 = vmax.f32 %v3943_v18, %v9022_v56  ;;  %v3958_v51 = vmax.f32 %v3957_v39, %v9065_v62  ;;  %v9098_v33 = vsel %vm3762_vm3, %v8655_v10, -1e+30 }
 0x43d   : > { %11617 = vst [vmem:[#allocation173_spill] sm:$0xff] %v9090_v52  ;;  %v3924_v44 = vmax.f32 %v3923_v28, %v9055_v5  ;;  %11618 = vst [vmem:[#allocation174_spill] sm:$0xff] %v9098_v33  ;;  %3919 = vmax.xlane.f32.xlu0 %v3918_v2  ;;  %v9103_v40 = vsel %vm3767_vm8, %v8739_v53, -1e+30  ;;  %v9108_v45 = vsel %vm3764_vm5, %v8765_v29, -1e+30  ;;  %v3975_v28 = vmax.f32 %v9074_v37, %v9090_v52 }
 0x43e   : > { %11619 = vst [vmem:[#allocation175_spill] sm:$0xff] %v9103_v40  ;;  %11620 = vst [vmem:[#allocation176_spill] sm:$0xff] %v9108_v45  ;;  %v9113_v18 = vsel %vm3763_vm4, %v8659_v9, -1e+30  ;;  %v3945_v2 = vmax.f32 %v3944_v13, %v9047_v34  ;;  %v3959_v10 = vmax.f32 %v3958_v51, %v9085_v26  ;;  %v9123_v53 = vsel %vm3760_vm1, %v8669_v58, -1e+30 }
 0x43f   : > { %11621 = vst [vmem:[#allocation177_spill] sm:$0xff] %v9113_v18  ;;  %v3925_v39 = vmax.f32 %v3924_v44, %v9060_v14  ;;  %v9128_v29 = vsel %vm3765_vm6, %v8769_v8, -1e+30  ;;  %v9133_v9 = vsel %vm3766_vm7, %v8767_v41, -1e+30  ;;  %v3976_v13 = vmax.f32 %v3975_v28, %v9098_v33  ;;  %v11630_v34 = vld [vmem:[#allocation116_spill] sm:$0xff] }
 0x440   : > { %11622 = vst [vmem:[#allocation178_spill] sm:$0xff] %v9128_v29  ;;  %11623 = vst [vmem:[#allocation179_spill] sm:$0xff] %v9133_v9  ;;  %v9139_v44 = vsel %vm3761_vm2, %v8673_v15, -1e+30  ;;  %3946 = vmax.xlane.f32.xlu1 %v3945_v2  ;;  %v3960_v58 = vmax.f32 %v3959_v10, %v9108_v45  ;;  %v9146_v8 = vsel %vm3764_vm5, %v8781_v17, -1e+30 }
 0x441   : > { %v3926_v51 = vmax.f32 %v3925_v39, %v9080_v38  ;;  %11624 = vst [vmem:[#allocation180_spill] sm:$0xff] %v9146_v8  ;;  %v9151_v41 = vsel %vm3762_vm3, %v8671_v59, -1e+30  ;;  %v9156_v28 = vsel %vm3765_vm6, %v8785_v30, -1e+30  ;;  %v3977_v2 = vmax.f32 %v3976_v13, %v9113_v18  ;;  %v11626_v39 = vld [vmem:[#allocation68_spill] sm:$0xff] }
 0x442   : > { %11625 = vst [vmem:[#allocation181_spill] sm:$0xff] %v9156_v28  ;;  %v9162_v10 = vsel %vm3763_vm4, %v11626_v39, -1e+30  ;;  %v3993_v15 = vmax.f32 %v9123_v53, %v9139_v44  ;;  %v3961_v59 = vmax.f32 %v3960_v58, %v9128_v29  ;;  %v9171_v45 = vsel %vm3760_vm1, %v11628_v3, -1e+30  ;;  %v11629_v30 = vld [vmem:[#allocation47_spill] sm:$0xff] }
 0x443   : > { %11627 = vst [vmem:[#allocation182_spill] sm:$0xff] %v9162_v10  ;;  %v3927_v17 = vmax.f32 %v3926_v51, %v9103_v40  ;;  %v9176_v13 = vsel %vm3761_vm2, %v11629_v30, -1e+30  ;;  %v9181_v39 = vsel %vm3767_vm8, %v11630_v34, -1e+30  ;;  %v11632_v56 = vld [vmem:[#allocation122_spill] sm:$0xff]  ;;  %v3978_v58 = vmax.f32 %v3977_v2, %v9146_v8 }
 0x444   : > { %11631 = vst [vmem:[#allocation183_spill] sm:$0xff] %v9181_v39  ;;  %v9186_v51 = vsel %vm3766_vm7, %v11632_v56, -1e+30  ;;  %v3994_v3 = vmax.f32 %v3993_v15, %v9151_v41  ;;  %v3962_v29 = vmax.f32 %v3961_v59, %v9133_v9  ;;  %v9194_v30 = vsel %vm3767_vm8, %v11634_v47, -1e+30  ;;  %v11636_v18 = vld [vmem:[#allocation129_spill] sm:$0xff] }
 0x445   : > { %11633 = vst [vmem:[#allocation184_spill] sm:$0xff] %v9186_v51  ;;  %3928 = vmax.xlane.f32.xlu0 %v3927_v17  ;;  %11635 = vst [vmem:[#allocation185_spill] sm:$0xff] %v9194_v30  ;;  %v9199_v34 = vsel %vm3764_vm5, %v11636_v18, -1e+30  ;;  %v9204_v56 = vsel %vm3762_vm3, %v11638_v25, -1e+30  ;;  %v3979_v15 = vmax.f32 %v3978_v58, %v9156_v28  ;;  %v3948_v2 = vmax.f32 %v9171_v45, %v9176_v13 }
 0x446   : > { %11637 = vst [vmem:[#allocation186_spill] sm:$0xff] %v9199_v34  ;;  %v11639_v17 = vld [vmem:[#allocation131_spill] sm:$0xff]  ;;  %v3995_v47 = vmax.f32 %v3994_v3, %v9162_v10  ;;  %v3963_v18 = vmax.f32 %v3962_v29, %v9181_v39  ;;  %v11641_v8 = vld [vmem:[#allocation48_spill] sm:$0xff]  ;;  %v11643_v25 = vld [vmem:[#allocation73_spill] sm:$0xff] }
 0x447   : > { %v9210_v59 = vsel %vm3765_vm6, %v11639_v17, -1e+30  ;;  %v9219_v9 = vsel %vm3763_vm4, %v11641_v8, -1e+30  ;;  %v9224_v58 = vsel %vm3760_vm1, %v11643_v25, -1e+30  ;;  %v3980_v3 = vmax.f32 %v3979_v15, %v9186_v51 }
 0x448   : > { %11640 = vst [vmem:[#allocation187_spill] sm:$0xff] %v9210_v59  ;;  %11642 = vst [vmem:[#allocation188_spill] sm:$0xff] %v9219_v9  ;;  %v11644_v28 = vld [vmem:[#allocation75_spill] sm:$0xff]  ;;  %v3996_v19 = vmax.f32 %v3995_v47, %v9199_v34  ;;  %v3949_v29 = vmax.f32 %v3948_v2, %v9204_v56  ;;  %v11645_v39 = vld [vmem:[#allocation74_spill] sm:$0xff]  ;;  %3964 = vmax.xlane.f32.xlu1 %v3963_v18 }
 0x449   : > { %v9229_v17 = vsel %vm3761_vm2, %v11644_v28, -1e+30  ;;  %v9237_v8 = vsel %vm3762_vm3, %v11645_v39, -1e+30  ;;  %v11646_v26 = vld [vmem:[#allocation130_spill] sm:$0xff]  ;;  %v11648_v10 = vld [vmem:[#allocation132_spill] sm:$0xff]  ;;  %v3981_v2 = vmax.f32 %v3980_v3, %v9194_v30 }
 0x44a   : > { %v9242_v25 = vsel %vm3766_vm7, %v11646_v26, -1e+30  ;;  %v9247_v28 = vsel %vm3767_vm8, %v11648_v10, -1e+30  ;;  %v11650_v15 = vld [vmem:[#allocation109_spill] sm:$0xff]  ;;  %v4011_v39 = vmax.f32 %v9224_v58, %v9229_v17  ;;  %v3997_v18 = vmax.f32 %v3996_v19, %v9210_v59  ;;  %v11652_v34 = vld [vmem:[#allocation76_spill] sm:$0xff] }
 0x44b   : > { %11647 = vst [vmem:[#allocation189_spill] sm:$0xff] %v9242_v25  ;;  %11649 = vst [vmem:[#allocation190_spill] sm:$0xff] %v9247_v28  ;;  %v9252_v47 = vsel %vm3764_vm5, %v11650_v15, -1e+30  ;;  %v3950_v26 = vmax.f32 %v3949_v29, %v9219_v9  ;;  %v9262_v51 = vsel %vm3763_vm4, %v11652_v34, -1e+30 }
 0x44c   : > { %11651 = vst [vmem:[#allocation191_spill] sm:$0xff] %v9252_v47  ;;  %11653 = vst [vmem:[#allocation192_spill] sm:$0xff] %v9262_v51  ;;  %v11654_v10 = vld [vmem:[#allocation111_spill] sm:$0xff]  ;;  %v4012_v15 = vmax.f32 %v4011_v39, %v9237_v8  ;;  %v11656_v40 = vld [vmem:[#allocation81_spill] sm:$0xff]  ;;  %v3998_v34 = vmax.f32 %v3997_v18, %v9242_v25  ;;  %3982 = vmax.xlane.f32.xlu1 %v3981_v2  ;;  %v9300_v18 = vsel %vm3765_vm6, %v11664_v6, -1e+30 }
 0x44d   : > { %v9267_v54 = vsel %vm3765_vm6, %v11654_v10, -1e+30  ;;  %v9273_v3 = vsel %vm3760_vm1, %v11656_v40, -1e+30  ;;  %v11657_v19 = vld [vmem:[#allocation83_spill] sm:$0xff]  ;;  %v11658_v59 = vld [vmem:[#allocation110_spill] sm:$0xff]  ;;  %v3951_v10 = vmax.f32 %v3950_v26, %v9252_v47 }
 0x44e   : > { %11655 = vst [vmem:[#allocation193_spill] sm:$0xff] %v9267_v54  ;;  %v9278_v29 = vsel %vm3761_vm2, %v11657_v19, -1e+30  ;;  %v9284_v30 = vsel %vm3766_vm7, %v11658_v59, -1e+30  ;;  %v11660_v39 = vld [vmem:[#allocation137_spill] sm:$0xff]  ;;  %v4013_v59 = vmax.f32 %v4012_v15, %v9262_v51 }
 0x44f   : > { %11659 = vst [vmem:[#allocation194_spill] sm:$0xff] %v9284_v30  ;;  %v9290_v9 = vsel %vm3764_vm5, %v11660_v39, -1e+30  ;;  %v11662_v40 = vld [vmem:[#allocation112_spill] sm:$0xff]  ;;  %11665 = vst [vmem:[#allocation197_spill] sm:$0xff] %v9300_v18  ;;  %v11666_v25 = vld [vmem:[#allocation82_spill] sm:$0xff]  ;;  %v3999_v39 = vmax.f32 %v3998_v34, %v9247_v28  ;;  %v3952_v2 = vmax.f32 %v3951_v10, %v9267_v54 }
 0x450   : > { %11661 = vst [vmem:[#allocation195_spill] sm:$0xff] %v9290_v9  ;;  %v9295_v19 = vsel %vm3767_vm8, %v11662_v40, -1e+30  ;;  %v9306_v26 = vsel %vm3762_vm3, %v11666_v25, -1e+30  ;;  %v4029_v40 = vmax.f32 %v9273_v3, %v9278_v29  ;;  %v11668_v47 = vld [vmem:[#allocation53_spill] sm:$0xff]  ;;  %v4014_v25 = vmax.f32 %v4013_v59, %v9290_v9 }
 0x451   : > { %11663 = vst [vmem:[#allocation196_spill] sm:$0xff] %v9295_v19  ;;  %11667 = vst [vmem:[#allocation198_spill] sm:$0xff] %v9306_v26  ;;  %v9315_v38 = vsel %vm3760_vm1, %v11668_v47, -1e+30  ;;  %v11669_v6 = vld [vmem:[#allocation138_spill] sm:$0xff]  ;;  %v11671_v51 = vld [vmem:[#allocation84_spill] sm:$0xff]  ;;  %v3953_v47 = vmax.f32 %v3952_v2, %v9284_v30  ;;  %4000 = vmax.xlane.f32.xlu1 %v3999_v39 }
 0x452   : > { %v9320_v15 = vsel %vm3766_vm7, %v11669_v6, -1e+30  ;;  %v9326_v34 = vsel %vm3763_vm4, %v11671_v51, -1e+30  ;;  %v11673_v10 = vld [vmem:[#allocation55_spill] sm:$0xff]  ;;  %v11674_v54 = vld [vmem:[#allocation140_spill] sm:$0xff]  ;;  %v4030_v6 = vmax.f32 %v4029_v40, %v9306_v26  ;;  %v4015_v51 = vmax.f32 %v4014_v25, %v9300_v18 }
 0x453   : > { %11670 = vst [vmem:[#allocation199_spill] sm:$0xff] %v9320_v15  ;;  %11672 = vst [vmem:[#allocation200_spill] sm:$0xff] %v9326_v34  ;;  %v9331_v28 = vsel %vm3761_vm2, %v11673_v10, -1e+30  ;;  %v9337_v14 = vsel %vm3767_vm8, %v11674_v54, -1e+30  ;;  %v3954_v30 = vmax.f32 %v3953_v47, %v9295_v19 }
 0x454   : > { %11675 = vst [vmem:[#allocation201_spill] sm:$0xff] %v9337_v14  ;;  %v11676_v59 = vld [vmem:[#allocation54_spill] sm:$0xff]  ;;  %v11677_v5 = vld [vmem:[#allocation145_spill] sm:$0xff]  ;;  %v11679_v2 = vld [vmem:[#allocation56_spill] sm:$0xff]  ;;  %v3966_v40 = vmax.f32 %v9315_v38, %v9331_v28 }
 0x455   : > { %v9343_v9 = vsel %vm3762_vm3, %v11676_v59, -1e+30  ;;  %v9349_v10 = vsel %vm3764_vm5, %v11677_v5, -1e+30  ;;  %v9354_v54 = vsel %vm3763_vm4, %v11679_v2, -1e+30  ;;  %v4031_v59 = vmax.f32 %v4030_v6, %v9326_v34  ;;  %3955 = vmax.xlane.f32.xlu0 %v3954_v30 }
 0x456   : > { %11678 = vst [vmem:[#allocation202_spill] sm:$0xff] %v9349_v10  ;;  %11680 = vst [vmem:[#allocation203_spill] sm:$0xff] %v9354_v54  ;;  %v11681_v39 = vld [vmem:[#allocation89_spill] sm:$0xff]  ;;  %v11683_v18 = vld [vmem:[#allocation91_spill] sm:$0xff]  ;;  %v4016_v2 = vmax.f32 %v4015_v51, %v9320_v15 }
 0x457   : > { %v9363_v25 = vsel %vm3760_vm1, %v11681_v39, -1e+30  ;;  %v9368_v5 = vsel %vm3761_vm2, %v11683_v18, -1e+30  ;;  %v11685_v22 = vld [vmem:[#allocation147_spill] sm:$0xff]  ;;  %v11687_v47 = vld [vmem:[#allocation146_spill] sm:$0xff]  ;;  %v3967_v39 = vmax.f32 %v3966_v40, %v9343_v9  ;;  %v4032_v51 = vmax.f32 %v4031_v59, %v9349_v10 }
 0x458   : > { %11682 = vst [vmem:[#allocation204_spill] sm:$0xff] %v9363_v25  ;;  %11684 = vst [vmem:[#allocation205_spill] sm:$0xff] %v9368_v5  ;;  %v9374_v33 = vsel %vm3765_vm6, %v11685_v22, -1e+30  ;;  %v9379_v6 = vsel %vm3766_vm7, %v11687_v47, -1e+30  ;;  %v4017_v40 = vmax.f32 %v4016_v2, %v9337_v14  ;;  %v4047_v59 = vmax.f32 %v9363_v25, %v9368_v5 }
 0x459   : > { %11686 = vst [vmem:[#allocation206_spill] sm:$0xff] %v9374_v33  ;;  %11688 = vst [vmem:[#allocation207_spill] sm:$0xff] %v9379_v6  ;;  %v11689_v19 = vld [vmem:[#allocation148_spill] sm:$0xff]  ;;  %v11691_v15 = vld [vmem:[#allocation117_spill] sm:$0xff] }
 0x45a   : > { %v9385_v18 = vsel %vm3767_vm8, %v11689_v19, -1e+30  ;;  %v9391_v22 = vsel %vm3764_vm5, %v11691_v15, -1e+30  ;;  %v11693_v34 = vld [vmem:[#allocation90_spill] sm:$0xff]  ;;  %v11695_v30 = vld [vmem:[#allocation119_spill] sm:$0xff]  ;;  %v3968_v19 = vmax.f32 %v3967_v39, %v9354_v54  ;;  %v4033_v15 = vmax.f32 %v4032_v51, %v9374_v33  ;;  %4018 = vmax.xlane.f32.xlu1 %v4017_v40 }
 0x45b   : > { %11690 = vst [vmem:[#allocation208_spill] sm:$0xff] %v9385_v18  ;;  %11692 = vst [vmem:[#allocation209_spill] sm:$0xff] %v9391_v22  ;;  %v9396_v47 = vsel %vm3762_vm3, %v11693_v34, -1e+30  ;;  %v9402_v52 = vsel %vm3765_vm6, %v11695_v30, -1e+30 }
 0x45c   : > { %11694 = vst [vmem:[#allocation210_spill] sm:$0xff] %v9396_v47  ;;  %11696 = vst [vmem:[#allocation211_spill] sm:$0xff] %v9402_v52  ;;  %v11697_v10 = vld [vmem:[#allocation92_spill] sm:$0xff]  ;;  %v11699_v34 = vld [vmem:[#allocation61_spill] sm:$0xff]  ;;  %v3969_v54 = vmax.f32 %v3968_v19, %v9391_v22  ;;  %v4034_v5 = vmax.f32 %v4033_v15, %v9379_v6 }
 0x45d   : > { %v9411_v37 = vsel %vm3763_vm4, %v11697_v10, -1e+30  ;;  %v9416_v2 = vsel %vm3760_vm1, %v11699_v34, -1e+30  ;;  %v11701_v14 = vld [vmem:[#allocation63_spill] sm:$0xff]  ;;  %v11703_v39 = vld [vmem:[#allocation118_spill] sm:$0xff]  ;;  %v4048_v34 = vmax.f32 %v4047_v59, %v9396_v47 }
 0x45e   : > { %11698 = vst [vmem:[#allocation212_spill] sm:$0xff] %v9411_v37  ;;  %11700 = vst [vmem:[#allocation213_spill] sm:$0xff] %v9416_v2  ;;  %v9421_v30 = vsel %vm3761_vm2, %v11701_v14, -1e+30  ;;  %v9426_v51 = vsel %vm3766_vm7, %v11703_v39, -1e+30  ;;  %v3970_v19 = vmax.f32 %v3969_v54, %v9402_v52 }
 0x45f   : > { %11702 = vst [vmem:[#allocation214_spill] sm:$0xff] %v9421_v30  ;;  %11704 = vst [vmem:[#allocation215_spill] sm:$0xff] %v9426_v51  ;;  %v11705_v33 = vld [vmem:[#allocation120_spill] sm:$0xff]  ;;  %v11707_v25 = vld [vmem:[#allocation153_spill] sm:$0xff]  ;;  %v4049_v59 = vmax.f32 %v4048_v34, %v9411_v37  ;;  %v3984_v15 = vmax.f32 %v9416_v2, %v9421_v30 }
 0x460   : > { %v9431_v10 = vsel %vm3767_vm8, %v11705_v33, -1e+30  ;;  %v9439_v14 = vsel %vm3764_vm5, %v11707_v25, -1e+30  ;;  %v11709_v40 = vld [vmem:[#allocation155_spill] sm:$0xff]  ;;  %v11711_v26 = vld [vmem:[#allocation62_spill] sm:$0xff] }
 0x461   : > { %11706 = vst [vmem:[#allocation216_spill] sm:$0xff] %v9431_v10  ;;  %11708 = vst [vmem:[#allocation217_spill] sm:$0xff] %v9439_v14  ;;  %v9444_v39 = vsel %vm3765_vm6, %v11709_v40, -1e+30  ;;  %v9449_v33 = vsel %vm3762_vm3, %v11711_v26, -1e+30  ;;  %v4035_v40 = vmax.f32 %v4034_v5, %v9385_v18  ;;  %v4050_v37 = vmax.f32 %v4049_v59, %v9439_v14 }
 0x462   : > { %11710 = vst [vmem:[#allocation218_spill] sm:$0xff] %v9444_v39  ;;  %11712 = vst [vmem:[#allocation219_spill] sm:$0xff] %v9449_v33  ;;  %v11713_v6 = vld [vmem:[#allocation69_spill] sm:$0xff]  ;;  %v11714_v22 = vld [vmem:[#allocation154_spill] sm:$0xff]  ;;  %v3985_v5 = vmax.f32 %v3984_v15, %v9449_v33 }
 0x463   : > { %v9458_v25 = vsel %vm3760_vm1, %v11713_v6, -1e+30  ;;  %v9464_v47 = vsel %vm3766_vm7, %v11714_v22, -1e+30  ;;  %v11716_v26 = vld [vmem:[#allocation64_spill] sm:$0xff]  ;;  %v11718_v34 = vld [vmem:[#allocation71_spill] sm:$0xff]  ;;  %v3971_v6 = vmax.f32 %v3970_v19, %v9426_v51  ;;  %4036 = vmax.xlane.f32.xlu1 %v4035_v40  ;;  %v4051_v40 = vmax.f32 %v4050_v37, %v9444_v39 }
 0x464   : > { %11715 = vst [vmem:[#allocation220_spill] sm:$0xff] %v9464_v47  ;;  %v9469_v54 = vsel %vm3763_vm4, %v11716_v26, -1e+30  ;;  %v9474_v52 = vsel %vm3761_vm2, %v11718_v34, -1e+30  ;;  %v11720_v18 = vld [vmem:[#allocation70_spill] sm:$0xff] }
 0x465   : > { %11717 = vst [vmem:[#allocation221_spill] sm:$0xff] %v9469_v54  ;;  %11719 = vst [vmem:[#allocation222_spill] sm:$0xff] %v9474_v52  ;;  %v9482_v22 = vsel %vm3762_vm3, %v11720_v18, -1e+30  ;;  %v11722_v30 = vld [vmem:[#allocation156_spill] sm:$0xff]  ;;  %v11724_v2 = vld [vmem:[#allocation125_spill] sm:$0xff]  ;;  %v4002_v18 = vmax.f32 %v9458_v25, %v9474_v52  ;;  %v3972_v15 = vmax.f32 %v3971_v6, %v9431_v10 }
 0x466   : > { %11721 = vst [vmem:[#allocation223_spill] sm:$0xff] %v9482_v22  ;;  %v9487_v26 = vsel %vm3767_vm8, %v11722_v30, -1e+30  ;;  %v9492_v34 = vsel %vm3764_vm5, %v11724_v2, -1e+30  ;;  %v11726_v19 = vld [vmem:[#allocation72_spill] sm:$0xff]  ;;  %v3986_v30 = vmax.f32 %v3985_v5, %v9469_v54 }
 0x467   : > { %11723 = vst [vmem:[#allocation224_spill] sm:$0xff] %v9487_v26  ;;  %11725 = vst [vmem:[#allocation225_spill] sm:$0xff] %v9492_v34  ;;  %v9497_v59 = vsel %vm3763_vm4, %v11726_v19, -1e+30  ;;  %v11728_v14 = vld [vmem:[#allocation77_spill] sm:$0xff]  ;;  %v11729_v2 = vld [vmem:[#allocation127_spill] sm:$0xff]  ;;  %v4003_v6 = vmax.f32 %v4002_v18, %v9482_v22  ;;  %3973 = vmax.xlane.f32.xlu0 %v3972_v15 }
 0x468   : > { %11727 = vst [vmem:[#allocation226_spill] sm:$0xff] %v9497_v59  ;;  %v9507_v51 = vsel %vm3760_vm1, %v11728_v14, -1e+30  ;;  %v9512_v33 = vsel %vm3765_vm6, %v11729_v2, -1e+30  ;;  %v11730_v19 = vld [vmem:[#allocation126_spill] sm:$0xff]  ;;  %v4052_v14 = vmax.f32 %v4051_v40, %v9464_v47  ;;  %v3987_v39 = vmax.f32 %v3986_v30, %v9492_v34 }
 0x469   : > { %v9517_v52 = vsel %vm3766_vm7, %v11730_v19, -1e+30  ;;  %v11732_v37 = vld [vmem:[#allocation79_spill] sm:$0xff]  ;;  %v11734_v10 = vld [vmem:[#allocation133_spill] sm:$0xff]  ;;  %v11736_v54 = vld [vmem:[#allocation78_spill] sm:$0xff]  ;;  %v4004_v15 = vmax.f32 %v4003_v6, %v9497_v59 }
 0x46a   : > { %11731 = vst [vmem:[#allocation227_spill] sm:$0xff] %v9517_v52  ;;  %v9523_v5 = vsel %vm3761_vm2, %v11732_v37, -1e+30  ;;  %v9530_v2 = vsel %vm3764_vm5, %v11734_v10, -1e+30  ;;  %v11737_v18 = vld [vmem:[#allocation135_spill] sm:$0xff]  ;;  %v4053_v47 = vmax.f32 %v4052_v14, %v9487_v26 }
 0x46b   : > { %11733 = vst [vmem:[#allocation228_spill] sm:$0xff] %v9523_v5  ;;  %11735 = vst [vmem:[#allocation229_spill] sm:$0xff] %v9530_v2  ;;  %v9535_v19 = vsel %vm3762_vm3, %v11736_v54, -1e+30  ;;  %v9540_v37 = vsel %vm3765_vm6, %v11737_v18, -1e+30  ;;  %v4020_v10 = vmax.f32 %v9507_v51, %v9523_v5  ;;  %v3988_v54 = vmax.f32 %v3987_v39, %v9512_v33 }
 0x46c   : > { %11738 = vst [vmem:[#allocation230_spill] sm:$0xff] %v9540_v37  ;;  %v11739_v40 = vld [vmem:[#allocation80_spill] sm:$0xff]  ;;  %v11740_v34 = vld [vmem:[#allocation85_spill] sm:$0xff]  ;;  %v11741_v18 = vld [vmem:[#allocation87_spill] sm:$0xff]  ;;  %v4005_v5 = vmax.f32 %v4004_v15, %v9530_v2  ;;  %4054 = vmax.xlane.f32.xlu1 %v4053_v47 }
 0x46d   : > { %v9546_v30 = vsel %vm3763_vm4, %v11739_v40, -1e+30  ;;  %v9555_v22 = vsel %vm3760_vm1, %v11740_v34, -1e+30  ;;  %v9560_v6 = vsel %vm3761_vm2, %v11741_v18, -1e+30  ;;  %v4021_v14 = vmax.f32 %v4020_v10, %v9535_v19 }
 0x46e   : > { %v11742_v59 = vld [vmem:[#allocation128_spill] sm:$0xff]  ;;  %v3989_v39 = vmax.f32 %v3988_v54, %v9517_v52  ;;  %v9573_v34 = vsel %vm3766_vm7, %v11744_v0, -1e+30  ;;  %v9578_v18 = vsel %vm3764_vm5, %v11746_v21, -1e+30  ;;  %v11748_v26 = vld [vmem:[#allocation86_spill] sm:$0xff]  ;;  %v4006_v10 = vmax.f32 %v4005_v5, %v9540_v37 }
 0x46f   : > { %v9565_v40 = vsel %vm3767_vm8, %v11742_v59, -1e+30  ;;  %11745 = vst [vmem:[#allocation232_spill] sm:$0xff] %v9573_v34  ;;  %11747 = vst [vmem:[#allocation233_spill] sm:$0xff] %v9578_v18  ;;  %v9583_v59 = vsel %vm3762_vm3, %v11748_v26, -1e+30  ;;  %v4022_v54 = vmax.f32 %v4021_v14, %v9546_v30  ;;  %v4038_v0 = vmax.f32 %v9555_v22, %v9560_v6 }
 0x470   : > { %11743 = vst [vmem:[#allocation231_spill] sm:$0xff] %v9565_v40  ;;  %v11749_v15 = vld [vmem:[#allocation136_spill] sm:$0xff]  ;;  %v3990_v21 = vmax.f32 %v3989_v39, %v9565_v40  ;;  %v11751_v2 = vld [vmem:[#allocation143_spill] sm:$0xff]  ;;  %v7831_v37 = vmov 0   ;;  %v11754_v39 = vld [vmem:[#allocation142_spill] sm:$0xff] }
 0x471   : > { %v9588_v47 = vsel %vm3767_vm8, %v11749_v15, -1e+30  ;;  %v9598_v50 = vsel %vm3765_vm6, %v11751_v2, -1e+30  ;;  %v11753_v26 = vld [vmem:[#allocation88_spill] sm:$0xff]  ;;  %v4007_v15 = vmax.f32 %v4006_v10, %v9573_v34  ;;  %v4023_v5 = vmax.f32 %v4022_v54, %v9578_v18  ;;  %6980 = vset.pattern.permute.xlu0 %v7831_v37  ;;  %6981 = vset.pattern.permute.xlu1 %v7831_v37  ;;  %v11756_v40 = vld [vmem:[#allocation149_spill] sm:$0xff] }
 0x472   : > { %11750 = vst [vmem:[#allocation234_spill] sm:$0xff] %v9588_v47  ;;  %11752 = vst [vmem:[#allocation235_spill] sm:$0xff] %v9598_v50  ;;  %v9603_v52 = vsel %vm3763_vm4, %v11753_v26, -1e+30  ;;  %v4039_v14 = vmax.f32 %v4038_v0, %v9583_v59  ;;  %3991 = vmax.xlane.f32.xlu0 %v3990_v21  ;;  %v9611_v2 = vsel %vm3766_vm7, %v11754_v39, -1e+30 }
 0x473   : > { %11755 = vst [vmem:[#allocation236_spill] sm:$0xff] %v9611_v2  ;;  %v9616_v11 = vsel %vm3764_vm5, %v11756_v40, -1e+30  ;;  %v4008_v10 = vmax.f32 %v4007_v15, %v9588_v47  ;;  %v4024_v54 = vmax.f32 %v4023_v5, %v9598_v50  ;;  %v11758_v26 = vld [vmem:[#allocation144_spill] sm:$0xff]  ;;  %v11760_v21 = vld [vmem:[#allocation151_spill] sm:$0xff]  ;;  %v11762_v15 = vld [vmem:[#allocation150_spill] sm:$0xff] }
 0x474   : > { %11757 = vst [vmem:[#allocation237_spill] sm:$0xff] %v9616_v11  ;;  %v4040_v0 = vmax.f32 %v4039_v14, %v9603_v52  ;;  %v9624_v37 = vsel %vm3767_vm8, %v11758_v26, -1e+30  ;;  %v9629_v39 = vsel %vm3765_vm6, %v11760_v21, -1e+30  ;;  %v11764_v50 = vld [vmem:[#allocation152_spill] sm:$0xff] }
 0x475   : > { %11759 = vst [vmem:[#allocation238_spill] sm:$0xff] %v9624_v37  ;;  %11761 = vst [vmem:[#allocation239_spill] sm:$0xff] %v9629_v39  ;;  %v4025_v36 = vmax.f32 %v4024_v54, %v9611_v2  ;;  %v9636_v5 = vsel %vm3766_vm7, %v11762_v15, -1e+30  ;;  %v9643_v61 = vsel %vm3767_vm8, %v11764_v50, -1e+30 }
 0x476   : > { %v4041_v40 = vmax.f32 %v4040_v0, %v9616_v11  ;;  %4009 = vmax.xlane.f32.xlu0 %v4008_v10  ;;  %11763 = vst [vmem:[#allocation240_spill] sm:$0xff] %v9636_v5  ;;  %11765 = vst [vmem:[#allocation241_spill] sm:$0xff] %v9643_v61  ;;  %v9647_v10 = vld [vmem:[#allocation3 + $0x10] sm:$0xff]  ;;  %v9661_v15 = vld [vmem:[#allocation3 + $0x18] sm:$0xff] }
 0x477   : > { %v4026_v14 = vmax.f32 %v4025_v36, %v9624_v37  ;;  %11766 = vst [vmem:[#allocation242_spill] sm:$0xff] %v9647_v10  ;;  %v9652_v36 = vld [vmem:[#allocation3] sm:$0xff]  ;;  %11770 = vst [vmem:[#allocation246_spill] sm:$0xff] %v9661_v15 }
 0x478   : > { %v4042_v26 = vmax.f32 %v4041_v40, %v9629_v39  ;;  %11768 = vst [vmem:[#allocation244_spill] sm:$0xff] %v9652_v36  ;;  %v11816_v39 = vld [vmem:[#allocation169_spill] sm:$0xff] }
 0x47a   : > { %v4043_v21 = vmax.f32 %v4042_v26, %v9636_v5  ;;  %4027 = vmax.xlane.f32.xlu0 %v4026_v14  ;;  %v9680_v14 = vld [vmem:[#allocation3 + $0x28] sm:$0xff] }
 0x47b   : > { %11774 = vst [vmem:[#allocation250_spill] sm:$0xff] %v9680_v14 }
 0x47c   : > { %v4044_v54 = vmax.f32 %v4043_v21, %v9643_v61 }
 0x47e   : > { %4045 = vmax.xlane.f32.xlu0 %v4044_v54  ;;  %v9671_v54 = vld [vmem:[#allocation3 + $0x8] sm:$0xff] }
 0x47f   : > { %11772 = vst [vmem:[#allocation248_spill] sm:$0xff] %v9671_v54 }
 0x4c7   : > { %v3938_v27 = vpop.xlane.xlu1 %3937 }
 0x4c8   : > { %v9650_v0 = vmax.f32 %v9647_v10, %v3938_v27 }
 0x4ca   : > { %11767 = vst [vmem:[#allocation243_spill] sm:$0xff] %v9650_v0  ;;  %4795 = vst.msk [vmem:[#allocation3 + $0x10] sm:$0xff] %vm4776_vm9, %v9650_v0  ;;  %v3920_v50 = vpop.xlane.xlu0 %3919 }
 0x4cb   : > { %v9659_v40 = vmax.f32 %v9652_v36, %v3920_v50 }
 0x4cd   : > { %11769 = vst [vmem:[#allocation245_spill] sm:$0xff] %v9659_v40  ;;  %4793 = vst.msk [vmem:[#allocation3] sm:$0xff] %vm4776_vm9, %v9659_v40  ;;  %4154 = vperm.xlu0 %6980, %v9659_v40   ;;  %v3947_v26 = vpop.xlane.xlu1 %3946  ;;  %v9700_v40 = vld [vmem:[#allocation3 + $0x48] sm:$0xff] }
 0x4ce   : > { %v9669_v21 = vmax.f32 %v9661_v15, %v3947_v26  ;;  %v9690_v15 = vld [vmem:[#allocation3 + $0x38] sm:$0xff]  ;;  %11778 = vst [vmem:[#allocation254_spill] sm:$0xff] %v9700_v40 }
 0x4cf   : > { %11776 = vst [vmem:[#allocation252_spill] sm:$0xff] %v9690_v15 }
 0x4d0   : > { %11771 = vst [vmem:[#allocation247_spill] sm:$0xff] %v9669_v21  ;;  %4796 = vst.msk [vmem:[#allocation3 + $0x18] sm:$0xff] %vm4776_vm9, %v9669_v21 }
 0x4d2   : > { %v3929_v50 = vpop.xlane.xlu0 %3928 }
 0x4d3   : > { %v9678_v1 = vmax.f32 %v9671_v54, %v3929_v50 }
 0x4d5   : > { %11773 = vst [vmem:[#allocation249_spill] sm:$0xff] %v9678_v1  ;;  %4794 = vst.msk [vmem:[#allocation3 + $0x8] sm:$0xff] %vm4776_vm9, %v9678_v1  ;;  %4159 = vperm.xlu1 %6981, %v9678_v1   ;;  %v3965_v26 = vpop.xlane.xlu1 %3964  ;;  %v9710_v1 = vld [vmem:[#allocation3 + $0x20] sm:$0xff] }
 0x4d6   : > { %v9688_v27 = vmax.f32 %v9680_v14, %v3965_v26  ;;  %11780 = vst [vmem:[#allocation256_spill] sm:$0xff] %v9710_v1 }
 0x4d8   : > { %11775 = vst [vmem:[#allocation251_spill] sm:$0xff] %v9688_v27  ;;  %4798 = vst.msk [vmem:[#allocation3 + $0x28] sm:$0xff] %vm4776_vm9, %v9688_v27 }
 0x4d9   : > { %4164 = vperm.xlu1 %6981, %v9650_v0   ;;  %v3983_v10 = vpop.xlane.xlu1 %3982 }
 0x4da   : > { %v9698_v54 = vmax.f32 %v9690_v15, %v3983_v10  ;;  %v9720_v15 = vld [vmem:[#allocation3 + $0x58] sm:$0xff] }
 0x4db   : > { %11782 = vst [vmem:[#allocation258_spill] sm:$0xff] %v9720_v15 }
 0x4dc   : > { %11777 = vst [vmem:[#allocation253_spill] sm:$0xff] %v9698_v54  ;;  %4800 = vst.msk [vmem:[#allocation3 + $0x38] sm:$0xff] %vm4776_vm9, %v9698_v54 }
 0x4dd   : > { %4169 = vperm.xlu1 %6981, %v9669_v21  }
 0x4de   : > { %v4001_v50 = vpop.xlane.xlu1 %4000 }
 0x4df   : > { %v9708_v14 = vmax.f32 %v9700_v40, %v4001_v50 }
 0x4e1   : > { %11779 = vst [vmem:[#allocation255_spill] sm:$0xff] %v9708_v14  ;;  %4802 = vst.msk [vmem:[#allocation3 + $0x48] sm:$0xff] %vm4776_vm9, %v9708_v14  ;;  %4199 = vperm.xlu0 %6980, %v9708_v14  }
 0x4e2   : > { %v3956_v0 = vpop.xlane.xlu0 %3955 }
 0x4e3   : > { %v9718_v26 = vmax.f32 %v9710_v1, %v3956_v0  ;;  %v9735_v0 = vld [vmem:[#allocation3 + $0x68] sm:$0xff] }
 0x4e4   : > { %11784 = vst [vmem:[#allocation260_spill] sm:$0xff] %v9735_v0 }
 0x4e5   : > { %11781 = vst [vmem:[#allocation257_spill] sm:$0xff] %v9718_v26  ;;  %4797 = vst.msk [vmem:[#allocation3 + $0x20] sm:$0xff] %vm4776_vm9, %v9718_v26  ;;  %4174 = vperm.xlu1 %6981, %v9718_v26   ;;  %v9741_v26 = vld [vmem:[#allocation3 + $0x30] sm:$0xff] }
 0x4e6   : > { %11786 = vst [vmem:[#allocation262_spill] sm:$0xff] %v9741_v26 }
 0x4e7   : > { %v4019_v10 = vpop.xlane.xlu1 %4018 }
 0x4e8   : > { %v9728_v40 = vmax.f32 %v9720_v15, %v4019_v10  ;;  %v9751_v15 = vld [vmem:[#allocation3 + $0x78] sm:$0xff] }
 0x4e9   : > { %4179 = vperm.xlu1 %6981, %v9688_v27   ;;  %11788 = vst [vmem:[#allocation264_spill] sm:$0xff] %v9751_v15  ;;  %v9761_v27 = vld [vmem:[#allocation3 + $0x40] sm:$0xff] }
 0x4ea   : > { %11783 = vst [vmem:[#allocation259_spill] sm:$0xff] %v9728_v40  ;;  %4804 = vst.msk [vmem:[#allocation3 + $0x58] sm:$0xff] %vm4776_vm9, %v9728_v40  ;;  %4209 = vperm.xlu0 %6980, %v9728_v40  }
 0x4eb   : > { %11790 = vst [vmem:[#allocation266_spill] sm:$0xff] %v9761_v27 }
 0x4f0   : > { %v4037_v50 = vpop.xlane.xlu1 %4036 }
 0x4f1   : > { %v9739_v1 = vmax.f32 %v9735_v0, %v4037_v50 }
 0x4f3   : > { %11785 = vst [vmem:[#allocation261_spill] sm:$0xff] %v9739_v1  ;;  %4806 = vst.msk [vmem:[#allocation3 + $0x68] sm:$0xff] %vm4776_vm9, %v9739_v1  ;;  %4219 = vperm.xlu0 %6980, %v9739_v1  }
 0x4f4   : > { %v3974_v14 = vpop.xlane.xlu0 %3973 }
 0x4f5   : > { %v9749_v40 = vmax.f32 %v9741_v26, %v3974_v14 }
 0x4f7   : > { %11787 = vst [vmem:[#allocation263_spill] sm:$0xff] %v9749_v40  ;;  %4799 = vst.msk [vmem:[#allocation3 + $0x30] sm:$0xff] %vm4776_vm9, %v9749_v40  ;;  %4184 = vperm.xlu1 %6981, %v9749_v40   ;;  %v9772_v40 = vld [vmem:[#allocation3 + $0x50] sm:$0xff] }
 0x4f8   : > { %11792 = vst [vmem:[#allocation268_spill] sm:$0xff] %v9772_v40 }
 0x4f9   : > { %v4055_v10 = vpop.xlane.xlu1 %4054 }
 0x4fa   : > { %v9759_v0 = vmax.f32 %v9751_v15, %v4055_v10 }
 0x4fb   : > { %4189 = vperm.xlu1 %6981, %v9698_v54   ;;  %v9792_v54 = vld [vmem:[#allocation3 + $0x70] sm:$0xff] }
 0x4fc   : > { %11789 = vst [vmem:[#allocation265_spill] sm:$0xff] %v9759_v0  ;;  %4808 = vst.msk [vmem:[#allocation3 + $0x78] sm:$0xff] %vm4776_vm9, %v9759_v0  ;;  %4229 = vperm.xlu0 %6980, %v9759_v0   ;;  %v9782_v0 = vld [vmem:[#allocation3 + $0x60] sm:$0xff] }
 0x4fd   : > { %11794 = vst [vmem:[#allocation270_spill] sm:$0xff] %v9782_v0  ;;  %11796 = vst [vmem:[#allocation272_spill] sm:$0xff] %v9792_v54 }
 0x4ff   : > { %v3992_v50 = vpop.xlane.xlu0 %3991 }
 0x500   : > { %v9770_v1 = vmax.f32 %v9761_v27, %v3992_v50 }
 0x502   : > { %11791 = vst [vmem:[#allocation267_spill] sm:$0xff] %v9770_v1  ;;  %4801 = vst.msk [vmem:[#allocation3 + $0x40] sm:$0xff] %vm4776_vm9, %v9770_v1  ;;  %4194 = vperm.xlu1 %6981, %v9770_v1  }
 0x503   : > { %v4010_v14 = vpop.xlane.xlu0 %4009 }
 0x504   : > { %v9780_v15 = vmax.f32 %v9772_v40, %v4010_v14 }
 0x506   : > { %11793 = vst [vmem:[#allocation269_spill] sm:$0xff] %v9780_v15  ;;  %4803 = vst.msk [vmem:[#allocation3 + $0x50] sm:$0xff] %vm4776_vm9, %v9780_v15  ;;  %4204 = vperm.xlu1 %6981, %v9780_v15  }
 0x507   : > { %v4028_v10 = vpop.xlane.xlu0 %4027 }
 0x508   : > { %v9790_v27 = vmax.f32 %v9782_v0, %v4028_v10 }
 0x50a   : > { %11795 = vst [vmem:[#allocation271_spill] sm:$0xff] %v9790_v27  ;;  %4805 = vst.msk [vmem:[#allocation3 + $0x60] sm:$0xff] %vm4776_vm9, %v9790_v27  ;;  %4214 = vperm.xlu1 %6981, %v9790_v27  }
 0x50b   : > { %v4046_v50 = vpop.xlane.xlu0 %4045 }
 0x50c   : > { %v9800_v40 = vmax.f32 %v9792_v54, %v4046_v50 }
 0x50e   : > { %11797 = vst [vmem:[#allocation273_spill] sm:$0xff] %v9800_v40  ;;  %4807 = vst.msk [vmem:[#allocation3 + $0x70] sm:$0xff] %vm4776_vm9, %v9800_v40  ;;  %4224 = vperm.xlu1 %6981, %v9800_v40  }
 0x54c   : > { %v4155_v10 = vpop.permute.xlu0 %4154 }
 0x54d   : > { %v4232_v14 = vsub.f32 %v8902_v43, %v4155_v10  ;;  %v4233_v0 = vsub.f32 %v8907_v57, %v4155_v10  ;;  %v4234_v1 = vsub.f32 %v8915_v32, %v4155_v10  ;;  %v4235_v27 = vsub.f32 %v8933_v20, %v4155_v10 }
 0x54e   : > { %v4236_v15 = vsub.f32 %v8965_v7, %v4155_v10  ;;  %v4237_v54 = vsub.f32 %v8970_v23, %v4155_v10 }
 0x54f   : > { %v4360_v26 = vmul.f32 1.442695, %v4232_v14  ;;  %v4362_v50 = vmul.f32 1.442695, %v4233_v0  ;;  %v4364_v21 = vmul.f32 1.442695, %v4234_v1  ;;  %v4238_v1 = vsub.f32 %v8994_v42, %v4155_v10 }
 0x550   : > { %v4366_v36 = vmul.f32 1.442695, %v4235_v27  ;;  %v4368_v57 = vmul.f32 1.442695, %v4236_v15  ;;  %v4370_v7 = vmul.f32 1.442695, %v4237_v54 }
 0x551   : > { %6982 = vpow2.f32 %v4360_v26  ;;  %v4372_v42 = vmul.f32 1.442695, %v4238_v1 }
 0x552   : > { %6984 = vpow2.f32 %v4362_v50 }
 0x553   : > { %6986 = vpow2.f32 %v4364_v21 }
 0x554   : > { %v9813_v40 = vpop.permute.xlu1 %4159  ;;  %6988 = vpow2.f32 %v4366_v36 }
 0x555   : > { %v4240_v43 = vsub.f32 %v8983_v60, %v9813_v40  ;;  %v4241_v32 = vsub.f32 %v8988_v4, %v9813_v40  ;;  %v4242_v20 = vsub.f32 %v9016_v31, %v9813_v40  ;;  %6990 = vpow2.f32 %v4368_v57 }
 0x556   : > { %v4239_v31 = vsub.f32 %v8999_v35, %v4155_v10  ;;  %6992 = vpow2.f32 %v4370_v7  ;;  %v4245_v11 = vsub.f32 %v11816_v39, %v9813_v40 }
 0x557   : > { %v4376_v26 = vmul.f32 1.442695, %v4240_v43  ;;  %v4378_v23 = vmul.f32 1.442695, %v4241_v32  ;;  %v4380_v27 = vmul.f32 1.442695, %v4242_v20 }
 0x558   : > { %v9822_v0 = vpop.permute.xlu1 %4164  ;;  %v4374_v32 = vmul.f32 1.442695, %v4239_v31 }
 0x559   : > { %v4248_v21 = vsub.f32 %v8878_v24, %v9822_v0  ;;  %v4249_v60 = vsub.f32 %v8883_v49, %v9822_v0  ;;  %v4250_v4 = vsub.f32 %v8888_v12, %v9822_v0  ;;  %6994 = vpow2.f32 %v4376_v26 }
 0x55a   : > { %6996 = vpow2.f32 %v4378_v23 }
 0x55b   : > { %v6983_v15 = vpop.eup %6982  ;;  %v4392_v54 = vmul.f32 1.442695, %v4248_v21  ;;  %v4394_v24 = vmul.f32 1.442695, %v4249_v60  ;;  %6998 = vpow2.f32 %v4380_v27  ;;  %v4396_v12 = vmul.f32 1.442695, %v4250_v4 }
 0x55c   : > { %v9831_v36 = vpop.permute.xlu1 %4169  ;;  %v6985_v14 = vpop.eup %6984  ;;  %7000 = vpow2.f32 %v4372_v42 }
 0x55d   : > { %v4256_v49 = vsub.f32 %v8938_v16, %v9831_v36  ;;  %v4257_v50 = vsub.f32 %v8943_v63, %v9831_v36  ;;  %v4258_v35 = vsub.f32 %v8959_v48, %v9831_v36  ;;  %v4616_v10 = vadd.f32 %v6985_v14, %v6983_v15  ;;  %v6987_v43 = vpop.eup %6986 }
 0x55e   : > { %7002 = vpow2.f32 %v4392_v54  ;;  %v6989_v26 = vpop.eup %6988 }
 0x55f   : > { %v4408_v20 = vmul.f32 1.442695, %v4256_v49  ;;  %v4617_v1 = vadd.f32 %v6987_v43, %v4616_v10  ;;  %7004 = vpow2.f32 %v4394_v24  ;;  %v4410_v7 = vmul.f32 1.442695, %v4257_v50  ;;  %v6991_v4 = vpop.eup %6990 }
 0x560   : > { %v9839_v57 = vpop.permute.xlu0 %4199  ;;  %7006 = vpow2.f32 %v4396_v12  ;;  %v4412_v48 = vmul.f32 1.442695, %v4258_v35 }
 0x561   : > { %11798 = vst [vmem:[#allocation274_spill] sm:$0xff] %v9839_v57  ;;  %v4304_v16 = vsub.f32 %v9123_v53, %v9839_v57  ;;  %v4305_v63 = vsub.f32 %v9139_v44, %v9839_v57  ;;  %v4306_v23 = vsub.f32 %v9151_v41, %v9839_v57  ;;  %7008 = vpow2.f32 %v4374_v32  ;;  %v6993_v44 = vpop.eup %6992 }
 0x562   : > { %v4618_v27 = vadd.f32 %v6989_v26, %v4617_v1  ;;  %7010 = vpow2.f32 %v4408_v20 }
 0x563   : > { %v4504_v60 = vmul.f32 1.442695, %v4304_v16  ;;  %7012 = vpow2.f32 %v4410_v7  ;;  %v4506_v15 = vmul.f32 1.442695, %v4305_v63  ;;  %v9855_v41 = vpop.eup %6994  ;;  %v4508_v54 = vmul.f32 1.442695, %v4306_v23 }
 0x564   : > { %v9847_v21 = vpop.permute.xlu1 %4174  ;;  %7014 = vpow2.f32 %v4412_v48  ;;  %v9859_v24 = vpop.eup %6996  ;;  %v4619_v50 = vadd.f32 %v6991_v4, %v4618_v27 }
 0x565   : > { %v4264_v31 = vsub.f32 %v9171_v45, %v9847_v21  ;;  %v4265_v53 = vsub.f32 %v9176_v13, %v9847_v21  ;;  %v4266_v42 = vsub.f32 %v9204_v56, %v9847_v21  ;;  %7016 = vpow2.f32 %v4504_v60  ;;  %v9863_v13 = vpop.eup %6998 }
 0x566   : > { %v7001_v43 = vpop.eup %7000  ;;  %7018 = vpow2.f32 %v4506_v15  ;;  %v4620_v26 = vadd.f32 %v6993_v44, %v4619_v50 }
 0x567   : > { %v4424_v49 = vmul.f32 1.442695, %v4264_v31  ;;  %v4426_v12 = vmul.f32 1.442695, %v4265_v53  ;;  %v4428_v32 = vmul.f32 1.442695, %v4266_v42  ;;  %7020 = vpow2.f32 %v4508_v54 }
 0x568   : > { %v9861_v45 = vpop.permute.xlu1 %4179  ;;  %v9873_v1 = vpop.eup %7002  ;;  %v4621_v53 = vadd.f32 %v7001_v43, %v4620_v26 }
 0x569   : > { %v9857_v14 = vpop.permute.xlu0 %4209  ;;  %v4272_v56 = vsub.f32 %v9036_v46, %v9861_v45  ;;  %v4273_v35 = vsub.f32 %v9041_v55, %v9861_v45  ;;  %v4274_v10 = vsub.f32 %v9065_v62, %v9861_v45  ;;  %v9879_v55 = vpop.eup %7004  ;;  %7022 = vpow2.f32 %v4424_v49 }
 0x56a   : > { %11799 = vst [vmem:[#allocation275_spill] sm:$0xff] %v9857_v14  ;;  %v4320_v20 = vsub.f32 %v9224_v58, %v9857_v14  ;;  %v4321_v16 = vsub.f32 %v9229_v17, %v9857_v14  ;;  %v4322_v46 = vsub.f32 %v9237_v8, %v9857_v14  ;;  %v9883_v48 = vpop.eup %7006  ;;  %7024 = vpow2.f32 %v4426_v12 }
 0x56b   : > { %v4440_v7 = vmul.f32 1.442695, %v4272_v56  ;;  %v4442_v62 = vmul.f32 1.442695, %v4273_v35  ;;  %v4444_v58 = vmul.f32 1.442695, %v4274_v10  ;;  %v7009_v60 = vpop.eup %7008  ;;  %7026 = vpow2.f32 %v4428_v32 }
 0x56c   : > { %v4536_v17 = vmul.f32 1.442695, %v4320_v20  ;;  %v9887_v27 = vpop.eup %7010  ;;  %v4538_v8 = vmul.f32 1.442695, %v4321_v16  ;;  %v4540_v4 = vmul.f32 1.442695, %v4322_v46 }
 0x56d   : > { %7028 = vpow2.f32 %v4440_v7  ;;  %v9891_v42 = vpop.eup %7012  ;;  %v11802_v35 = vld [vmem:[#allocation198_spill] sm:$0xff]  ;;  %v11805_v16 = vld [vmem:[#allocation173_spill] sm:$0xff] }
 0x56e   : > { %7030 = vpow2.f32 %v4442_v62  ;;  %v9899_v54 = vpop.eup %7014 }
 0x56f   : > { %7032 = vpow2.f32 %v4444_v58  ;;  %v9903_v12 = vpop.eup %7016  ;;  %v11807_v58 = vld [vmem:[#allocation174_spill] sm:$0xff] }
 0x570   : > { %11801 = vst [vmem:[#allocation277_spill] sm:$0xff] %v9903_v12  ;;  %7034 = vpow2.f32 %v4536_v17  ;;  %v9911_v32 = vpop.eup %7018 }
 0x571   : > { %7036 = vpow2.f32 %v4538_v8  ;;  %11803 = vst [vmem:[#allocation198_spill] sm:$0xff] %v9911_v32  ;;  %v9917_v62 = vpop.eup %7020  ;;  %v11808_v8 = vld [vmem:[#allocation204_spill] sm:$0xff] }
 0x572   : > { %v9881_v63 = vpop.permute.xlu0 %4219  ;;  %7038 = vpow2.f32 %v4540_v4 }
 0x573   : > { %11800 = vst [vmem:[#allocation276_spill] sm:$0xff] %v9881_v63  ;;  %v4336_v23 = vsub.f32 %v9273_v3, %v9881_v63  ;;  %v4337_v49 = vsub.f32 %v9278_v29, %v9881_v63  ;;  %v11804_v29 = vld [vmem:[#allocation170_spill] sm:$0xff]  ;;  %v9921_v17 = vpop.eup %7022 }
 0x574   : > { %11806 = vst [vmem:[#allocation170_spill] sm:$0xff] %v9917_v62 }
 0x575   : > { %v4568_v50 = vmul.f32 1.442695, %v4336_v23  ;;  %v4570_v26 = vmul.f32 1.442695, %v4337_v49 }
 0x576   : > { %v9889_v31 = vpop.permute.xlu1 %4184 }
 0x577   : > { %v4280_v44 = vsub.f32 %v9315_v38, %v9889_v31  ;;  %v4281_v3 = vsub.f32 %v9331_v28, %v9889_v31  ;;  %v4282_v15 = vsub.f32 %v9343_v9, %v9889_v31  ;;  %v4338_v38 = vsub.f32 %v11802_v35, %v9881_v63 }
 0x578   : > { %v4622_v9 = vadd.f32 %v7009_v60, %v4621_v53  ;;  %7040 = vpow2.f32 %v4568_v50  ;;  %v9925_v53 = vpop.eup %7024 }
 0x579   : > { %v4456_v56 = vmul.f32 1.442695, %v4280_v44  ;;  %v4458_v10 = vmul.f32 1.442695, %v4281_v3  ;;  %v4460_v20 = vmul.f32 1.442695, %v4282_v15  ;;  %v9931_v49 = vpop.eup %7026 }
 0x57a   : > { %v9907_v28 = vpop.permute.xlu1 %4189  ;;  %4623 = vadd.xlane.f32.xlu1 %v4622_v9  ;;  %v4572_v60 = vmul.f32 1.442695, %v4338_v38  ;;  %v11809_v3 = vld [vmem:[#allocation205_spill] sm:$0xff]  ;;  %v11810_v9 = vld [vmem:[#allocation210_spill] sm:$0xff]  ;;  %v9935_v38 = vpop.eup %7028 }
 0x57b   : > { %v9909_v43 = vpop.permute.xlu0 %4229  ;;  %v4288_v7 = vsub.f32 %v11804_v29, %v9907_v28  ;;  %v4289_v46 = vsub.f32 %v11805_v16, %v9907_v28  ;;  %v4290_v23 = vsub.f32 %v11807_v58, %v9907_v28  ;;  %7042 = vpow2.f32 %v4456_v56  ;;  %v11811_v16 = vld [vmem:[#allocation213_spill] sm:$0xff]  ;;  %v11812_v58 = vld [vmem:[#allocation166_spill] sm:$0xff] }
 0x57c   : > { %v4352_v4 = vsub.f32 %v11808_v8, %v9909_v43  ;;  %7044 = vpow2.f32 %v4458_v10  ;;  %v4353_v15 = vsub.f32 %v11809_v3, %v9909_v43  ;;  %v4354_v56 = vsub.f32 %v11810_v9, %v9909_v43 }
 0x57d   : > { %v4472_v44 = vmul.f32 1.442695, %v4288_v7  ;;  %7046 = vpow2.f32 %v4460_v20  ;;  %v4474_v35 = vmul.f32 1.442695, %v4289_v46  ;;  %v4476_v29 = vmul.f32 1.442695, %v4290_v23  ;;  %v9939_v7 = vpop.eup %7030 }
 0x57e   : > { %7048 = vpow2.f32 %v4570_v26  ;;  %v4243_v8 = vsub.f32 %v11812_v58, %v9813_v40  ;;  %v4600_v3 = vmul.f32 1.442695, %v4352_v4  ;;  %v9943_v61 = vpop.eup %7032  ;;  %v4602_v20 = vmul.f32 1.442695, %v4353_v15  ;;  %v11813_v46 = vld [vmem:[#allocation214_spill] sm:$0xff]  ;;  %v11815_v23 = vld [vmem:[#allocation168_spill] sm:$0xff] }
 0x57f   : > { %7050 = vpow2.f32 %v4572_v60  ;;  %v9947_v5 = vpop.eup %7034  ;;  %v4604_v26 = vmul.f32 1.442695, %v4354_v56  ;;  %v11818_v60 = vld [vmem:[#allocation219_spill] sm:$0xff]  ;;  %v11821_v56 = vld [vmem:[#allocation157_spill] sm:$0xff] }
 0x580   : > { %7052 = vpow2.f32 %v4472_v44  ;;  %11814 = vst [vmem:[#allocation173_spill] sm:$0xff] %v9947_v5  ;;  %v9953_v58 = vpop.eup %7036  ;;  %v11819_v15 = vld [vmem:[#allocation171_spill] sm:$0xff]  ;;  %v4251_v2 = vsub.f32 %v11821_v56, %v9822_v0 }
 0x581   : > { %v9929_v50 = vpop.permute.xlu1 %4194  ;;  %7054 = vpow2.f32 %v4474_v35  ;;  %11817 = vst [vmem:[#allocation174_spill] sm:$0xff] %v9953_v58  ;;  %v9959_v37 = vpop.eup %7038  ;;  %v4382_v35 = vmul.f32 1.442695, %v4243_v8 }
 0x582   : > { %v4296_v10 = vsub.f32 %v11811_v16, %v9929_v50  ;;  %v4297_v9 = vsub.f32 %v11813_v46, %v9929_v50  ;;  %v4244_v16 = vsub.f32 %v11815_v23, %v9813_v40  ;;  %7056 = vpow2.f32 %v4476_v29  ;;  %11820 = vst [vmem:[#allocation204_spill] sm:$0xff] %v9959_v37  ;;  %v11822_v23 = vld [vmem:[#allocation175_spill] sm:$0xff]  ;;  %v9967_v29 = vpop.eup %7040 }
 0x583   : > { %v4298_v4 = vsub.f32 %v11818_v60, %v9929_v50  ;;  %v4246_v46 = vsub.f32 %v11819_v15, %v9813_v40  ;;  %7058 = vpow2.f32 %v4600_v3  ;;  %v4247_v39 = vsub.f32 %v11822_v23, %v9813_v40  ;;  %11823 = vst [vmem:[#allocation205_spill] sm:$0xff] %v9967_v29  ;;  %v11824_v15 = vld [vmem:[#allocation162_spill] sm:$0xff] }
 0x584   : > { %v4488_v44 = vmul.f32 1.442695, %v4296_v10  ;;  %7060 = vpow2.f32 %v4602_v20  ;;  %v4490_v60 = vmul.f32 1.442695, %v4297_v9  ;;  %v4259_v58 = vsub.f32 %v11824_v15, %v9831_v36  ;;  %v11825_v29 = vld [vmem:[#allocation158_spill] sm:$0xff] }
 0x585   : > { %v9965_v5 = vpop.permute.xlu1 %4204  ;;  %v9969_v10 = vpop.eup %7042  ;;  %7062 = vpow2.f32 %v4604_v26  ;;  %v4384_v8 = vmul.f32 1.442695, %v4244_v16  ;;  %v4386_v37 = vmul.f32 1.442695, %v4245_v11  ;;  %v4492_v3 = vmul.f32 1.442695, %v4298_v4 }
 0x586   : > { %v9973_v18 = vpop.eup %7044  ;;  %7064 = vpow2.f32 %v4488_v44  ;;  %v4388_v56 = vmul.f32 1.442695, %v4246_v46  ;;  %v4312_v40 = vsub.f32 %v9458_v25, %v9965_v5  ;;  %v4398_v20 = vmul.f32 1.442695, %v4251_v2  ;;  %v11827_v11 = vld [vmem:[#allocation182_spill] sm:$0xff]  ;;  %v11829_v44 = vld [vmem:[#allocation159_spill] sm:$0xff] }
 0x587   : > { %v9977_v23 = vpop.eup %7046  ;;  %7066 = vpow2.f32 %v4382_v35  ;;  %v4390_v9 = vmul.f32 1.442695, %v4247_v39  ;;  %v4252_v62 = vsub.f32 %v11825_v29, %v9822_v0  ;;  %v4307_v26 = vsub.f32 %v11827_v11, %v9839_v57  ;;  %v11828_v16 = vld [vmem:[#allocation222_spill] sm:$0xff]  ;;  %v11831_v35 = vld [vmem:[#allocation188_spill] sm:$0xff]  ;;  %v11833_v11 = vld [vmem:[#allocation223_spill] sm:$0xff] }
 0x588   : > { %v9981_v15 = vpop.eup %7048  ;;  %7068 = vpow2.f32 %v4490_v60  ;;  %v4313_v4 = vsub.f32 %v11828_v16, %v9965_v5  ;;  %v4253_v25 = vsub.f32 %v11829_v44, %v9822_v0  ;;  %v9991_v2 = vmul.f32 1.442695, %v4259_v58  ;;  %v11832_v29 = vld [vmem:[#allocation172_spill] sm:$0xff] }
 0x589   : > { %11826 = vst [vmem:[#allocation210_spill] sm:$0xff] %v9981_v15  ;;  %v9989_v46 = vpop.eup %7050  ;;  %v4267_v39 = vsub.f32 %v11831_v35, %v9847_v21  ;;  %v4275_v15 = vsub.f32 %v11832_v29, %v9861_v45  ;;  %7070 = vpow2.f32 %v4384_v8  ;;  %v4625_v60 = vadd.f32 %v9859_v24, %v9855_v41  ;;  %v11834_v58 = vld [vmem:[#allocation192_spill] sm:$0xff]  ;;  %v11836_v8 = vld [vmem:[#allocation161_spill] sm:$0xff]  ;;  %v11837_v24 = vld [vmem:[#allocation203_spill] sm:$0xff] }
 0x58a   : > { %11830 = vst [vmem:[#allocation213_spill] sm:$0xff] %v9989_v46  ;;  %v9997_v47 = vpop.eup %7052  ;;  %7072 = vpow2.f32 %v4492_v3  ;;  %v4314_v16 = vsub.f32 %v11833_v11, %v9965_v5  ;;  %v4520_v44 = vmul.f32 1.442695, %v4312_v40  ;;  %v4323_v34 = vsub.f32 %v11834_v58, %v9857_v14  ;;  %v11835_v35 = vld [vmem:[#allocation160_spill] sm:$0xff]  ;;  %v10011_v3 = vpop.permute.xlu1 %4214 }
 0x58b   : > { %v10003_v46 = vpop.eup %7054  ;;  %7074 = vpow2.f32 %v4386_v37  ;;  %v4254_v29 = vsub.f32 %v11835_v35, %v9822_v0  ;;  %v4255_v32 = vsub.f32 %v11836_v8, %v9822_v0  ;;  %v10015_v41 = vmul.f32 1.442695, %v4307_v26 }
 0x58c   : > { %v10013_v12 = vpop.eup %7056  ;;  %v4283_v40 = vsub.f32 %v11837_v24, %v9889_v31  ;;  %7076 = vpow2.f32 %v4388_v56  ;;  %v4522_v11 = vmul.f32 1.442695, %v4313_v4  ;;  %v10021_v37 = vmul.f32 1.442695, %v4267_v39  ;;  %v11841_v4 = vld [vmem:[#allocation200_spill] sm:$0xff] }
 0x58d   : > { %v10019_v57 = vpop.eup %7058  ;;  %v10023_v58 = vmul.f32 1.442695, %v4275_v15  ;;  %7078 = vpow2.f32 %v4390_v9  ;;  %v4400_v35 = vmul.f32 1.442695, %v4252_v62  ;;  %v4626_v8 = vadd.f32 %v9863_v13, %v4625_v60  ;;  %v11842_v60 = vld [vmem:[#allocation228_spill] sm:$0xff] }
 0x58e   : > { %11838 = vst [vmem:[#allocation166_spill] sm:$0xff] %v10019_v57  ;;  %v10025_v0 = vpop.eup %7060  ;;  %7080 = vpow2.f32 %v4520_v44  ;;  %v4524_v26 = vmul.f32 1.442695, %v4314_v16  ;;  %v4328_v14 = vsub.f32 %v9507_v51, %v10011_v3  ;;  %v10032_v56 = vmul.f32 1.442695, %v4323_v34 }
 0x58f   : > { %11839 = vst [vmem:[#allocation214_spill] sm:$0xff] %v10025_v0  ;;  %v10030_v24 = vpop.eup %7062  ;;  %v4339_v39 = vsub.f32 %v11841_v4, %v9881_v63  ;;  %7082 = vpow2.f32 %v4398_v20  ;;  %v4402_v15 = vmul.f32 1.442695, %v4253_v25  ;;  %v10038_v62 = vmul.f32 1.442695, %v4283_v40 }
 0x590   : > { %11840 = vst [vmem:[#allocation168_spill] sm:$0xff] %v10030_v24  ;;  %v10036_v9 = vpop.eup %7064  ;;  %7084 = vpow2.f32 %v4522_v11  ;;  %v4404_v13 = vmul.f32 1.442695, %v4254_v29  ;;  %v4329_v16 = vsub.f32 %v11842_v60, %v10011_v3  ;;  %v4406_v51 = vmul.f32 1.442695, %v4255_v32  ;;  %v11843_v24 = vld [vmem:[#allocation163_spill] sm:$0xff]  ;;  %v10056_v60 = vpop.permute.xlu1 %4224 }
 0x591   : > { %v7067_v44 = vpop.eup %7066  ;;  %7086 = vpow2.f32 %v4400_v35  ;;  %v4634_v34 = vadd.f32 %v9879_v55, %v9873_v1  ;;  %v4260_v4 = vsub.f32 %v11843_v24, %v9831_v36  ;;  %v4330_v40 = vsub.f32 %v9535_v19, %v10011_v3  ;;  %v11845_v35 = vld [vmem:[#allocation177_spill] sm:$0xff]  ;;  %v11846_v1 = vld [vmem:[#allocation164_spill] sm:$0xff] }
 0x592   : > { %v10046_v20 = vpop.eup %7068  ;;  %v4627_v25 = vadd.f32 %v7067_v44, %v4626_v8  ;;  %7088 = vpow2.f32 %v4524_v26  ;;  %v4552_v29 = vmul.f32 1.442695, %v4328_v14  ;;  %v10050_v0 = vmul.f32 1.442695, %v4339_v39  ;;  %v11847_v19 = vld [vmem:[#allocation165_spill] sm:$0xff] }
 0x593   : > { %v7071_v11 = vpop.eup %7070  ;;  %v4291_v32 = vsub.f32 %v11845_v35, %v9907_v28  ;;  %7090 = vpow2.f32 %v4402_v15  ;;  %v4261_v55 = vsub.f32 %v11846_v1, %v9831_v36  ;;  %v4554_v26 = vmul.f32 1.442695, %v4329_v16  ;;  %v11848_v35 = vld [vmem:[#allocation167_spill] sm:$0xff]  ;;  %v11849_v16 = vld [vmem:[#allocation212_spill] sm:$0xff] }
 0x594   : > { %11844 = vst [vmem:[#allocation169_spill] sm:$0xff] %v10050_v0  ;;  %v10058_v24 = vpop.eup %7072  ;;  %v4628_v8 = vadd.f32 %v7071_v11, %v4627_v25  ;;  %7092 = vpow2.f32 %v4404_v13  ;;  %v4262_v14 = vsub.f32 %v11847_v19, %v9831_v36  ;;  %v4635_v39 = vadd.f32 %v9883_v48, %v4634_v34 }
 0x595   : > { %v7075_v44 = vpop.eup %7074  ;;  %7094 = vpow2.f32 %v4406_v51  ;;  %v4263_v15 = vsub.f32 %v11848_v35, %v9831_v36  ;;  %v4416_v57 = vmul.f32 1.442695, %v4260_v4  ;;  %v4556_v63 = vmul.f32 1.442695, %v4330_v40 }
 0x596   : > { %v7077_v0 = vpop.eup %7076  ;;  %v4629_v1 = vadd.f32 %v7075_v44, %v4628_v8  ;;  %7096 = vpow2.f32 %v4552_v29  ;;  %v4344_v25 = vsub.f32 %v9555_v22, %v10056_v60  ;;  %v4355_v11 = vsub.f32 %v11849_v16, %v9909_v43 }
 0x597   : > { %v7079_v13 = vpop.eup %7078  ;;  %7098 = vpow2.f32 %v9991_v2  ;;  %v4418_v51 = vmul.f32 1.442695, %v4261_v55  ;;  %v4643_v48 = vadd.f32 %v9891_v42, %v9887_v27  ;;  %v4420_v4 = vmul.f32 1.442695, %v4262_v14  ;;  %v11850_v2 = vld [vmem:[#allocation191_spill] sm:$0xff] }
 0x598   : > { %v10072_v34 = vpop.eup %7080  ;;  %v4630_v36 = vadd.f32 %v7077_v0, %v4629_v1  ;;  %7100 = vpow2.f32 %v4554_v26  ;;  %v4345_v40 = vsub.f32 %v9560_v6, %v10056_v60  ;;  %v4422_v22 = vmul.f32 1.442695, %v4263_v15  ;;  %v11851_v6 = vld [vmem:[#allocation193_spill] sm:$0xff] }
 0x599   : > { %v7083_v29 = vpop.eup %7082  ;;  %7102 = vpow2.f32 %v4416_v57  ;;  %v4346_v8 = vsub.f32 %v9583_v59, %v10056_v60  ;;  %v4268_v55 = vsub.f32 %v11850_v2, %v9847_v21  ;;  %v4584_v0 = vmul.f32 1.442695, %v4344_v25  ;;  %v11852_v59 = vld [vmem:[#allocation221_spill] sm:$0xff]  ;;  %v11853_v25 = vld [vmem:[#allocation194_spill] sm:$0xff] }
 0x59a   : > { %v10080_v19 = vpop.eup %7084  ;;  %v4631_v27 = vadd.f32 %v7079_v13, %v4630_v36  ;;  %v4636_v42 = vadd.f32 %v7083_v29, %v4635_v39  ;;  %7104 = vpow2.f32 %v4556_v63  ;;  %v10082_v14 = vmul.f32 1.442695, %v4291_v32  ;;  %v11854_v29 = vld [vmem:[#allocation176_spill] sm:$0xff] }
 0x59b   : > { %v7087_v26 = vpop.eup %7086  ;;  %v10084_v44 = vmul.f32 1.442695, %v4355_v11  ;;  %7106 = vpow2.f32 %v4418_v51  ;;  %v4269_v57 = vsub.f32 %v11851_v6, %v9847_v21  ;;  %v4299_v15 = vsub.f32 %v11852_v59, %v9929_v50 }
 0x59c   : > { %v10088_v35 = vpop.eup %7088  ;;  %4632 = vadd.xlane.f32.xlu0 %v4631_v27  ;;  %v4637_v1 = vadd.f32 %v7087_v26, %v4636_v42  ;;  %7108 = vpow2.f32 %v4420_v4  ;;  %v4586_v39 = vmul.f32 1.442695, %v4345_v40  ;;  %v4644_v32 = vadd.f32 %v9899_v54, %v4643_v48  ;;  %v11855_v27 = vld [vmem:[#allocation226_spill] sm:$0xff]  ;;  %v11856_v40 = vld [vmem:[#allocation196_spill] sm:$0xff] }
 0x59d   : > { %v7091_v63 = vpop.eup %7090  ;;  %7110 = vpow2.f32 %v4422_v22  ;;  %v4270_v13 = vsub.f32 %v11853_v25, %v9847_v21  ;;  %v4432_v16 = vmul.f32 1.442695, %v4268_v55  ;;  %v4588_v36 = vmul.f32 1.442695, %v4346_v8  ;;  %v11857_v8 = vld [vmem:[#allocation178_spill] sm:$0xff] }
 0x59e   : > { %v7093_v11 = vpop.eup %7092  ;;  %v4638_v51 = vadd.f32 %v7091_v63, %v4637_v1  ;;  %7112 = vpow2.f32 %v4584_v0  ;;  %v4276_v2 = vsub.f32 %v11854_v29, %v9861_v45  ;;  %v4315_v4 = vsub.f32 %v11855_v27, %v9965_v5 }
 0x59f   : > { %v7095_v6 = vpop.eup %7094  ;;  %v4271_v22 = vsub.f32 %v11856_v40, %v9847_v21  ;;  %7114 = vpow2.f32 %v10021_v37  ;;  %v4434_v54 = vmul.f32 1.442695, %v4269_v57  ;;  %v4331_v42 = vsub.f32 %v9546_v30, %v10011_v3  ;;  %v11858_v21 = vld [vmem:[#allocation179_spill] sm:$0xff] }
 0x5a0   : > { %v10102_v48 = vpop.eup %7096  ;;  %v4639_v55 = vadd.f32 %v7093_v11, %v4638_v51  ;;  %7116 = vpow2.f32 %v4586_v39  ;;  %v4277_v0 = vsub.f32 %v11857_v8, %v9861_v45  ;;  %v4436_v59 = vmul.f32 1.442695, %v4270_v13 }
 0x5a1   : > { %v7099_v26 = vpop.eup %7098  ;;  %7118 = vpow2.f32 %v4432_v16  ;;  %v4652_v1 = vadd.f32 %v9925_v53, %v9921_v17  ;;  %v4278_v37 = vsub.f32 %v11858_v21, %v9861_v45  ;;  %v4448_v11 = vmul.f32 1.442695, %v4276_v2  ;;  %v11859_v16 = vld [vmem:[#allocation209_spill] sm:$0xff]  ;;  %v11860_v53 = vld [vmem:[#allocation183_spill] sm:$0xff] }
 0x5a2   : > { %v10112_v57 = vpop.eup %7100  ;;  %v4640_v63 = vadd.f32 %v7095_v6, %v4639_v55  ;;  %v4645_v25 = vadd.f32 %v7099_v26, %v4644_v32  ;;  %7120 = vpow2.f32 %v4588_v36  ;;  %v10114_v39 = vmul.f32 1.442695, %v4299_v15  ;;  %v11861_v6 = vld [vmem:[#allocation211_spill] sm:$0xff] }
 0x5a3   : > { %v7103_v30 = vpop.eup %7102  ;;  %7122 = vpow2.f32 %v4434_v54  ;;  %v4438_v51 = vmul.f32 1.442695, %v4271_v22  ;;  %v4284_v13 = vsub.f32 %v11859_v16, %v9889_v31  ;;  %v4279_v27 = vsub.f32 %v11860_v53, %v9861_v45  ;;  %v11865_v16 = vld [vmem:[#allocation181_spill] sm:$0xff] }
 0x5a4   : > { %v10118_v29 = vpop.eup %7104  ;;  %4641 = vadd.xlane.f32.xlu0 %v4640_v63  ;;  %v4646_v17 = vadd.f32 %v7103_v30, %v4645_v25  ;;  %7124 = vpow2.f32 %v10023_v58  ;;  %v4450_v32 = vmul.f32 1.442695, %v4277_v0  ;;  %v10123_v2 = vmul.f32 1.442695, %v4315_v4  ;;  %v11862_v58 = vld [vmem:[#allocation215_spill] sm:$0xff]  ;;  %v11863_v63 = vld [vmem:[#allocation180_spill] sm:$0xff] }
 0x5a5   : > { %v7107_v36 = vpop.eup %7106  ;;  %v10125_v15 = vmul.f32 1.442695, %v4331_v42  ;;  %7126 = vpow2.f32 %v4436_v59  ;;  %v4285_v40 = vsub.f32 %v11861_v6, %v9889_v31  ;;  %v4653_v55 = vadd.f32 %v9931_v49, %v4652_v1 }
 0x5a6   : > { %v7109_v22 = vpop.eup %7108  ;;  %v4647_v54 = vadd.f32 %v7107_v36, %v4646_v17  ;;  %7128 = vpow2.f32 %v4448_v11  ;;  %v4452_v8 = vmul.f32 1.442695, %v4278_v37  ;;  %v4661_v45 = vadd.f32 %v9939_v7, %v9935_v38  ;;  %v11864_v37 = vld [vmem:[#allocation216_spill] sm:$0xff] }
 0x5a7   : > { %v7111_v26 = vpop.eup %7110  ;;  %7130 = vpow2.f32 %v4438_v51  ;;  %v4286_v4 = vsub.f32 %v11862_v58, %v9889_v31  ;;  %v4464_v42 = vmul.f32 1.442695, %v4284_v13  ;;  %v4454_v21 = vmul.f32 1.442695, %v4279_v27 }
 0x5a8   : > { %v10134_v0 = vpop.eup %7112  ;;  %v4648_v59 = vadd.f32 %v7109_v22, %v4647_v54  ;;  %7132 = vpow2.f32 %v4450_v32  ;;  %v4292_v25 = vsub.f32 %v11863_v63, %v9907_v28  ;;  %v4347_v1 = vsub.f32 %v9603_v52, %v10056_v60  ;;  %v11866_v32 = vld [vmem:[#allocation184_spill] sm:$0xff] }
 0x5a9   : > { %v7115_v49 = vpop.eup %7114  ;;  %v4287_v11 = vsub.f32 %v11864_v37, %v9889_v31  ;;  %7134 = vpow2.f32 %v10038_v62  ;;  %v4466_v38 = vmul.f32 1.442695, %v4285_v40  ;;  %v4293_v13 = vsub.f32 %v11865_v16, %v9907_v28 }
 0x5aa   : > { %v10143_v7 = vpop.eup %7116  ;;  %v4649_v30 = vadd.f32 %v7111_v26, %v4648_v59  ;;  %v4654_v51 = vadd.f32 %v7115_v49, %v4653_v55  ;;  %7136 = vpow2.f32 %v4452_v8  ;;  %v4662_v53 = vadd.f32 %v9943_v61, %v4661_v45  ;;  %v11867_v61 = vld [vmem:[#allocation225_spill] sm:$0xff] }
 0x5ab   : > { %v7119_v17 = vpop.eup %7118  ;;  %7138 = vpow2.f32 %v4464_v42  ;;  %v4468_v27 = vmul.f32 1.442695, %v4286_v4  ;;  %v4670_v52 = vadd.f32 %v9973_v18, %v9969_v10  ;;  %v4294_v36 = vsub.f32 %v11866_v32, %v9907_v28  ;;  %v11868_v18 = vld [vmem:[#allocation185_spill] sm:$0xff]  ;;  %v11873_v32 = vld [vmem:[#allocation187_spill] sm:$0xff] }
 0x5ac   : > { %v10150_v31 = vpop.eup %7120  ;;  %4650 = vadd.xlane.f32.xlu1 %v4649_v30  ;;  %v4655_v62 = vadd.f32 %v7119_v17, %v4654_v51  ;;  %7140 = vpow2.f32 %v4454_v21  ;;  %v4480_v6 = vmul.f32 1.442695, %v4292_v25  ;;  %v10154_v22 = vmul.f32 1.442695, %v4347_v1  ;;  %v11870_v51 = vld [vmem:[#allocation274_spill] sm:$0xff] }
 0x5ad   : > { %v7123_v40 = vpop.eup %7122  ;;  %7142 = vpow2.f32 %v4466_v38  ;;  %v4470_v54 = vmul.f32 1.442695, %v4287_v11  ;;  %v4300_v55 = vsub.f32 %v11867_v61, %v9929_v50  ;;  %v4295_v10 = vsub.f32 %v11868_v18, %v9907_v28 }
 0x5ae   : > { %v7125_v8 = vpop.eup %7124  ;;  %v4656_v26 = vadd.f32 %v7123_v40, %v4655_v62  ;;  %7144 = vpow2.f32 %v10082_v14  ;;  %v4482_v45 = vmul.f32 1.442695, %v4293_v13  ;;  %v4671_v42 = vadd.f32 %v9977_v23, %v4670_v52  ;;  %v11869_v14 = vld [vmem:[#allocation227_spill] sm:$0xff] }
 0x5af   : > { %v7127_v58 = vpop.eup %7126  ;;  %v4663_v4 = vadd.f32 %v7125_v8, %v4662_v53  ;;  %7146 = vpow2.f32 %v4468_v27  ;;  %v4301_v59 = vsub.f32 %v9512_v33, %v9929_v50  ;;  %v4484_v25 = vmul.f32 1.442695, %v4294_v36  ;;  %v11871_v33 = vld [vmem:[#allocation186_spill] sm:$0xff]  ;;  %v11872_v53 = vld [vmem:[#allocation231_spill] sm:$0xff] }
 0x5b0   : > { %v7129_v21 = vpop.eup %7128  ;;  %v4657_v63 = vadd.f32 %v7127_v58, %v4656_v26  ;;  %7148 = vpow2.f32 %v4480_v6  ;;  %v4679_v49 = vadd.f32 %v10003_v46, %v9997_v47  ;;  %v4302_v37 = vsub.f32 %v11869_v14, %v9929_v50 }
 0x5b1   : > { %v7131_v1 = vpop.eup %7130  ;;  %v4664_v28 = vadd.f32 %v7129_v21, %v4663_v4  ;;  %7150 = vpow2.f32 %v4470_v54  ;;  %v4496_v11 = vmul.f32 1.442695, %v4300_v55  ;;  %v4486_v23 = vmul.f32 1.442695, %v4295_v10 }
 0x5b2   : > { %v7133_v38 = vpop.eup %7132  ;;  %v4658_v30 = vadd.f32 %v7131_v1, %v4657_v63  ;;  %7152 = vpow2.f32 %v4482_v45  ;;  %v4308_v16 = vsub.f32 %v11871_v33, %v11870_v51  ;;  %v4303_v27 = vsub.f32 %v11872_v53, %v9929_v50  ;;  %v11875_v45 = vld [vmem:[#allocation229_spill] sm:$0xff]  ;;  %v11881_v53 = vld [vmem:[#allocation275_spill] sm:$0xff] }
 0x5b3   : > { %v7135_v13 = vpop.eup %7134  ;;  %v4665_v17 = vadd.f32 %v7133_v38, %v4664_v28  ;;  %7154 = vpow2.f32 %v10114_v39  ;;  %v4498_v47 = vmul.f32 1.442695, %v4301_v59  ;;  %v4680_v62 = vadd.f32 %v10013_v12, %v4679_v49  ;;  %v11874_v39 = vld [vmem:[#allocation189_spill] sm:$0xff]  ;;  %v11876_v59 = vld [vmem:[#allocation190_spill] sm:$0xff] }
 0x5b4   : > { %v7137_v46 = vpop.eup %7136  ;;  %4659 = vadd.xlane.f32.xlu0 %v4658_v30  ;;  %v4672_v52 = vadd.f32 %v7135_v13, %v4671_v42  ;;  %7156 = vpow2.f32 %v4484_v25  ;;  %v4309_v36 = vsub.f32 %v11873_v32, %v11870_v51  ;;  %v4500_v54 = vmul.f32 1.442695, %v4302_v37  ;;  %v11877_v49 = vld [vmem:[#allocation230_spill] sm:$0xff] }
 0x5b5   : > { %v7139_v6 = vpop.eup %7138  ;;  %v4666_v40 = vadd.f32 %v7137_v46, %v4665_v17  ;;  %7158 = vpow2.f32 %v4496_v11  ;;  %v4688_v61 = vadd.f32 %v10046_v20, %v10036_v9  ;;  %v4310_v8 = vsub.f32 %v11874_v39, %v11870_v51  ;;  %v11878_v11 = vld [vmem:[#allocation277_spill] sm:$0xff]  ;;  %v11879_v38 = vld [vmem:[#allocation198_spill] sm:$0xff] }
 0x5b6   : > { %v7141_v50 = vpop.eup %7140  ;;  %v4673_v55 = vadd.f32 %v7139_v6, %v4672_v52  ;;  %7160 = vpow2.f32 %v4486_v23  ;;  %v4512_v26 = vmul.f32 1.442695, %v4308_v16  ;;  %v4502_v12 = vmul.f32 1.442695, %v4303_v27  ;;  %v11882_v27 = vld [vmem:[#allocation195_spill] sm:$0xff] }
 0x5b7   : > { %v7143_v18 = vpop.eup %7142  ;;  %v4667_v10 = vadd.f32 %v7141_v50, %v4666_v40  ;;  %7162 = vpow2.f32 %v4498_v47  ;;  %v4316_v58 = vsub.f32 %v11875_v45, %v9965_v5  ;;  %v4311_v21 = vsub.f32 %v11876_v59, %v11870_v51  ;;  %v11885_v50 = vld [vmem:[#allocation197_spill] sm:$0xff] }
 0x5b8   : > { %v7145_v4 = vpop.eup %7144  ;;  %v4674_v42 = vadd.f32 %v7143_v18, %v4673_v55  ;;  %7164 = vpow2.f32 %v10015_v41  ;;  %v4514_v9 = vmul.f32 1.442695, %v4309_v36  ;;  %v4689_v25 = vadd.f32 %v10058_v24, %v4688_v61  ;;  %v11880_v41 = vld [vmem:[#allocation232_spill] sm:$0xff]  ;;  %v11887_v59 = vld [vmem:[#allocation233_spill] sm:$0xff] }
 0x5b9   : > { %v7147_v20 = vpop.eup %7146  ;;  %4668 = vadd.xlane.f32.xlu1 %v4667_v10  ;;  %v4681_v63 = vadd.f32 %v7145_v4, %v4680_v62  ;;  %7166 = vpow2.f32 %v4500_v54  ;;  %v4317_v1 = vsub.f32 %v11877_v49, %v9965_v5  ;;  %v4516_v37 = vmul.f32 1.442695, %v4310_v8  ;;  %v11883_v62 = vld [vmem:[#allocation234_spill] sm:$0xff] }
 0x5ba   : > { %v7149_v28 = vpop.eup %7148  ;;  %v4675_v14 = vadd.f32 %v7147_v20, %v4674_v42  ;;  %7168 = vpow2.f32 %v4512_v26  ;;  %v4697_v30 = vadd.f32 %v11879_v38, %v11878_v11  ;;  %v4318_v33 = vsub.f32 %v11880_v41, %v9965_v5  ;;  %v11884_v54 = vld [vmem:[#allocation170_spill] sm:$0xff] }
 0x5bb   : > { %v7151_v23 = vpop.eup %7150  ;;  %v4682_v51 = vadd.f32 %v7149_v28, %v4681_v63  ;;  %7170 = vpow2.f32 %v4502_v12  ;;  %v4528_v16 = vmul.f32 1.442695, %v4316_v58  ;;  %v4518_v24 = vmul.f32 1.442695, %v4311_v21  ;;  %v11888_v63 = vld [vmem:[#allocation201_spill] sm:$0xff]  ;;  %v11889_v28 = vld [vmem:[#allocation235_spill] sm:$0xff] }
 0x5bc   : > { %v7153_v13 = vpop.eup %7152  ;;  %v4676_v17 = vadd.f32 %v7151_v23, %v4675_v14  ;;  %7172 = vpow2.f32 %v4514_v9  ;;  %v4324_v47 = vsub.f32 %v11882_v27, %v11881_v53  ;;  %v4319_v32 = vsub.f32 %v11883_v62, %v9965_v5  ;;  %v11891_v23 = vld [vmem:[#allocation174_spill] sm:$0xff] }
 0x5bd   : > { %v7155_v46 = vpop.eup %7154  ;;  %v4683_v52 = vadd.f32 %v7153_v13, %v4682_v51  ;;  %7174 = vpow2.f32 %v10123_v2  ;;  %v4530_v36 = vmul.f32 1.442695, %v4317_v1  ;;  %v4698_v61 = vadd.f32 %v11884_v54, %v4697_v30  ;;  %v11886_v2 = vld [vmem:[#allocation199_spill] sm:$0xff]  ;;  %v11890_v30 = vld [vmem:[#allocation173_spill] sm:$0xff]  ;;  %v11894_v27 = vld [vmem:[#allocation202_spill] sm:$0xff] }
 0x5be   : > { %v7157_v6 = vpop.eup %7156  ;;  %4677 = vadd.xlane.f32.xlu0 %v4676_v17  ;;  %v4690_v40 = vadd.f32 %v7155_v46, %v4689_v25  ;;  %7176 = vpow2.f32 %v4516_v37  ;;  %v4325_v55 = vsub.f32 %v11885_v50, %v11881_v53  ;;  %v4532_v26 = vmul.f32 1.442695, %v4318_v33  ;;  %v11895_v62 = vld [vmem:[#allocation238_spill] sm:$0xff]  ;;  %v11896_v54 = vld [vmem:[#allocation204_spill] sm:$0xff] }
 0x5bf   : > { %v7159_v39 = vpop.eup %7158  ;;  %v4684_v8 = vadd.f32 %v7157_v6, %v4683_v52  ;;  %7178 = vpow2.f32 %v4528_v16  ;;  %v4706_v18 = vadd.f32 %v10080_v19, %v10072_v34  ;;  %v4326_v12 = vsub.f32 %v11886_v2, %v11881_v53  ;;  %v11897_v50 = vld [vmem:[#allocation206_spill] sm:$0xff] }
 0x5c0   : > { %v7161_v5 = vpop.eup %7160  ;;  %v4691_v10 = vadd.f32 %v7159_v39, %v4690_v40  ;;  %7180 = vpow2.f32 %v4518_v24  ;;  %v4544_v45 = vmul.f32 1.442695, %v4324_v47  ;;  %v4534_v42 = vmul.f32 1.442695, %v4319_v32 }
 0x5c1   : > { %v7163_v58 = vpop.eup %7162  ;;  %v4685_v4 = vadd.f32 %v7161_v5, %v4684_v8  ;;  %7182 = vpow2.f32 %v4530_v36  ;;  %v4332_v21 = vsub.f32 %v11887_v59, %v10011_v3  ;;  %v4327_v25 = vsub.f32 %v11888_v63, %v11881_v53  ;;  %v11893_v53 = vld [vmem:[#allocation276_spill] sm:$0xff] }
 0x5c2   : > { %v7165_v9 = vpop.eup %7164  ;;  %v4692_v20 = vadd.f32 %v7163_v58, %v4691_v10  ;;  %7184 = vpow2.f32 %v10032_v56  ;;  %v4546_v34 = vmul.f32 1.442695, %v4325_v55  ;;  %v4707_v1 = vadd.f32 %v10088_v35, %v4706_v18  ;;  %v11892_v56 = vld [vmem:[#allocation236_spill] sm:$0xff] }
 0x5c3   : > { %v7167_v19 = vpop.eup %7166  ;;  %4686 = vadd.xlane.f32.xlu1 %v4685_v4  ;;  %v4699_v49 = vadd.f32 %v7165_v9, %v4698_v61  ;;  %7186 = vpow2.f32 %v4532_v26  ;;  %v4333_v14 = vsub.f32 %v11889_v28, %v10011_v3  ;;  %v4548_v38 = vmul.f32 1.442695, %v4326_v12  ;;  %v11899_v4 = vld [vmem:[#allocation237_spill] sm:$0xff]  ;;  %v11900_v9 = vld [vmem:[#allocation208_spill] sm:$0xff] }
 0x5c4   : > { %v7169_v37 = vpop.eup %7168  ;;  %v4693_v11 = vadd.f32 %v7167_v19, %v4692_v20  ;;  %7188 = vpow2.f32 %v4544_v45  ;;  %v4715_v51 = vadd.f32 %v11891_v23, %v11890_v30  ;;  %v4334_v16 = vsub.f32 %v11892_v56, %v10011_v3  ;;  %v11902_v19 = vld [vmem:[#allocation239_spill] sm:$0xff] }
 0x5c5   : > { %v7171_v41 = vpop.eup %7170  ;;  %v4700_v33 = vadd.f32 %v7169_v37, %v4699_v49  ;;  %7190 = vpow2.f32 %v4534_v42  ;;  %v4560_v13 = vmul.f32 1.442695, %v4332_v21  ;;  %v4550_v35 = vmul.f32 1.442695, %v4327_v25  ;;  %v11903_v37 = vld [vmem:[#allocation205_spill] sm:$0xff] }
 0x5c6   : > { %v7173_v17 = vpop.eup %7172  ;;  %v4694_v24 = vadd.f32 %v7171_v41, %v4693_v11  ;;  %7192 = vpow2.f32 %v4546_v34  ;;  %v4340_v47 = vsub.f32 %v11894_v27, %v11893_v53  ;;  %v4335_v32 = vsub.f32 %v11895_v62, %v10011_v3  ;;  %v11904_v11 = vld [vmem:[#allocation210_spill] sm:$0xff]  ;;  %v11908_v62 = vld [vmem:[#allocation213_spill] sm:$0xff] }
 0x5c7   : > { %v7175_v46 = vpop.eup %7174  ;;  %v4701_v52 = vadd.f32 %v7173_v17, %v4700_v33  ;;  %7194 = vpow2.f32 %v10125_v15  ;;  %v4562_v36 = vmul.f32 1.442695, %v4333_v14  ;;  %v4716_v61 = vadd.f32 %v11896_v54, %v4715_v51  ;;  %v11898_v15 = vld [vmem:[#allocation207_spill] sm:$0xff]  ;;  %v11905_v51 = vld [vmem:[#allocation240_spill] sm:$0xff] }
 0x5c8   : > { %v7177_v6 = vpop.eup %7176  ;;  %4695 = vadd.xlane.f32.xlu0 %v4694_v24  ;;  %v4708_v40 = vadd.f32 %v7175_v46, %v4707_v1  ;;  %7196 = vpow2.f32 %v4548_v38  ;;  %v4341_v55 = vsub.f32 %v11897_v50, %v11893_v53  ;;  %v4564_v26 = vmul.f32 1.442695, %v4334_v16 }
 0x5c9   : > { %v7179_v39 = vpop.eup %7178  ;;  %v4702_v8 = vadd.f32 %v7177_v6, %v4701_v52  ;;  %7198 = vpow2.f32 %v4560_v13  ;;  %v4724_v18 = vadd.f32 %v10112_v57, %v10102_v48  ;;  %v4342_v10 = vsub.f32 %v11898_v15, %v11893_v53  ;;  %v11901_v48 = vld [vmem:[#allocation169_spill] sm:$0xff] }
 0x5ca   : > { %v7181_v3 = vpop.eup %7180  ;;  %v4709_v5 = vadd.f32 %v7179_v39, %v4708_v40  ;;  %7200 = vpow2.f32 %v4550_v35  ;;  %v4576_v2 = vmul.f32 1.442695, %v4340_v47  ;;  %v4566_v58 = vmul.f32 1.442695, %v4335_v32  ;;  %v11906_v13 = vld [vmem:[#allocation217_spill] sm:$0xff] }
 0x5cb   : > { %v7183_v12 = vpop.eup %7182  ;;  %v4703_v45 = vadd.f32 %v7181_v3, %v4702_v8  ;;  %7202 = vpow2.f32 %v4562_v36  ;;  %v4348_v42 = vsub.f32 %v11899_v4, %v10056_v60  ;;  %v4343_v20 = vsub.f32 %v11900_v9, %v11893_v53  ;;  %v11907_v53 = vld [vmem:[#allocation241_spill] sm:$0xff]  ;;  %v11909_v36 = vld [vmem:[#allocation218_spill] sm:$0xff] }
 0x5cc   : > { %v7185_v59 = vpop.eup %7184  ;;  %v4710_v21 = vadd.f32 %v7183_v12, %v4709_v5  ;;  %7204 = vpow2.f32 %v11901_v48  ;;  %v4578_v57 = vmul.f32 1.442695, %v4341_v55  ;;  %v4725_v34 = vadd.f32 %v10118_v29, %v4724_v18  ;;  %v11912_v9 = vld [vmem:[#allocation166_spill] sm:$0xff] }
 0x5cd   : > { %v7187_v63 = vpop.eup %7186  ;;  %4704 = vadd.xlane.f32.xlu1 %v4703_v45  ;;  %v4717_v25 = vadd.f32 %v7185_v59, %v4716_v61  ;;  %7206 = vpow2.f32 %v4564_v26  ;;  %v4349_v49 = vsub.f32 %v11902_v19, %v10056_v60  ;;  %v4580_v14 = vmul.f32 1.442695, %v4342_v10  ;;  %v11911_v10 = vld [vmem:[#allocation224_spill] sm:$0xff] }
 0x5ce   : > { %v7189_v1 = vpop.eup %7188  ;;  %v4711_v28 = vadd.f32 %v7187_v63, %v4710_v21  ;;  %7208 = vpow2.f32 %v4576_v2  ;;  %v4733_v38 = vadd.f32 %v11904_v11, %v11903_v37  ;;  %v4350_v41 = vsub.f32 %v11905_v51, %v10056_v60 }
 0x5cf   : > { %v7191_v30 = vpop.eup %7190  ;;  %v4718_v23 = vadd.f32 %v7189_v1, %v4717_v25  ;;  %7210 = vpow2.f32 %v4566_v58  ;;  %v4592_v33 = vmul.f32 1.442695, %v4348_v42  ;;  %v4582_v29 = vmul.f32 1.442695, %v4343_v20  ;;  %v11913_v20 = vld [vmem:[#allocation214_spill] sm:$0xff]  ;;  %v11914_v1 = vld [vmem:[#allocation168_spill] sm:$0xff] }
 0x5d0   : > { %v7193_v56 = vpop.eup %7192  ;;  %v4712_v16 = vadd.f32 %v7191_v30, %v4711_v28  ;;  %7212 = vpow2.f32 %v4578_v57  ;;  %v4356_v17 = vsub.f32 %v11906_v13, %v9909_v43  ;;  %v4351_v27 = vsub.f32 %v11907_v53, %v10056_v60 }
 0x5d1   : > { %v7195_v24 = vpop.eup %7194  ;;  %v4719_v35 = vadd.f32 %v7193_v56, %v4718_v23  ;;  %7214 = vpow2.f32 %v10154_v22  ;;  %v4594_v47 = vmul.f32 1.442695, %v4349_v49  ;;  %v4734_v32 = vadd.f32 %v11908_v62, %v4733_v38  ;;  %v11910_v22 = vld [vmem:[#allocation220_spill] sm:$0xff] }
 0x5d2   : > { %v7197_v46 = vpop.eup %7196  ;;  %4713 = vadd.xlane.f32.xlu0 %v4712_v16  ;;  %v4726_v52 = vadd.f32 %v7195_v24, %v4725_v34  ;;  %7216 = vpow2.f32 %v4580_v14  ;;  %v4357_v6 = vsub.f32 %v11909_v36, %v9909_v43  ;;  %v4596_v61 = vmul.f32 1.442695, %v4350_v41 }
 0x5d3   : > { %v7199_v40 = vpop.eup %7198  ;;  %v4720_v54 = vadd.f32 %v7197_v46, %v4719_v35  ;;  %7218 = vpow2.f32 %v4592_v33  ;;  %v4742_v50 = vadd.f32 %v10143_v7, %v10134_v0  ;;  %v4358_v39 = vsub.f32 %v11910_v22, %v9909_v43  ;;  %v11915_v46 = vld [vmem:[#allocation244_spill] sm:$0xff] }
 0x5d4   : > { %v7201_v60 = vpop.eup %7200  ;;  %v4727_v55 = vadd.f32 %v7199_v40, %v4726_v52  ;;  %7220 = vpow2.f32 %v4582_v29  ;;  %v4608_v8 = vmul.f32 1.442695, %v4356_v17  ;;  %v4598_v3 = vmul.f32 1.442695, %v4351_v27  ;;  %v11916_v52 = vld [vmem:[#allocation245_spill] sm:$0xff] }
 0x5d5   : > { %v7203_v26 = vpop.eup %7202  ;;  %v4721_v18 = vadd.f32 %v7201_v60, %v4720_v54  ;;  %7222 = vpow2.f32 %v4594_v47  ;;  %v4359_v2 = vsub.f32 %v11911_v10, %v9909_v43  ;;  %v4610_v12 = vmul.f32 1.442695, %v4357_v6  ;;  %v4072_v6 = vld [vmem:[#allocation4] sm:$0xff]  ;;  %v11925_v10 = vld [vmem:[#allocation247_spill] sm:$0xff] }
 0x5d6   : > { %v7205_v5 = vpop.eup %7204  ;;  %v4728_v15 = vadd.f32 %v7203_v26, %v4727_v55  ;;  %7224 = vpow2.f32 %v10084_v44  ;;  %v4743_v4 = vadd.f32 %v10150_v31, %v4742_v50  ;;  %v4612_v42 = vmul.f32 1.442695, %v4358_v39  ;;  %v11918_v50 = vld [vmem:[#allocation248_spill] sm:$0xff]  ;;  %v11919_v60 = vld [vmem:[#allocation249_spill] sm:$0xff]  ;;  %v11921_v39 = vld [vmem:[#allocation242_spill] sm:$0xff] }
 0x5d7   : > { %v7207_v0 = vpop.eup %7206  ;;  %4722 = vadd.xlane.f32.xlu1 %v4721_v18  ;;  %v4735_v7 = vadd.f32 %v7205_v5, %v4734_v32  ;;  %7226 = vpow2.f32 %v4596_v61  ;;  %v4751_v48 = vadd.f32 %v11913_v20, %v11912_v9  ;;  %v4614_v44 = vmul.f32 1.442695, %v4359_v2  ;;  %v4073_v5 = vld [vmem:[#allocation4 + $0x8] sm:$0xff] }
 0x5d8   : > { %v7209_v45 = vpop.eup %7208  ;;  %v4729_v58 = vadd.f32 %v7207_v0, %v4728_v15  ;;  %7228 = vpow2.f32 %v4608_v8  ;;  %v11917_v62 = vsub.f32 %v11915_v46, %v11916_v52  ;;  %v11920_v55 = vsub.f32 %v11918_v50, %v11919_v60  ;;  %v11922_v8 = vld [vmem:[#allocation243_spill] sm:$0xff]  ;;  %v11924_v15 = vld [vmem:[#allocation246_spill] sm:$0xff] }
 0x5d9   : > { %v7211_v59 = vpop.eup %7210  ;;  %v4736_v21 = vadd.f32 %v7209_v45, %v4735_v7  ;;  %7230 = vpow2.f32 %v4598_v3  ;;  %v4752_v28 = vadd.f32 %v11914_v1, %v4751_v48  ;;  %v11923_v26 = vsub.f32 %v11921_v39, %v11922_v8  ;;  %v11934_v1 = vld [vmem:[#allocation263_spill] sm:$0xff]  ;;  %v11945_v39 = vld [vmem:[#allocation268_spill] sm:$0xff]  ;;  %v11946_v8 = vld [vmem:[#allocation269_spill] sm:$0xff] }
 0x5da   : > { %v7213_v43 = vpop.eup %7212  ;;  %v4730_v57 = vadd.f32 %v7211_v59, %v4729_v58  ;;  %7232 = vpow2.f32 %v4610_v12  ;;  %v4104_v32 = vmul.f32 1.442695, %v11917_v62  ;;  %v4106_v22 = vmul.f32 1.442695, %v11920_v55  ;;  %v11928_v59 = vld [vmem:[#allocation257_spill] sm:$0xff] }
 0x5db   : > { %v7215_v63 = vpop.eup %7214  ;;  %v4737_v25 = vadd.f32 %v7213_v43, %v4736_v21  ;;  %7234 = vpow2.f32 %v4612_v42  ;;  %v4108_v18 = vmul.f32 1.442695, %v11923_v26  ;;  %v11926_v2 = vsub.f32 %v11924_v15, %v11925_v10  ;;  %v11927_v42 = vld [vmem:[#allocation256_spill] sm:$0xff] }
 0x5dc   : > { %v7217_v34 = vpop.eup %7216  ;;  %4731 = vadd.xlane.f32.xlu0 %v4730_v57  ;;  %v4744_v19 = vadd.f32 %v7215_v63, %v4743_v4  ;;  %7236 = vpow2.f32 %v4614_v44  ;;  %v4074_v4 = vld [vmem:[#allocation4 + $0x10] sm:$0xff]  ;;  %v11929_v21 = vsub.f32 %v11927_v42, %v11928_v59  ;;  %v11930_v57 = vld [vmem:[#allocation250_spill] sm:$0xff]  ;;  %v11947_v26 = vsub.f32 %v11945_v39, %v11946_v8 }
 0x5dd   : > { %v7219_v49 = vpop.eup %7218  ;;  %v4738_v31 = vadd.f32 %v7217_v34, %v4737_v25  ;;  %7238 = vpow2.f32 %v4104_v32  ;;  %v4110_v12 = vmul.f32 1.442695, %v11926_v2  ;;  %v11931_v44 = vld [vmem:[#allocation251_spill] sm:$0xff]  ;;  %v4080_v2 = vld [vmem:[#allocation4 + $0x40] sm:$0xff]  ;;  %v4081_v59 = vld [vmem:[#allocation4 + $0x48] sm:$0xff] }
 0x5de   : > { %v7221_v14 = vpop.eup %7220  ;;  %v4745_v37 = vadd.f32 %v7219_v49, %v4744_v19  ;;  %7240 = vpow2.f32 %v4106_v22  ;;  %v4112_v9 = vmul.f32 1.442695, %v11929_v21  ;;  %v11932_v63 = vsub.f32 %v11930_v57, %v11931_v44  ;;  %v4075_v19 = vld [vmem:[#allocation4 + $0x18] sm:$0xff]  ;;  %v4078_v32 = vld [vmem:[#allocation4 + $0x30] sm:$0xff] }
 0x5df   : > { %v7223_v11 = vpop.eup %7222  ;;  %v4739_v38 = vadd.f32 %v7221_v14, %v4738_v31  ;;  %7242 = vpow2.f32 %v4108_v18  ;;  %v11933_v31 = vld [vmem:[#allocation262_spill] sm:$0xff]  ;;  %v4079_v22 = vld [vmem:[#allocation4 + $0x38] sm:$0xff]  ;;  %v4124_v18 = vmul.f32 1.442695, %v11947_v26 }
 0x5e0   : > { %v7225_v30 = vpop.eup %7224  ;;  %v4746_v23 = vadd.f32 %v7223_v11, %v4745_v37  ;;  %7244 = vpow2.f32 %v4110_v12  ;;  %v4114_v25 = vmul.f32 1.442695, %v11932_v63  ;;  %v11948_v12 = vld [vmem:[#allocation258_spill] sm:$0xff] }
 0x5e1   : > { %v7227_v51 = vpop.eup %7226  ;;  %4740 = vadd.xlane.f32.xlu1 %v4739_v38  ;;  %v4753_v41 = vadd.f32 %v7225_v30, %v4752_v28  ;;  %7246 = vpow2.f32 %v4112_v9  ;;  %v11935_v28 = vsub.f32 %v11933_v31, %v11934_v1  ;;  %v4076_v30 = vld [vmem:[#allocation4 + $0x20] sm:$0xff]  ;;  %v11951_v9 = vld [vmem:[#allocation270_spill] sm:$0xff] }
 0x5e2   : > { %v7229_v33 = vpop.eup %7228  ;;  %v4747_v56 = vadd.f32 %v7227_v51, %v4746_v23  ;;  %7248 = vpow2.f32 %v4114_v25  ;;  %v11936_v23 = vld [vmem:[#allocation252_spill] sm:$0xff]  ;;  %v11937_v51 = vld [vmem:[#allocation253_spill] sm:$0xff] }
 0x5e3   : > { %v7231_v16 = vpop.eup %7230  ;;  %v4754_v29 = vadd.f32 %v7229_v33, %v4753_v41  ;;  %v4116_v14 = vmul.f32 1.442695, %v11935_v28  ;;  %v11938_v41 = vsub.f32 %v11936_v23, %v11937_v51  ;;  %v11958_v23 = vld [vmem:[#allocation273_spill] sm:$0xff] }
 0x5e4   : > { %v7233_v13 = vpop.eup %7232  ;;  %v4748_v17 = vadd.f32 %v7231_v16, %v4747_v56 }
 0x5e5   : > { %v4755_v24 = vadd.f32 %v7233_v13, %v4754_v29  ;;  %v7235_v35 = vpop.eup %7234  ;;  %7250 = vpow2.f32 %v4116_v14  ;;  %v4118_v33 = vmul.f32 1.442695, %v11938_v41 }
 0x5e6   : > { %4749 = vadd.xlane.f32.xlu0 %v4748_v17  ;;  %v7237_v27 = vpop.eup %7236  ;;  %v4077_v17 = vld [vmem:[#allocation4 + $0x28] sm:$0xff] }
 0x5e7   : > { %v4756_v53 = vadd.f32 %v7235_v35, %v4755_v24  ;;  %v7239_v36 = vpop.eup %7238  ;;  %7252 = vpow2.f32 %v4118_v33  ;;  %v11939_v24 = vld [vmem:[#allocation266_spill] sm:$0xff]  ;;  %v11940_v35 = vld [vmem:[#allocation267_spill] sm:$0xff] }
 0x5e8   : > { %v4136_v40 = vmul.f32 %v7239_v36, %v4072_v6  ;;  %v7241_v3 = vpop.eup %7240  ;;  %v11942_v36 = vld [vmem:[#allocation254_spill] sm:$0xff]  ;;  %v11943_v6 = vld [vmem:[#allocation255_spill] sm:$0xff] }
 0x5e9   : > { %v4757_v47 = vadd.f32 %v7237_v27, %v4756_v53  ;;  %v4137_v0 = vmul.f32 %v7241_v3, %v4073_v5  ;;  %v7243_v58 = vpop.eup %7242  ;;  %v11941_v53 = vsub.f32 %v11939_v24, %v11940_v35  ;;  %v11961_v24 = vld [vmem:[#allocation265_spill] sm:$0xff] }
 0x5ea   : > { %v4138_v20 = vmul.f32 %v7243_v58, %v4074_v4  ;;  %v7245_v34 = vpop.eup %7244 }
 0x5eb   : > { %4758 = vadd.xlane.f32.xlu1 %v4757_v47  ;;  %v4139_v49 = vmul.f32 %v7245_v34, %v4075_v19  ;;  %v7247_v38 = vpop.eup %7246  ;;  %v4120_v27 = vmul.f32 1.442695, %v11941_v53  ;;  %v4082_v34 = vld [vmem:[#allocation4 + $0x50] sm:$0xff]  ;;  %v11954_v19 = vld [vmem:[#allocation260_spill] sm:$0xff] }
 0x5ec   : > { %v4140_v56 = vmul.f32 %v7247_v38, %v4076_v30  ;;  %v7249_v29 = vpop.eup %7248  ;;  %v11957_v30 = vld [vmem:[#allocation272_spill] sm:$0xff] }
 0x5ed   : > { %v4141_v47 = vmul.f32 %v7249_v29, %v4077_v17  ;;  %7254 = vpow2.f32 %v4120_v27  ;;  %v11959_v51 = vsub.f32 %v11957_v30, %v11958_v23  ;;  %v11960_v17 = vld [vmem:[#allocation264_spill] sm:$0xff] }
 0x5ee   : > { %v11962_v35 = vsub.f32 %v11960_v17, %v11961_v24 }
 0x5ef   : > { %v7251_v52 = vpop.eup %7250  ;;  %v4132_v41 = vmul.f32 1.442695, %v11959_v51 }
 0x5f0   : > { %v4134_v53 = vmul.f32 1.442695, %v11962_v35 }
 0x5f1   : > { %v7253_v60 = vpop.eup %7252 }
 0x5f2   : > { %v4143_v3 = vmul.f32 %v7253_v60, %v4079_v22 }
 0x5f7   : > { %v7255_v15 = vpop.eup %7254 }
 0x5f8   : > { %v4144_v58 = vmul.f32 %v7255_v15, %v4080_v2 }
 0x607   : > { %v4624_v54 = vpop.xlane.xlu1 %4623 }
 0x608   : > { %v4760_v61 = vadd.f32 %v4624_v54, %v4136_v40  ;;  %v11944_v40 = vsub.f32 %v11942_v36, %v11943_v6 }
 0x60a   : > { %4777 = vst.msk [vmem:[#allocation4] sm:$0xff] %vm4776_vm9, %v4760_v61  ;;  %v4122_v54 = vmul.f32 1.442695, %v11944_v40  ;;  %v4142_v61 = vmul.f32 %v7251_v52, %v4078_v32  ;;  %v4085_v52 = vld [vmem:[#allocation4 + $0x68] sm:$0xff] }
 0x60c   : > { %7256 = vpow2.f32 %v4122_v54  ;;  %v4086_v54 = vld [vmem:[#allocation4 + $0x70] sm:$0xff] }
 0x60d   : > { %7258 = vpow2.f32 %v4124_v18 }
 0x616   : > { %v7257_v42 = vpop.eup %7256 }
 0x617   : > { %v4145_v57 = vmul.f32 %v7257_v42, %v4081_v59  ;;  %v7259_v63 = vpop.eup %7258 }
 0x618   : > { %v4146_v28 = vmul.f32 %v7259_v63, %v4082_v34 }
 0x629   : > { %v4633_v7 = vpop.xlane.xlu0 %4632 }
 0x62a   : > { %v4761_v45 = vadd.f32 %v4633_v7, %v4137_v0  ;;  %v11949_v0 = vld [vmem:[#allocation259_spill] sm:$0xff] }
 0x62b   : > { %v11950_v7 = vsub.f32 %v11948_v12, %v11949_v0 }
 0x62c   : > { %4778 = vst.msk [vmem:[#allocation4 + $0x8] sm:$0xff] %vm4776_vm9, %v4761_v45 }
 0x62d   : > { %v4126_v45 = vmul.f32 1.442695, %v11950_v7 }
 0x62f   : > { %7260 = vpow2.f32 %v4126_v45 }
 0x631   : > { %v4642_v48 = vpop.xlane.xlu0 %4641 }
 0x632   : > { %v4762_v43 = vadd.f32 %v4642_v48, %v4138_v20  ;;  %v11952_v20 = vld [vmem:[#allocation271_spill] sm:$0xff] }
 0x633   : > { %v11953_v48 = vsub.f32 %v11951_v9, %v11952_v20 }
 0x634   : > { %4779 = vst.msk [vmem:[#allocation4 + $0x10] sm:$0xff] %vm4776_vm9, %v4762_v43 }
 0x635   : > { %v4128_v43 = vmul.f32 1.442695, %v11953_v48 }
 0x637   : > { %7262 = vpow2.f32 %v4128_v43 }
 0x639   : > { %v4651_v37 = vpop.xlane.xlu1 %4650 }
 0x63a   : > { %v4763_v11 = vadd.f32 %v4651_v37, %v4139_v49  ;;  %v11955_v49 = vld [vmem:[#allocation261_spill] sm:$0xff]  ;;  %v7261_v37 = vpop.eup %7260 }
 0x63b   : > { %v11956_v31 = vsub.f32 %v11954_v19, %v11955_v49 }
 0x63c   : > { %4780 = vst.msk [vmem:[#allocation4 + $0x18] sm:$0xff] %vm4776_vm9, %v4763_v11  ;;  %v4083_v11 = vld [vmem:[#allocation4 + $0x58] sm:$0xff] }
 0x63d   : > { %v4130_v1 = vmul.f32 1.442695, %v11956_v31  ;;  %v4147_v33 = vmul.f32 %v7261_v37, %v4083_v11 }
 0x63f   : > { %7264 = vpow2.f32 %v4130_v1 }
 0x640   : > { %7266 = vpow2.f32 %v4132_v41 }
 0x641   : > { %v4660_v16 = vpop.xlane.xlu0 %4659  ;;  %7268 = vpow2.f32 %v4134_v53 }
 0x642   : > { %v4764_v13 = vadd.f32 %v4660_v16, %v4140_v56  ;;  %v7263_v16 = vpop.eup %7262 }
 0x644   : > { %4781 = vst.msk [vmem:[#allocation4 + $0x20] sm:$0xff] %vm4776_vm9, %v4764_v13  ;;  %v4084_v13 = vld [vmem:[#allocation4 + $0x60] sm:$0xff] }
 0x645   : > { %v4148_v27 = vmul.f32 %v7263_v16, %v4084_v13 }
 0x646   : > { %v4669_v46 = vpop.xlane.xlu1 %4668 }
 0x647   : > { %v4765_v62 = vadd.f32 %v4669_v46, %v4141_v47 }
 0x649   : > { %4782 = vst.msk [vmem:[#allocation4 + $0x28] sm:$0xff] %vm4776_vm9, %v4765_v62  ;;  %v7265_v46 = vpop.eup %7264 }
 0x64a   : > { %v4149_v32 = vmul.f32 %v7265_v46, %v4085_v52  ;;  %v7267_v6 = vpop.eup %7266 }
 0x64b   : > { %v4678_v50 = vpop.xlane.xlu0 %4677  ;;  %v7269_v60 = vpop.eup %7268 }
 0x64c   : > { %v4766_v55 = vadd.f32 %v4678_v50, %v4142_v61  ;;  %v4150_v61 = vmul.f32 %v7267_v6, %v4086_v54 }
 0x64e   : > { %4783 = vst.msk [vmem:[#allocation4 + $0x30] sm:$0xff] %vm4776_vm9, %v4766_v55  ;;  %v4087_v55 = vld [vmem:[#allocation4 + $0x78] sm:$0xff] }
 0x64f   : > { %v4151_v39 = vmul.f32 %v7269_v60, %v4087_v55 }
 0x650   : > { %v4687_v5 = vpop.xlane.xlu1 %4686 }
 0x651   : > { %v4767_v10 = vadd.f32 %v4687_v5, %v4143_v3 }
 0x653   : > { %4784 = vst.msk [vmem:[#allocation4 + $0x38] sm:$0xff] %vm4776_vm9, %v4767_v10 }
 0x655   : > { %v4696_v4 = vpop.xlane.xlu0 %4695 }
 0x656   : > { %v4768_v21 = vadd.f32 %v4696_v4, %v4144_v58 }
 0x658   : > { %4785 = vst.msk [vmem:[#allocation4 + $0x40] sm:$0xff] %vm4776_vm9, %v4768_v21 }
 0x65a   : > { %v4705_v44 = vpop.xlane.xlu1 %4704 }
 0x65b   : > { %v4769_v25 = vadd.f32 %v4705_v44, %v4145_v57 }
 0x65d   : > { %4786 = vst.msk [vmem:[#allocation4 + $0x48] sm:$0xff] %vm4776_vm9, %v4769_v25 }
 0x65f   : > { %v4714_v14 = vpop.xlane.xlu0 %4713 }
 0x660   : > { %v4770_v38 = vadd.f32 %v4714_v14, %v4146_v28 }
 0x662   : > { %4787 = vst.msk [vmem:[#allocation4 + $0x50] sm:$0xff] %vm4776_vm9, %v4770_v38 }
 0x664   : > { %v4723_v56 = vpop.xlane.xlu1 %4722 }
 0x665   : > { %v4771_v29 = vadd.f32 %v4723_v56, %v4147_v33 }
 0x667   : > { %4788 = vst.msk [vmem:[#allocation4 + $0x58] sm:$0xff] %vm4776_vm9, %v4771_v29 }
 0x669   : > { %v4732_v47 = vpop.xlane.xlu0 %4731 }
 0x66a   : > { %v4772_v62 = vadd.f32 %v4732_v47, %v4148_v27 }
 0x66c   : > { %4789 = vst.msk [vmem:[#allocation4 + $0x60] sm:$0xff] %vm4776_vm9, %v4772_v62 }
 0x66e   : > { %v4741_v36 = vpop.xlane.xlu1 %4740 }
 0x66f   : > { %v4773_v40 = vadd.f32 %v4741_v36, %v4149_v32 }
 0x671   : > { %4790 = vst.msk [vmem:[#allocation4 + $0x68] sm:$0xff] %vm4776_vm9, %v4773_v40 }
 0x673   : > { %v4750_v50 = vpop.xlane.xlu0 %4749 }
 0x674   : > { %v4774_v22 = vadd.f32 %v4750_v50, %v4150_v61 }
 0x676   : > { %4791 = vst.msk [vmem:[#allocation4 + $0x70] sm:$0xff] %vm4776_vm9, %v4774_v22 }
 0x678   : > { %v4759_v8 = vpop.xlane.xlu1 %4758 }
 0x679   : > { %v4775_v26 = vadd.f32 %v4759_v8, %v4151_v39 }
 0x67b   : > { %4792 = vst.msk [vmem:[#allocation4 + $0x78] sm:$0xff] %vm4776_vm9, %v4775_v26 }
 0x67c PF: > { %s11963_s20 = sld [smem:[#allocation19_spill]] }
 0x682   : > { %p6157_p6 = scmp.ne.s32.totalorder %s11963_s20, 1 }
 0x684   : > { %4812 = sbr.rel (%p6157_p6) target bundleno = 1957 (0x7a5), region = 56 }
 0x68b   : > { %v4863_v18 = vld [vmem:[#allocation3 + $0x10] sm:$0xff]  ;;  %v4861_v3 = vld [vmem:[#allocation3] sm:$0xff]  ;;  %v7832_v5 = vmov 0   ;;  %v4864_v15 = vld [vmem:[#allocation3 + $0x18] sm:$0xff] }
 0x68c   : > { %7271 = vset.pattern.permute.xlu1 %v7832_v5  ;;  %7270 = vset.pattern.permute.xlu0 %v7832_v5  ;;  %v4862_v10 = vld [vmem:[#allocation3 + $0x8] sm:$0xff]  ;;  %v4865_v12 = vld [vmem:[#allocation3 + $0x20] sm:$0xff]  ;;  %v4868_v0 = vld [vmem:[#allocation3 + $0x38] sm:$0xff] }
 0x68d   : > { %4889 = vperm.xlu1 %7271, %v4863_v18   ;;  %4879 = vperm.xlu0 %7270, %v4861_v3   ;;  %v4866_v2 = vld [vmem:[#allocation3 + $0x28] sm:$0xff]  ;;  %v4867_v7 = vld [vmem:[#allocation3 + $0x30] sm:$0xff]  ;;  %v4869_v58 = vld [vmem:[#allocation3 + $0x40] sm:$0xff] }
 0x68e   : > { %v4870_v45 = vld [vmem:[#allocation3 + $0x48] sm:$0xff]  ;;  %v4813_v42 = vld [vmem:[#allocation4] sm:$0xff]  ;;  %v4872_v59 = vld [vmem:[#allocation3 + $0x58] sm:$0xff] }
 0x68f   : > { %v4814_v4 = vld [vmem:[#allocation4 + $0x8] sm:$0xff]  ;;  %v4871_v21 = vld [vmem:[#allocation3 + $0x50] sm:$0xff]  ;;  %v4816_v9 = vld [vmem:[#allocation4 + $0x18] sm:$0xff] }
 0x690   : > { %7272 = vrcp.f32 %v4814_v4  ;;  %v4815_v20 = vld [vmem:[#allocation4 + $0x10] sm:$0xff]  ;;  %v4874_v48 = vld [vmem:[#allocation3 + $0x68] sm:$0xff]  ;;  %v4873_v43 = vld [vmem:[#allocation3 + $0x60] sm:$0xff] }
 0x691   : > { %4894 = vperm.xlu1 %7271, %v4864_v15   ;;  %4884 = vperm.xlu0 %7270, %v4862_v10   ;;  %7274 = vrcp.f32 %v4813_v42  ;;  %v4818_v57 = vld [vmem:[#allocation4 + $0x28] sm:$0xff]  ;;  %v4817_v44 = vld [vmem:[#allocation4 + $0x20] sm:$0xff]  ;;  %v4876_v63 = vld [vmem:[#allocation3 + $0x78] sm:$0xff] }
 0x692   : > { %7276 = vrcp.f32 %v4816_v9  ;;  %v4875_v25 = vld [vmem:[#allocation3 + $0x70] sm:$0xff]  ;;  %v4820_v34 = vld [vmem:[#allocation4 + $0x38] sm:$0xff]  ;;  %v4822_v1 = vld [vmem:[#allocation4 + $0x48] sm:$0xff] }
 0x693   : > { %7278 = vrcp.f32 %v4815_v20  ;;  %v4819_v49 = vld [vmem:[#allocation4 + $0x30] sm:$0xff]  ;;  %v4821_v14 = vld [vmem:[#allocation4 + $0x40] sm:$0xff]  ;;  %v4824_v11 = vld [vmem:[#allocation4 + $0x58] sm:$0xff] }
 0x694   : > { %7280 = vrcp.f32 %v4818_v57  ;;  %v4823_v30 = vld [vmem:[#allocation4 + $0x50] sm:$0xff]  ;;  %v4826_v51 = vld [vmem:[#allocation4 + $0x68] sm:$0xff]  ;;  %v4825_v33 = vld [vmem:[#allocation4 + $0x60] sm:$0xff] }
 0x695   : > { %4904 = vperm.xlu1 %7271, %v4866_v2   ;;  %4899 = vperm.xlu0 %7270, %v4865_v12   ;;  %7282 = vrcp.f32 %v4817_v44  ;;  %v4828_v16 = vld [vmem:[#allocation4 + $0x78] sm:$0xff]  ;;  %v4827_v13 = vld [vmem:[#allocation4 + $0x70] sm:$0xff]  ;;  %v11964_v62 = vld [vmem:[#allocation37_spill] sm:$0xff] }
 0x696   : > { %7284 = vrcp.f32 %v4820_v34  ;;  %v11965_v36 = vld [vmem:[#allocation39_spill] sm:$0xff]  ;;  %v11966_v40 = vld [vmem:[#allocation38_spill] sm:$0xff]  ;;  %v11967_v61 = vld [vmem:[#allocation40_spill] sm:$0xff] }
 0x697   : > { %7286 = vrcp.f32 %v4819_v49  ;;  %v11968_v60 = vld [vmem:[#allocation101_spill] sm:$0xff]  ;;  %v11969_v22 = vld [vmem:[#allocation103_spill] sm:$0xff]  ;;  %v11970_v26 = vld [vmem:[#allocation102_spill] sm:$0xff] }
 0x698   : > { %7288 = vrcp.f32 %v4822_v1  ;;  %v11971_v10 = vld [vmem:[#allocation104_spill] sm:$0xff]  ;;  %v11973_v4 = vld [vmem:[#allocation31_spill] sm:$0xff]  ;;  %v11976_v57 = vld [vmem:[#allocation93_spill] sm:$0xff] }
 0x699   : > { %4914 = vperm.xlu1 %7271, %v4868_v0   ;;  %4909 = vperm.xlu0 %7270, %v4867_v7   ;;  %7290 = vrcp.f32 %v4821_v14  ;;  %v11972_v7 = vld [vmem:[#allocation29_spill] sm:$0xff]  ;;  %v11979_v14 = vld [vmem:[#allocation96_spill] sm:$0xff] }
 0x69a   : > { %v7273_v19 = vpop.eup %7272  ;;  %7292 = vrcp.f32 %v4824_v11 }
 0x69b   : > { %v7275_v31 = vpop.eup %7274  ;;  %7294 = vrcp.f32 %v4823_v30  ;;  %v11980_v30 = vld [vmem:[#allocation41_spill] sm:$0xff] }
 0x69c   : > { %v7277_v28 = vpop.eup %7276  ;;  %7296 = vrcp.f32 %v4826_v51 }
 0x69d   : > { %4924 = vperm.xlu1 %7271, %v4870_v45   ;;  %4919 = vperm.xlu0 %7270, %v4869_v58   ;;  %v7279_v37 = vpop.eup %7278  ;;  %7298 = vrcp.f32 %v4825_v33 }
 0x69e   : > { %v7281_v38 = vpop.eup %7280  ;;  %7300 = vrcp.f32 %v4828_v16 }
 0x69f   : > { %v7283_v23 = vpop.eup %7282  ;;  %7302 = vrcp.f32 %v4827_v13 }
 0x6a0   : > { %v7285_v41 = vpop.eup %7284 }
 0x6a1   : > { %4934 = vperm.xlu1 %7271, %v4872_v59   ;;  %4929 = vperm.xlu0 %7270, %v4871_v21   ;;  %v7287_v56 = vpop.eup %7286  ;;  %v11974_v21 = vld [vmem:[#allocation30_spill] sm:$0xff] }
 0x6a2   : > { %v7289_v29 = vpop.eup %7288 }
 0x6a3   : > { %v7291_v17 = vpop.eup %7290 }
 0x6a4   : > { %v7293_v24 = vpop.eup %7292 }
 0x6a5   : > { %4944 = vperm.xlu1 %7271, %v4874_v48   ;;  %4939 = vperm.xlu0 %7270, %v4873_v43   ;;  %v7295_v35 = vpop.eup %7294  ;;  %v11975_v48 = vld [vmem:[#allocation32_spill] sm:$0xff] }
 0x6a6   : > { %v7297_v53 = vpop.eup %7296 }
 0x6a7   : > { %v7299_v27 = vpop.eup %7298 }
 0x6a8   : > { %v7301_v47 = vpop.eup %7300 }
 0x6a9   : > { %4954 = vperm.xlu1 %7271, %v4876_v63   ;;  %4949 = vperm.xlu0 %7270, %v4875_v25   ;;  %v7303_v46 = vpop.eup %7302  ;;  %v11977_v25 = vld [vmem:[#allocation95_spill] sm:$0xff] }
 0x6ad   : > { %5348 = vperm.xlu1 %7271, %v7273_v19   ;;  %5343 = vperm.xlu0 %7270, %v7275_v31   ;;  %v11978_v31 = vld [vmem:[#allocation94_spill] sm:$0xff] }
 0x6b1   : > { %5358 = vperm.xlu1 %7271, %v7277_v28   ;;  %5353 = vperm.xlu0 %7270, %v7279_v37  }
 0x6b5   : > { %5368 = vperm.xlu1 %7271, %v7281_v38   ;;  %5363 = vperm.xlu0 %7270, %v7283_v23  }
 0x6b9   : > { %5378 = vperm.xlu1 %7271, %v7285_v41   ;;  %5373 = vperm.xlu0 %7270, %v7287_v56   ;;  %v11981_v41 = vld [vmem:[#allocation43_spill] sm:$0xff]  ;;  %v11982_v56 = vld [vmem:[#allocation42_spill] sm:$0xff] }
 0x6bd   : > { %5388 = vperm.xlu1 %7271, %v7289_v29   ;;  %5383 = vperm.xlu0 %7270, %v7291_v17   ;;  %v11984_v17 = vld [vmem:[#allocation44_spill] sm:$0xff] }
 0x6c1   : > { %5398 = vperm.xlu1 %7271, %v7293_v24   ;;  %5393 = vperm.xlu0 %7270, %v7295_v35  }
 0x6c5   : > { %5408 = vperm.xlu1 %7271, %v7297_v53   ;;  %5403 = vperm.xlu0 %7270, %v7299_v27   ;;  %v11986_v27 = vld [vmem:[#allocation105_spill] sm:$0xff] }
 0x6c9   : > { %5418 = vperm.xlu1 %7271, %v7301_v47   ;;  %5413 = vperm.xlu0 %7270, %v7303_v46   ;;  %v11987_v46 = vld [vmem:[#allocation107_spill] sm:$0xff] }
 0x70c   : > { %v4890_v52 = vpop.permute.xlu1 %4889  ;;  %v4880_v8 = vpop.permute.xlu0 %4879 }
 0x70d   : > { %v4973_v32 = vsub.f32 %v11964_v62, %v4890_v52  ;;  %v4974_v6 = vsub.f32 %v11965_v36, %v4890_v52  ;;  %v4975_v54 = vsub.f32 %v11966_v40, %v4890_v52  ;;  %v4976_v50 = vsub.f32 %v11967_v61, %v4890_v52  ;;  %v11989_v36 = vld [vmem:[#allocation106_spill] sm:$0xff]  ;;  %v11990_v40 = vld [vmem:[#allocation108_spill] sm:$0xff] }
 0x70e   : > { %v4977_v55 = vsub.f32 %v11968_v60, %v4890_v52  ;;  %v4978_v39 = vsub.f32 %v11969_v22, %v4890_v52  ;;  %v4979_v18 = vsub.f32 %v11970_v26, %v4890_v52  ;;  %v4980_v2 = vsub.f32 %v11971_v10, %v4890_v52  ;;  %v11996_v10 = vld [vmem:[#allocation34_spill] sm:$0xff] }
 0x70f   : > { %v5117_v3 = vmul.f32 1.442695, %v4973_v32  ;;  %v5119_v5 = vmul.f32 1.442695, %v4974_v6  ;;  %v5121_v15 = vmul.f32 1.442695, %v4975_v54  ;;  %v4957_v45 = vsub.f32 %v11972_v7, %v4880_v8 }
 0x710   : > { %v5123_v12 = vmul.f32 1.442695, %v4976_v50  ;;  %v5125_v0 = vmul.f32 1.442695, %v4977_v55  ;;  %v5127_v58 = vmul.f32 1.442695, %v4978_v39  ;;  %v4958_v42 = vsub.f32 %v11973_v4, %v4880_v8  ;;  %v4895_v49 = vpop.permute.xlu1 %4894  ;;  %v4885_v62 = vpop.permute.xlu0 %4884 }
 0x711   : > { %7304 = vpow2.f32 %v5117_v3  ;;  %v5129_v59 = vmul.f32 1.442695, %v4979_v18  ;;  %v4959_v9 = vsub.f32 %v11974_v21, %v4880_v8  ;;  %v5131_v20 = vmul.f32 1.442695, %v4980_v2  ;;  %v11994_v18 = vld [vmem:[#allocation35_spill] sm:$0xff]  ;;  %v12000_v21 = vld [vmem:[#allocation97_spill] sm:$0xff] }
 0x712   : > { %7306 = vpow2.f32 %v5119_v5  ;;  %v4960_v43 = vsub.f32 %v11975_v48, %v4880_v8  ;;  %v4961_v44 = vsub.f32 %v11976_v57, %v4880_v8  ;;  %v5085_v63 = vmul.f32 1.442695, %v4957_v45 }
 0x713   : > { %7308 = vpow2.f32 %v5121_v15  ;;  %v4962_v34 = vsub.f32 %v11977_v25, %v4880_v8  ;;  %v5087_v19 = vmul.f32 1.442695, %v4958_v42  ;;  %v4963_v1 = vsub.f32 %v11978_v31, %v4880_v8 }
 0x714   : > { %7310 = vpow2.f32 %v5123_v12  ;;  %v5089_v28 = vmul.f32 1.442695, %v4959_v9  ;;  %v4964_v37 = vsub.f32 %v11979_v14, %v4880_v8  ;;  %v5091_v11 = vmul.f32 1.442695, %v4960_v43  ;;  %v11993_v8 = vld [vmem:[#allocation33_spill] sm:$0xff]  ;;  %v11997_v12 = vld [vmem:[#allocation36_spill] sm:$0xff]  ;;  %v4905_v42 = vpop.permute.xlu1 %4904 }
 0x715   : > { %7312 = vpow2.f32 %v5125_v0  ;;  %v5093_v38 = vmul.f32 1.442695, %v4961_v44  ;;  %v4981_v23 = vsub.f32 %v11980_v30, %v4895_v49  ;;  %v5095_v51 = vmul.f32 1.442695, %v4962_v34  ;;  %v12002_v43 = vld [vmem:[#allocation98_spill] sm:$0xff] }
 0x716   : > { %7314 = vpow2.f32 %v5127_v58  ;;  %v4982_v33 = vsub.f32 %v11981_v41, %v4895_v49  ;;  %v4983_v16 = vsub.f32 %v11982_v56, %v4895_v49  ;;  %v5097_v13 = vmul.f32 1.442695, %v4963_v1  ;;  %v12006_v30 = vld [vmem:[#allocation50_spill] sm:$0xff] }
 0x717   : > { %7316 = vpow2.f32 %v5129_v59  ;;  %v4984_v24 = vsub.f32 %v11984_v17, %v4895_v49  ;;  %v5099_v53 = vmul.f32 1.442695, %v4964_v37  ;;  %v4985_v47 = vsub.f32 %v11986_v27, %v4895_v49 }
 0x718   : > { %7318 = vpow2.f32 %v5131_v20  ;;  %v4986_v52 = vsub.f32 %v11987_v46, %v4895_v49  ;;  %v4987_v6 = vsub.f32 %v11989_v36, %v4895_v49  ;;  %v4988_v54 = vsub.f32 %v11990_v40, %v4895_v49  ;;  %v12001_v20 = vld [vmem:[#allocation99_spill] sm:$0xff]  ;;  %v12010_v36 = vld [vmem:[#allocation114_spill] sm:$0xff]  ;;  %v12011_v40 = vld [vmem:[#allocation116_spill] sm:$0xff] }
 0x719   : > { %7320 = vpow2.f32 %v5085_v63  ;;  %v5133_v61 = vmul.f32 1.442695, %v4981_v23  ;;  %v5135_v60 = vmul.f32 1.442695, %v4982_v33  ;;  %v5137_v55 = vmul.f32 1.442695, %v4983_v16 }
 0x71a   : > { %7322 = vpow2.f32 %v5087_v19  ;;  %v5139_v39 = vmul.f32 1.442695, %v4984_v24  ;;  %v4965_v26 = vsub.f32 %v11993_v8, %v4885_v62  ;;  %v4966_v3 = vsub.f32 %v11994_v18, %v4885_v62  ;;  %v12003_v63 = vld [vmem:[#allocation100_spill] sm:$0xff]  ;;  %v12012_v18 = vld [vmem:[#allocation45_spill] sm:$0xff] }
 0x71b   : > { %v10343_v29 = vpop.eup %7304  ;;  %7324 = vpow2.f32 %v5089_v28  ;;  %v5141_v15 = vmul.f32 1.442695, %v4985_v47  ;;  %v4967_v2 = vsub.f32 %v11996_v10, %v4885_v62  ;;  %v4968_v0 = vsub.f32 %v11997_v12, %v4885_v62  ;;  %v12004_v28 = vld [vmem:[#allocation49_spill] sm:$0xff]  ;;  %v12009_v47 = vld [vmem:[#allocation115_spill] sm:$0xff] }
 0x71c   : > { %11983 = vst [vmem:[#allocation278_spill] sm:$0xff] %v10343_v29  ;;  %v10346_v35 = vpop.eup %7306  ;;  %7326 = vpow2.f32 %v5091_v11  ;;  %v5143_v45 = vmul.f32 1.442695, %v4986_v52  ;;  %v5145_v58 = vmul.f32 1.442695, %v4987_v6  ;;  %v4969_v9 = vsub.f32 %v12000_v21, %v4885_v62  ;;  %v12005_v11 = vld [vmem:[#allocation51_spill] sm:$0xff]  ;;  %v4900_v52 = vpop.permute.xlu0 %4899 }
 0x71d   : > { %11985 = vst [vmem:[#allocation279_spill] sm:$0xff] %v10346_v35  ;;  %v10350_v32 = vpop.eup %7308  ;;  %7328 = vpow2.f32 %v5093_v38  ;;  %v5147_v4 = vmul.f32 1.442695, %v4988_v54  ;;  %v4970_v48 = vsub.f32 %v12001_v20, %v4885_v62  ;;  %v4971_v57 = vsub.f32 %v12002_v43, %v4885_v62 }
 0x71e   : > { %11988 = vst [vmem:[#allocation280_spill] sm:$0xff] %v10350_v32  ;;  %v10354_v50 = vpop.eup %7310  ;;  %7330 = vpow2.f32 %v5095_v51  ;;  %v4972_v25 = vsub.f32 %v12003_v63, %v4885_v62  ;;  %v5101_v34 = vmul.f32 1.442695, %v4965_v26  ;;  %v5103_v19 = vmul.f32 1.442695, %v4966_v3  ;;  %v12007_v51 = vld [vmem:[#allocation52_spill] sm:$0xff] }
 0x71f   : > { %11991 = vst [vmem:[#allocation281_spill] sm:$0xff] %v10354_v50  ;;  %v10356_v22 = vpop.eup %7312  ;;  %7332 = vpow2.f32 %v5097_v13  ;;  %v5105_v31 = vmul.f32 1.442695, %v4967_v2  ;;  %v5107_v1 = vmul.f32 1.442695, %v4968_v0  ;;  %v4997_v14 = vsub.f32 %v12004_v28, %v4905_v42  ;;  %v12014_v2 = vld [vmem:[#allocation46_spill] sm:$0xff] }
 0x720   : > { %11992 = vst [vmem:[#allocation282_spill] sm:$0xff] %v10356_v22  ;;  %v10360_v5 = vpop.eup %7314  ;;  %7334 = vpow2.f32 %v5099_v53  ;;  %v4998_v38 = vsub.f32 %v12005_v11, %v4905_v42  ;;  %v4999_v23 = vsub.f32 %v12006_v30, %v4905_v42  ;;  %v5000_v41 = vsub.f32 %v12007_v51, %v4905_v42  ;;  %v12008_v53 = vld [vmem:[#allocation113_spill] sm:$0xff]  ;;  %v12045_v22 = vld [vmem:[#allocation66_spill] sm:$0xff] }
 0x721   : > { %11995 = vst [vmem:[#allocation283_spill] sm:$0xff] %v10360_v5  ;;  %v10364_v7 = vpop.eup %7316  ;;  %7336 = vpow2.f32 %v5133_v61  ;;  %v5109_v56 = vmul.f32 1.442695, %v4969_v9  ;;  %v5111_v16 = vmul.f32 1.442695, %v4970_v48  ;;  %v5001_v27 = vsub.f32 %v12008_v53, %v4905_v42  ;;  %v12017_v48 = vld [vmem:[#allocation109_spill] sm:$0xff] }
 0x722   : > { %11998 = vst [vmem:[#allocation284_spill] sm:$0xff] %v10364_v7  ;;  %v10366_v59 = vpop.eup %7318  ;;  %7338 = vpow2.f32 %v5135_v60  ;;  %v5113_v13 = vmul.f32 1.442695, %v4971_v57  ;;  %v5115_v24 = vmul.f32 1.442695, %v4972_v25  ;;  %v5002_v46 = vsub.f32 %v12009_v47, %v4905_v42  ;;  %v4915_v57 = vpop.permute.xlu1 %4914  ;;  %v12019_v25 = vld [vmem:[#allocation111_spill] sm:$0xff] }
 0x723   : > { %11999 = vst [vmem:[#allocation285_spill] sm:$0xff] %v10366_v59  ;;  %v10371_v44 = vpop.eup %7320  ;;  %7340 = vpow2.f32 %v5137_v55  ;;  %v5003_v6 = vsub.f32 %v12010_v36, %v4905_v42  ;;  %v5004_v54 = vsub.f32 %v12011_v40, %v4905_v42  ;;  %v5165_v61 = vmul.f32 1.442695, %v4997_v14  ;;  %v12025_v53 = vld [vmem:[#allocation59_spill] sm:$0xff]  ;;  %v12028_v36 = vld [vmem:[#allocation60_spill] sm:$0xff]  ;;  %v12043_v7 = vld [vmem:[#allocation65_spill] sm:$0xff] }
 0x724   : > { %v10374_v49 = vpop.eup %7322  ;;  %7342 = vpow2.f32 %v5139_v39  ;;  %v5167_v55 = vmul.f32 1.442695, %v4998_v38  ;;  %v5169_v39 = vmul.f32 1.442695, %v4999_v23  ;;  %v5171_v8 = vmul.f32 1.442695, %v5000_v41 }
 0x725   : > { %v10377_v37 = vpop.eup %7324  ;;  %7344 = vpow2.f32 %v5141_v15  ;;  %v4989_v3 = vsub.f32 %v12012_v18, %v4900_v52  ;;  %v12013_v15 = vld [vmem:[#allocation47_spill] sm:$0xff]  ;;  %v4991_v12 = vsub.f32 %v12014_v2, %v4900_v52  ;;  %v5177_v9 = vmul.f32 1.442695, %v5003_v6  ;;  %v12024_v41 = vld [vmem:[#allocation57_spill] sm:$0xff] }
 0x726   : > { %v10382_v33 = vpop.eup %7326  ;;  %7346 = vpow2.f32 %v5143_v45  ;;  %v4990_v10 = vsub.f32 %v12013_v15, %v4900_v52  ;;  %v5173_v45 = vmul.f32 1.442695, %v5001_v27  ;;  %v5179_v20 = vmul.f32 1.442695, %v5004_v54  ;;  %v12032_v2 = vld [vmem:[#allocation123_spill] sm:$0xff] }
 0x727   : > { %v10384_v17 = vpop.eup %7328  ;;  %7348 = vpow2.f32 %v5145_v58  ;;  %v5175_v58 = vmul.f32 1.442695, %v5002_v46  ;;  %v4993_v43 = vsub.f32 %v12017_v48, %v4900_v52  ;;  %v5149_v38 = vmul.f32 1.442695, %v4989_v3  ;;  %v4910_v3 = vpop.permute.xlu0 %4909  ;;  %v12044_v5 = vld [vmem:[#allocation67_spill] sm:$0xff] }
 0x728   : > { %v10388_v62 = vpop.eup %7330  ;;  %7350 = vpow2.f32 %v5147_v4  ;;  %v12015_v4 = vld [vmem:[#allocation48_spill] sm:$0xff]  ;;  %v5151_v30 = vmul.f32 1.442695, %v4990_v10  ;;  %v5014_v27 = vsub.f32 %v12025_v53, %v4915_v57  ;;  %v5016_v6 = vsub.f32 %v12028_v36, %v4915_v57  ;;  %v12036_v53 = vld [vmem:[#allocation55_spill] sm:$0xff] }
 0x729   : > { %v10392_v60 = vpop.eup %7332  ;;  %7352 = vpow2.f32 %v5101_v34  ;;  %v4992_v42 = vsub.f32 %v12015_v4, %v4900_v52  ;;  %v4994_v34 = vsub.f32 %v12019_v25, %v4900_v52  ;;  %v10422_v46 = vmul.f32 1.442695, %v4993_v43  ;;  %v12033_v4 = vld [vmem:[#allocation122_spill] sm:$0xff] }
 0x72a   : > { %v10394_v26 = vpop.eup %7334  ;;  %7354 = vpow2.f32 %v5103_v19  ;;  %v12020_v19 = vld [vmem:[#allocation110_spill] sm:$0xff] }
 0x72b   : > { %v10399_v0 = vpop.eup %7336  ;;  %7356 = vpow2.f32 %v5105_v31  ;;  %v4995_v28 = vsub.f32 %v12020_v19, %v4900_v52  ;;  %v12021_v31 = vld [vmem:[#allocation112_spill] sm:$0xff]  ;;  %v10416_v51 = vmul.f32 1.442695, %v4992_v42  ;;  %v10428_v54 = vmul.f32 1.442695, %v4994_v34  ;;  %v4920_v50 = vpop.permute.xlu0 %4919 }
 0x72c   : > { %v10402_v21 = vpop.eup %7338  ;;  %7358 = vpow2.f32 %v5107_v1  ;;  %v4996_v14 = vsub.f32 %v12021_v31, %v4900_v52  ;;  %v10412_v1 = vmul.f32 1.442695, %v4991_v12  ;;  %v12027_v52 = vld [vmem:[#allocation58_spill] sm:$0xff]  ;;  %v5018_v12 = vsub.f32 %v12032_v2, %v4915_v57  ;;  %v12035_v31 = vld [vmem:[#allocation53_spill] sm:$0xff] }
 0x72d   : > { %12016 = vst [vmem:[#allocation286_spill] sm:$0xff] %v10402_v21  ;;  %v10405_v63 = vpop.eup %7340  ;;  %7360 = vpow2.f32 %v5109_v56  ;;  %v5013_v56 = vsub.f32 %v12024_v41, %v4915_v57  ;;  %v5019_v42 = vsub.f32 %v12033_v4, %v4915_v57  ;;  %v10444_v34 = vmul.f32 1.442695, %v5014_v27 }
 0x72e   : > { %12018 = vst [vmem:[#allocation287_spill] sm:$0xff] %v10405_v63  ;;  %v10410_v11 = vpop.eup %7342  ;;  %7362 = vpow2.f32 %v5111_v16  ;;  %v5015_v16 = vsub.f32 %v12027_v52, %v4915_v57  ;;  %v10432_v18 = vmul.f32 1.442695, %v4996_v14  ;;  %v5005_v14 = vsub.f32 %v12035_v31, %v4910_v3  ;;  %v12037_v52 = vld [vmem:[#allocation54_spill] sm:$0xff] }
 0x72f   : > { %12022 = vst [vmem:[#allocation288_spill] sm:$0xff] %v10410_v11  ;;  %v10414_v23 = vpop.eup %7344  ;;  %7364 = vpow2.f32 %v5113_v13  ;;  %v10430_v13 = vmul.f32 1.442695, %v4995_v28  ;;  %v10442_v25 = vmul.f32 1.442695, %v5013_v56  ;;  %v12038_v56 = vld [vmem:[#allocation56_spill] sm:$0xff] }
 0x730   : > { %12023 = vst [vmem:[#allocation289_spill] sm:$0xff] %v10414_v23  ;;  %v10420_v47 = vpop.eup %7346  ;;  %7366 = vpow2.f32 %v5115_v24  ;;  %v12031_v24 = vld [vmem:[#allocation121_spill] sm:$0xff]  ;;  %v10448_v28 = vmul.f32 1.442695, %v5015_v16  ;;  %v5008_v36 = vsub.f32 %v12038_v56, %v4910_v3  ;;  %v10464_v16 = vmul.f32 1.442695, %v5019_v42 }
 0x731   : > { %12026 = vst [vmem:[#allocation290_spill] sm:$0xff] %v10420_v47  ;;  %v10426_v40 = vpop.eup %7348  ;;  %7368 = vpow2.f32 %v5165_v61  ;;  %v5017_v10 = vsub.f32 %v12031_v24, %v4915_v57  ;;  %v12034_v61 = vld [vmem:[#allocation124_spill] sm:$0xff]  ;;  %v10476_v59 = vmul.f32 1.442695, %v5005_v14 }
 0x732   : > { %12029 = vst [vmem:[#allocation291_spill] sm:$0xff] %v10426_v40  ;;  %v10434_v15 = vpop.eup %7350  ;;  %7370 = vpow2.f32 %v5167_v55  ;;  %v5020_v43 = vsub.f32 %v12034_v61, %v4915_v57  ;;  %v10450_v55 = vmul.f32 1.442695, %v5016_v6  ;;  %v5007_v57 = vsub.f32 %v12037_v52, %v4910_v3  ;;  %v12040_v61 = vld [vmem:[#allocation119_spill] sm:$0xff]  ;;  %v12042_v56 = vld [vmem:[#allocation120_spill] sm:$0xff] }
 0x733   : > { %12030 = vst [vmem:[#allocation292_spill] sm:$0xff] %v10434_v15  ;;  %v10439_v48 = vpop.eup %7352  ;;  %7372 = vpow2.f32 %v5169_v39  ;;  %v5006_v39 = vsub.f32 %v12036_v53, %v4910_v3  ;;  %v10460_v24 = vmul.f32 1.442695, %v5017_v10  ;;  %v5010_v31 = vsub.f32 %v12040_v61, %v4910_v3  ;;  %v4925_v53 = vpop.permute.xlu1 %4924 }
 0x734   : > { %v10446_v19 = vpop.eup %7354  ;;  %7374 = vpow2.f32 %v5171_v8  ;;  %v10462_v8 = vmul.f32 1.442695, %v5018_v12  ;;  %v10468_v2 = vmul.f32 1.442695, %v5020_v43  ;;  %v5012_v12 = vsub.f32 %v12042_v56, %v4910_v3 }
 0x735   : > { %v10453_v41 = vpop.eup %7356  ;;  %7376 = vpow2.f32 %v5173_v45  ;;  %v12039_v45 = vld [vmem:[#allocation117_spill] sm:$0xff]  ;;  %v10482_v43 = vmul.f32 1.442695, %v5007_v57  ;;  %v12047_v57 = vld [vmem:[#allocation68_spill] sm:$0xff] }
 0x736   : > { %v10458_v27 = vpop.eup %7358  ;;  %7378 = vpow2.f32 %v5175_v58  ;;  %v5009_v4 = vsub.f32 %v12039_v45, %v4910_v3  ;;  %v12041_v58 = vld [vmem:[#allocation118_spill] sm:$0xff]  ;;  %v10484_v45 = vmul.f32 1.442695, %v5008_v36  ;;  %v5032_v36 = vsub.f32 %v12047_v57, %v4925_v53  ;;  %v12053_v57 = vld [vmem:[#allocation132_spill] sm:$0xff] }
 0x737   : > { %v10466_v6 = vpop.eup %7360  ;;  %7380 = vpow2.f32 %v5177_v9  ;;  %v5011_v10 = vsub.f32 %v12041_v58, %v4910_v3  ;;  %v10480_v9 = vmul.f32 1.442695, %v5006_v39  ;;  %v5030_v58 = vsub.f32 %v12044_v5, %v4925_v53  ;;  %v12049_v5 = vld [vmem:[#allocation129_spill] sm:$0xff] }
 0x738   : > { %v10472_v52 = vpop.eup %7362  ;;  %7382 = vpow2.f32 %v5179_v20  ;;  %v5029_v20 = vsub.f32 %v12043_v7, %v4925_v53  ;;  %v5031_v3 = vsub.f32 %v12045_v22, %v4925_v53  ;;  %v10496_v39 = vmul.f32 1.442695, %v5010_v31  ;;  %v12052_v31 = vld [vmem:[#allocation130_spill] sm:$0xff] }
 0x739   : > { %v10478_v42 = vpop.eup %7364  ;;  %7384 = vpow2.f32 %v5149_v38  ;;  %v10494_v38 = vmul.f32 1.442695, %v5009_v4  ;;  %v10504_v7 = vmul.f32 1.442695, %v5012_v12  ;;  %v5033_v22 = vsub.f32 %v12049_v5, %v4925_v53 }
 0x73a   : > { %v10486_v61 = vpop.eup %7366  ;;  %7386 = vpow2.f32 %v5151_v30  ;;  %v10502_v30 = vmul.f32 1.442695, %v5011_v10  ;;  %v5035_v32 = vsub.f32 %v12052_v31, %v4925_v53  ;;  %v5036_v35 = vsub.f32 %v12053_v57, %v4925_v53 }
 0x73b   : > { %v10491_v14 = vpop.eup %7368  ;;  %7388 = vpow2.f32 %v10412_v1  ;;  %v12051_v1 = vld [vmem:[#allocation131_spill] sm:$0xff]  ;;  %v10518_v10 = vmul.f32 1.442695, %v5030_v58  ;;  %v10520_v12 = vmul.f32 1.442695, %v5031_v3  ;;  %v12060_v3 = vld [vmem:[#allocation64_spill] sm:$0xff] }
 0x73c   : > { %12046 = vst [vmem:[#allocation293_spill] sm:$0xff] %v10491_v14  ;;  %v10499_v56 = vpop.eup %7370  ;;  %7390 = vpow2.f32 %v10416_v51  ;;  %v5034_v4 = vsub.f32 %v12051_v1, %v4925_v53  ;;  %v10516_v51 = vmul.f32 1.442695, %v5029_v20  ;;  %v12056_v1 = vld [vmem:[#allocation61_spill] sm:$0xff]  ;;  %v12059_v20 = vld [vmem:[#allocation62_spill] sm:$0xff] }
 0x73d   : > { %12048 = vst [vmem:[#allocation294_spill] sm:$0xff] %v10499_v56  ;;  %v10507_v14 = vpop.eup %7372  ;;  %7392 = vpow2.f32 %v10422_v46  ;;  %v10525_v46 = vmul.f32 1.442695, %v5032_v36  ;;  %v5021_v31 = vsub.f32 %v12056_v1, %v4920_v50  ;;  %v5023_v58 = vsub.f32 %v12059_v20, %v4920_v50  ;;  %v12064_v20 = vld [vmem:[#allocation127_spill] sm:$0xff] }
 0x73e   : > { %12050 = vst [vmem:[#allocation295_spill] sm:$0xff] %v10507_v14  ;;  %v10513_v56 = vpop.eup %7374  ;;  %7394 = vpow2.f32 %v10428_v54  ;;  %v12057_v14 = vld [vmem:[#allocation63_spill] sm:$0xff]  ;;  %v10532_v54 = vmul.f32 1.442695, %v5033_v22  ;;  %v10541_v36 = vmul.f32 1.442695, %v5035_v32 }
 0x73f   : > { %12054 = vst [vmem:[#allocation296_spill] sm:$0xff] %v10513_v56  ;;  %v10522_v5 = vpop.eup %7376  ;;  %7396 = vpow2.f32 %v10430_v13  ;;  %v5022_v53 = vsub.f32 %v12057_v14, %v4920_v50  ;;  %v5024_v56 = vsub.f32 %v12060_v3, %v4920_v50  ;;  %v10539_v13 = vmul.f32 1.442695, %v5034_v4  ;;  %v4935_v14 = vpop.permute.xlu1 %4934  ;;  %v12065_v3 = vld [vmem:[#allocation126_spill] sm:$0xff] }
 0x740   : > { %12055 = vst [vmem:[#allocation297_spill] sm:$0xff] %v10522_v5  ;;  %v10529_v57 = vpop.eup %7378  ;;  %7398 = vpow2.f32 %v10432_v18  ;;  %v10543_v1 = vmul.f32 1.442695, %v5036_v35  ;;  %v12063_v18 = vld [vmem:[#allocation125_spill] sm:$0xff]  ;;  %v5026_v5 = vsub.f32 %v12064_v20, %v4920_v50  ;;  %v5027_v15 = vsub.f32 %v12065_v3, %v4920_v50 }
 0x741   : > { %12058 = vst [vmem:[#allocation298_spill] sm:$0xff] %v10529_v57  ;;  %v10536_v29 = vpop.eup %7380  ;;  %7400 = vpow2.f32 %v10442_v25  ;;  %v5025_v22 = vsub.f32 %v12063_v18, %v4920_v50  ;;  %v12067_v25 = vld [vmem:[#allocation128_spill] sm:$0xff]  ;;  %v10555_v4 = vmul.f32 1.442695, %v5021_v31  ;;  %v10557_v35 = vmul.f32 1.442695, %v5022_v53 }
 0x742   : > { %12061 = vst [vmem:[#allocation299_spill] sm:$0xff] %v10536_v29  ;;  %v10545_v57 = vpop.eup %7382  ;;  %7402 = vpow2.f32 %v10444_v34  ;;  %v5028_v32 = vsub.f32 %v12067_v25, %v4920_v50  ;;  %v10562_v34 = vmul.f32 1.442695, %v5023_v58  ;;  %v10564_v18 = vmul.f32 1.442695, %v5024_v56  ;;  %v12069_v20 = vld [vmem:[#allocation73_spill] sm:$0xff] }
 0x743   : > { %12062 = vst [vmem:[#allocation300_spill] sm:$0xff] %v10545_v57  ;;  %v10551_v29 = vpop.eup %7384  ;;  %7404 = vpow2.f32 %v10448_v28  ;;  %v5045_v3 = vsub.f32 %v12069_v20, %v4935_v14  ;;  %v12071_v28 = vld [vmem:[#allocation75_spill] sm:$0xff]  ;;  %v12072_v31 = vld [vmem:[#allocation74_spill] sm:$0xff]  ;;  %v12073_v53 = vld [vmem:[#allocation76_spill] sm:$0xff]  ;;  %v10578_v56 = vmul.f32 1.442695, %v5026_v5 }
 0x744   : > { %12066 = vst [vmem:[#allocation301_spill] sm:$0xff] %v10551_v29  ;;  %v10559_v40 = vpop.eup %7386  ;;  %7406 = vpow2.f32 %v10450_v55  ;;  %v5046_v50 = vsub.f32 %v12071_v28, %v4935_v14  ;;  %v5047_v25 = vsub.f32 %v12072_v31, %v4935_v14  ;;  %v5048_v29 = vsub.f32 %v12073_v53, %v4935_v14  ;;  %v12076_v28 = vld [vmem:[#allocation137_spill] sm:$0xff] }
 0x745   : > { %12068 = vst [vmem:[#allocation302_spill] sm:$0xff] %v10559_v40  ;;  %v10567_v57 = vpop.eup %7388  ;;  %7408 = vpow2.f32 %v10460_v24  ;;  %v10576_v55 = vmul.f32 1.442695, %v5025_v22  ;;  %v10580_v58 = vmul.f32 1.442695, %v5027_v15  ;;  %v5049_v31 = vsub.f32 %v12076_v28, %v4935_v14  ;;  %v4930_v40 = vpop.permute.xlu0 %4929  ;;  %v12080_v22 = vld [vmem:[#allocation140_spill] sm:$0xff] }
 0x746   : > { %12070 = vst [vmem:[#allocation303_spill] sm:$0xff] %v10567_v57  ;;  %v10573_v47 = vpop.eup %7390  ;;  %7410 = vpow2.f32 %v10462_v8  ;;  %v10585_v24 = vmul.f32 1.442695, %v5028_v32  ;;  %v12077_v57 = vld [vmem:[#allocation139_spill] sm:$0xff]  ;;  %v12079_v8 = vld [vmem:[#allocation138_spill] sm:$0xff]  ;;  %v5052_v15 = vsub.f32 %v12080_v22, %v4935_v14 }
 0x747   : > { %12074 = vst [vmem:[#allocation304_spill] sm:$0xff] %v10573_v47  ;;  %v10582_v20 = vpop.eup %7392  ;;  %7412 = vpow2.f32 %v10464_v16  ;;  %v5050_v53 = vsub.f32 %v12077_v57, %v4935_v14  ;;  %v5051_v5 = vsub.f32 %v12079_v8, %v4935_v14  ;;  %v10594_v23 = vmul.f32 1.442695, %v5045_v3  ;;  %v12085_v3 = vld [vmem:[#allocation70_spill] sm:$0xff] }
 0x748   : > { %12075 = vst [vmem:[#allocation305_spill] sm:$0xff] %v10582_v20  ;;  %v10589_v47 = vpop.eup %7394  ;;  %7414 = vpow2.f32 %v10468_v2  ;;  %v10599_v16 = vmul.f32 1.442695, %v5046_v50  ;;  %v10601_v32 = vmul.f32 1.442695, %v5047_v25  ;;  %v12083_v2 = vld [vmem:[#allocation69_spill] sm:$0xff]  ;;  %v5039_v22 = vsub.f32 %v12085_v3, %v4930_v40 }
 0x749   : > { %12078 = vst [vmem:[#allocation306_spill] sm:$0xff] %v10589_v47  ;;  %v10596_v20 = vpop.eup %7396  ;;  %7416 = vpow2.f32 %v10476_v59  ;;  %v10603_v57 = vmul.f32 1.442695, %v5048_v29  ;;  %v5037_v8 = vsub.f32 %v12083_v2, %v4930_v40  ;;  %v12084_v47 = vld [vmem:[#allocation71_spill] sm:$0xff]  ;;  %v10614_v59 = vmul.f32 1.442695, %v5049_v31 }
 0x74a   : > { %12081 = vst [vmem:[#allocation307_spill] sm:$0xff] %v10596_v20  ;;  %v10605_v28 = vpop.eup %7398  ;;  %7418 = vpow2.f32 %v10480_v9  ;;  %v5038_v14 = vsub.f32 %v12084_v47, %v4930_v40  ;;  %v10616_v50 = vmul.f32 1.442695, %v5050_v53  ;;  %v12087_v29 = vld [vmem:[#allocation72_spill] sm:$0xff]  ;;  %v10622_v9 = vmul.f32 1.442695, %v5051_v5 }
 0x74b   : > { %12082 = vst [vmem:[#allocation308_spill] sm:$0xff] %v10605_v28  ;;  %v10611_v11 = vpop.eup %7400  ;;  %7420 = vpow2.f32 %v10482_v43  ;;  %v5040_v25 = vsub.f32 %v12087_v29, %v4930_v40  ;;  %v10624_v2 = vmul.f32 1.442695, %v5052_v15  ;;  %v12089_v47 = vld [vmem:[#allocation133_spill] sm:$0xff]  ;;  %v4945_v28 = vpop.permute.xlu1 %4944  ;;  %v12091_v43 = vld [vmem:[#allocation135_spill] sm:$0xff]  ;;  %v12092_v53 = vld [vmem:[#allocation134_spill] sm:$0xff] }
 0x74c   : > { %12086 = vst [vmem:[#allocation309_spill] sm:$0xff] %v10611_v11  ;;  %v10619_v20 = vpop.eup %7402  ;;  %7422 = vpow2.f32 %v10484_v45  ;;  %v5041_v3 = vsub.f32 %v12089_v47, %v4930_v40  ;;  %v5042_v31 = vsub.f32 %v12091_v43, %v4930_v40  ;;  %v5043_v63 = vsub.f32 %v12092_v53, %v4930_v40  ;;  %v12093_v29 = vld [vmem:[#allocation136_spill] sm:$0xff]  ;;  %v12097_v43 = vld [vmem:[#allocation81_spill] sm:$0xff] }
 0x74d   : > { %12088 = vst [vmem:[#allocation310_spill] sm:$0xff] %v10619_v20  ;;  %v10627_v11 = vpop.eup %7404  ;;  %7424 = vpow2.f32 %v10494_v38  ;;  %v5044_v21 = vsub.f32 %v12093_v29, %v4930_v40  ;;  %v10636_v45 = vmul.f32 1.442695, %v5037_v8  ;;  %v10638_v5 = vmul.f32 1.442695, %v5038_v14  ;;  %v12101_v8 = vld [vmem:[#allocation82_spill] sm:$0xff] }
 0x74e   : > { %12090 = vst [vmem:[#allocation311_spill] sm:$0xff] %v10627_v11  ;;  %v10633_v20 = vpop.eup %7406  ;;  %7426 = vpow2.f32 %v10496_v39  ;;  %v10640_v15 = vmul.f32 1.442695, %v5039_v22  ;;  %v10645_v38 = vmul.f32 1.442695, %v5040_v25  ;;  %v5061_v53 = vsub.f32 %v12097_v43, %v4945_v28  ;;  %v12098_v11 = vld [vmem:[#allocation83_spill] sm:$0xff] }
 0x74f   : > { %12094 = vst [vmem:[#allocation312_spill] sm:$0xff] %v10633_v20  ;;  %v10642_v47 = vpop.eup %7408  ;;  %7428 = vpow2.f32 %v10502_v30  ;;  %v5062_v40 = vsub.f32 %v12098_v11, %v4945_v28  ;;  %v10652_v39 = vmul.f32 1.442695, %v5041_v3  ;;  %v5063_v14 = vsub.f32 %v12101_v8, %v4945_v28  ;;  %v12102_v22 = vld [vmem:[#allocation84_spill] sm:$0xff]  ;;  %v4940_v11 = vpop.permute.xlu0 %4939  ;;  %v12107_v8 = vld [vmem:[#allocation147_spill] sm:$0xff] }
 0x750   : > { %12095 = vst [vmem:[#allocation313_spill] sm:$0xff] %v10640_v15  ;;  %12096 = vst [vmem:[#allocation314_spill] sm:$0xff] %v10642_v47  ;;  %v10649_v29 = vpop.eup %7410  ;;  %7430 = vpow2.f32 %v10504_v7  ;;  %v5064_v20 = vsub.f32 %v12102_v22, %v4945_v28  ;;  %v10659_v30 = vmul.f32 1.442695, %v5042_v31  ;;  %v10661_v25 = vmul.f32 1.442695, %v5043_v63 }
 0x751   : > { %12099 = vst [vmem:[#allocation315_spill] sm:$0xff] %v10649_v29  ;;  %12100 = vst [vmem:[#allocation316_spill] sm:$0xff] %v10652_v39  ;;  %v10656_v15 = vpop.eup %7412  ;;  %7432 = vpow2.f32 %v10516_v51  ;;  %v10663_v43 = vmul.f32 1.442695, %v5044_v21  ;;  %v12106_v7 = vld [vmem:[#allocation145_spill] sm:$0xff]  ;;  %v5066_v47 = vsub.f32 %v12107_v8, %v4945_v28  ;;  %v12108_v22 = vld [vmem:[#allocation146_spill] sm:$0xff] }
 0x752   : > { %12103 = vst [vmem:[#allocation317_spill] sm:$0xff] %v10656_v15  ;;  %v10665_v29 = vpop.eup %7414  ;;  %7434 = vpow2.f32 %v10518_v10  ;;  %v5065_v3 = vsub.f32 %v12106_v7, %v4945_v28  ;;  %v5067_v39 = vsub.f32 %v12108_v22, %v4945_v28  ;;  %v12110_v51 = vld [vmem:[#allocation148_spill] sm:$0xff]  ;;  %v10675_v31 = vmul.f32 1.442695, %v5061_v53  ;;  %v12114_v8 = vld [vmem:[#allocation77_spill] sm:$0xff]  ;;  %v12118_v53 = vld [vmem:[#allocation78_spill] sm:$0xff] }
 0x753   : > { %12104 = vst [vmem:[#allocation318_spill] sm:$0xff] %v10663_v43  ;;  %12105 = vst [vmem:[#allocation319_spill] sm:$0xff] %v10665_v29  ;;  %v10671_v15 = vpop.eup %7416  ;;  %7436 = vpow2.f32 %v10520_v12  ;;  %v5068_v63 = vsub.f32 %v12110_v51, %v4945_v28  ;;  %v10677_v21 = vmul.f32 1.442695, %v5062_v40  ;;  %v10682_v10 = vmul.f32 1.442695, %v5063_v14  ;;  %v10687_v29 = vpop.permute.xlu1 %4954 }
 0x754   : > { %12109 = vst [vmem:[#allocation320_spill] sm:$0xff] %v10671_v15  ;;  %v10679_v43 = vpop.eup %7418  ;;  %7438 = vpow2.f32 %v10525_v46  ;;  %v10684_v7 = vmul.f32 1.442695, %v5064_v20  ;;  %v5053_v22 = vsub.f32 %v12114_v8, %v4940_v11  ;;  %12115 = vst [vmem:[#allocation324_spill] sm:$0xff] %v10687_v29  ;;  %v12117_v12 = vld [vmem:[#allocation79_spill] sm:$0xff]  ;;  %v5055_v40 = vsub.f32 %v12118_v53, %v4940_v11  ;;  %v12119_v51 = vld [vmem:[#allocation80_spill] sm:$0xff] }
 0x755   : > { %12111 = vst [vmem:[#allocation321_spill] sm:$0xff] %v10677_v21  ;;  %12112 = vst [vmem:[#allocation322_spill] sm:$0xff] %v10679_v43  ;;  %v10689_v15 = vpop.eup %7420  ;;  %7440 = vpow2.f32 %v10532_v54  ;;  %v5054_v28 = vsub.f32 %v12117_v12, %v4940_v11  ;;  %v5056_v43 = vsub.f32 %v12119_v51, %v4940_v11  ;;  %v10698_v46 = vmul.f32 1.442695, %v5065_v3  ;;  %v12124_v12 = vld [vmem:[#allocation141_spill] sm:$0xff] }
 0x756   : > { %12113 = vst [vmem:[#allocation323_spill] sm:$0xff] %v10684_v7  ;;  %12116 = vst [vmem:[#allocation325_spill] sm:$0xff] %v10689_v15  ;;  %v10695_v21 = vpop.eup %7422  ;;  %7442 = vpow2.f32 %v10539_v13  ;;  %v10700_v20 = vmul.f32 1.442695, %v5066_v47  ;;  %v10702_v14 = vmul.f32 1.442695, %v5067_v39  ;;  %v5057_v53 = vsub.f32 %v12124_v12, %v4940_v11  ;;  %v10711_v7 = vpop.permute.xlu0 %4949 }
 0x757   : > { %12120 = vst [vmem:[#allocation326_spill] sm:$0xff] %v10695_v21  ;;  %v10704_v8 = vpop.eup %7424  ;;  %7444 = vpow2.f32 %v10541_v36  ;;  %v10707_v54 = vmul.f32 1.442695, %v5068_v63  ;;  %v12125_v15 = vld [vmem:[#allocation143_spill] sm:$0xff]  ;;  %v12126_v13 = vld [vmem:[#allocation142_spill] sm:$0xff]  ;;  %v12127_v39 = vld [vmem:[#allocation144_spill] sm:$0xff] }
 0x758   : > { %12121 = vst [vmem:[#allocation327_spill] sm:$0xff] %v10700_v20  ;;  %12122 = vst [vmem:[#allocation328_spill] sm:$0xff] %v10702_v14  ;;  %v5058_v51 = vsub.f32 %v12125_v15, %v4940_v11  ;;  %v10713_v21 = vpop.eup %7426  ;;  %7446 = vpow2.f32 %v10543_v1  ;;  %v5059_v47 = vsub.f32 %v12126_v13, %v4940_v11  ;;  %v5060_v3 = vsub.f32 %v12127_v39, %v4940_v11  ;;  %v12133_v1 = vld [vmem:[#allocation89_spill] sm:$0xff]  ;;  %v12134_v11 = vld [vmem:[#allocation91_spill] sm:$0xff] }
 0x759   : > { %12123 = vst [vmem:[#allocation329_spill] sm:$0xff] %v10707_v54  ;;  %v10718_v14 = vmul.f32 1.442695, %v5053_v22  ;;  %v10720_v20 = vpop.eup %7428  ;;  %7448 = vpow2.f32 %v10555_v4  ;;  %v10723_v36 = vmul.f32 1.442695, %v5054_v28  ;;  %v5077_v13 = vsub.f32 %v12133_v1, %v10687_v29  ;;  %v12135_v39 = vld [vmem:[#allocation90_spill] sm:$0xff]  ;;  %v5349_v4 = vpop.permute.xlu1 %5348 }
 0x75a   : > { %v10725_v63 = vmul.f32 1.442695, %v5055_v40  ;;  %v10727_v15 = vmul.f32 1.442695, %v5056_v43  ;;  %v10729_v12 = vpop.eup %7430  ;;  %7450 = vpow2.f32 %v10557_v35  ;;  %v5078_v22 = vsub.f32 %v12134_v11, %v10687_v29  ;;  %v12137_v43 = vld [vmem:[#allocation92_spill] sm:$0xff]  ;;  %v12142_v54 = vld [vmem:[#allocation154_spill] sm:$0xff] }
 0x75b   : > { %12128 = vst [vmem:[#allocation330_spill] sm:$0xff] %v10718_v14  ;;  %12129 = vst [vmem:[#allocation331_spill] sm:$0xff] %v10723_v36  ;;  %v5079_v14 = vsub.f32 %v12135_v39, %v10687_v29  ;;  %v10738_v28 = vpop.eup %7432  ;;  %7452 = vpow2.f32 %v10562_v34  ;;  %v5080_v40 = vsub.f32 %v12137_v43, %v10687_v29  ;;  %v10750_v11 = vmul.f32 1.442695, %v5057_v53 }
 0x75c   : > { %12130 = vst [vmem:[#allocation332_spill] sm:$0xff] %v10725_v63  ;;  %12131 = vst [vmem:[#allocation333_spill] sm:$0xff] %v10727_v15  ;;  %v12138_v15 = vld [vmem:[#allocation153_spill] sm:$0xff]  ;;  %v12139_v63 = vld [vmem:[#allocation155_spill] sm:$0xff]  ;;  %v10747_v36 = vpop.eup %7434  ;;  %7454 = vpow2.f32 %v10564_v18  ;;  %v10752_v39 = vmul.f32 1.442695, %v5058_v51  ;;  %v5083_v34 = vsub.f32 %v12142_v54, %v10687_v29 }
 0x75d   : > { %12132 = vst [vmem:[#allocation334_spill] sm:$0xff] %v10729_v12  ;;  %12136 = vst [vmem:[#allocation335_spill] sm:$0xff] %v10738_v28  ;;  %v5081_v35 = vsub.f32 %v12138_v15, %v10687_v29  ;;  %v5082_v1 = vsub.f32 %v12139_v63, %v10687_v29  ;;  %v10756_v28 = vpop.eup %7436  ;;  %7456 = vpow2.f32 %v10576_v55  ;;  %v10759_v43 = vmul.f32 1.442695, %v5059_v47  ;;  %v12143_v63 = vld [vmem:[#allocation156_spill] sm:$0xff]  ;;  %v5344_v12 = vpop.permute.xlu0 %5343 }
 0x75e   : > { %12140 = vst [vmem:[#allocation336_spill] sm:$0xff] %v10747_v36  ;;  %12141 = vst [vmem:[#allocation337_spill] sm:$0xff] %v10752_v39  ;;  %v10761_v15 = vmul.f32 1.442695, %v5060_v3  ;;  %v10765_v18 = vpop.eup %7438  ;;  %7458 = vpow2.f32 %v10578_v56  ;;  %v10768_v53 = vmul.f32 1.442695, %v5077_v13  ;;  %v5432_v29 = vmul.f32 %v10458_v27, %v5349_v4 }
 0x75f   : > { %v10770_v51 = vmul.f32 1.442695, %v5078_v22  ;;  %v10772_v54 = vmul.f32 1.442695, %v5079_v14  ;;  %v10774_v39 = vpop.eup %7440  ;;  %7460 = vpow2.f32 %v10580_v58  ;;  %v10777_v55 = vmul.f32 1.442695, %v5080_v40  ;;  %v5359_v58 = vpop.permute.xlu1 %5358 }
 0x760   : > { %v10779_v47 = vmul.f32 1.442695, %v5081_v35  ;;  %v10781_v3 = vmul.f32 1.442695, %v5082_v1  ;;  %v10783_v36 = vpop.eup %7442  ;;  %7462 = vpow2.f32 %v10585_v24  ;;  %v10786_v56 = vmul.f32 1.442695, %v5083_v34 }
 0x761   : > { %v12145_v13 = vld [vmem:[#allocation85_spill] sm:$0xff]  ;;  %v12146_v22 = vld [vmem:[#allocation87_spill] sm:$0xff]  ;;  %v10792_v40 = vpop.eup %7444  ;;  %7464 = vpow2.f32 %v10594_v23  ;;  %v5429_v35 = vmul.f32 %v10439_v48, %v5349_v4  ;;  %v5430_v24 = vmul.f32 %v10446_v19, %v5349_v4  ;;  %v5431_v1 = vmul.f32 %v10453_v41, %v5349_v4  ;;  %v5354_v27 = vpop.permute.xlu0 %5353  ;;  %5560 = vst [vmem:[%s8177_s28 + $0x58] sm:$0xff] %v5432_v29 }
 0x762   : > { %12144 = vst [vmem:[#allocation338_spill] sm:$0xff] %v10786_v56  ;;  %v10798_v34 = vpop.eup %7446  ;;  %7466 = vpow2.f32 %v10599_v16  ;;  %v5433_v14 = vmul.f32 %v10466_v6, %v5349_v4  ;;  %v5434_v56 = vmul.f32 %v10472_v52, %v5349_v4  ;;  %v5435_v48 = vmul.f32 %v10478_v42, %v5349_v4 }
 0x763   : > { %v10804_v23 = vpop.eup %7448  ;;  %7468 = vpow2.f32 %v10601_v32  ;;  %v5436_v19 = vmul.f32 %v10486_v61, %v5349_v4  ;;  %5557 = vst [vmem:[%s8177_s28 + $0x40] sm:$0xff] %v5429_v35  ;;  %5558 = vst [vmem:[%s8177_s28 + $0x48] sm:$0xff] %v5430_v24  ;;  %v5421_v41 = vmul.f32 %v10371_v44, %v5344_v12  ;;  %v5422_v52 = vmul.f32 %v10374_v49, %v5344_v12 }
 0x764   : > { %5559 = vst [vmem:[%s8177_s28 + $0x50] sm:$0xff] %v5431_v1  ;;  %v10813_v6 = vpop.eup %7450  ;;  %7470 = vpow2.f32 %v10603_v57  ;;  %5561 = vst [vmem:[%s8177_s28 + $0x60] sm:$0xff] %v5433_v14  ;;  %v5423_v42 = vmul.f32 %v10377_v37, %v5344_v12  ;;  %v5424_v61 = vmul.f32 %v10382_v33, %v5344_v12  ;;  %v5425_v44 = vmul.f32 %v10384_v17, %v5344_v12  ;;  %v12147_v17 = vld [vmem:[#allocation286_spill] sm:$0xff]  ;;  %v12153_v1 = vld [vmem:[#allocation292_spill] sm:$0xff] }
 0x765   : > { %5562 = vst [vmem:[%s8177_s28 + $0x68] sm:$0xff] %v5434_v56  ;;  %v10822_v16 = vpop.eup %7452  ;;  %7472 = vpow2.f32 %v10614_v59  ;;  %5563 = vst [vmem:[%s8177_s28 + $0x70] sm:$0xff] %v5435_v48  ;;  %v5426_v32 = vmul.f32 %v10388_v62, %v5344_v12  ;;  %v5427_v49 = vmul.f32 %v10392_v60, %v5344_v12  ;;  %v5428_v37 = vmul.f32 %v10394_v26, %v5344_v12  ;;  %v5369_v62 = vpop.permute.xlu1 %5368  ;;  %v12148_v60 = vld [vmem:[#allocation287_spill] sm:$0xff]  ;;  %v12151_v14 = vld [vmem:[#allocation290_spill] sm:$0xff] }
 0x766   : > { %5564 = vst [vmem:[%s8177_s28 + $0x78] sm:$0xff] %v5436_v19  ;;  %5549 = vst [vmem:[%s8177_s28] sm:$0xff] %v5421_v41  ;;  %v10831_v57 = vpop.eup %7454  ;;  %7474 = vpow2.f32 %v10616_v50  ;;  %v5445_v33 = vmul.f32 %v10399_v0, %v5359_v58  ;;  %v5446_v59 = vmul.f32 %v12147_v17, %v5359_v58  ;;  %v5447_v26 = vmul.f32 %v12148_v60, %v5359_v58  ;;  %v12149_v50 = vld [vmem:[#allocation288_spill] sm:$0xff]  ;;  %v12150_v0 = vld [vmem:[#allocation289_spill] sm:$0xff] }
 0x767   : > { %5550 = vst [vmem:[%s8177_s28 + $0x8] sm:$0xff] %v5422_v52  ;;  %5551 = vst [vmem:[%s8177_s28 + $0x10] sm:$0xff] %v5423_v42  ;;  %v10840_v29 = vpop.eup %7456  ;;  %7476 = vpow2.f32 %v10622_v9  ;;  %v5448_v12 = vmul.f32 %v12149_v50, %v5359_v58  ;;  %v5449_v4 = vmul.f32 %v12150_v0, %v5359_v58  ;;  %v5450_v35 = vmul.f32 %v12151_v14, %v5359_v58  ;;  %v12152_v9 = vld [vmem:[#allocation291_spill] sm:$0xff]  ;;  %v12161_v50 = vld [vmem:[#allocation284_spill] sm:$0xff] }
 0x768   : > { %5552 = vst [vmem:[%s8177_s28 + $0x18] sm:$0xff] %v5424_v61  ;;  %5553 = vst [vmem:[%s8177_s28 + $0x20] sm:$0xff] %v5425_v44  ;;  %v10849_v56 = vpop.eup %7458  ;;  %7478 = vpow2.f32 %v10624_v2  ;;  %v5451_v24 = vmul.f32 %v12152_v9, %v5359_v58  ;;  %v5452_v48 = vmul.f32 %v12153_v1, %v5359_v58  ;;  %v12154_v2 = vld [vmem:[#allocation278_spill] sm:$0xff]  ;;  %v12155_v52 = vld [vmem:[#allocation279_spill] sm:$0xff]  ;;  %v5364_v58 = vpop.permute.xlu0 %5363 }
 0x769   : > { %5554 = vst [vmem:[%s8177_s28 + $0x28] sm:$0xff] %v5426_v32  ;;  %5555 = vst [vmem:[%s8177_s28 + $0x30] sm:$0xff] %v5427_v49  ;;  %v10858_v19 = vpop.eup %7460  ;;  %7480 = vpow2.f32 %v10636_v45  ;;  %v5437_v41 = vmul.f32 %v12154_v2, %v5354_v27  ;;  %v5438_v42 = vmul.f32 %v12155_v52, %v5354_v27  ;;  %v12156_v61 = vld [vmem:[#allocation280_spill] sm:$0xff]  ;;  %v12157_v45 = vld [vmem:[#allocation281_spill] sm:$0xff] }
 0x76a   : > { %5556 = vst [vmem:[%s8177_s28 + $0x38] sm:$0xff] %v5428_v37  ;;  %5573 = vst [vmem:[%s8177_s28 + $0xc0] sm:$0xff] %v5445_v33  ;;  %v5439_v44 = vmul.f32 %v12156_v61, %v5354_v27  ;;  %v10867_v32 = vpop.eup %7462  ;;  %7482 = vpow2.f32 %v10638_v5  ;;  %v5440_v49 = vmul.f32 %v12157_v45, %v5354_v27  ;;  %v12158_v37 = vld [vmem:[#allocation282_spill] sm:$0xff]  ;;  %v12159_v17 = vld [vmem:[#allocation283_spill] sm:$0xff] }
 0x76b   : > { %5574 = vst [vmem:[%s8177_s28 + $0xc8] sm:$0xff] %v5446_v59  ;;  %5575 = vst [vmem:[%s8177_s28 + $0xd0] sm:$0xff] %v5447_v26  ;;  %v5441_v33 = vmul.f32 %v12158_v37, %v5354_v27  ;;  %v5442_v59 = vmul.f32 %v12159_v17, %v5354_v27  ;;  %v10876_v60 = vpop.eup %7464  ;;  %v12160_v26 = vld [vmem:[#allocation313_spill] sm:$0xff]  ;;  %v12164_v9 = vld [vmem:[#allocation294_spill] sm:$0xff] }
 0x76c   : > { %5576 = vst [vmem:[%s8177_s28 + $0xd8] sm:$0xff] %v5448_v12  ;;  %5577 = vst [vmem:[%s8177_s28 + $0xe0] sm:$0xff] %v5449_v4  ;;  %7484 = vpow2.f32 %v12160_v26  ;;  %v5443_v12 = vmul.f32 %v12161_v50, %v5354_v27  ;;  %v12162_v0 = vld [vmem:[#allocation285_spill] sm:$0xff]  ;;  %v12165_v1 = vld [vmem:[#allocation295_spill] sm:$0xff] }
 0x76d   : > { %5578 = vst [vmem:[%s8177_s28 + $0xe8] sm:$0xff] %v5450_v35  ;;  %5579 = vst [vmem:[%s8177_s28 + $0xf0] sm:$0xff] %v5451_v24  ;;  %v5444_v5 = vmul.f32 %v12162_v0, %v5354_v27  ;;  %v12163_v4 = vld [vmem:[#allocation293_spill] sm:$0xff]  ;;  %v10885_v35 = vpop.eup %7466  ;;  %7486 = vpow2.f32 %v10645_v38  ;;  %v5462_v24 = vmul.f32 %v12164_v9, %v5369_v62  ;;  %v5463_v27 = vmul.f32 %v12165_v1, %v5369_v62  ;;  %v12171_v17 = vld [vmem:[#allocation300_spill] sm:$0xff]  ;;  %v5374_v1 = vpop.permute.xlu0 %5373 }
 0x76e   : > { %5580 = vst [vmem:[%s8177_s28 + $0xf8] sm:$0xff] %v5452_v48  ;;  %5565 = vst [vmem:[%s8177_s28 + $0x80] sm:$0xff] %v5437_v41  ;;  %v5461_v14 = vmul.f32 %v12163_v4, %v5369_v62  ;;  %v12166_v48 = vld [vmem:[#allocation296_spill] sm:$0xff]  ;;  %v5379_v41 = vpop.permute.xlu1 %5378  ;;  %v10894_v52 = vpop.eup %7468  ;;  %v12168_v38 = vld [vmem:[#allocation297_spill] sm:$0xff] }
 0x76f   : > { %5566 = vst [vmem:[%s8177_s28 + $0x88] sm:$0xff] %v5438_v42  ;;  %5567 = vst [vmem:[%s8177_s28 + $0x90] sm:$0xff] %v5439_v44  ;;  %v5464_v2 = vmul.f32 %v12166_v48, %v5369_v62  ;;  %v12167_v42 = vld [vmem:[#allocation316_spill] sm:$0xff]  ;;  %v5465_v61 = vmul.f32 %v12168_v38, %v5369_v62  ;;  %v12169_v44 = vld [vmem:[#allocation298_spill] sm:$0xff] }
 0x770   : > { %5568 = vst [vmem:[%s8177_s28 + $0x98] sm:$0xff] %v5440_v49  ;;  %5569 = vst [vmem:[%s8177_s28 + $0xa0] sm:$0xff] %v5441_v33  ;;  %7488 = vpow2.f32 %v12167_v42  ;;  %v5466_v45 = vmul.f32 %v12169_v44, %v5369_v62  ;;  %v12170_v49 = vld [vmem:[#allocation299_spill] sm:$0xff]  ;;  %v10903_v33 = vpop.eup %7470  ;;  %v12172_v26 = vld [vmem:[#allocation301_spill] sm:$0xff] }
 0x771   : > { %5570 = vst [vmem:[%s8177_s28 + $0xa8] sm:$0xff] %v5442_v59  ;;  %5571 = vst [vmem:[%s8177_s28 + $0xb0] sm:$0xff] %v5443_v12  ;;  %v5467_v37 = vmul.f32 %v12170_v49, %v5369_v62  ;;  %7490 = vpow2.f32 %v10659_v30  ;;  %v5468_v59 = vmul.f32 %v12171_v17, %v5369_v62  ;;  %v5453_v50 = vmul.f32 %v12172_v26, %v5364_v58  ;;  %v12173_v12 = vld [vmem:[#allocation302_spill] sm:$0xff]  ;;  %v12174_v30 = vld [vmem:[#allocation303_spill] sm:$0xff] }
 0x772   : > { %5572 = vst [vmem:[%s8177_s28 + $0xb8] sm:$0xff] %v5444_v5  ;;  %5589 = vst [vmem:[%s8177_s28 + $0x140] sm:$0xff] %v5461_v14  ;;  %v5454_v0 = vmul.f32 %v12173_v12, %v5364_v58  ;;  %v10912_v5 = vpop.eup %7472  ;;  %7492 = vpow2.f32 %v10661_v25  ;;  %v5455_v62 = vmul.f32 %v12174_v30, %v5364_v58  ;;  %v12175_v4 = vld [vmem:[#allocation304_spill] sm:$0xff]  ;;  %v12176_v9 = vld [vmem:[#allocation305_spill] sm:$0xff] }
 0x773   : > { %5590 = vst [vmem:[%s8177_s28 + $0x148] sm:$0xff] %v5462_v24  ;;  %5591 = vst [vmem:[%s8177_s28 + $0x150] sm:$0xff] %v5463_v27  ;;  %v5456_v14 = vmul.f32 %v12175_v4, %v5364_v58  ;;  %v5457_v24 = vmul.f32 %v12176_v9, %v5364_v58  ;;  %v10921_v27 = vpop.eup %7474  ;;  %v12177_v48 = vld [vmem:[#allocation318_spill] sm:$0xff]  ;;  %v12179_v42 = vld [vmem:[#allocation307_spill] sm:$0xff]  ;;  %v5389_v9 = vpop.permute.xlu1 %5388 }
 0x774   : > { %5592 = vst [vmem:[%s8177_s28 + $0x158] sm:$0xff] %v5464_v2  ;;  %5593 = vst [vmem:[%s8177_s28 + $0x160] sm:$0xff] %v5465_v61  ;;  %7494 = vpow2.f32 %v12177_v48  ;;  %v12178_v2 = vld [vmem:[#allocation306_spill] sm:$0xff]  ;;  %v5459_v38 = vmul.f32 %v12179_v42, %v5364_v58  ;;  %v12180_v61 = vld [vmem:[#allocation308_spill] sm:$0xff] }
 0x775   : > { %5594 = vst [vmem:[%s8177_s28 + $0x168] sm:$0xff] %v5466_v45  ;;  %5595 = vst [vmem:[%s8177_s28 + $0x170] sm:$0xff] %v5467_v37  ;;  %v5458_v25 = vmul.f32 %v12178_v2, %v5364_v58  ;;  %v5460_v44 = vmul.f32 %v12180_v61, %v5364_v58  ;;  %v10930_v45 = vpop.eup %7476  ;;  %7496 = vpow2.f32 %v10675_v31  ;;  %v12181_v49 = vld [vmem:[#allocation309_spill] sm:$0xff]  ;;  %v12182_v17 = vld [vmem:[#allocation310_spill] sm:$0xff] }
 0x776   : > { %5596 = vst [vmem:[%s8177_s28 + $0x178] sm:$0xff] %v5468_v59  ;;  %5581 = vst [vmem:[%s8177_s28 + $0x100] sm:$0xff] %v5453_v50  ;;  %v5477_v37 = vmul.f32 %v12181_v49, %v5379_v41  ;;  %v5478_v59 = vmul.f32 %v12182_v17, %v5379_v41  ;;  %v12183_v26 = vld [vmem:[#allocation311_spill] sm:$0xff]  ;;  %v10939_v30 = vpop.eup %7478  ;;  %v12184_v58 = vld [vmem:[#allocation321_spill] sm:$0xff] }
 0x777   : > { %5582 = vst [vmem:[%s8177_s28 + $0x108] sm:$0xff] %v5454_v0  ;;  %5583 = vst [vmem:[%s8177_s28 + $0x110] sm:$0xff] %v5455_v62  ;;  %v5479_v12 = vmul.f32 %v12183_v26, %v5379_v41  ;;  %7498 = vpow2.f32 %v12184_v58  ;;  %v12185_v31 = vld [vmem:[#allocation312_spill] sm:$0xff]  ;;  %v12186_v0 = vld [vmem:[#allocation314_spill] sm:$0xff] }
 0x778   : > { %5584 = vst [vmem:[%s8177_s28 + $0x118] sm:$0xff] %v5456_v14  ;;  %5585 = vst [vmem:[%s8177_s28 + $0x120] sm:$0xff] %v5457_v24  ;;  %v5480_v50 = vmul.f32 %v12185_v31, %v5379_v41  ;;  %v5481_v62 = vmul.f32 %v12186_v0, %v5379_v41  ;;  %v12187_v4 = vld [vmem:[#allocation315_spill] sm:$0xff]  ;;  %v10948_v24 = vpop.eup %7480  ;;  %7500 = vpow2.f32 %v10682_v10  ;;  %v12188_v48 = vld [vmem:[#allocation317_spill] sm:$0xff]  ;;  %v5474_v31 = vmul.f32 %v10713_v21, %v5374_v1  ;;  %v5384_v0 = vpop.permute.xlu0 %5383 }
 0x779   : > { %5586 = vst [vmem:[%s8177_s28 + $0x128] sm:$0xff] %v5458_v25  ;;  %5587 = vst [vmem:[%s8177_s28 + $0x130] sm:$0xff] %v5459_v38  ;;  %v5482_v14 = vmul.f32 %v12187_v4, %v5379_v41  ;;  %v5483_v2 = vmul.f32 %v12188_v48, %v5379_v41  ;;  %v12189_v42 = vld [vmem:[#allocation319_spill] sm:$0xff]  ;;  %v12190_v38 = vld [vmem:[#allocation320_spill] sm:$0xff] }
 0x77a   : > { %5588 = vst [vmem:[%s8177_s28 + $0x138] sm:$0xff] %v5460_v44  ;;  %v5484_v25 = vmul.f32 %v12189_v42, %v5379_v41  ;;  %5605 = vst [vmem:[%s8177_s28 + $0x1c0] sm:$0xff] %v5477_v37  ;;  %v5469_v61 = vmul.f32 %v12190_v38, %v5374_v1  ;;  %v10957_v44 = vpop.eup %7482  ;;  %v12191_v49 = vld [vmem:[#allocation323_spill] sm:$0xff]  ;;  %v12192_v10 = vld [vmem:[#allocation322_spill] sm:$0xff]  ;;  %v5497_v38 = vmul.f32 %v10774_v39, %v5389_v9 }
 0x77b   : > { %5606 = vst [vmem:[%s8177_s28 + $0x1c8] sm:$0xff] %v5478_v59  ;;  %5607 = vst [vmem:[%s8177_s28 + $0x1d0] sm:$0xff] %v5479_v12  ;;  %7502 = vpow2.f32 %v12191_v49  ;;  %v5470_v17 = vmul.f32 %v12192_v10, %v5374_v1  ;;  %v12193_v26 = vld [vmem:[#allocation325_spill] sm:$0xff]  ;;  %v12194_v58 = vld [vmem:[#allocation326_spill] sm:$0xff]  ;;  %v10966_v59 = vpop.eup %7484  ;;  %v5473_v12 = vmul.f32 %v10704_v8, %v5374_v1  ;;  %v5498_v10 = vmul.f32 %v10783_v36, %v5389_v9 }
 0x77c   : > { %5608 = vst [vmem:[%s8177_s28 + $0x1d8] sm:$0xff] %v5480_v50  ;;  %5609 = vst [vmem:[%s8177_s28 + $0x1e0] sm:$0xff] %v5481_v62  ;;  %v5471_v41 = vmul.f32 %v12193_v26, %v5374_v1  ;;  %v5472_v37 = vmul.f32 %v12194_v58, %v5374_v1  ;;  %7504 = vpow2.f32 %v10698_v46  ;;  %v5475_v50 = vmul.f32 %v10720_v20, %v5374_v1  ;;  %v10975_v62 = vpop.eup %7486  ;;  %v12195_v4 = vld [vmem:[#allocation327_spill] sm:$0xff]  ;;  %v12199_v20 = vld [vmem:[#allocation328_spill] sm:$0xff] }
 0x77d   : > { %5610 = vst [vmem:[%s8177_s28 + $0x1e8] sm:$0xff] %v5482_v14  ;;  %5611 = vst [vmem:[%s8177_s28 + $0x1f0] sm:$0xff] %v5483_v2  ;;  %7506 = vpow2.f32 %v12195_v4  ;;  %v12196_v14 = vld [vmem:[#allocation334_spill] sm:$0xff]  ;;  %v12197_v46 = vld [vmem:[#allocation335_spill] sm:$0xff]  ;;  %v10984_v42 = vpop.eup %7488  ;;  %v5500_v26 = vmul.f32 %v10798_v34, %v5389_v9  ;;  %v5485_v39 = vmul.f32 %v10804_v23, %v5384_v0  ;;  %v5486_v36 = vmul.f32 %v10813_v6, %v5384_v0 }
 0x77e   : > { %5612 = vst [vmem:[%s8177_s28 + $0x1f8] sm:$0xff] %v5484_v25  ;;  %5597 = vst [vmem:[%s8177_s28 + $0x180] sm:$0xff] %v5469_v61  ;;  %v5476_v48 = vmul.f32 %v12196_v14, %v5374_v1  ;;  %v5493_v8 = vmul.f32 %v12197_v46, %v5389_v9  ;;  %v12198_v2 = vld [vmem:[#allocation336_spill] sm:$0xff]  ;;  %7508 = vpow2.f32 %v12199_v20  ;;  %v5495_v1 = vmul.f32 %v10756_v28, %v5389_v9  ;;  %v10993_v61 = vpop.eup %7490  ;;  %v12200_v49 = vld [vmem:[#allocation329_spill] sm:$0xff]  ;;  %v5399_v28 = vpop.permute.xlu1 %5398 }
 0x77f   : > { %5598 = vst [vmem:[%s8177_s28 + $0x188] sm:$0xff] %v5470_v17  ;;  %5599 = vst [vmem:[%s8177_s28 + $0x190] sm:$0xff] %v5471_v41  ;;  %v5494_v21 = vmul.f32 %v12198_v2, %v5389_v9  ;;  %v5496_v25 = vmul.f32 %v10765_v18, %v5389_v9  ;;  %7510 = vpow2.f32 %v12200_v49  ;;  %v5499_v17 = vmul.f32 %v10792_v40, %v5389_v9  ;;  %v7493_v18 = vpop.eup %7492  ;;  %v12201_v41 = vld [vmem:[#allocation330_spill] sm:$0xff]  ;;  %v12202_v9 = vld [vmem:[#allocation331_spill] sm:$0xff] }
 0x780   : > { %5600 = vst [vmem:[%s8177_s28 + $0x198] sm:$0xff] %v5472_v37  ;;  %5601 = vst [vmem:[%s8177_s28 + $0x1a0] sm:$0xff] %v5473_v12  ;;  %7512 = vpow2.f32 %v12201_v41  ;;  %v5487_v40 = vmul.f32 %v10822_v16, %v5384_v0  ;;  %v7495_v34 = vpop.eup %7494  ;;  %v5488_v58 = vmul.f32 %v10831_v57, %v5384_v0  ;;  %v5489_v37 = vmul.f32 %v10840_v29, %v5384_v0  ;;  %v12203_v6 = vld [vmem:[#allocation332_spill] sm:$0xff]  ;;  %v5394_v57 = vpop.permute.xlu0 %5393  ;;  %v12204_v29 = vld [vmem:[#allocation333_spill] sm:$0xff] }
 0x781   : > { %5602 = vst [vmem:[%s8177_s28 + $0x1a8] sm:$0xff] %v5474_v31  ;;  %5603 = vst [vmem:[%s8177_s28 + $0x1b0] sm:$0xff] %v5475_v50  ;;  %7514 = vpow2.f32 %v12202_v9  ;;  %v5490_v23 = vmul.f32 %v10849_v56, %v5384_v0  ;;  %v7497_v12 = vpop.eup %7496  ;;  %v5491_v16 = vmul.f32 %v10858_v19, %v5384_v0  ;;  %v5492_v31 = vmul.f32 %v10867_v32, %v5384_v0  ;;  %v12205_v46 = vld [vmem:[#allocation337_spill] sm:$0xff] }
 0x782   : > { %5604 = vst [vmem:[%s8177_s28 + $0x1b8] sm:$0xff] %v5476_v48  ;;  %5621 = vst [vmem:[%s8177_s28 + $0x240] sm:$0xff] %v5493_v8  ;;  %7516 = vpow2.f32 %v12203_v6  ;;  %v5509_v50 = vmul.f32 %v10876_v60, %v5399_v28  ;;  %v7499_v4 = vpop.eup %7498  ;;  %v5510_v56 = vmul.f32 %v10885_v35, %v5399_v28  ;;  %v5511_v19 = vmul.f32 %v10894_v52, %v5399_v28  ;;  %v12209_v41 = vld [vmem:[#allocation88_spill] sm:$0xff] }
 0x783   : > { %5622 = vst [vmem:[%s8177_s28 + $0x248] sm:$0xff] %v5494_v21  ;;  %5623 = vst [vmem:[%s8177_s28 + $0x250] sm:$0xff] %v5495_v1  ;;  %7518 = vpow2.f32 %v12204_v29  ;;  %v5512_v32 = vmul.f32 %v10903_v33, %v5399_v28  ;;  %v7501_v0 = vpop.eup %7500  ;;  %v5513_v60 = vmul.f32 %v10912_v5, %v5399_v28  ;;  %v5514_v14 = vmul.f32 %v10921_v27, %v5399_v28  ;;  %v5409_v5 = vpop.permute.xlu1 %5408 }
 0x784   : > { %5624 = vst [vmem:[%s8177_s28 + $0x258] sm:$0xff] %v5496_v25  ;;  %5625 = vst [vmem:[%s8177_s28 + $0x260] sm:$0xff] %v5497_v38  ;;  %7520 = vpow2.f32 %v10750_v11  ;;  %v5515_v48 = vmul.f32 %v10930_v45, %v5399_v28  ;;  %v5516_v52 = vmul.f32 %v10939_v30, %v5399_v28  ;;  %v5501_v11 = vmul.f32 %v10948_v24, %v5394_v57 }
 0x785   : > { %5626 = vst [vmem:[%s8177_s28 + $0x268] sm:$0xff] %v5498_v10  ;;  %5627 = vst [vmem:[%s8177_s28 + $0x270] sm:$0xff] %v5499_v17  ;;  %v7503_v35 = vpop.eup %7502  ;;  %7522 = vpow2.f32 %v12205_v46  ;;  %v5502_v33 = vmul.f32 %v10957_v44, %v5394_v57  ;;  %v5503_v45 = vmul.f32 %v10966_v59, %v5394_v57  ;;  %v5504_v30 = vmul.f32 %v10975_v62, %v5394_v57 }
 0x786   : > { %5628 = vst [vmem:[%s8177_s28 + $0x278] sm:$0xff] %v5500_v26  ;;  %5613 = vst [vmem:[%s8177_s28 + $0x200] sm:$0xff] %v5485_v39  ;;  %v7505_v27 = vpop.eup %7504  ;;  %7524 = vpow2.f32 %v10759_v43  ;;  %v5505_v24 = vmul.f32 %v10984_v42, %v5394_v57  ;;  %v5506_v44 = vmul.f32 %v10993_v61, %v5394_v57  ;;  %v5507_v43 = vmul.f32 %v7493_v18, %v5394_v57  ;;  %v11060_v42 = vpop.permute.xlu0 %5403  ;;  %v12206_v61 = vld [vmem:[#allocation86_spill] sm:$0xff]  ;;  %v12207_v26 = vld [vmem:[#allocation324_spill] sm:$0xff] }
 0x787   : > { %5614 = vst [vmem:[%s8177_s28 + $0x208] sm:$0xff] %v5486_v36  ;;  %5615 = vst [vmem:[%s8177_s28 + $0x210] sm:$0xff] %v5487_v40  ;;  %v7507_v8 = vpop.eup %7506  ;;  %7526 = vpow2.f32 %v10761_v15  ;;  %v5508_v2 = vmul.f32 %v7495_v34, %v5394_v57  ;;  %v5525_v59 = vmul.f32 %v7497_v12, %v5409_v5  ;;  %v5526_v62 = vmul.f32 %v7499_v4, %v5409_v5  ;;  %v12210_v40 = vld [vmem:[#allocation149_spill] sm:$0xff] }
 0x788   : > { %5616 = vst [vmem:[%s8177_s28 + $0x218] sm:$0xff] %v5488_v58  ;;  %5617 = vst [vmem:[%s8177_s28 + $0x220] sm:$0xff] %v5489_v37  ;;  %v7509_v21 = vpop.eup %7508  ;;  %7528 = vpow2.f32 %v10768_v53  ;;  %v5527_v15 = vmul.f32 %v7501_v0, %v5409_v5  ;;  %v5528_v1 = vmul.f32 %v7503_v35, %v5409_v5  ;;  %v5529_v53 = vmul.f32 %v7505_v27, %v5409_v5  ;;  %v12212_v37 = vld [vmem:[#allocation151_spill] sm:$0xff] }
 0x789   : > { %5618 = vst [vmem:[%s8177_s28 + $0x228] sm:$0xff] %v5490_v23  ;;  %5619 = vst [vmem:[%s8177_s28 + $0x230] sm:$0xff] %v5491_v16  ;;  %v7511_v20 = vpop.eup %7510  ;;  %7530 = vpow2.f32 %v10770_v51  ;;  %v5530_v25 = vmul.f32 %v7507_v8, %v5409_v5  ;;  %v5071_v49 = vsub.f32 %v12206_v61, %v10711_v7  ;;  %v5531_v10 = vmul.f32 %v7509_v21, %v5409_v5  ;;  %v12214_v16 = vld [vmem:[#allocation338_spill] sm:$0xff] }
 0x78a   : > { %5620 = vst [vmem:[%s8177_s28 + $0x238] sm:$0xff] %v5492_v31  ;;  %5637 = vst [vmem:[%s8177_s28 + $0x2c0] sm:$0xff] %v5509_v50  ;;  %v7513_v38 = vpop.eup %7512  ;;  %7532 = vpow2.f32 %v10772_v54  ;;  %v5532_v17 = vmul.f32 %v7511_v20, %v5409_v5  ;;  %v12208_v28 = vsub.f32 %v12143_v63, %v12207_v26  ;;  %v5072_v54 = vsub.f32 %v12209_v41, %v10711_v7  ;;  %v12215_v31 = vld [vmem:[#allocation150_spill] sm:$0xff] }
 0x78b   : > { %5638 = vst [vmem:[%s8177_s28 + $0x2c8] sm:$0xff] %v5510_v56  ;;  %5639 = vst [vmem:[%s8177_s28 + $0x2d0] sm:$0xff] %v5511_v19  ;;  %v7515_v51 = vpop.eup %7514  ;;  %7534 = vpow2.f32 %v10777_v55  ;;  %v5517_v39 = vmul.f32 %v7513_v38, %v11060_v42  ;;  %v5073_v34 = vsub.f32 %v12210_v40, %v10711_v7  ;;  %v12211_v55 = vsub.f32 %v12145_v13, %v10711_v7 }
 0x78c   : > { %5640 = vst [vmem:[%s8177_s28 + $0x2d8] sm:$0xff] %v5512_v32  ;;  %5641 = vst [vmem:[%s8177_s28 + $0x2e0] sm:$0xff] %v5513_v60  ;;  %v5339_v18 = vmul.f32 1.442695, %v12208_v28  ;;  %v7517_v36 = vpop.eup %7516  ;;  %7536 = vpow2.f32 %v10779_v47  ;;  %v5518_v9 = vmul.f32 %v7515_v51, %v11060_v42  ;;  %v5074_v23 = vsub.f32 %v12212_v37, %v10711_v7 }
 0x78d   : > { %5642 = vst [vmem:[%s8177_s28 + $0x2e8] sm:$0xff] %v5514_v14  ;;  %5643 = vst [vmem:[%s8177_s28 + $0x2f0] sm:$0xff] %v5515_v48  ;;  %v5309_v63 = vmul.f32 1.442695, %v12211_v55  ;;  %v7519_v58 = vpop.eup %7518  ;;  %7538 = vpow2.f32 %v10781_v3  ;;  %v12213_v47 = vsub.f32 %v12146_v22, %v10711_v7  ;;  %v5519_v6 = vmul.f32 %v7517_v36, %v11060_v42  ;;  %v12216_v22 = vld [vmem:[#allocation152_spill] sm:$0xff]  ;;  %v5419_v14 = vpop.permute.xlu1 %5418 }
 0x78e   : > { %5644 = vst [vmem:[%s8177_s28 + $0x2f8] sm:$0xff] %v5516_v52  ;;  %5629 = vst [vmem:[%s8177_s28 + $0x280] sm:$0xff] %v5501_v11  ;;  %v7521_v13 = vpop.eup %7520  ;;  %7540 = vpow2.f32 %v12214_v16  ;;  %v5075_v50 = vsub.f32 %v12215_v31, %v10711_v7  ;;  %v5313_v57 = vmul.f32 1.442695, %v5071_v49  ;;  %v5520_v3 = vmul.f32 %v7519_v58, %v11060_v42 }
 0x78f   : > { %5630 = vst [vmem:[%s8177_s28 + $0x288] sm:$0xff] %v5502_v33  ;;  %5631 = vst [vmem:[%s8177_s28 + $0x290] sm:$0xff] %v5503_v45  ;;  %v5311_v12 = vmul.f32 1.442695, %v12213_v47  ;;  %v7523_v4 = vpop.eup %7522  ;;  %7542 = vpow2.f32 %v5339_v18  ;;  %v5076_v29 = vsub.f32 %v12216_v22, %v10711_v7  ;;  %v5315_v56 = vmul.f32 1.442695, %v5072_v54 }
 0x790   : > { %5632 = vst [vmem:[%s8177_s28 + $0x298] sm:$0xff] %v5504_v30  ;;  %5633 = vst [vmem:[%s8177_s28 + $0x2a0] sm:$0xff] %v5505_v24  ;;  %v5521_v19 = vmul.f32 %v7521_v13, %v11060_v42  ;;  %v7525_v32 = vpop.eup %7524  ;;  %7544 = vpow2.f32 %v5309_v63  ;;  %v5317_v0 = vmul.f32 1.442695, %v5073_v34  ;;  %v5522_v60 = vmul.f32 %v7523_v4, %v11060_v42 }
 0x791   : > { %5634 = vst [vmem:[%s8177_s28 + $0x2a8] sm:$0xff] %v5506_v44  ;;  %5635 = vst [vmem:[%s8177_s28 + $0x2b0] sm:$0xff] %v5507_v43  ;;  %v7527_v48 = vpop.eup %7526  ;;  %7546 = vpow2.f32 %v5311_v12  ;;  %v5319_v35 = vmul.f32 1.442695, %v5074_v23  ;;  %v5523_v46 = vmul.f32 %v7525_v32, %v11060_v42  ;;  %v5321_v52 = vmul.f32 1.442695, %v5075_v50 }
 0x792   : > { %5636 = vst [vmem:[%s8177_s28 + $0x2b8] sm:$0xff] %v5508_v2  ;;  %5653 = vst [vmem:[%s8177_s28 + $0x340] sm:$0xff] %v5525_v59  ;;  %v7529_v7 = vpop.eup %7528  ;;  %7548 = vpow2.f32 %v5313_v57  ;;  %v5524_v11 = vmul.f32 %v7527_v48, %v11060_v42  ;;  %v5323_v5 = vmul.f32 1.442695, %v5076_v29 }
 0x793   : > { %5654 = vst [vmem:[%s8177_s28 + $0x348] sm:$0xff] %v5526_v62  ;;  %5655 = vst [vmem:[%s8177_s28 + $0x350] sm:$0xff] %v5527_v15  ;;  %v7531_v33 = vpop.eup %7530  ;;  %7550 = vpow2.f32 %v5315_v56  ;;  %v5541_v27 = vmul.f32 %v7529_v7, %v5419_v14  ;;  %v5414_v15 = vpop.permute.xlu0 %5413 }
 0x794   : > { %5656 = vst [vmem:[%s8177_s28 + $0x358] sm:$0xff] %v5528_v1  ;;  %5657 = vst [vmem:[%s8177_s28 + $0x360] sm:$0xff] %v5529_v53  ;;  %v7533_v45 = vpop.eup %7532  ;;  %7552 = vpow2.f32 %v5317_v0  ;;  %v5542_v30 = vmul.f32 %v7531_v33, %v5419_v14 }
 0x795   : > { %5658 = vst [vmem:[%s8177_s28 + $0x368] sm:$0xff] %v5530_v25  ;;  %5659 = vst [vmem:[%s8177_s28 + $0x370] sm:$0xff] %v5531_v10  ;;  %v7535_v24 = vpop.eup %7534  ;;  %7554 = vpow2.f32 %v5319_v35  ;;  %v5543_v8 = vmul.f32 %v7533_v45, %v5419_v14 }
 0x796   : > { %5660 = vst [vmem:[%s8177_s28 + $0x378] sm:$0xff] %v5532_v17  ;;  %5645 = vst [vmem:[%s8177_s28 + $0x300] sm:$0xff] %v5517_v39  ;;  %v7537_v44 = vpop.eup %7536  ;;  %7556 = vpow2.f32 %v5321_v52  ;;  %v5544_v43 = vmul.f32 %v7535_v24, %v5419_v14 }
 0x797   : > { %5646 = vst [vmem:[%s8177_s28 + $0x308] sm:$0xff] %v5518_v9  ;;  %5647 = vst [vmem:[%s8177_s28 + $0x310] sm:$0xff] %v5519_v6  ;;  %v7539_v2 = vpop.eup %7538  ;;  %7558 = vpow2.f32 %v5323_v5  ;;  %v5545_v21 = vmul.f32 %v7537_v44, %v5419_v14 }
 0x798   : > { %5648 = vst [vmem:[%s8177_s28 + $0x318] sm:$0xff] %v5520_v3  ;;  %5649 = vst [vmem:[%s8177_s28 + $0x320] sm:$0xff] %v5521_v19  ;;  %v7541_v59 = vpop.eup %7540  ;;  %v5546_v62 = vmul.f32 %v7539_v2, %v5419_v14 }
 0x799   : > { %5650 = vst [vmem:[%s8177_s28 + $0x328] sm:$0xff] %v5522_v60  ;;  %5651 = vst [vmem:[%s8177_s28 + $0x330] sm:$0xff] %v5523_v46  ;;  %v7543_v42 = vpop.eup %7542  ;;  %v5547_v20 = vmul.f32 %v7541_v59, %v5419_v14 }
 0x79a   : > { %5652 = vst [vmem:[%s8177_s28 + $0x338] sm:$0xff] %v5524_v11  ;;  %5669 = vst [vmem:[%s8177_s28 + $0x3c0] sm:$0xff] %v5541_v27  ;;  %v7545_v1 = vpop.eup %7544  ;;  %v5548_v53 = vmul.f32 %v7543_v42, %v5419_v14 }
 0x79b   : > { %5670 = vst [vmem:[%s8177_s28 + $0x3c8] sm:$0xff] %v5542_v30  ;;  %5671 = vst [vmem:[%s8177_s28 + $0x3d0] sm:$0xff] %v5543_v8  ;;  %v7547_v25 = vpop.eup %7546  ;;  %v5533_v38 = vmul.f32 %v7545_v1, %v5414_v15 }
 0x79c   : > { %5672 = vst [vmem:[%s8177_s28 + $0x3d8] sm:$0xff] %v5544_v43  ;;  %5673 = vst [vmem:[%s8177_s28 + $0x3e0] sm:$0xff] %v5545_v21  ;;  %v7549_v61 = vpop.eup %7548  ;;  %v5534_v49 = vmul.f32 %v7547_v25, %v5414_v15 }
 0x79d   : > { %5674 = vst [vmem:[%s8177_s28 + $0x3e8] sm:$0xff] %v5546_v62  ;;  %5675 = vst [vmem:[%s8177_s28 + $0x3f0] sm:$0xff] %v5547_v20  ;;  %v7551_v10 = vpop.eup %7550  ;;  %v5535_v17 = vmul.f32 %v7549_v61, %v5414_v15 }
 0x79e   : > { %5676 = vst [vmem:[%s8177_s28 + $0x3f8] sm:$0xff] %v5548_v53  ;;  %5661 = vst [vmem:[%s8177_s28 + $0x380] sm:$0xff] %v5533_v38  ;;  %v7553_v51 = vpop.eup %7552  ;;  %v5536_v26 = vmul.f32 %v7551_v10, %v5414_v15 }
 0x79f   : > { %5662 = vst [vmem:[%s8177_s28 + $0x388] sm:$0xff] %v5534_v49  ;;  %v7555_v28 = vpop.eup %7554  ;;  %v5537_v18 = vmul.f32 %v7553_v51, %v5414_v15  ;;  %5663 = vst [vmem:[%s8177_s28 + $0x390] sm:$0xff] %v5535_v17 }
 0x7a0   : > { %v7557_v41 = vpop.eup %7556  ;;  %v5538_v54 = vmul.f32 %v7555_v28, %v5414_v15  ;;  %5664 = vst [vmem:[%s8177_s28 + $0x398] sm:$0xff] %v5536_v26 }
 0x7a1   : > { %v7559_v39 = vpop.eup %7558  ;;  %v5539_v36 = vmul.f32 %v7557_v41, %v5414_v15  ;;  %5665 = vst [vmem:[%s8177_s28 + $0x3a0] sm:$0xff] %v5537_v18 }
 0x7a2   : > { %v5540_v40 = vmul.f32 %v7559_v39, %v5414_v15  ;;  %5666 = vst [vmem:[%s8177_s28 + $0x3a8] sm:$0xff] %v5538_v54 }
 0x7a3   : > { %5667 = vst [vmem:[%s8177_s28 + $0x3b0] sm:$0xff] %v5539_v36 }
 0x7a4   : > { %5668 = vst [vmem:[%s8177_s28 + $0x3b8] sm:$0xff] %v5540_v40 }
 0x7a5 PF: > { %s12217_s21 = sld [smem:[#allocation19_spill]]  ;;  %s12218_s11 = sld [smem:[#allocation18_spill]] }
 0x7a6   : > { %s12219_s5 = sld [smem:[#allocation20_spill]]  ;;  %s5695_s29 = sshll.u32 %s8177_s28, 4  ;;  %s11136_s29 = int_to_ptr.vmem [resolvable:$true] %s5695_s29 }
 0x7a7   : > { %s12220_s3 = sld [smem:[#allocation342_spill]]  ;;  %s11145_s25 = scalar_lea.sflag [#allocation7], %s262_s10 }
 0x7a8   : > { %s7648_s18 = scalar_lea.vmem %s11136_s29, 16384  ;;  %p12221_p1 = scmp.ne.s32.totalorder %s11452_s15, 0 }
 0x7a9   : > { %p7649_p7 = scmp.ne.s32.totalorder %s11136_s29, %s7648_s18  ;;  %s7833_s28 = smov [#allocation11]  }
 0x7aa   : > { %s7652_s1 = sshll.u32 %s7833_s28, 4  ;;  %s7653_s1 = int_to_ptr.vmem [resolvable:$false] %s7652_s1 }
 0x7ab   : > { %s5685_s7 = smul.u32 %s12218_s11, %s12217_s21  ;;  %p7650_p8 = pnand %p7649_p7, %p12221_p1 }
 0x7ac   : > { %s6168_s26 = sshll.u32 %s12219_s5, 8  ;;  %s7654_s0 = scalar_lea.vmem %s7653_s1, 32768 }
 0x7ad   : > { %s6160_s8 = sshll.u32 %s5685_s7, 3  ;;  %p7651_p11 = pneg %p7650_p8 }
 0x7ae   : > { %s5692_s4 = sadd.s32 %s6168_s26, %s6160_s8  ;;  %p7655_p4 = scmp.lt.s32.totalorder %s11136_s29, %s7653_s1 }
 0x7af   : > { %s6162_s17 = sshll.u32 %s5692_s4, 7  ;;  %p7656_p10 = scmp.lt.s32.totalorder %s7654_s0, %s7648_s18 }
 0x7b0   : > { %s11141_s9 = scalar_lea.hbm %s12220_s3, %s6162_s17 }
 0x7b1   : > { %p7657_p13 = por %p7656_p10, %p7655_p4 }
 0x7b3   : > { %p7658_p12 = pnand %p7657_p13, %p7651_p11 }
 0x7b5   : > { %7661 = shalt.err (!%p7658_p12)
}
 0x7b6   : > { %s7662_s10 = scalar_lea.hbm %s11141_s9, 16384  ;;  %s7666_s11 = scalar_lea.hbm %s12220_s3, 65536 }
 0x7b7   : > { %p7663_p9 = scmp.ne.s32.totalorder %s11141_s9, %s7662_s10  ;;  %p7667_p2 = scmp.lt.u32.totalorder %s11141_s9, %s12220_s3 }
 0x7b8   : > { %p7668_p0 = scmp.lt.u32.totalorder %s7666_s11, %s7662_s10  ;;  %p7670_p7 = scmp.lt.u32.totalorder %s7662_s10, %s11141_s9 }
 0x7b9   : > { %p7664_p3 = pnand %p7663_p9, %p12221_p1 }
 0x7ba   : > { %p7669_p6 = por %p7668_p0, %p7667_p2 }
 0x7bb   : > { %p7665_p5 = pneg %p7664_p3 }
 0x7bc   : > { %p7671_p8 = por %p7670_p7, %p7669_p6 }
 0x7be   : > { %p7672_p11 = pnand %p7671_p8, %p7665_p5 }
 0x7c0   : > { %7675 = shalt.err (!%p7672_p11)
}
 0x7c1   : > { %s7834_s26 = smov 1024   ;;  %s7835_s8 = smov 2048  }
 0x7c2   : > { %s7836_s4 = smov 64  }
 0x7c3   : > { %6689 = dma.vmem_to_hbm [thread:$0]  (%p12221_p1), %s11136_s29, 16384, %s11141_s9, %s11145_s25, %s7834_s26, %s7835_s8, %s7836_s4  }
 0x7c4 PF: > { %p6709_p4 = scmp.ge.s32.totalorder %s7818_s27, 2  ;;  %s5710_s17 = sand.u32 1, %s7758_s12  }
 0x7c5   : > { %p12222_p10 = scmp.ne.s32.totalorder %s11453_s6, 0  ;;  %s5711_s24 = scalar_lea.sflag [#allocation7], %s5710_s17 }
 0x7c7   : > { %p6703_p13 = pnand %p6709_p4, %p12222_p10 }
 0x7c9   : > { %7753 = dma.done.wait (!%p6703_p13), %s5711_s24, 16384  }
 0x7ca   : > { %7755 = vsyncadd (!%p6703_p13), %s5711_s24, 4294950912  ;;  %s20_s27 = sadd.s32 1, %s7818_s27   ;;  %s12224_s29 = sld [smem:[#allocation16_spill]] }
 0x7cb   : > { %p11174_p12 = scmp.ge.s32.totalorder %s20_s27, 10   ;;  %s12225_s17 = sld [smem:[#allocation28_spill]] }
 0x7cc   : > { %s12226_s9 = sld [smem:[#allocation17_spill]]  ;;  %s12227_s20 = sld [smem:[#allocation27_spill]] }
 0x7cd   : > { %s12228_s21 = sld [smem:[#allocation21_spill]]  ;;  %s12229_s6 = sld [smem:[#allocation22_spill]] }
 0x7ce   : > { %s12230_s25 = sld [smem:[#allocation23_spill]]  ;;  %s12231_s24 = sld [smem:[#allocation24_spill]] }
 0x7cf   : > { %s12232_s28 = sld [smem:[#allocation25_spill]]  ;;  %s12233_s26 = sld [smem:[#allocation26_spill]] }
 0x7d0   : > { %s12234_s12 = smov %s7762_s13  ;;  %s12236_s13 = smov %s7766_s14 }
 0x7d1   : > { %s12237_s14 = smov %s7978_s22  ;;  %s12238_s15 = smov %s7774_s16 }
 0x7d2   : > { %s12239_s16 = smov %s12224_s29  ;;  %s12240_s18 = smov %s7786_s19 }
 0x7d3   : > { %s12241_s19 = smov %s12226_s9  ;;  %s12242_s22 = smov %s12229_s6 }
 0x7d4   : > { %s12243_s23 = smov %s12230_s25  ;;  %19 = sbr.rel (!%p11174_p12) target bundleno = 17 (0x11), region = 104 }
 0x7d5   : > { %s12244_s25 = smov %s12232_s28 }
 0x7db   :  { %5716 = vsyncpa [#allocation6], 1 }
 0x7dc   :  { %5718 = vsyncpa [#allocation6 + $0x1], 1 }
 0x7dd   :  { %5719 = vsyncpa [#allocation9], 1 }
 0x7de   :  { %5720 = vsyncpa [#allocation7], 1 }
 0x7df   :  { %5722 = vsyncpa [#allocation7 + $0x1], 1 }

</bundles_post_ra>
